<compile_context>
chip_gen: v5e
topology: v5e:2x2
jax: 0.10.0
libtpu: 0.0.40
codegen_flags: <defaults>
</compile_context>

<pallas_src>
import functools

import numpy as np
import jax
import jax.numpy as jnp
from jax import lax
from jax.experimental import pallas as pl
from jax.experimental.pallas import tpu as pltpu


# ----------------------------------------------------------------------------
# Fused kernel: conv0+pool+relu -> conv1+pool+relu -> flatten+fc1+relu -> fc2+relu -> fc3
# ----------------------------------------------------------------------------
def _fused_forward_kernel(bn,
                          p0_ref, w0a_ref, w1r_ref, b1_ref,
                          v1_ref, bf1_ref, w2_ref, b2_ref, w3p_ref, b3p_ref,
                          out_ref):
    f32 = jnp.float32

    # ---- stage_zero: Conv2d(3->8) + MaxPool(2,2) + ReLU --------------------------
    # p0 rows enumerate (uv pool-slab, i, jp, n) with jp the width-padded pooled
    # column (jp in {0,9} are all-zero pad rows).  Column 27 is a 0/1 indicator that
    # folds the conv bias into the matmul, so pad rows stay exactly 0.
    patches = p0_ref[...].reshape(4 * 80 * bn, 28)                     # (320*bn, 28)
    conv0 = jnp.dot(patches, w0a_ref[...], preferred_element_type=f32)  # one matmul
    conv0 = conv0.reshape(4, 80 * bn, 8)
    h0 = jnp.maximum(jnp.maximum(conv0[0], conv0[1]),
                     jnp.maximum(conv0[2], conv0[3]))                  # MaxPool 2x2
    h0 = jnp.maximum(h0, 0.0)                                          # (80*bn, 8)
    # h0 rows = (i, jp, n) over the pooled 8x10(width-padded) grid, lanes = 8 ch.

    # ---- stage_one: Conv2d(8->16) + MaxPool(2,2) + ReLU --------------------------
    # Height zero-padding via two zero row-blocks; each of the 9 conv taps is then a
    # single static row slice (offset (dy-1)*10 + dx).  One K=72 matmul does conv1.
    h0ext = jnp.concatenate(
        [jnp.zeros((10 * bn, 8), f32), h0, jnp.zeros((12 * bn, 8), f32)],
        axis=0)                                                        # (102*bn, 8)
    taps = []
    for dy in range(3):
        for dx in range(3):
            start = ((dy - 1) * 10 + dx + 10) * bn                     # static, bn-aligned
            taps.append(h0ext[start:start + 80 * bn, :])
    p1 = jnp.concatenate(taps, axis=1)                                 # (80*bn, 72)
    c1 = jnp.dot(p1, w1r_ref[...], preferred_element_type=f32)         # (80*bn, 16)

    # MaxPool(2,2): rows are (i_out, j_out, n) with j_out on a width-10 grid
    # (columns 8,9 are garbage and get sliced away).
    c1 = c1.reshape(4, 2, 10 * bn, 16)
    c1 = jnp.maximum(c1[:, 0], c1[:, 1])                               # vertical max
    c1 = c1.reshape(4, 10, bn, 16)[:, 0:8]                             # drop pad cols
    c1 = c1.reshape(16, 2, bn, 16)
    pooled = jnp.maximum(c1[:, 0], c1[:, 1])                           # horizontal max
    h1 = jnp.maximum(pooled + b1_ref[...], 0.0)                        # (16, bn, 16)
    # h1[ab, n, co] = stage_one output at (n, co, a, b);  AdaptiveAvgPool2d(4) is an
    # exact identity for 16x16 inputs (4x4 maps) and is folded away.

    # ---- flatten (NCHW order folded into v1) + fc1 + fc2 + fc3 -------------------
    f_in = jnp.concatenate([h1[ab] for ab in range(16)], axis=1)       # (bn, 256) n-major
    f1 = jnp.maximum(jnp.dot(f_in, v1_ref[...], preferred_element_type=f32)
                     + bf1_ref[...], 0.0)                              # (bn, 256)
    f2 = jnp.maximum(jnp.dot(f1, w2_ref[...], preferred_element_type=f32)
                     + b2_ref[...], 0.0)                               # (bn, 128)
    # fc3 padded to 128 output lanes -> lane-dense (bn, 128) store.
    out_ref[...] = jnp.dot(f2, w3p_ref[...], preferred_element_type=f32) + b3p_ref[...]


# ----------------------------------------------------------------------------
# Host-side patch construction for stage_zero (tiny, pure XLA)
# ----------------------------------------------------------------------------
def _stage0_patches(x_nchw):
    """im2col of the raw 3-channel input, grouped by MaxPool window slot (u, v) and
    with the pooled width axis zero-padded (jp = 0..9), plus a bias-indicator column.
    Returns (320, N, 28) with row index = uv*80 + i*10 + jp."""
    n = x_nchw.shape[0]
    x = jnp.transpose(x_nchw, (0, 2, 3, 1)).astype(jnp.float32)        # NHWC (N,16,16,3)
    xp = jnp.pad(x, ((0, 0), (1, 1), (1, 1), (0, 0)))                  # (N,18,18,3)
    slabs = []
    for u in range(2):
        for v in range(2):
            taps = []
            for dy in range(3):
                for dx in range(3):
                    # conv output position (2i+u, 2j+v) reads padded input (2i+u+dy, 2j+v+dx)
                    taps.append(xp[:, u + dy:u + dy + 16:2, v + dx:v + dx + 16:2, :])
            pt = jnp.concatenate(taps, axis=-1)                        # (N,8,8,27)
            pt = jnp.concatenate(
                [pt, jnp.ones((n, 8, 8, 1), jnp.float32)], axis=-1)    # + bias indicator
            pt = jnp.pad(pt, ((0, 0), (0, 0), (1, 1), (0, 0)))         # width pad jp=0,9
            slabs.append(pt)                                           # (N,8,10,28)
    p0 = jnp.stack(slabs, axis=0)                                      # (4,N,8,10,28)
    p0 = jnp.transpose(p0, (0, 2, 3, 1, 4))                            # (4,8,10,N,28)
    return p0.reshape(4 * 80, n, 28)                                   # (320, N, 28)


# ----------------------------------------------------------------------------
# Forward
# ----------------------------------------------------------------------------
@jax.jit
def forward(params, x_nchw):
    n, c, h, w = x_nchw.shape
    assert c == 3 and h == 16 and w == 16, "kernel specialized to 3x16x16 inputs"
    # TODO(synk): general H/W would need a real averaging AdaptiveAvgPool2d(4); for
    # 16x16 inputs the 4x4 adaptive pool is an exact identity and is folded away.

    # Batch tile: grow with N (caps at 32; the 8/16/28-lane intermediates are
    # lane-padded to 128 in VMEM, which is what bounds the tile).  Arbitrary N is
    # handled by zero-padding the batch instead of asserting.
    bn = int(min(32, ((n + 7) // 8) * 8))
    n_pad = ((n + bn - 1) // bn) * bn
    if n_pad != n:
        x_nchw = jnp.pad(x_nchw, ((0, n_pad - n), (0, 0), (0, 0), (0, 0)))

    p0 = _stage0_patches(x_nchw)                                       # (320, n_pad, 28)

    # Fold weight layouts at trace time (PyTorch OIHW / (out,in) -> matmul-ready).
    w0a = jnp.concatenate(
        [jnp.transpose(params["conv0_w"], (2, 3, 1, 0)).reshape(27, 8),
         params["conv0_b"].reshape(1, 8)], axis=0)                     # (28, 8), bias row
    w1r = jnp.transpose(params["conv1_w"], (2, 3, 1, 0)).reshape(72, 16)
    b1 = params["conv1_b"].reshape(1, 16)
    # fc1 weight absorbs the NCHW flatten: v1[ab*16 + co, o] = W_fc1[o, co*16 + ab]
    v1 = jnp.transpose(params["fc1_w"].reshape(256, 16, 16), (2, 1, 0)).reshape(256, 256)
    bf1 = params["fc1_b"].reshape(1, 256)
    w2 = jnp.transpose(params["fc2_w"], (1, 0))                        # (256, 128)
    b2 = params["fc2_b"].reshape(1, 128)
    # Lane-dense output: pad fc3 to 128 output lanes, slice [:, :10] outside.
    w3p = jnp.pad(jnp.transpose(params["fc3_w"], (1, 0)), ((0, 0), (0, 118)))  # (128, 128)
    b3p = jnp.pad(params["fc3_b"], (0, 118)).reshape(1, 128)

    def const_spec(shape):
        return pl.BlockSpec(shape, lambda g: tuple(0 for _ in shape))

    kernel = functools.partial(_fused_forward_kernel, bn)
    out = pl.pallas_call(
        kernel,
        out_shape=jax.ShapeDtypeStruct((n_pad, 128), jnp.float32),
        grid_spec=pltpu.PrefetchScalarGridSpec(
            num_scalar_prefetch=0,
            grid=(n_pad // bn,),
            in_specs=[
                pl.BlockSpec((320, bn, 28), lambda g: (0, g, 0)),      # stage-0 patches
                const_spec((28, 8)),                                   # conv0 w + bias row
                const_spec((72, 16)), const_spec((1, 16)),             # conv1 w, b
                const_spec((256, 256)), const_spec((1, 256)),          # fc1 (flatten folded)
                const_spec((256, 128)), const_spec((1, 128)),          # fc2
                const_spec((128, 128)), const_spec((1, 128)),          # fc3 (lane padded)
            ],
            out_specs=pl.BlockSpec((bn, 128), lambda g: (g, 0)),
        ),
        compiler_params=pltpu.CompilerParams(
            dimension_semantics=("parallel",),
            vmem_limit_bytes=40 * 1024 * 1024),
    )(p0, w0a, w1r, b1, v1, bf1, w2, b2, w3p, b3p)
    return out[:n, :10]


# ----------------------------------------------------------------------------
# Parameters (PyTorch layouts) and a pure-JAX reference for verification
# ----------------------------------------------------------------------------
def init_params(key):
    ks = jax.random.split(key, 10)

    def u(k, shape, fan_in):
        b = 1.0 / np.sqrt(fan_in)
        return jax.random.uniform(k, shape, jnp.float32, -b, b)

    return {
        "conv0_w": u(ks[0], (8, 3, 3, 3), 3 * 9),
        "conv0_b": u(ks[1], (8,), 3 * 9),
        "conv1_w": u(ks[2], (16, 8, 3, 3), 8 * 9),
        "conv1_b": u(ks[3], (16,), 8 * 9),
        "fc1_w": u(ks[4], (256, 256), 256),
        "fc1_b": u(ks[5], (256,), 256),
        "fc2_w": u(ks[6], (128, 256), 256),
        "fc2_b": u(ks[7], (128,), 256),
        "fc3_w": u(ks[8], (10, 128), 128),
        "fc3_b": u(ks[9], (10,), 128),
    }


def reference_forward(params, x):
    dn = ("NCHW", "OIHW", "NCHW")
    h = lax.conv_general_dilated(x.astype(jnp.float32), params["conv0_w"],
                                 (1, 1), ((1, 1), (1, 1)), dimension_numbers=dn)
    h = h + params["conv0_b"].reshape(1, -1, 1, 1)
    n, c, hh, ww = h.shape
    h = h.reshape(n, c, hh // 2, 2, ww // 2, 2).max(axis=(3, 5))
    h = jnp.maximum(h, 0.0)
    h = lax.conv_general_dilated(h, params["conv1_w"],
                                 (1, 1), ((1, 1), (1, 1)), dimension_numbers=dn)
    h = h + params["conv1_b"].reshape(1, -1, 1, 1)
    n, c, hh, ww = h.shape
    h = h.reshape(n, c, hh // 2, 2, ww // 2, 2).max(axis=(3, 5))
    h = jnp.maximum(h, 0.0)
    flat = h.reshape(n, -1)            # AdaptiveAvgPool2d(4) is identity for 4x4 maps
    f1 = jnp.maximum(flat @ params["fc1_w"].T + params["fc1_b"], 0.0)
    f2 = jnp.maximum(f1 @ params["fc2_w"].T + params["fc2_b"], 0.0)
    return f2 @ params["fc3_w"].T + params["fc3_b"]


if __name__ == "__main__":
    key_p, key_x = jax.random.split(jax.random.PRNGKey(0))
    params = init_params(key_p)
    x = jax.random.normal(key_x, (2, 3, 16, 16), jnp.float32)

    out = forward(params, x)
    out = jax.block_until_ready(out)
    assert out.shape == (2, 10) and out.dtype == jnp.float32

    with jax.default_matmul_precision("highest"):
        ref = reference_forward(params, x)
    ref = jax.block_until_ready(ref)
    assert np.allclose(np.asarray(out), np.asarray(ref), atol=5e-2, rtol=5e-2), \
        "fused Pallas kernel disagrees with the reference forward"
    print("KERNEL_OK")
</pallas_src>

<mosaic_0001>
module attributes {stable_mosaic.version = 11 : i64} {
  func.func @_fused_forward_kernel(%arg0: i32, %arg1: memref<320x8x28xf32, #tpu.memory_space<vmem>>, %arg2: memref<28x8xf32, #tpu.memory_space<vmem>>, %arg3: memref<72x16xf32, #tpu.memory_space<vmem>>, %arg4: memref<1x16xf32, #tpu.memory_space<vmem>>, %arg5: memref<256x256xf32, #tpu.memory_space<vmem>>, %arg6: memref<1x256xf32, #tpu.memory_space<vmem>>, %arg7: memref<256x128xf32, #tpu.memory_space<vmem>>, %arg8: memref<1x128xf32, #tpu.memory_space<vmem>>, %arg9: memref<128x128xf32, #tpu.memory_space<vmem>>, %arg10: memref<1x128xf32, #tpu.memory_space<vmem>>, %arg11: memref<8x128xf32, #tpu.memory_space<vmem>>) attributes {dimension_semantics = [#tpu.dimension_semantics<parallel>], iteration_bounds = array<i64: 1>, scalar_prefetch = 0 : i64, scratch_operands = 0 : i64, tpu.core_type = #tpu.core_type<tc>, window_params = [{transform_indices = @transform_0, window_bounds = array<i64: 320, 8, 28>}, {pipeline_mode = #tpu.pipeline_mode<synchronous>, transform_indices = @transform_1, window_bounds = array<i64: 28, 8>}, {pipeline_mode = #tpu.pipeline_mode<synchronous>, transform_indices = @transform_2, window_bounds = array<i64: 72, 16>}, {pipeline_mode = #tpu.pipeline_mode<synchronous>, transform_indices = @transform_3, window_bounds = array<i64: 1, 16>}, {pipeline_mode = #tpu.pipeline_mode<synchronous>, transform_indices = @transform_4, window_bounds = array<i64: 256, 256>}, {pipeline_mode = #tpu.pipeline_mode<synchronous>, transform_indices = @transform_5, window_bounds = array<i64: 1, 256>}, {pipeline_mode = #tpu.pipeline_mode<synchronous>, transform_indices = @transform_6, window_bounds = array<i64: 256, 128>}, {pipeline_mode = #tpu.pipeline_mode<synchronous>, transform_indices = @transform_7, window_bounds = array<i64: 1, 128>}, {pipeline_mode = #tpu.pipeline_mode<synchronous>, transform_indices = @transform_8, window_bounds = array<i64: 128, 128>}, {pipeline_mode = #tpu.pipeline_mode<synchronous>, transform_indices = @transform_9, window_bounds = array<i64: 1, 128>}, {transform_indices = @transform_10, window_bounds = array<i64: 8, 128>}]} {
    %c0 = arith.constant 0 : index
    %c0_0 = arith.constant 0 : index
    %c0_1 = arith.constant 0 : index
    %0 = vector.load %arg1[%c0, %c0_0, %c0_1] : memref<320x8x28xf32, #tpu.memory_space<vmem>>, vector<320x8x28xf32>
    %1 = vector.shape_cast %0 : vector<320x8x28xf32> to vector<2560x28xf32>
    %c0_2 = arith.constant 0 : index
    %c0_3 = arith.constant 0 : index
    %2 = vector.load %arg2[%c0_2, %c0_3] : memref<28x8xf32, #tpu.memory_space<vmem>>, vector<28x8xf32>
    %cst = arith.constant dense<0.000000e+00> : vector<2560x8xf32>
    %3 = tpu.matmul %1, %2, %cst {dimension_numbers = #tpu.dot_dimension_numbers<[1], [0], [0], [1], [0, 0, 1, 1], [], []>} : vector<2560x28xf32>, vector<28x8xf32>, vector<2560x8xf32> -> vector<2560x8xf32>
    %4 = vector.shape_cast %3 : vector<2560x8xf32> to vector<4x640x8xf32>
    %5 = vector.extract_strided_slice %4 {offsets = [0, 0, 0], sizes = [1, 640, 8], strides = [1, 1, 1]} : vector<4x640x8xf32> to vector<1x640x8xf32>
    %6 = vector.shape_cast %5 : vector<1x640x8xf32> to vector<640x8xf32>
    %7 = vector.extract_strided_slice %4 {offsets = [1, 0, 0], sizes = [1, 640, 8], strides = [1, 1, 1]} : vector<4x640x8xf32> to vector<1x640x8xf32>
    %8 = vector.shape_cast %7 : vector<1x640x8xf32> to vector<640x8xf32>
    %9 = arith.maximumf %6, %8 : vector<640x8xf32>
    %10 = vector.extract_strided_slice %4 {offsets = [2, 0, 0], sizes = [1, 640, 8], strides = [1, 1, 1]} : vector<4x640x8xf32> to vector<1x640x8xf32>
    %11 = vector.shape_cast %10 : vector<1x640x8xf32> to vector<640x8xf32>
    %12 = vector.extract_strided_slice %4 {offsets = [3, 0, 0], sizes = [1, 640, 8], strides = [1, 1, 1]} : vector<4x640x8xf32> to vector<1x640x8xf32>
    %13 = vector.shape_cast %12 : vector<1x640x8xf32> to vector<640x8xf32>
    %14 = arith.maximumf %11, %13 : vector<640x8xf32>
    %15 = arith.maximumf %9, %14 : vector<640x8xf32>
    %cst_4 = arith.constant 0.000000e+00 : f32
    %16 = vector.broadcast %cst_4 : f32 to vector<640x8xf32>
    %17 = arith.maximumf %15, %16 : vector<640x8xf32>
    %cst_5 = arith.constant 0.000000e+00 : f32
    %18 = vector.broadcast %cst_5 : f32 to vector<80x8xf32>
    %cst_6 = arith.constant 0.000000e+00 : f32
    %19 = vector.broadcast %cst_6 : f32 to vector<96x8xf32>
    %20 = tpu.concatenate %18, %17, %19 in 0 : vector<80x8xf32>, vector<640x8xf32>, vector<96x8xf32> -> vector<816x8xf32>
    %21 = vector.extract_strided_slice %20 {offsets = [0, 0], sizes = [640, 8], strides = [1, 1]} : vector<816x8xf32> to vector<640x8xf32>
    %22 = vector.extract_strided_slice %20 {offsets = [8, 0], sizes = [640, 8], strides = [1, 1]} : vector<816x8xf32> to vector<640x8xf32>
    %23 = vector.extract_strided_slice %20 {offsets = [16, 0], sizes = [640, 8], strides = [1, 1]} : vector<816x8xf32> to vector<640x8xf32>
    %24 = vector.extract_strided_slice %20 {offsets = [80, 0], sizes = [640, 8], strides = [1, 1]} : vector<816x8xf32> to vector<640x8xf32>
    %25 = vector.extract_strided_slice %20 {offsets = [88, 0], sizes = [640, 8], strides = [1, 1]} : vector<816x8xf32> to vector<640x8xf32>
    %26 = vector.extract_strided_slice %20 {offsets = [96, 0], sizes = [640, 8], strides = [1, 1]} : vector<816x8xf32> to vector<640x8xf32>
    %27 = vector.extract_strided_slice %20 {offsets = [160, 0], sizes = [640, 8], strides = [1, 1]} : vector<816x8xf32> to vector<640x8xf32>
    %28 = vector.extract_strided_slice %20 {offsets = [168, 0], sizes = [640, 8], strides = [1, 1]} : vector<816x8xf32> to vector<640x8xf32>
    %29 = vector.extract_strided_slice %20 {offsets = [176, 0], sizes = [640, 8], strides = [1, 1]} : vector<816x8xf32> to vector<640x8xf32>
    %30 = tpu.concatenate %21, %22, %23, %24, %25, %26, %27, %28, %29 in 1 : vector<640x8xf32>, vector<640x8xf32>, vector<640x8xf32>, vector<640x8xf32>, vector<640x8xf32>, vector<640x8xf32>, vector<640x8xf32>, vector<640x8xf32>, vector<640x8xf32> -> vector<640x72xf32>
    %c0_7 = arith.constant 0 : index
    %c0_8 = arith.constant 0 : index
    %31 = vector.load %arg3[%c0_7, %c0_8] : memref<72x16xf32, #tpu.memory_space<vmem>>, vector<72x16xf32>
    %cst_9 = arith.constant dense<0.000000e+00> : vector<640x16xf32>
    %32 = tpu.matmul %30, %31, %cst_9 {dimension_numbers = #tpu.dot_dimension_numbers<[1], [0], [0], [1], [0, 0, 1, 1], [], []>} : vector<640x72xf32>, vector<72x16xf32>, vector<640x16xf32> -> vector<640x16xf32>
    %33 = vector.shape_cast %32 : vector<640x16xf32> to vector<4x2x80x16xf32>
    %34 = vector.extract_strided_slice %33 {offsets = [0, 0, 0, 0], sizes = [4, 1, 80, 16], strides = [1, 1, 1, 1]} : vector<4x2x80x16xf32> to vector<4x1x80x16xf32>
    %35 = vector.shape_cast %34 : vector<4x1x80x16xf32> to vector<4x80x16xf32>
    %36 = vector.extract_strided_slice %33 {offsets = [0, 1, 0, 0], sizes = [4, 1, 80, 16], strides = [1, 1, 1, 1]} : vector<4x2x80x16xf32> to vector<4x1x80x16xf32>
    %37 = vector.shape_cast %36 : vector<4x1x80x16xf32> to vector<4x80x16xf32>
    %38 = arith.maximumf %35, %37 : vector<4x80x16xf32>
    %39 = vector.shape_cast %38 : vector<4x80x16xf32> to vector<4x10x8x16xf32>
    %40 = vector.extract_strided_slice %39 {offsets = [0, 0, 0, 0], sizes = [4, 8, 8, 16], strides = [1, 1, 1, 1]} : vector<4x10x8x16xf32> to vector<4x8x8x16xf32>
    %41 = vector.shape_cast %40 : vector<4x8x8x16xf32> to vector<16x2x8x16xf32>
    %42 = vector.extract_strided_slice %41 {offsets = [0, 0, 0, 0], sizes = [16, 1, 8, 16], strides = [1, 1, 1, 1]} : vector<16x2x8x16xf32> to vector<16x1x8x16xf32>
    %43 = vector.shape_cast %42 : vector<16x1x8x16xf32> to vector<16x8x16xf32>
    %44 = vector.extract_strided_slice %41 {offsets = [0, 1, 0, 0], sizes = [16, 1, 8, 16], strides = [1, 1, 1, 1]} : vector<16x2x8x16xf32> to vector<16x1x8x16xf32>
    %45 = vector.shape_cast %44 : vector<16x1x8x16xf32> to vector<16x8x16xf32>
    %46 = arith.maximumf %43, %45 : vector<16x8x16xf32>
    %c0_10 = arith.constant 0 : index
    %c0_11 = arith.constant 0 : index
    %47 = vector.load %arg4[%c0_10, %c0_11] : memref<1x16xf32, #tpu.memory_space<vmem>>, vector<1x16xf32>
    %48 = vector.shape_cast %47 : vector<1x16xf32> to vector<1x1x16xf32>
    %49 = vector.broadcast %48 : vector<1x1x16xf32> to vector<16x8x16xf32>
    %50 = arith.addf %46, %49 : vector<16x8x16xf32>
    %cst_12 = arith.constant 0.000000e+00 : f32
    %51 = vector.broadcast %cst_12 : f32 to vector<16x8x16xf32>
    %52 = arith.maximumf %50, %51 : vector<16x8x16xf32>
    %53 = vector.extract_strided_slice %52 {offsets = [0, 0, 0], sizes = [1, 8, 16], strides = [1, 1, 1]} : vector<16x8x16xf32> to vector<1x8x16xf32>
    %54 = vector.shape_cast %53 : vector<1x8x16xf32> to vector<8x16xf32>
    %55 = vector.extract_strided_slice %52 {offsets = [1, 0, 0], sizes = [1, 8, 16], strides = [1, 1, 1]} : vector<16x8x16xf32> to vector<1x8x16xf32>
    %56 = vector.shape_cast %55 : vector<1x8x16xf32> to vector<8x16xf32>
    %57 = vector.extract_strided_slice %52 {offsets = [2, 0, 0], sizes = [1, 8, 16], strides = [1, 1, 1]} : vector<16x8x16xf32> to vector<1x8x16xf32>
    %58 = vector.shape_cast %57 : vector<1x8x16xf32> to vector<8x16xf32>
    %59 = vector.extract_strided_slice %52 {offsets = [3, 0, 0], sizes = [1, 8, 16], strides = [1, 1, 1]} : vector<16x8x16xf32> to vector<1x8x16xf32>
    %60 = vector.shape_cast %59 : vector<1x8x16xf32> to vector<8x16xf32>
    %61 = vector.extract_strided_slice %52 {offsets = [4, 0, 0], sizes = [1, 8, 16], strides = [1, 1, 1]} : vector<16x8x16xf32> to vector<1x8x16xf32>
    %62 = vector.shape_cast %61 : vector<1x8x16xf32> to vector<8x16xf32>
    %63 = vector.extract_strided_slice %52 {offsets = [5, 0, 0], sizes = [1, 8, 16], strides = [1, 1, 1]} : vector<16x8x16xf32> to vector<1x8x16xf32>
    %64 = vector.shape_cast %63 : vector<1x8x16xf32> to vector<8x16xf32>
    %65 = vector.extract_strided_slice %52 {offsets = [6, 0, 0], sizes = [1, 8, 16], strides = [1, 1, 1]} : vector<16x8x16xf32> to vector<1x8x16xf32>
    %66 = vector.shape_cast %65 : vector<1x8x16xf32> to vector<8x16xf32>
    %67 = vector.extract_strided_slice %52 {offsets = [7, 0, 0], sizes = [1, 8, 16], strides = [1, 1, 1]} : vector<16x8x16xf32> to vector<1x8x16xf32>
    %68 = vector.shape_cast %67 : vector<1x8x16xf32> to vector<8x16xf32>
    %69 = vector.extract_strided_slice %52 {offsets = [8, 0, 0], sizes = [1, 8, 16], strides = [1, 1, 1]} : vector<16x8x16xf32> to vector<1x8x16xf32>
    %70 = vector.shape_cast %69 : vector<1x8x16xf32> to vector<8x16xf32>
    %71 = vector.extract_strided_slice %52 {offsets = [9, 0, 0], sizes = [1, 8, 16], strides = [1, 1, 1]} : vector<16x8x16xf32> to vector<1x8x16xf32>
    %72 = vector.shape_cast %71 : vector<1x8x16xf32> to vector<8x16xf32>
    %73 = vector.extract_strided_slice %52 {offsets = [10, 0, 0], sizes = [1, 8, 16], strides = [1, 1, 1]} : vector<16x8x16xf32> to vector<1x8x16xf32>
    %74 = vector.shape_cast %73 : vector<1x8x16xf32> to vector<8x16xf32>
    %75 = vector.extract_strided_slice %52 {offsets = [11, 0, 0], sizes = [1, 8, 16], strides = [1, 1, 1]} : vector<16x8x16xf32> to vector<1x8x16xf32>
    %76 = vector.shape_cast %75 : vector<1x8x16xf32> to vector<8x16xf32>
    %77 = vector.extract_strided_slice %52 {offsets = [12, 0, 0], sizes = [1, 8, 16], strides = [1, 1, 1]} : vector<16x8x16xf32> to vector<1x8x16xf32>
    %78 = vector.shape_cast %77 : vector<1x8x16xf32> to vector<8x16xf32>
    %79 = vector.extract_strided_slice %52 {offsets = [13, 0, 0], sizes = [1, 8, 16], strides = [1, 1, 1]} : vector<16x8x16xf32> to vector<1x8x16xf32>
    %80 = vector.shape_cast %79 : vector<1x8x16xf32> to vector<8x16xf32>
    %81 = vector.extract_strided_slice %52 {offsets = [14, 0, 0], sizes = [1, 8, 16], strides = [1, 1, 1]} : vector<16x8x16xf32> to vector<1x8x16xf32>
    %82 = vector.shape_cast %81 : vector<1x8x16xf32> to vector<8x16xf32>
    %83 = vector.extract_strided_slice %52 {offsets = [15, 0, 0], sizes = [1, 8, 16], strides = [1, 1, 1]} : vector<16x8x16xf32> to vector<1x8x16xf32>
    %84 = vector.shape_cast %83 : vector<1x8x16xf32> to vector<8x16xf32>
    %85 = tpu.concatenate %54, %56, %58, %60, %62, %64, %66, %68, %70, %72, %74, %76, %78, %80, %82, %84 in 1 : vector<8x16xf32>, vector<8x16xf32>, vector<8x16xf32>, vector<8x16xf32>, vector<8x16xf32>, vector<8x16xf32>, vector<8x16xf32>, vector<8x16xf32>, vector<8x16xf32>, vector<8x16xf32>, vector<8x16xf32>, vector<8x16xf32>, vector<8x16xf32>, vector<8x16xf32>, vector<8x16xf32>, vector<8x16xf32> -> vector<8x256xf32>
    %c0_13 = arith.constant 0 : index
    %c0_14 = arith.constant 0 : index
    %86 = vector.load %arg5[%c0_13, %c0_14] : memref<256x256xf32, #tpu.memory_space<vmem>>, vector<256x256xf32>
    %cst_15 = arith.constant dense<0.000000e+00> : vector<8x256xf32>
    %87 = tpu.matmul %85, %86, %cst_15 {dimension_numbers = #tpu.dot_dimension_numbers<[1], [0], [0], [1], [0, 0, 1, 1], [], []>} : vector<8x256xf32>, vector<256x256xf32>, vector<8x256xf32> -> vector<8x256xf32>
    %c0_16 = arith.constant 0 : index
    %c0_17 = arith.constant 0 : index
    %88 = vector.load %arg6[%c0_16, %c0_17] : memref<1x256xf32, #tpu.memory_space<vmem>>, vector<1x256xf32>
    %89 = vector.broadcast %88 : vector<1x256xf32> to vector<8x256xf32>
    %90 = arith.addf %87, %89 : vector<8x256xf32>
    %cst_18 = arith.constant 0.000000e+00 : f32
    %91 = vector.broadcast %cst_18 : f32 to vector<8x256xf32>
    %92 = arith.maximumf %90, %91 : vector<8x256xf32>
    %c0_19 = arith.constant 0 : index
    %c0_20 = arith.constant 0 : index
    %93 = vector.load %arg7[%c0_19, %c0_20] : memref<256x128xf32, #tpu.memory_space<vmem>>, vector<256x128xf32>
    %cst_21 = arith.constant dense<0.000000e+00> : vector<8x128xf32>
    %94 = tpu.matmul %92, %93, %cst_21 {dimension_numbers = #tpu.dot_dimension_numbers<[1], [0], [0], [1], [0, 0, 1, 1], [], []>} : vector<8x256xf32>, vector<256x128xf32>, vector<8x128xf32> -> vector<8x128xf32>
    %c0_22 = arith.constant 0 : index
    %c0_23 = arith.constant 0 : index
    %95 = vector.load %arg8[%c0_22, %c0_23] : memref<1x128xf32, #tpu.memory_space<vmem>>, vector<1x128xf32>
    %96 = vector.broadcast %95 : vector<1x128xf32> to vector<8x128xf32>
    %97 = arith.addf %94, %96 : vector<8x128xf32>
    %cst_24 = arith.constant 0.000000e+00 : f32
    %98 = vector.broadcast %cst_24 : f32 to vector<8x128xf32>
    %99 = arith.maximumf %97, %98 : vector<8x128xf32>
    %c0_25 = arith.constant 0 : index
    %c0_26 = arith.constant 0 : index
    %100 = vector.load %arg9[%c0_25, %c0_26] : memref<128x128xf32, #tpu.memory_space<vmem>>, vector<128x128xf32>
    %cst_27 = arith.constant dense<0.000000e+00> : vector<8x128xf32>
    %101 = tpu.matmul %99, %100, %cst_27 {dimension_numbers = #tpu.dot_dimension_numbers<[1], [0], [0], [1], [0, 0, 1, 1], [], []>} : vector<8x128xf32>, vector<128x128xf32>, vector<8x128xf32> -> vector<8x128xf32>
    %c0_28 = arith.constant 0 : index
    %c0_29 = arith.constant 0 : index
    %102 = vector.load %arg10[%c0_28, %c0_29] : memref<1x128xf32, #tpu.memory_space<vmem>>, vector<1x128xf32>
    %103 = vector.broadcast %102 : vector<1x128xf32> to vector<8x128xf32>
    %104 = arith.addf %101, %103 : vector<8x128xf32>
    %c0_30 = arith.constant 0 : index
    %c0_31 = arith.constant 0 : index
    %105 = vector.load %arg11[%c0_30, %c0_31] : memref<8x128xf32, #tpu.memory_space<vmem>>, vector<8x128xf32>
    tpu.vector_store %arg11[%c0_30, %c0_31], %104 {strides = array<i32>} : memref<8x128xf32, #tpu.memory_space<vmem>>, vector<8x128xf32>,
    return
  }
  func.func @transform_0(%arg0: i32) -> (i32, i32, i32) {
    %c0_i32 = arith.constant 0 : i32
    %c0_i32_0 = arith.constant 0 : i32
    %c0_i32_1 = arith.constant 0 : i32
    return %c0_i32, %arg0, %c0_i32_0 : i32, i32, i32
  }
  func.func @transform_1(%arg0: i32) -> (i32, i32) {
    %c0_i32 = arith.constant 0 : i32
    %c0_i32_0 = arith.constant 0 : i32
    %c0_i32_1 = arith.constant 0 : i32
    return %c0_i32, %c0_i32_0 : i32, i32
  }
  func.func @transform_2(%arg0: i32) -> (i32, i32) {
    %c0_i32 = arith.constant 0 : i32
    %c0_i32_0 = arith.constant 0 : i32
    %c0_i32_1 = arith.constant 0 : i32
    return %c0_i32, %c0_i32_0 : i32, i32
  }
  func.func @transform_3(%arg0: i32) -> (i32, i32) {
    %c0_i32 = arith.constant 0 : i32
    %c0_i32_0 = arith.constant 0 : i32
    %c0_i32_1 = arith.constant 0 : i32
    return %c0_i32, %c0_i32_0 : i32, i32
  }
  func.func @transform_4(%arg0: i32) -> (i32, i32) {
    %c0_i32 = arith.constant 0 : i32
    %c0_i32_0 = arith.constant 0 : i32
    %c0_i32_1 = arith.constant 0 : i32
    return %c0_i32, %c0_i32_0 : i32, i32
  }
  func.func @transform_5(%arg0: i32) -> (i32, i32) {
    %c0_i32 = arith.constant 0 : i32
    %c0_i32_0 = arith.constant 0 : i32
    %c0_i32_1 = arith.constant 0 : i32
    return %c0_i32, %c0_i32_0 : i32, i32
  }
  func.func @transform_6(%arg0: i32) -> (i32, i32) {
    %c0_i32 = arith.constant 0 : i32
    %c0_i32_0 = arith.constant 0 : i32
    %c0_i32_1 = arith.constant 0 : i32
    return %c0_i32, %c0_i32_0 : i32, i32
  }
  func.func @transform_7(%arg0: i32) -> (i32, i32) {
    %c0_i32 = arith.constant 0 : i32
    %c0_i32_0 = arith.constant 0 : i32
    %c0_i32_1 = arith.constant 0 : i32
    return %c0_i32, %c0_i32_0 : i32, i32
  }
  func.func @transform_8(%arg0: i32) -> (i32, i32) {
    %c0_i32 = arith.constant 0 : i32
    %c0_i32_0 = arith.constant 0 : i32
    %c0_i32_1 = arith.constant 0 : i32
    return %c0_i32, %c0_i32_0 : i32, i32
  }
  func.func @transform_9(%arg0: i32) -> (i32, i32) {
    %c0_i32 = arith.constant 0 : i32
    %c0_i32_0 = arith.constant 0 : i32
    %c0_i32_1 = arith.constant 0 : i32
    return %c0_i32, %c0_i32_0 : i32, i32
  }
  func.func @transform_10(%arg0: i32) -> (i32, i32) {
    %c0_i32 = arith.constant 0 : i32
    %c0_i32_0 = arith.constant 0 : i32
    return %arg0, %c0_i32 : i32, i32
  }
}

</mosaic_0001>

<bundles_post_ra>
// kernel: forward.1
= control target key start
LH: loop header
LB: loop body
LE: loop exit
PB: predicated region body
PF: predicated region fallthrough
CT: control target
= control target key end

     0   :  { %vm1320_vm0 = vcmask 1043456   ;;  %vm359_vm1 = vcmask 228352   ;;  %s6503_s13 = smov 8   ;;  %s6504_s22 = smov 16   ;;  %vm4484_vm2 = vcmask 64512   ;;  %vm4557_vm3 = vcmask 130048   ;;  %s12623_s1 = inlined_call_operand.vmem [shape: f32[28,8], index: 1, kind: input, shape index: {}]   ;;  %s12624_s0 = inlined_call_operand.vmem [shape: f32[320,8,28], index: 0, kind: input, shape index: {}]   ;;  %s12625_s2 = inlined_call_operand.vmem [shape: f32[72,16], index: 2, kind: input, shape index: {}]   ;;  %s12626_s3 = inlined_call_operand.vmem [shape: f32[1,16], index: 3, kind: input, shape index: {}]   ;;  %s12627_s4 = inlined_call_operand.vmem [shape: f32[256,256], index: 4, kind: input, shape index: {}]   ;;  %s12628_s6 = inlined_call_operand.vmem [shape: f32[256,128], index: 6, kind: input, shape index: {}]   ;;  %s12629_s7 = inlined_call_operand.vmem [shape: f32[1,128], index: 7, kind: input, shape index: {}]   ;;  %s12630_s8 = inlined_call_operand.vmem [shape: f32[128,128], index: 8, kind: input, shape index: {}]   ;;  %s12631_s5 = inlined_call_operand.vmem [shape: f32[1,256], index: 5, kind: input, shape index: {}]   ;;  %s12632_s9 = inlined_call_operand.vmem [shape: f32[1,128], index: 9, kind: input, shape index: {}]   ;;  %s12633_s10 = inlined_call_operand.vmem [shape: f32[8,128], index: 10, kind: output, shape index: {}]  }
   0x1   :  { %v358_v0 = vld [vmem:[%s12623_s1 + $0x18] sm:$0xf]  ;;  %v357_v1 = vld [vmem:[%s12623_s1 + $0x10] sm:$0xff]  ;;  %v356_v2 = vld [vmem:[%s12623_s1 + $0x8] sm:$0xff]  ;;  %s6505_s18 = smov 48   ;;  %s6506_s19 = smov 56  }
   0x2   :  { %6039 = vmatpush.msk.msra.mxu0 %vm1320_vm0, %v358_v0  ;;  %6441 = vmatpush.msk.msra.mxu2 %vm1320_vm0, %v358_v0  ;;  %v355_v3 = vld [vmem:[%s12623_s1] sm:$0xff]  ;;  %v165_v5 = vld [vmem:[%s12624_s0 + $0x410] sm:$0xff]  ;;  %v258_v6 = vld [vmem:[%s12624_s0 + $0x6f8] sm:$0xff]  ;;  %s6507_s1 = smov 40   ;;  %s6508_s14 = smov 64   ;;  %vm4631_vm4 = vcmask 195584  }
   0x3   :  { %6442 = vmatpush.msk.msra.mxu3 %vm1320_vm0, %v358_v0  ;;  %6440 = vmatpush.msk.msra.mxu1 %vm1320_vm0, %v358_v0  ;;  %v35_v4 = vld [vmem:[%s12624_s0] sm:$0xff]  ;;  %v36_v7 = vld [vmem:[%s12624_s0 + $0x8] sm:$0xff]  ;;  %v166_v8 = vld [vmem:[%s12624_s0 + $0x418] sm:$0xff]  ;;  %s6509_s15 = smov 24   ;;  %s6510_s25 = smov 32   ;;  %vm4712_vm5 = vcmask 261120  }
   0x4   :  { %1337 = vmatpush.msra.mxu0 %v357_v1  ;;  %6444 = vmatpush.msra.mxu2 %v357_v1  ;;  %v259_v9 = vld [vmem:[%s12624_s0 + $0x700] sm:$0xff]  ;;  %v37_v10 = vld [vmem:[%s12624_s0 + $0x10] sm:$0xff]  ;;  %v260_v12 = vld [vmem:[%s12624_s0 + $0x708] sm:$0xff]  ;;  %vm4874_vm6 = vcmask 392192   ;;  %vm4793_vm7 = vcmask 326656   ;;  %vm4955_vm8 = vcmask 457728  }
   0x5   :  { %6445 = vmatpush.msra.mxu3 %v357_v1  ;;  %6443 = vmatpush.msra.mxu1 %v357_v1  ;;  %v167_v11 = vld [vmem:[%s12624_s0 + $0x420] sm:$0xff]  ;;  %v38_v13 = vld [vmem:[%s12624_s0 + $0x18] sm:$0xff]  ;;  %v168_v14 = vld [vmem:[%s12624_s0 + $0x428] sm:$0xff]  ;;  %vm5126_vm9 = vcmask 588800   ;;  %vm5036_vm10 = vcmask 523264   ;;  %vm5752_vm11 = vcmask 654336  }
   0x6   :  { %1338 = vmatpush.msra.mxu0 %v356_v2  ;;  %6447 = vmatpush.msra.mxu2 %v356_v2  ;;  %v261_v15 = vld [vmem:[%s12624_s0 + $0x710] sm:$0xff]  ;;  %v39_v16 = vld [vmem:[%s12624_s0 + $0x20] sm:$0xff]  ;;  %v262_v18 = vld [vmem:[%s12624_s0 + $0x718] sm:$0xff]  ;;  %vm5754_vm12 = vcmask 785408   ;;  %vm5756_vm13 = vcmask 916480  }
   0x7   :  { %6448 = vmatpush.msra.mxu3 %v356_v2  ;;  %6446 = vmatpush.msra.mxu1 %v356_v2  ;;  %v169_v17 = vld [vmem:[%s12624_s0 + $0x430] sm:$0xff]  ;;  %v40_v19 = vld [vmem:[%s12624_s0 + $0x28] sm:$0xff]  ;;  %v170_v20 = vld [vmem:[%s12624_s0 + $0x438] sm:$0xff] }
   0x8   :  { %1339 = vmatpush.msra.mxu0 %v355_v3  ;;  %6450 = vmatpush.msra.mxu2 %v355_v3  ;;  %v263_v21 = vld [vmem:[%s12624_s0 + $0x720] sm:$0xff]  ;;  %v41_v22 = vld [vmem:[%s12624_s0 + $0x30] sm:$0xff]  ;;  %v264_v24 = vld [vmem:[%s12624_s0 + $0x728] sm:$0xff] }
   0x9   :  { %6451 = vmatpush.msra.mxu3 %v355_v3  ;;  %6040 = vmatmul.msk.f32.vlgmr.msra.gmra.mxu0 %vm359_vm1, %v35_v4  ;;  %v171_v23 = vld [vmem:[%s12624_s0 + $0x440] sm:$0xff]  ;;  %v42_v25 = vld [vmem:[%s12624_s0 + $0x38] sm:$0xff]  ;;  %v172_v26 = vld [vmem:[%s12624_s0 + $0x448] sm:$0xff] }
   0xa   :  { %6170 = vmatmul.msk.f32.vlgmr.msra.gmra.mxu2 %vm359_vm1, %v165_v5  ;;  %6263 = vmatmul.msk.f32.vlgmr.msra.gmra.mxu3 %vm359_vm1, %v258_v6  ;;  %v265_v27 = vld [vmem:[%s12624_s0 + $0x730] sm:$0xff]  ;;  %v43_v28 = vld [vmem:[%s12624_s0 + $0x40] sm:$0xff]  ;;  %v266_v30 = vld [vmem:[%s12624_s0 + $0x738] sm:$0xff] }
   0xb   :  { %6449 = vmatpush.msra.mxu1 %v355_v3  ;;  %v173_v29 = vld [vmem:[%s12624_s0 + $0x450] sm:$0xff]  ;;  %v44_v31 = vld [vmem:[%s12624_s0 + $0x48] sm:$0xff]  ;;  %v174_v32 = vld [vmem:[%s12624_s0 + $0x458] sm:$0xff] }
   0xc   :  { %v267_v33 = vld [vmem:[%s12624_s0 + $0x740] sm:$0xff]  ;;  %v45_v34 = vld [vmem:[%s12624_s0 + $0x50] sm:$0xff]  ;;  %v268_v36 = vld [vmem:[%s12624_s0 + $0x748] sm:$0xff] }
   0xd   :  { %v175_v35 = vld [vmem:[%s12624_s0 + $0x460] sm:$0xff]  ;;  %v46_v37 = vld [vmem:[%s12624_s0 + $0x58] sm:$0xff]  ;;  %v176_v38 = vld [vmem:[%s12624_s0 + $0x468] sm:$0xff] }
   0xe   :  { %v269_v39 = vld [vmem:[%s12624_s0 + $0x750] sm:$0xff]  ;;  %v47_v40 = vld [vmem:[%s12624_s0 + $0x60] sm:$0xff]  ;;  %v270_v42 = vld [vmem:[%s12624_s0 + $0x758] sm:$0xff] }
   0xf   :  { %v177_v41 = vld [vmem:[%s12624_s0 + $0x470] sm:$0xff]  ;;  %v48_v43 = vld [vmem:[%s12624_s0 + $0x68] sm:$0xff]  ;;  %v178_v44 = vld [vmem:[%s12624_s0 + $0x478] sm:$0xff] }
  0x10   :  { %v271_v45 = vld [vmem:[%s12624_s0 + $0x760] sm:$0xff]  ;;  %v49_v46 = vld [vmem:[%s12624_s0 + $0x70] sm:$0xff]  ;;  %v272_v48 = vld [vmem:[%s12624_s0 + $0x768] sm:$0xff] }
  0x11   :  { %6041 = vmatmul.msk.f32.gmra.mxu0 %vm359_vm1, %v36_v7  ;;  %v179_v47 = vld [vmem:[%s12624_s0 + $0x480] sm:$0xff]  ;;  %v50_v49 = vld [vmem:[%s12624_s0 + $0x78] sm:$0xff]  ;;  %v180_v50 = vld [vmem:[%s12624_s0 + $0x488] sm:$0xff] }
  0x12   :  { %6171 = vmatmul.msk.f32.gmra.mxu2 %vm359_vm1, %v166_v8  ;;  %6264 = vmatmul.msk.f32.gmra.mxu3 %vm359_vm1, %v259_v9  ;;  %v273_v51 = vld [vmem:[%s12624_s0 + $0x770] sm:$0xff]  ;;  %v51_v53 = vld [vmem:[%s12624_s0 + $0x80] sm:$0xff]  ;;  %v274_v55 = vld [vmem:[%s12624_s0 + $0x778] sm:$0xff] }
  0x13   :  { %v181_v54 = vld [vmem:[%s12624_s0 + $0x490] sm:$0xff]  ;;  %v52_v59 = vld [vmem:[%s12624_s0 + $0x88] sm:$0xff]  ;;  %v182_v60 = vld [vmem:[%s12624_s0 + $0x498] sm:$0xff] }
  0x14   :  { %v275_v61 = vld [vmem:[%s12624_s0 + $0x780] sm:$0xff]  ;;  %v53_v1 = vld [vmem:[%s12624_s0 + $0x90] sm:$0xff]  ;;  %v276_v3 = vld [vmem:[%s12624_s0 + $0x788] sm:$0xff] }
  0x15   :  { %v183_v2 = vld [vmem:[%s12624_s0 + $0x4a0] sm:$0xff]  ;;  %v54_v7 = vld [vmem:[%s12624_s0 + $0x98] sm:$0xff]  ;;  %v184_v8 = vld [vmem:[%s12624_s0 + $0x4a8] sm:$0xff] }
  0x16   :  { %v277_v9 = vld [vmem:[%s12624_s0 + $0x790] sm:$0xff] }
  0x19   :  { %6042 = vmatmul.msk.f32.gmra.mxu0 %vm359_vm1, %v37_v10 }
  0x1a   :  { %6172 = vmatmul.msk.f32.gmra.mxu2 %vm359_vm1, %v167_v11  ;;  %6265 = vmatmul.msk.f32.gmra.mxu3 %vm359_vm1, %v260_v12 }
  0x21   :  { %6043 = vmatmul.msk.f32.gmra.mxu0 %vm359_vm1, %v38_v13  ;;  %v55_v13 = vld [vmem:[%s12624_s0 + $0xa0] sm:$0xff] }
  0x22   :  { %6173 = vmatmul.msk.f32.gmra.mxu2 %vm359_vm1, %v168_v14  ;;  %6266 = vmatmul.msk.f32.gmra.mxu3 %vm359_vm1, %v261_v15  ;;  %v185_v14 = vld [vmem:[%s12624_s0 + $0x4b0] sm:$0xff]  ;;  %v278_v15 = vld [vmem:[%s12624_s0 + $0x798] sm:$0xff] }
  0x29   :  { %6044 = vmatmul.msk.f32.gmra.mxu0 %vm359_vm1, %v39_v16 }
  0x2a   :  { %6174 = vmatmul.msk.f32.gmra.mxu2 %vm359_vm1, %v169_v17  ;;  %6267 = vmatmul.msk.f32.gmra.mxu3 %vm359_vm1, %v262_v18 }
  0x31   :  { %6045 = vmatmul.msk.f32.gmra.mxu0 %vm359_vm1, %v40_v19  ;;  %v56_v19 = vld [vmem:[%s12624_s0 + $0xa8] sm:$0xff] }
  0x32   :  { %6175 = vmatmul.msk.f32.gmra.mxu2 %vm359_vm1, %v170_v20  ;;  %6268 = vmatmul.msk.f32.gmra.mxu3 %vm359_vm1, %v263_v21  ;;  %v186_v20 = vld [vmem:[%s12624_s0 + $0x4b8] sm:$0xff]  ;;  %v279_v21 = vld [vmem:[%s12624_s0 + $0x7a0] sm:$0xff] }
  0x39   :  { %6046 = vmatmul.msk.f32.gmra.mxu0 %vm359_vm1, %v41_v22 }
  0x3a   :  { %6176 = vmatmul.msk.f32.gmra.mxu2 %vm359_vm1, %v171_v23  ;;  %6269 = vmatmul.msk.f32.gmra.mxu3 %vm359_vm1, %v264_v24 }
  0x41   :  { %6047 = vmatmul.msk.f32.gmra.mxu0 %vm359_vm1, %v42_v25  ;;  %v57_v25 = vld [vmem:[%s12624_s0 + $0xb0] sm:$0xff] }
  0x42   :  { %6177 = vmatmul.msk.f32.gmra.mxu2 %vm359_vm1, %v172_v26  ;;  %6270 = vmatmul.msk.f32.gmra.mxu3 %vm359_vm1, %v265_v27  ;;  %v187_v26 = vld [vmem:[%s12624_s0 + $0x4c0] sm:$0xff]  ;;  %v280_v27 = vld [vmem:[%s12624_s0 + $0x7a8] sm:$0xff] }
  0x49   :  { %6048 = vmatmul.msk.f32.gmra.mxu0 %vm359_vm1, %v43_v28 }
  0x4a   :  { %6178 = vmatmul.msk.f32.gmra.mxu2 %vm359_vm1, %v173_v29  ;;  %6271 = vmatmul.msk.f32.gmra.mxu3 %vm359_vm1, %v266_v30 }
  0x51   :  { %6049 = vmatmul.msk.f32.gmra.mxu0 %vm359_vm1, %v44_v31  ;;  %v58_v31 = vld [vmem:[%s12624_s0 + $0xb8] sm:$0xff] }
  0x52   :  { %6179 = vmatmul.msk.f32.gmra.mxu2 %vm359_vm1, %v174_v32  ;;  %6272 = vmatmul.msk.f32.gmra.mxu3 %vm359_vm1, %v267_v33  ;;  %v188_v32 = vld [vmem:[%s12624_s0 + $0x4c8] sm:$0xff]  ;;  %v281_v33 = vld [vmem:[%s12624_s0 + $0x7b0] sm:$0xff] }
  0x59   :  { %6050 = vmatmul.msk.f32.gmra.mxu0 %vm359_vm1, %v45_v34 }
  0x5a   :  { %6180 = vmatmul.msk.f32.gmra.mxu2 %vm359_vm1, %v175_v35  ;;  %6273 = vmatmul.msk.f32.gmra.mxu3 %vm359_vm1, %v268_v36 }
  0x61   :  { %6051 = vmatmul.msk.f32.gmra.mxu0 %vm359_vm1, %v46_v37  ;;  %v59_v37 = vld [vmem:[%s12624_s0 + $0xc0] sm:$0xff] }
  0x62   :  { %6181 = vmatmul.msk.f32.gmra.mxu2 %vm359_vm1, %v176_v38  ;;  %6274 = vmatmul.msk.f32.gmra.mxu3 %vm359_vm1, %v269_v39  ;;  %v189_v38 = vld [vmem:[%s12624_s0 + $0x4d0] sm:$0xff]  ;;  %v282_v39 = vld [vmem:[%s12624_s0 + $0x7b8] sm:$0xff] }
  0x69   :  { %6052 = vmatmul.msk.f32.gmra.mxu0 %vm359_vm1, %v47_v40 }
  0x6a   :  { %6182 = vmatmul.msk.f32.gmra.mxu2 %vm359_vm1, %v177_v41  ;;  %6275 = vmatmul.msk.f32.gmra.mxu3 %vm359_vm1, %v270_v42 }
  0x71   :  { %6053 = vmatmul.msk.f32.gmra.mxu0 %vm359_vm1, %v48_v43  ;;  %v60_v43 = vld [vmem:[%s12624_s0 + $0xc8] sm:$0xff] }
  0x72   :  { %6183 = vmatmul.msk.f32.gmra.mxu2 %vm359_vm1, %v178_v44  ;;  %6276 = vmatmul.msk.f32.gmra.mxu3 %vm359_vm1, %v271_v45  ;;  %v190_v44 = vld [vmem:[%s12624_s0 + $0x4d8] sm:$0xff]  ;;  %v283_v45 = vld [vmem:[%s12624_s0 + $0x7c0] sm:$0xff] }
  0x79   :  { %6054 = vmatmul.msk.f32.gmra.mxu0 %vm359_vm1, %v49_v46 }
  0x7a   :  { %6184 = vmatmul.msk.f32.gmra.mxu2 %vm359_vm1, %v179_v47  ;;  %6277 = vmatmul.msk.f32.gmra.mxu3 %vm359_vm1, %v272_v48 }
  0x81   :  { %6055 = vmatmul.msk.f32.gmra.mxu0 %vm359_vm1, %v50_v49  ;;  %v61_v49 = vld [vmem:[%s12624_s0 + $0xd0] sm:$0xff] }
  0x82   :  { %6185 = vmatmul.msk.f32.gmra.mxu2 %vm359_vm1, %v180_v50  ;;  %6278 = vmatmul.msk.f32.gmra.mxu3 %vm359_vm1, %v273_v51  ;;  %v191_v50 = vld [vmem:[%s12624_s0 + $0x4e0] sm:$0xff]  ;;  %v284_v51 = vld [vmem:[%s12624_s0 + $0x7c8] sm:$0xff] }
  0x86   :  { %v6773_v52 = vpop.f32.mrf.mxu0 }
  0x89   :  { %6056 = vmatmul.msk.f32.gmra.mxu0 %vm359_vm1, %v51_v53 }
  0x8a   :  { %6186 = vmatmul.msk.f32.gmra.mxu2 %vm359_vm1, %v181_v54  ;;  %6279 = vmatmul.msk.f32.gmra.mxu3 %vm359_vm1, %v274_v55 }
  0x8d   :  { %v6787_v56 = vpop.f32.mrf.mxu2  ;;  %v6789_v57 = vpop.f32.mrf.mxu3 }
  0x8e   :  { %v6791_v58 = vpop.f32.mrf.mxu0 }
  0x91   :  { %6057 = vmatmul.msk.f32.gmra.mxu0 %vm359_vm1, %v52_v59  ;;  %v62_v59 = vld [vmem:[%s12624_s0 + $0xd8] sm:$0xff] }
  0x92   :  { %6187 = vmatmul.msk.f32.gmra.mxu2 %vm359_vm1, %v182_v60  ;;  %6280 = vmatmul.msk.f32.gmra.mxu3 %vm359_vm1, %v275_v61  ;;  %v192_v60 = vld [vmem:[%s12624_s0 + $0x4e8] sm:$0xff]  ;;  %v285_v61 = vld [vmem:[%s12624_s0 + $0x7d0] sm:$0xff] }
  0x95   :  { %v6805_v62 = vpop.f32.mrf.mxu2  ;;  %v6807_v63 = vpop.f32.mrf.mxu3 }
  0x96   :  { %12753 = vst [vmem:[#allocation2_spill] sm:$0xff] %v6805_v62  ;;  %v6809_v0 = vpop.f32.mrf.mxu0 }
  0x99   :  { %6058 = vmatmul.msk.f32.gmra.mxu0 %vm359_vm1, %v53_v1 }
  0x9a   :  { %6188 = vmatmul.msk.f32.gmra.mxu2 %vm359_vm1, %v183_v2  ;;  %6281 = vmatmul.msk.f32.gmra.mxu3 %vm359_vm1, %v276_v3 }
  0x9d   :  { %v6823_v4 = vpop.f32.mrf.mxu2  ;;  %v6825_v5 = vpop.f32.mrf.mxu3 }
  0x9e   :  { %12754 = vst [vmem:[#allocation3_spill] sm:$0xff] %v6823_v4  ;;  %v6827_v6 = vpop.f32.mrf.mxu0 }
  0x9f   :  { %12755 = vst [vmem:[#allocation4_spill] sm:$0xff] %v6827_v6 }
  0xa1   :  { %6059 = vmatmul.msk.f32.gmra.mxu0 %vm359_vm1, %v54_v7  ;;  %v63_v7 = vld [vmem:[%s12624_s0 + $0xe0] sm:$0xff] }
  0xa2   :  { %6189 = vmatmul.msk.f32.gmra.mxu2 %vm359_vm1, %v184_v8  ;;  %6282 = vmatmul.msk.f32.gmra.mxu3 %vm359_vm1, %v277_v9  ;;  %v193_v8 = vld [vmem:[%s12624_s0 + $0x4f0] sm:$0xff]  ;;  %v286_v9 = vld [vmem:[%s12624_s0 + $0x7d8] sm:$0xff] }
  0xa5   :  { %v6841_v10 = vpop.f32.mrf.mxu2  ;;  %v6843_v11 = vpop.f32.mrf.mxu3 }
  0xa6   :  { %12756 = vst [vmem:[#allocation5_spill] sm:$0xff] %v6841_v10  ;;  %v6845_v12 = vpop.f32.mrf.mxu0  ;;  %v238_v10 = vld [vmem:[%s12624_s0 + $0x658] sm:$0xff] }
  0xa7   :  { %12757 = vst [vmem:[#allocation6_spill] sm:$0xff] %v6843_v11 }
  0xa8   :  { %12758 = vst [vmem:[#allocation7_spill] sm:$0xff] %v6845_v12 }
  0xa9   :  { %6060 = vmatmul.msk.f32.gmra.mxu0 %vm359_vm1, %v55_v13 }
  0xaa   :  { %6190 = vmatmul.msk.f32.gmra.mxu2 %vm359_vm1, %v185_v14  ;;  %6283 = vmatmul.msk.f32.gmra.mxu3 %vm359_vm1, %v278_v15 }
  0xad   :  { %v6859_v16 = vpop.f32.mrf.mxu2  ;;  %v6861_v17 = vpop.f32.mrf.mxu3 }
  0xae   :  { %12759 = vst [vmem:[#allocation8_spill] sm:$0xff] %v6859_v16  ;;  %v6863_v18 = vpop.f32.mrf.mxu0  ;;  %v97_v16 = vld [vmem:[%s12624_s0 + $0x1f0] sm:$0xff] }
  0xaf   :  { %12760 = vst [vmem:[#allocation9_spill] sm:$0xff] %v6861_v17  ;;  %v325_v17 = vld [vmem:[%s12624_s0 + $0x910] sm:$0xff] }
  0xb0   :  { %12761 = vst [vmem:[#allocation10_spill] sm:$0xff] %v6863_v18  ;;  %v104_v18 = vld [vmem:[%s12624_s0 + $0x228] sm:$0xff] }
  0xb1   :  { %6061 = vmatmul.msk.f32.gmra.mxu0 %vm359_vm1, %v56_v19  ;;  %v64_v19 = vld [vmem:[%s12624_s0 + $0xe8] sm:$0xff] }
  0xb2   :  { %6191 = vmatmul.msk.f32.gmra.mxu2 %vm359_vm1, %v186_v20  ;;  %6284 = vmatmul.msk.f32.gmra.mxu3 %vm359_vm1, %v279_v21  ;;  %v194_v20 = vld [vmem:[%s12624_s0 + $0x4f8] sm:$0xff]  ;;  %v287_v21 = vld [vmem:[%s12624_s0 + $0x7e0] sm:$0xff] }
  0xb5   :  { %v6877_v22 = vpop.f32.mrf.mxu2  ;;  %v6879_v23 = vpop.f32.mrf.mxu3 }
  0xb6   :  { %12762 = vst [vmem:[#allocation11_spill] sm:$0xff] %v6877_v22  ;;  %v6881_v24 = vpop.f32.mrf.mxu0 }
  0xb7   :  { %12763 = vst [vmem:[#allocation12_spill] sm:$0xff] %v6879_v23 }
  0xb8   :  { %12764 = vst [vmem:[#allocation13_spill] sm:$0xff] %v6881_v24 }
  0xb9   :  { %6062 = vmatmul.msk.f32.gmra.mxu0 %vm359_vm1, %v57_v25 }
  0xba   :  { %6192 = vmatmul.msk.f32.gmra.mxu2 %vm359_vm1, %v187_v26  ;;  %6285 = vmatmul.msk.f32.gmra.mxu3 %vm359_vm1, %v280_v27 }
  0xbd   :  { %v6895_v28 = vpop.f32.mrf.mxu2  ;;  %v6897_v29 = vpop.f32.mrf.mxu3 }
  0xbe   :  { %12765 = vst [vmem:[#allocation14_spill] sm:$0xff] %v6895_v28  ;;  %v6899_v30 = vpop.f32.mrf.mxu0  ;;  %v225_v28 = vld [vmem:[%s12624_s0 + $0x5f0] sm:$0xff] }
  0xbf   :  { %12766 = vst [vmem:[#allocation15_spill] sm:$0xff] %v6897_v29 }
  0xc0   :  { %12767 = vst [vmem:[#allocation16_spill] sm:$0xff] %v6899_v30  ;;  %v224_v30 = vld [vmem:[%s12624_s0 + $0x5e8] sm:$0xff] }
  0xc1   :  { %6063 = vmatmul.msk.f32.gmra.mxu0 %vm359_vm1, %v58_v31  ;;  %v65_v31 = vld [vmem:[%s12624_s0 + $0xf0] sm:$0xff] }
  0xc2   :  { %6193 = vmatmul.msk.f32.gmra.mxu2 %vm359_vm1, %v188_v32  ;;  %6286 = vmatmul.msk.f32.gmra.mxu3 %vm359_vm1, %v281_v33  ;;  %v195_v32 = vld [vmem:[%s12624_s0 + $0x500] sm:$0xff]  ;;  %v288_v33 = vld [vmem:[%s12624_s0 + $0x7e8] sm:$0xff] }
  0xc5   :  { %v6913_v34 = vpop.f32.mrf.mxu2  ;;  %v6915_v35 = vpop.f32.mrf.mxu3 }
  0xc6   :  { %12768 = vst [vmem:[#allocation17_spill] sm:$0xff] %v6913_v34  ;;  %v6917_v36 = vpop.f32.mrf.mxu0  ;;  %v215_v34 = vld [vmem:[%s12624_s0 + $0x5a0] sm:$0xff] }
  0xc7   :  { %12769 = vst [vmem:[#allocation18_spill] sm:$0xff] %v6915_v35 }
  0xc8   :  { %12770 = vst [vmem:[#allocation19_spill] sm:$0xff] %v6917_v36  ;;  %v221_v36 = vld [vmem:[%s12624_s0 + $0x5d0] sm:$0xff] }
  0xc9   :  { %6064 = vmatmul.msk.f32.gmra.mxu0 %vm359_vm1, %v59_v37 }
  0xca   :  { %6194 = vmatmul.msk.f32.gmra.mxu2 %vm359_vm1, %v189_v38  ;;  %6287 = vmatmul.msk.f32.gmra.mxu3 %vm359_vm1, %v282_v39 }
  0xcd   :  { %v6931_v40 = vpop.f32.mrf.mxu2  ;;  %v6933_v41 = vpop.f32.mrf.mxu3 }
  0xce   :  { %12771 = vst [vmem:[#allocation20_spill] sm:$0xff] %v6931_v40  ;;  %v6935_v42 = vpop.f32.mrf.mxu0 }
  0xcf   :  { %12772 = vst [vmem:[#allocation21_spill] sm:$0xff] %v6933_v41  ;;  %v219_v41 = vld [vmem:[%s12624_s0 + $0x5c0] sm:$0xff] }
  0xd0   :  { %12773 = vst [vmem:[#allocation22_spill] sm:$0xff] %v6935_v42 }
  0xd1   :  { %6065 = vmatmul.msk.f32.gmra.mxu0 %vm359_vm1, %v60_v43  ;;  %v66_v43 = vld [vmem:[%s12624_s0 + $0xf8] sm:$0xff] }
  0xd2   :  { %6195 = vmatmul.msk.f32.gmra.mxu2 %vm359_vm1, %v190_v44  ;;  %6288 = vmatmul.msk.f32.gmra.mxu3 %vm359_vm1, %v283_v45  ;;  %v196_v44 = vld [vmem:[%s12624_s0 + $0x508] sm:$0xff]  ;;  %v289_v45 = vld [vmem:[%s12624_s0 + $0x7f0] sm:$0xff] }
  0xd5   :  { %v6949_v46 = vpop.f32.mrf.mxu2  ;;  %v6951_v47 = vpop.f32.mrf.mxu3 }
  0xd6   :  { %12774 = vst [vmem:[#allocation23_spill] sm:$0xff] %v6949_v46  ;;  %v6953_v48 = vpop.f32.mrf.mxu0 }
  0xd7   :  { %12775 = vst [vmem:[#allocation24_spill] sm:$0xff] %v6951_v47  ;;  %v203_v47 = vld [vmem:[%s12624_s0 + $0x540] sm:$0xff] }
  0xd8   :  { %12776 = vst [vmem:[#allocation25_spill] sm:$0xff] %v6953_v48  ;;  %v214_v48 = vld [vmem:[%s12624_s0 + $0x598] sm:$0xff] }
  0xd9   :  { %6066 = vmatmul.msk.f32.gmra.mxu0 %vm359_vm1, %v61_v49 }
  0xda   :  { %6196 = vmatmul.msk.f32.gmra.mxu2 %vm359_vm1, %v191_v50  ;;  %6289 = vmatmul.msk.f32.gmra.mxu3 %vm359_vm1, %v284_v51 }
  0xdd   :  { %v6967_v53 = vpop.f32.mrf.mxu2  ;;  %v6969_v54 = vpop.f32.mrf.mxu3 }
  0xde   :  { %12777 = vst [vmem:[#allocation26_spill] sm:$0xff] %v6967_v53  ;;  %v6971_v55 = vpop.f32.mrf.mxu0  ;;  %v211_v53 = vld [vmem:[%s12624_s0 + $0x580] sm:$0xff] }
  0xdf   :  { %12778 = vst [vmem:[#allocation27_spill] sm:$0xff] %v6969_v54  ;;  %v73_v54 = vld [vmem:[%s12624_s0 + $0x130] sm:$0xff] }
  0xe0   :  { %12779 = vst [vmem:[#allocation28_spill] sm:$0xff] %v6971_v55  ;;  %v213_v55 = vld [vmem:[%s12624_s0 + $0x590] sm:$0xff] }
  0xe1   :  { %6067 = vmatmul.msk.f32.gmra.mxu0 %vm359_vm1, %v62_v59  ;;  %v67_v59 = vld [vmem:[%s12624_s0 + $0x100] sm:$0xff] }
  0xe2   :  { %6197 = vmatmul.msk.f32.gmra.mxu2 %vm359_vm1, %v192_v60  ;;  %6290 = vmatmul.msk.f32.gmra.mxu3 %vm359_vm1, %v285_v61  ;;  %v197_v60 = vld [vmem:[%s12624_s0 + $0x510] sm:$0xff]  ;;  %v290_v61 = vld [vmem:[%s12624_s0 + $0x7f8] sm:$0xff] }
  0xe5   :  { %v6985_v1 = vpop.f32.mrf.mxu2  ;;  %v6987_v2 = vpop.f32.mrf.mxu3 }
  0xe6   :  { %12780 = vst [vmem:[#allocation29_spill] sm:$0xff] %v6985_v1  ;;  %v6989_v3 = vpop.f32.mrf.mxu0  ;;  %v81_v1 = vld [vmem:[%s12624_s0 + $0x170] sm:$0xff] }
  0xe7   :  { %12781 = vst [vmem:[#allocation30_spill] sm:$0xff] %v6987_v2 }
  0xe8   :  { %12782 = vst [vmem:[#allocation31_spill] sm:$0xff] %v6989_v3  ;;  %v212_v3 = vld [vmem:[%s12624_s0 + $0x588] sm:$0xff] }
  0xe9   :  { %6068 = vmatmul.msk.f32.gmra.mxu0 %vm359_vm1, %v63_v7 }
  0xea   :  { %6198 = vmatmul.msk.f32.gmra.mxu2 %vm359_vm1, %v193_v8  ;;  %6291 = vmatmul.msk.f32.gmra.mxu3 %vm359_vm1, %v286_v9 }
  0xed   :  { %v7003_v13 = vpop.f32.mrf.mxu2  ;;  %v7005_v14 = vpop.f32.mrf.mxu3 }
  0xee   :  { %12783 = vst [vmem:[#allocation32_spill] sm:$0xff] %v7003_v13  ;;  %v7007_v15 = vpop.f32.mrf.mxu0  ;;  %v210_v13 = vld [vmem:[%s12624_s0 + $0x578] sm:$0xff] }
  0xef   :  { %12784 = vst [vmem:[#allocation33_spill] sm:$0xff] %v7005_v14  ;;  %v202_v14 = vld [vmem:[%s12624_s0 + $0x538] sm:$0xff] }
  0xf0   :  { %12785 = vst [vmem:[#allocation34_spill] sm:$0xff] %v7007_v15  ;;  %v80_v15 = vld [vmem:[%s12624_s0 + $0x168] sm:$0xff] }
  0xf1   :  { %6069 = vmatmul.msk.f32.gmra.mxu0 %vm359_vm1, %v64_v19  ;;  %v68_v19 = vld [vmem:[%s12624_s0 + $0x108] sm:$0xff] }
  0xf2   :  { %6199 = vmatmul.msk.f32.gmra.mxu2 %vm359_vm1, %v194_v20  ;;  %6292 = vmatmul.msk.f32.gmra.mxu3 %vm359_vm1, %v287_v21  ;;  %v198_v20 = vld [vmem:[%s12624_s0 + $0x518] sm:$0xff]  ;;  %v291_v21 = vld [vmem:[%s12624_s0 + $0x800] sm:$0xff] }
  0xf5   :  { %v7021_v25 = vpop.f32.mrf.mxu2  ;;  %v7023_v26 = vpop.f32.mrf.mxu3 }
  0xf6   :  { %12786 = vst [vmem:[#allocation35_spill] sm:$0xff] %v7023_v26  ;;  %v7025_v27 = vpop.f32.mrf.mxu0  ;;  %v72_v26 = vld [vmem:[%s12624_s0 + $0x128] sm:$0xff] }
  0xf7   :  { %12787 = vst [vmem:[#allocation36_spill] sm:$0xff] %v7025_v27  ;;  %v209_v27 = vld [vmem:[%s12624_s0 + $0x570] sm:$0xff] }
  0xf9   :  { %6070 = vmatmul.msk.f32.gmra.mxu0 %vm359_vm1, %v65_v31 }
  0xfa   :  { %6200 = vmatmul.msk.f32.gmra.mxu2 %vm359_vm1, %v195_v32  ;;  %6293 = vmatmul.msk.f32.gmra.mxu3 %vm359_vm1, %v288_v33 }
  0xfd   :  { %v7039_v37 = vpop.f32.mrf.mxu2  ;;  %v7041_v38 = vpop.f32.mrf.mxu3 }
  0xfe   :  { %12788 = vst [vmem:[#allocation37_spill] sm:$0xff] %v7041_v38  ;;  %v7043_v39 = vpop.f32.mrf.mxu0 }
  0xff   :  { %12789 = vst [vmem:[#allocation38_spill] sm:$0xff] %v7043_v39  ;;  %v79_v39 = vld [vmem:[%s12624_s0 + $0x160] sm:$0xff] }
 0x101   :  { %6071 = vmatmul.msk.f32.gmra.mxu0 %vm359_vm1, %v66_v43  ;;  %v69_v43 = vld [vmem:[%s12624_s0 + $0x110] sm:$0xff] }
 0x102   :  { %6201 = vmatmul.msk.f32.gmra.mxu2 %vm359_vm1, %v196_v44  ;;  %6294 = vmatmul.msk.f32.gmra.mxu3 %vm359_vm1, %v289_v45  ;;  %v199_v44 = vld [vmem:[%s12624_s0 + $0x520] sm:$0xff]  ;;  %v292_v45 = vld [vmem:[%s12624_s0 + $0x808] sm:$0xff] }
 0x105   :  { %v7057_v49 = vpop.f32.mrf.mxu2  ;;  %v7059_v50 = vpop.f32.mrf.mxu3 }
 0x106   :  { %12790 = vst [vmem:[#allocation39_spill] sm:$0xff] %v7057_v49  ;;  %v7061_v51 = vpop.f32.mrf.mxu0 }
 0x107   :  { %12791 = vst [vmem:[#allocation40_spill] sm:$0xff] %v7059_v50  ;;  %v201_v50 = vld [vmem:[%s12624_s0 + $0x530] sm:$0xff] }
 0x108   :  { %12792 = vst [vmem:[#allocation41_spill] sm:$0xff] %v7061_v51  ;;  %v208_v51 = vld [vmem:[%s12624_s0 + $0x568] sm:$0xff] }
 0x109   :  { %6072 = vmatmul.msk.f32.gmra.mxu0 %vm359_vm1, %v67_v59 }
 0x10a   :  { %6202 = vmatmul.msk.f32.gmra.mxu2 %vm359_vm1, %v197_v60  ;;  %6295 = vmatmul.msk.f32.gmra.mxu3 %vm359_vm1, %v290_v61 }
 0x10d   :  { %v7075_v7 = vpop.f32.mrf.mxu2  ;;  %v7077_v8 = vpop.f32.mrf.mxu3 }
 0x10e   :  { %12793 = vst [vmem:[#allocation42_spill] sm:$0xff] %v7075_v7  ;;  %v7079_v9 = vpop.f32.mrf.mxu0  ;;  %v229_v7 = vld [vmem:[%s12624_s0 + $0x610] sm:$0xff] }
 0x10f   :  { %12794 = vst [vmem:[#allocation43_spill] sm:$0xff] %v7077_v8  ;;  %v71_v8 = vld [vmem:[%s12624_s0 + $0x120] sm:$0xff] }
 0x110   :  { %12795 = vst [vmem:[#allocation44_spill] sm:$0xff] %v7079_v9  ;;  %v207_v9 = vld [vmem:[%s12624_s0 + $0x560] sm:$0xff] }
 0x111   :  { %6073 = vmatmul.msk.f32.gmra.mxu0 %vm359_vm1, %v68_v19  ;;  %v70_v19 = vld [vmem:[%s12624_s0 + $0x118] sm:$0xff] }
 0x112   :  { %6203 = vmatmul.msk.f32.gmra.mxu2 %vm359_vm1, %v198_v20  ;;  %6296 = vmatmul.msk.f32.gmra.mxu3 %vm359_vm1, %v291_v21  ;;  %v200_v20 = vld [vmem:[%s12624_s0 + $0x528] sm:$0xff]  ;;  %v293_v21 = vld [vmem:[%s12624_s0 + $0x810] sm:$0xff] }
 0x115   :  { %v7093_v31 = vpop.f32.mrf.mxu2  ;;  %v7095_v32 = vpop.f32.mrf.mxu3 }
 0x116   :  { %12796 = vst [vmem:[#allocation45_spill] sm:$0xff] %v7093_v31  ;;  %v7097_v33 = vpop.f32.mrf.mxu0 }
 0x117   :  { %12797 = vst [vmem:[#allocation46_spill] sm:$0xff] %v7097_v33  ;;  %v206_v33 = vld [vmem:[%s12624_s0 + $0x558] sm:$0xff] }
 0x119   :  { %6074 = vmatmul.msk.f32.gmra.mxu0 %vm359_vm1, %v69_v43 }
 0x11a   :  { %6204 = vmatmul.msk.f32.gmra.mxu2 %vm359_vm1, %v199_v44  ;;  %6297 = vmatmul.msk.f32.gmra.mxu3 %vm359_vm1, %v292_v45 }
 0x11d   :  { %v7111_v59 = vpop.f32.mrf.mxu2  ;;  %v7113_v60 = vpop.f32.mrf.mxu3 }
 0x11e   :  { %12798 = vst [vmem:[#allocation47_spill] sm:$0xff] %v7111_v59  ;;  %v7115_v61 = vpop.f32.mrf.mxu0  ;;  %v100_v59 = vld [vmem:[%s12624_s0 + $0x208] sm:$0xff] }
 0x11f   :  { %12799 = vst [vmem:[#allocation48_spill] sm:$0xff] %v7115_v61  ;;  %v205_v61 = vld [vmem:[%s12624_s0 + $0x550] sm:$0xff] }
 0x121   :  { %6075 = vmatmul.msk.f32.gmra.mxu0 %vm359_vm1, %v70_v19  ;;  %v294_v19 = vld [vmem:[%s12624_s0 + $0x818] sm:$0xff] }
 0x122   :  { %6205 = vmatmul.msk.f32.gmra.mxu2 %vm359_vm1, %v200_v20  ;;  %6298 = vmatmul.msk.f32.gmra.mxu3 %vm359_vm1, %v293_v21 }
 0x125   :  { %v7129_v43 = vpop.f32.mrf.mxu2  ;;  %v7131_v44 = vpop.f32.mrf.mxu3 }
 0x126   :  { %12800 = vst [vmem:[#allocation49_spill] sm:$0xff] %v7129_v43  ;;  %v7133_v45 = vpop.f32.mrf.mxu0  ;;  %v217_v43 = vld [vmem:[%s12624_s0 + $0x5b0] sm:$0xff] }
 0x127   :  { %12801 = vst [vmem:[#allocation50_spill] sm:$0xff] %v7133_v45  ;;  %v204_v45 = vld [vmem:[%s12624_s0 + $0x548] sm:$0xff] }
 0x129   :  { %6076 = vmatmul.msk.f32.gmra.mxu0 %vm359_vm1, %v71_v8 }
 0x12a   :  { %6206 = vmatmul.msk.f32.gmra.mxu2 %vm359_vm1, %v201_v50  ;;  %6299 = vmatmul.msk.f32.gmra.mxu3 %vm359_vm1, %v294_v19  ;;  %v295_v50 = vld [vmem:[%s12624_s0 + $0x820] sm:$0xff] }
 0x12d   :  { %v7147_v20 = vpop.f32.mrf.mxu2  ;;  %v7149_v21 = vpop.f32.mrf.mxu3 }
 0x12e   :  { %12802 = vst [vmem:[#allocation51_spill] sm:$0xff] %v7147_v20  ;;  %v7151_v38 = vpop.f32.mrf.mxu0  ;;  %v218_v20 = vld [vmem:[%s12624_s0 + $0x5b8] sm:$0xff] }
 0x12f   :  { %12803 = vst [vmem:[#allocation52_spill] sm:$0xff] %v7149_v21 }
 0x130   :  { %12804 = vst [vmem:[#allocation53_spill] sm:$0xff] %v7151_v38  ;;  %v74_v38 = vld [vmem:[%s12624_s0 + $0x138] sm:$0xff] }
 0x131   :  { %6077 = vmatmul.msk.f32.gmra.mxu0 %vm359_vm1, %v72_v26 }
 0x132   :  { %6207 = vmatmul.msk.f32.gmra.mxu2 %vm359_vm1, %v202_v14  ;;  %6300 = vmatmul.msk.f32.gmra.mxu3 %vm359_vm1, %v295_v50  ;;  %v296_v14 = vld [vmem:[%s12624_s0 + $0x828] sm:$0xff] }
 0x135   :  { %v7165_v8 = vpop.f32.mrf.mxu2  ;;  %v7167_v19 = vpop.f32.mrf.mxu3 }
 0x136   :  { %12805 = vst [vmem:[#allocation54_spill] sm:$0xff] %v7165_v8  ;;  %v7169_v2 = vpop.f32.mrf.mxu0 }
 0x137   :  { %12806 = vst [vmem:[#allocation55_spill] sm:$0xff] %v7167_v19 }
 0x138   :  { %12807 = vst [vmem:[#allocation56_spill] sm:$0xff] %v7169_v2 }
 0x139   :  { %6078 = vmatmul.msk.f32.gmra.mxu0 %vm359_vm1, %v73_v54 }
 0x13a   :  { %6208 = vmatmul.msk.f32.gmra.mxu2 %vm359_vm1, %v203_v47  ;;  %6301 = vmatmul.msk.f32.gmra.mxu3 %vm359_vm1, %v296_v14  ;;  %v297_v47 = vld [vmem:[%s12624_s0 + $0x830] sm:$0xff] }
 0x13d   :  { %v7183_v26 = vpop.f32.mrf.mxu2  ;;  %v7185_v50 = vpop.f32.mrf.mxu3 }
 0x13e   :  { %12808 = vst [vmem:[#allocation57_spill] sm:$0xff] %v7183_v26  ;;  %v7187_v2 = vpop.f32.mrf.mxu0 }
 0x13f   :  { %12809 = vst [vmem:[#allocation58_spill] sm:$0xff] %v7185_v50 }
 0x140   :  { %12810 = vst [vmem:[#allocation59_spill] sm:$0xff] %v7187_v2  ;;  %v75_v2 = vld [vmem:[%s12624_s0 + $0x140] sm:$0xff] }
 0x141   :  { %6079 = vmatmul.msk.f32.gmra.mxu0 %vm359_vm1, %v74_v38  ;;  %v298_v38 = vld [vmem:[%s12624_s0 + $0x838] sm:$0xff] }
 0x142   :  { %6209 = vmatmul.msk.f32.gmra.mxu2 %vm359_vm1, %v204_v45  ;;  %6302 = vmatmul.msk.f32.gmra.mxu3 %vm359_vm1, %v297_v47 }
 0x145   :  { %v7201_v54 = vpop.f32.mrf.mxu2  ;;  %v7203_v14 = vpop.f32.mrf.mxu3 }
 0x146   :  { %12811 = vst [vmem:[#allocation60_spill] sm:$0xff] %v7201_v54  ;;  %v7205_v26 = vpop.f32.mrf.mxu0 }
 0x147   :  { %12812 = vst [vmem:[#allocation61_spill] sm:$0xff] %v7203_v14  ;;  %v98_v14 = vld [vmem:[%s12624_s0 + $0x1f8] sm:$0xff] }
 0x148   :  { %12813 = vst [vmem:[#allocation62_spill] sm:$0xff] %v7205_v26  ;;  %v76_v26 = vld [vmem:[%s12624_s0 + $0x148] sm:$0xff] }
 0x149   :  { %6080 = vmatmul.msk.f32.gmra.mxu0 %vm359_vm1, %v75_v2  ;;  %v299_v2 = vld [vmem:[%s12624_s0 + $0x840] sm:$0xff] }
 0x14a   :  { %6210 = vmatmul.msk.f32.gmra.mxu2 %vm359_vm1, %v205_v61  ;;  %6303 = vmatmul.msk.f32.gmra.mxu3 %vm359_vm1, %v298_v38 }
 0x14d   :  { %v7219_v45 = vpop.f32.mrf.mxu2  ;;  %v7221_v47 = vpop.f32.mrf.mxu3 }
 0x14e   :  { %12814 = vst [vmem:[#allocation63_spill] sm:$0xff] %v7219_v45  ;;  %v7223_v54 = vpop.f32.mrf.mxu0 }
 0x14f   :  { %12815 = vst [vmem:[#allocation64_spill] sm:$0xff] %v7221_v47  ;;  %v223_v47 = vld [vmem:[%s12624_s0 + $0x5e0] sm:$0xff] }
 0x150   :  { %12816 = vst [vmem:[#allocation65_spill] sm:$0xff] %v7223_v54  ;;  %v77_v54 = vld [vmem:[%s12624_s0 + $0x150] sm:$0xff] }
 0x151   :  { %6081 = vmatmul.msk.f32.gmra.mxu0 %vm359_vm1, %v76_v26 }
 0x152   :  { %6211 = vmatmul.msk.f32.gmra.mxu2 %vm359_vm1, %v206_v33  ;;  %6304 = vmatmul.msk.f32.gmra.mxu3 %vm359_vm1, %v299_v2  ;;  %v300_v33 = vld [vmem:[%s12624_s0 + $0x848] sm:$0xff] }
 0x155   :  { %v7237_v61 = vpop.f32.mrf.mxu2  ;;  %v7239_v38 = vpop.f32.mrf.mxu3 }
 0x156   :  { %12817 = vst [vmem:[#allocation66_spill] sm:$0xff] %v7237_v61  ;;  %v7241_v45 = vpop.f32.mrf.mxu0 }
 0x157   :  { %12818 = vst [vmem:[#allocation67_spill] sm:$0xff] %v7239_v38  ;;  %v220_v38 = vld [vmem:[%s12624_s0 + $0x5c8] sm:$0xff] }
 0x158   :  { %12819 = vst [vmem:[#allocation68_spill] sm:$0xff] %v7241_v45  ;;  %v78_v45 = vld [vmem:[%s12624_s0 + $0x158] sm:$0xff] }
 0x159   :  { %6082 = vmatmul.msk.f32.gmra.mxu0 %vm359_vm1, %v77_v54 }
 0x15a   :  { %6212 = vmatmul.msk.f32.gmra.mxu2 %vm359_vm1, %v207_v9  ;;  %6305 = vmatmul.msk.f32.gmra.mxu3 %vm359_vm1, %v300_v33  ;;  %v301_v9 = vld [vmem:[%s12624_s0 + $0x850] sm:$0xff] }
 0x15d   :  { %v7255_v26 = vpop.f32.mrf.mxu2  ;;  %v7257_v2 = vpop.f32.mrf.mxu3 }
 0x15e   :  { %12820 = vst [vmem:[#allocation69_spill] sm:$0xff] %v7255_v26  ;;  %v7259_v61 = vpop.f32.mrf.mxu0 }
 0x15f   :  { %12821 = vst [vmem:[#allocation70_spill] sm:$0xff] %v7257_v2  ;;  %v216_v2 = vld [vmem:[%s12624_s0 + $0x5a8] sm:$0xff] }
 0x161   :  { %6083 = vmatmul.msk.f32.gmra.mxu0 %vm359_vm1, %v78_v45 }
 0x162   :  { %6213 = vmatmul.msk.f32.gmra.mxu2 %vm359_vm1, %v208_v51  ;;  %6306 = vmatmul.msk.f32.gmra.mxu3 %vm359_vm1, %v301_v9  ;;  %v302_v51 = vld [vmem:[%s12624_s0 + $0x858] sm:$0xff] }
 0x165   :  { %v7273_v54 = vpop.f32.mrf.mxu2  ;;  %v7275_v33 = vpop.f32.mrf.mxu3 }
 0x166   :  { %12822 = vst [vmem:[#allocation71_spill] sm:$0xff] %v7273_v54  ;;  %v7277_v26 = vpop.f32.mrf.mxu0 }
 0x167   :  { %12823 = vst [vmem:[#allocation72_spill] sm:$0xff] %v7275_v33  ;;  %v84_v33 = vld [vmem:[%s12624_s0 + $0x188] sm:$0xff] }
 0x169   :  { %6084 = vmatmul.msk.f32.gmra.mxu0 %vm359_vm1, %v79_v39 }
 0x16a   :  { %6214 = vmatmul.msk.f32.gmra.mxu2 %vm359_vm1, %v209_v27  ;;  %6307 = vmatmul.msk.f32.gmra.mxu3 %vm359_vm1, %v302_v51  ;;  %v303_v27 = vld [vmem:[%s12624_s0 + $0x860] sm:$0xff] }
 0x16d   :  { %v7291_v45 = vpop.f32.mrf.mxu2  ;;  %v7293_v9 = vpop.f32.mrf.mxu3 }
 0x16e   :  { %12824 = vst [vmem:[#allocation73_spill] sm:$0xff] %v7291_v45  ;;  %v7295_v54 = vpop.f32.mrf.mxu0 }
 0x16f   :  { %12825 = vst [vmem:[#allocation74_spill] sm:$0xff] %v7293_v9  ;;  %v83_v9 = vld [vmem:[%s12624_s0 + $0x180] sm:$0xff] }
 0x171   :  { %6085 = vmatmul.msk.f32.gmra.mxu0 %vm359_vm1, %v80_v15 }
 0x172   :  { %6215 = vmatmul.msk.f32.gmra.mxu2 %vm359_vm1, %v210_v13  ;;  %6308 = vmatmul.msk.f32.gmra.mxu3 %vm359_vm1, %v303_v27  ;;  %v304_v13 = vld [vmem:[%s12624_s0 + $0x868] sm:$0xff] }
 0x175   :  { %v7309_v39 = vpop.f32.mrf.mxu2  ;;  %v7311_v51 = vpop.f32.mrf.mxu3 }
 0x176   :  { %12826 = vst [vmem:[#allocation75_spill] sm:$0xff] %v7309_v39  ;;  %v7313_v45 = vpop.f32.mrf.mxu0 }
 0x177   :  { %12827 = vst [vmem:[#allocation76_spill] sm:$0xff] %v7311_v51  ;;  %v82_v51 = vld [vmem:[%s12624_s0 + $0x178] sm:$0xff] }
 0x179   :  { %6086 = vmatmul.msk.f32.gmra.mxu0 %vm359_vm1, %v81_v1 }
 0x17a   :  { %6216 = vmatmul.msk.f32.gmra.mxu2 %vm359_vm1, %v211_v53  ;;  %6309 = vmatmul.msk.f32.gmra.mxu3 %vm359_vm1, %v304_v13  ;;  %v305_v53 = vld [vmem:[%s12624_s0 + $0x870] sm:$0xff] }
 0x17d   :  { %v7327_v15 = vpop.f32.mrf.mxu2  ;;  %v7329_v27 = vpop.f32.mrf.mxu3 }
 0x17e   :  { %12828 = vst [vmem:[#allocation77_spill] sm:$0xff] %v7329_v27  ;;  %v7331_v39 = vpop.f32.mrf.mxu0 }
 0x181   :  { %6087 = vmatmul.msk.f32.gmra.mxu0 %vm359_vm1, %v82_v51 }
 0x182   :  { %6217 = vmatmul.msk.f32.gmra.mxu2 %vm359_vm1, %v212_v3  ;;  %6310 = vmatmul.msk.f32.gmra.mxu3 %vm359_vm1, %v305_v53  ;;  %v306_v3 = vld [vmem:[%s12624_s0 + $0x878] sm:$0xff] }
 0x185   :  { %v7345_v1 = vpop.f32.mrf.mxu2  ;;  %v7347_v13 = vpop.f32.mrf.mxu3 }
 0x186   :  { %12829 = vst [vmem:[#allocation78_spill] sm:$0xff] %v7347_v13  ;;  %v7349_v27 = vpop.f32.mrf.mxu0 }
 0x189   :  { %6088 = vmatmul.msk.f32.gmra.mxu0 %vm359_vm1, %v83_v9  ;;  %v142_v9 = vld [vmem:[%s12624_s0 + $0x358] sm:$0xff] }
 0x18a   :  { %6218 = vmatmul.msk.f32.gmra.mxu2 %vm359_vm1, %v213_v55  ;;  %6311 = vmatmul.msk.f32.gmra.mxu3 %vm359_vm1, %v306_v3  ;;  %v307_v55 = vld [vmem:[%s12624_s0 + $0x880] sm:$0xff] }
 0x18b   :  { %6147 = vmatmul.msk.f32.vlgmr.msra.gmra.mxu1 %vm359_vm1, %v142_v9 }
 0x18d   :  { %v7363_v51 = vpop.f32.mrf.mxu2  ;;  %v7365_v53 = vpop.f32.mrf.mxu3 }
 0x18e   :  { %12830 = vst [vmem:[#allocation79_spill] sm:$0xff] %v7365_v53  ;;  %v7367_v13 = vpop.f32.mrf.mxu0 }
 0x191   :  { %6089 = vmatmul.msk.f32.gmra.mxu0 %vm359_vm1, %v84_v33  ;;  %v85_v33 = vld [vmem:[%s12624_s0 + $0x190] sm:$0xff] }
 0x192   :  { %6219 = vmatmul.msk.f32.gmra.mxu2 %vm359_vm1, %v214_v48  ;;  %6312 = vmatmul.msk.f32.gmra.mxu3 %vm359_vm1, %v307_v55  ;;  %v308_v48 = vld [vmem:[%s12624_s0 + $0x888] sm:$0xff]  ;;  %v143_v55 = vld [vmem:[%s12624_s0 + $0x360] sm:$0xff] }
 0x193   :  { %6148 = vmatmul.msk.f32.gmra.mxu1 %vm359_vm1, %v143_v55 }
 0x195   :  { %v7385_v3 = vpop.f32.mrf.mxu2  ;;  %v7387_v53 = vpop.f32.mrf.mxu3 }
 0x196   :  { %12831 = vst [vmem:[#allocation80_spill] sm:$0xff] %v7385_v3  ;;  %v7389_v40 = vpop.f32.mrf.mxu0 }
 0x197   :  { %12832 = vst [vmem:[#allocation81_spill] sm:$0xff] %v7387_v53 }
 0x199   :  { %6090 = vmatmul.msk.f32.gmra.mxu0 %vm359_vm1, %v85_v33  ;;  %v86_v33 = vld [vmem:[%s12624_s0 + $0x198] sm:$0xff] }
 0x19a   :  { %6220 = vmatmul.msk.f32.gmra.mxu2 %vm359_vm1, %v215_v34  ;;  %6313 = vmatmul.msk.f32.gmra.mxu3 %vm359_vm1, %v308_v48  ;;  %v309_v34 = vld [vmem:[%s12624_s0 + $0x890] sm:$0xff]  ;;  %v144_v48 = vld [vmem:[%s12624_s0 + $0x368] sm:$0xff] }
 0x19b   :  { %6149 = vmatmul.msk.f32.gmra.mxu1 %vm359_vm1, %v144_v48 }
 0x19d   :  { %v7407_v9 = vpop.f32.mrf.mxu2  ;;  %v7409_v53 = vpop.f32.mrf.mxu3 }
 0x19e   :  { %12833 = vst [vmem:[#allocation82_spill] sm:$0xff] %v7407_v9  ;;  %v7411_v46 = vpop.f32.mrf.mxu0 }
 0x19f   :  { %12834 = vst [vmem:[#allocation83_spill] sm:$0xff] %v7409_v53 }
 0x1a1   :  { %6091 = vmatmul.msk.f32.gmra.mxu0 %vm359_vm1, %v86_v33  ;;  %v87_v33 = vld [vmem:[%s12624_s0 + $0x1a0] sm:$0xff] }
 0x1a2   :  { %6221 = vmatmul.msk.f32.gmra.mxu2 %vm359_vm1, %v216_v2  ;;  %6314 = vmatmul.msk.f32.gmra.mxu3 %vm359_vm1, %v309_v34  ;;  %v310_v2 = vld [vmem:[%s12624_s0 + $0x898] sm:$0xff]  ;;  %v145_v34 = vld [vmem:[%s12624_s0 + $0x370] sm:$0xff] }
 0x1a3   :  { %6150 = vmatmul.msk.f32.gmra.mxu1 %vm359_vm1, %v145_v34 }
 0x1a5   :  { %v7429_v55 = vpop.f32.mrf.mxu2  ;;  %v7431_v53 = vpop.f32.mrf.mxu3 }
 0x1a6   :  { %12835 = vst [vmem:[#allocation84_spill] sm:$0xff] %v7429_v55  ;;  %v7433_v42 = vpop.f32.mrf.mxu0 }
 0x1a7   :  { %12836 = vst [vmem:[#allocation85_spill] sm:$0xff] %v7431_v53 }
 0x1a9   :  { %6092 = vmatmul.msk.f32.gmra.mxu0 %vm359_vm1, %v87_v33  ;;  %v88_v33 = vld [vmem:[%s12624_s0 + $0x1a8] sm:$0xff] }
 0x1aa   :  { %6222 = vmatmul.msk.f32.gmra.mxu2 %vm359_vm1, %v217_v43  ;;  %6315 = vmatmul.msk.f32.gmra.mxu3 %vm359_vm1, %v310_v2  ;;  %v311_v43 = vld [vmem:[%s12624_s0 + $0x8a0] sm:$0xff]  ;;  %v146_v2 = vld [vmem:[%s12624_s0 + $0x378] sm:$0xff] }
 0x1ab   :  { %6151 = vmatmul.msk.f32.gmra.mxu1 %vm359_vm1, %v146_v2 }
 0x1ad   :  { %v7451_v48 = vpop.f32.mrf.mxu2  ;;  %v7453_v53 = vpop.f32.mrf.mxu3 }
 0x1ae   :  { %12837 = vst [vmem:[#allocation86_spill] sm:$0xff] %v7451_v48  ;;  %v7455_v8 = vpop.f32.mrf.mxu0 }
 0x1af   :  { %12838 = vst [vmem:[#allocation87_spill] sm:$0xff] %v7453_v53 }
 0x1b1   :  { %6093 = vmatmul.msk.f32.gmra.mxu0 %vm359_vm1, %v88_v33  ;;  %v89_v33 = vld [vmem:[%s12624_s0 + $0x1b0] sm:$0xff] }
 0x1b2   :  { %6223 = vmatmul.msk.f32.gmra.mxu2 %vm359_vm1, %v218_v20  ;;  %6316 = vmatmul.msk.f32.gmra.mxu3 %vm359_vm1, %v311_v43  ;;  %v312_v20 = vld [vmem:[%s12624_s0 + $0x8a8] sm:$0xff]  ;;  %v147_v43 = vld [vmem:[%s12624_s0 + $0x380] sm:$0xff] }
 0x1b3   :  { %6152 = vmatmul.msk.f32.gmra.mxu1 %vm359_vm1, %v147_v43 }
 0x1b5   :  { %v7473_v34 = vpop.f32.mrf.mxu2  ;;  %v7475_v53 = vpop.f32.mrf.mxu3 }
 0x1b6   :  { %12839 = vst [vmem:[#allocation88_spill] sm:$0xff] %v7473_v34  ;;  %v7477_v29 = vpop.f32.mrf.mxu0  ;;  %v222_v34 = vld [vmem:[%s12624_s0 + $0x5d8] sm:$0xff] }
 0x1b7   :  { %12840 = vst [vmem:[#allocation89_spill] sm:$0xff] %v7475_v53 }
 0x1b9   :  { %6094 = vmatmul.msk.f32.gmra.mxu0 %vm359_vm1, %v89_v33  ;;  %v90_v33 = vld [vmem:[%s12624_s0 + $0x1b8] sm:$0xff] }
 0x1ba   :  { %6224 = vmatmul.msk.f32.gmra.mxu2 %vm359_vm1, %v219_v41  ;;  %6317 = vmatmul.msk.f32.gmra.mxu3 %vm359_vm1, %v312_v20  ;;  %v313_v41 = vld [vmem:[%s12624_s0 + $0x8b0] sm:$0xff]  ;;  %v148_v20 = vld [vmem:[%s12624_s0 + $0x388] sm:$0xff] }
 0x1bb   :  { %6153 = vmatmul.msk.f32.gmra.mxu1 %vm359_vm1, %v148_v20 }
 0x1bd   :  { %v7495_v2 = vpop.f32.mrf.mxu2  ;;  %v7497_v53 = vpop.f32.mrf.mxu3 }
 0x1be   :  { %12841 = vst [vmem:[#allocation90_spill] sm:$0xff] %v7495_v2  ;;  %v7499_v35 = vpop.f32.mrf.mxu0 }
 0x1bf   :  { %12842 = vst [vmem:[#allocation91_spill] sm:$0xff] %v7497_v53 }
 0x1c1   :  { %6095 = vmatmul.msk.f32.gmra.mxu0 %vm359_vm1, %v90_v33  ;;  %v91_v33 = vld [vmem:[%s12624_s0 + $0x1c0] sm:$0xff] }
 0x1c2   :  { %6225 = vmatmul.msk.f32.gmra.mxu2 %vm359_vm1, %v220_v38  ;;  %6318 = vmatmul.msk.f32.gmra.mxu3 %vm359_vm1, %v313_v41  ;;  %v314_v38 = vld [vmem:[%s12624_s0 + $0x8b8] sm:$0xff]  ;;  %v149_v41 = vld [vmem:[%s12624_s0 + $0x390] sm:$0xff] }
 0x1c3   :  { %6154 = vmatmul.msk.f32.gmra.mxu1 %vm359_vm1, %v149_v41 }
 0x1c5   :  { %v7517_v43 = vpop.f32.mrf.mxu2  ;;  %v7519_v53 = vpop.f32.mrf.mxu3 }
 0x1c6   :  { %12843 = vst [vmem:[#allocation92_spill] sm:$0xff] %v7517_v43  ;;  %v7521_v2 = vpop.f32.mrf.mxu0 }
 0x1c7   :  { %12844 = vst [vmem:[#allocation93_spill] sm:$0xff] %v7519_v53 }
 0x1c9   :  { %6096 = vmatmul.msk.f32.gmra.mxu0 %vm359_vm1, %v91_v33  ;;  %v92_v33 = vld [vmem:[%s12624_s0 + $0x1c8] sm:$0xff] }
 0x1ca   :  { %6226 = vmatmul.msk.f32.gmra.mxu2 %vm359_vm1, %v221_v36  ;;  %6319 = vmatmul.msk.f32.gmra.mxu3 %vm359_vm1, %v314_v38  ;;  %v315_v36 = vld [vmem:[%s12624_s0 + $0x8c0] sm:$0xff]  ;;  %v150_v38 = vld [vmem:[%s12624_s0 + $0x398] sm:$0xff] }
 0x1cb   :  { %6155 = vmatmul.msk.f32.gmra.mxu1 %vm359_vm1, %v150_v38 }
 0x1cd   :  { %v7539_v20 = vpop.f32.mrf.mxu2  ;;  %v7541_v53 = vpop.f32.mrf.mxu3 }
 0x1ce   :  { %12845 = vst [vmem:[#allocation94_spill] sm:$0xff] %v7539_v20  ;;  %v7543_v43 = vpop.f32.mrf.mxu0 }
 0x1cf   :  { %12846 = vst [vmem:[#allocation95_spill] sm:$0xff] %v7541_v53 }
 0x1d1   :  { %6097 = vmatmul.msk.f32.gmra.mxu0 %vm359_vm1, %v92_v33  ;;  %v93_v33 = vld [vmem:[%s12624_s0 + $0x1d0] sm:$0xff] }
 0x1d2   :  { %6227 = vmatmul.msk.f32.gmra.mxu2 %vm359_vm1, %v222_v34  ;;  %6320 = vmatmul.msk.f32.gmra.mxu3 %vm359_vm1, %v315_v36  ;;  %v316_v34 = vld [vmem:[%s12624_s0 + $0x8c8] sm:$0xff]  ;;  %v151_v36 = vld [vmem:[%s12624_s0 + $0x3a0] sm:$0xff] }
 0x1d3   :  { %6156 = vmatmul.msk.f32.gmra.mxu1 %vm359_vm1, %v151_v36 }
 0x1d5   :  { %v7561_v41 = vpop.f32.mrf.mxu2  ;;  %v7563_v53 = vpop.f32.mrf.mxu3 }
 0x1d6   :  { %12847 = vst [vmem:[#allocation96_spill] sm:$0xff] %v7561_v41  ;;  %v7565_v20 = vpop.f32.mrf.mxu0 }
 0x1d7   :  { %12848 = vst [vmem:[#allocation97_spill] sm:$0xff] %v7563_v53 }
 0x1d9   :  { %6098 = vmatmul.msk.f32.gmra.mxu0 %vm359_vm1, %v93_v33  ;;  %v94_v33 = vld [vmem:[%s12624_s0 + $0x1d8] sm:$0xff] }
 0x1da   :  { %6228 = vmatmul.msk.f32.gmra.mxu2 %vm359_vm1, %v223_v47  ;;  %6321 = vmatmul.msk.f32.gmra.mxu3 %vm359_vm1, %v316_v34  ;;  %v317_v47 = vld [vmem:[%s12624_s0 + $0x8d0] sm:$0xff]  ;;  %v152_v34 = vld [vmem:[%s12624_s0 + $0x3a8] sm:$0xff] }
 0x1db   :  { %6157 = vmatmul.msk.f32.gmra.mxu1 %vm359_vm1, %v152_v34 }
 0x1dd   :  { %v7583_v38 = vpop.f32.mrf.mxu2  ;;  %v7585_v53 = vpop.f32.mrf.mxu3 }
 0x1de   :  { %12849 = vst [vmem:[#allocation98_spill] sm:$0xff] %v7583_v38  ;;  %v7587_v41 = vpop.f32.mrf.mxu0 }
 0x1df   :  { %12850 = vst [vmem:[#allocation99_spill] sm:$0xff] %v7585_v53 }
 0x1e1   :  { %6099 = vmatmul.msk.f32.gmra.mxu0 %vm359_vm1, %v94_v33  ;;  %v95_v33 = vld [vmem:[%s12624_s0 + $0x1e0] sm:$0xff] }
 0x1e2   :  { %6229 = vmatmul.msk.f32.gmra.mxu2 %vm359_vm1, %v224_v30  ;;  %6322 = vmatmul.msk.f32.gmra.mxu3 %vm359_vm1, %v317_v47  ;;  %v318_v30 = vld [vmem:[%s12624_s0 + $0x8d8] sm:$0xff]  ;;  %v153_v47 = vld [vmem:[%s12624_s0 + $0x3b0] sm:$0xff] }
 0x1e3   :  { %6158 = vmatmul.msk.f32.gmra.mxu1 %vm359_vm1, %v153_v47 }
 0x1e5   :  { %v7605_v36 = vpop.f32.mrf.mxu2  ;;  %v7607_v53 = vpop.f32.mrf.mxu3 }
 0x1e6   :  { %12851 = vst [vmem:[#allocation100_spill] sm:$0xff] %v7605_v36  ;;  %v7609_v38 = vpop.f32.mrf.mxu0  ;;  %v96_v36 = vld [vmem:[%s12624_s0 + $0x1e8] sm:$0xff] }
 0x1e7   :  { %12852 = vst [vmem:[#allocation101_spill] sm:$0xff] %v7607_v53 }
 0x1e9   :  { %6100 = vmatmul.msk.f32.gmra.mxu0 %vm359_vm1, %v95_v33  ;;  %v226_v33 = vld [vmem:[%s12624_s0 + $0x5f8] sm:$0xff] }
 0x1ea   :  { %6230 = vmatmul.msk.f32.gmra.mxu2 %vm359_vm1, %v225_v28  ;;  %6323 = vmatmul.msk.f32.gmra.mxu3 %vm359_vm1, %v318_v30  ;;  %v319_v28 = vld [vmem:[%s12624_s0 + $0x8e0] sm:$0xff]  ;;  %v154_v30 = vld [vmem:[%s12624_s0 + $0x3b8] sm:$0xff] }
 0x1eb   :  { %6159 = vmatmul.msk.f32.gmra.mxu1 %vm359_vm1, %v154_v30 }
 0x1ed   :  { %v7627_v34 = vpop.f32.mrf.mxu2  ;;  %v7634_v22 = vpop.f32.mrf.mxu3 }
 0x1ee   :  { %12853 = vst [vmem:[#allocation102_spill] sm:$0xff] %v7627_v34  ;;  %v7629_v53 = vpop.f32.mrf.mxu0 }
 0x1f1   :  { %6101 = vmatmul.msk.f32.gmra.mxu0 %vm359_vm1, %v96_v36  ;;  %v227_v36 = vld [vmem:[%s12624_s0 + $0x600] sm:$0xff] }
 0x1f2   :  { %6231 = vmatmul.msk.f32.gmra.mxu2 %vm359_vm1, %v226_v33  ;;  %6324 = vmatmul.msk.f32.gmra.mxu3 %vm359_vm1, %v319_v28  ;;  %v320_v33 = vld [vmem:[%s12624_s0 + $0x8e8] sm:$0xff]  ;;  %v155_v28 = vld [vmem:[%s12624_s0 + $0x3c0] sm:$0xff] }
 0x1f3   :  { %6160 = vmatmul.msk.f32.gmra.mxu1 %vm359_vm1, %v155_v28 }
 0x1f5   :  { %v7649_v47 = vpop.f32.mrf.mxu2  ;;  %v7662_v48 = vpop.f32.mrf.mxu3 }
 0x1f6   :  { %12854 = vst [vmem:[#allocation103_spill] sm:$0xff] %v7649_v47  ;;  %v7651_v34 = vpop.f32.mrf.mxu0 }
 0x1f9   :  { %6102 = vmatmul.msk.f32.gmra.mxu0 %vm359_vm1, %v97_v16  ;;  %v228_v16 = vld [vmem:[%s12624_s0 + $0x608] sm:$0xff] }
 0x1fa   :  { %6232 = vmatmul.msk.f32.gmra.mxu2 %vm359_vm1, %v227_v36  ;;  %6325 = vmatmul.msk.f32.gmra.mxu3 %vm359_vm1, %v320_v33  ;;  %v321_v36 = vld [vmem:[%s12624_s0 + $0x8f0] sm:$0xff]  ;;  %v156_v33 = vld [vmem:[%s12624_s0 + $0x3c8] sm:$0xff] }
 0x1fb   :  { %6161 = vmatmul.msk.f32.gmra.mxu1 %vm359_vm1, %v156_v33 }
 0x1fd   :  { %v7671_v30 = vpop.f32.mrf.mxu2  ;;  %v7690_v28 = vpop.f32.mrf.mxu3 }
 0x1fe   :  { %12855 = vst [vmem:[#allocation104_spill] sm:$0xff] %v7671_v30  ;;  %v7673_v47 = vpop.f32.mrf.mxu0 }
 0x201   :  { %6103 = vmatmul.msk.f32.gmra.mxu0 %vm359_vm1, %v98_v14  ;;  %v99_v14 = vld [vmem:[%s12624_s0 + $0x200] sm:$0xff] }
 0x202   :  { %6233 = vmatmul.msk.f32.gmra.mxu2 %vm359_vm1, %v228_v16  ;;  %6326 = vmatmul.msk.f32.gmra.mxu3 %vm359_vm1, %v321_v36  ;;  %v322_v16 = vld [vmem:[%s12624_s0 + $0x8f8] sm:$0xff]  ;;  %v157_v36 = vld [vmem:[%s12624_s0 + $0x3d0] sm:$0xff] }
 0x203   :  { %6162 = vmatmul.msk.f32.gmra.mxu1 %vm359_vm1, %v157_v36 }
 0x205   :  { %v7693_v30 = vpop.f32.mrf.mxu2  ;;  %v7713_v33 = vpop.f32.mrf.mxu3 }
 0x206   :  { %12856 = vst [vmem:[#allocation105_spill] sm:$0xff] %v7693_v30  ;;  %v7695_v24 = vpop.f32.mrf.mxu0 }
 0x209   :  { %6104 = vmatmul.msk.f32.gmra.mxu0 %vm359_vm1, %v99_v14  ;;  %v230_v14 = vld [vmem:[%s12624_s0 + $0x618] sm:$0xff] }
 0x20a   :  { %6234 = vmatmul.msk.f32.gmra.mxu2 %vm359_vm1, %v229_v7  ;;  %6327 = vmatmul.msk.f32.gmra.mxu3 %vm359_vm1, %v322_v16  ;;  %v323_v7 = vld [vmem:[%s12624_s0 + $0x900] sm:$0xff]  ;;  %v158_v16 = vld [vmem:[%s12624_s0 + $0x3d8] sm:$0xff] }
 0x20b   :  { %6163 = vmatmul.msk.f32.gmra.mxu1 %vm359_vm1, %v158_v16 }
 0x20d   :  { %v7715_v30 = vpop.f32.mrf.mxu2  ;;  %v7740_v11 = vpop.f32.mrf.mxu3 }
 0x20e   :  { %12857 = vst [vmem:[#allocation106_spill] sm:$0xff] %v7715_v30  ;;  %v7720_v31 = vpop.f32.mrf.mxu0  ;;  %v101_v30 = vld [vmem:[%s12624_s0 + $0x210] sm:$0xff] }
 0x211   :  { %6105 = vmatmul.msk.f32.gmra.mxu0 %vm359_vm1, %v100_v59  ;;  %v231_v59 = vld [vmem:[%s12624_s0 + $0x620] sm:$0xff] }
 0x212   :  { %6235 = vmatmul.msk.f32.gmra.mxu2 %vm359_vm1, %v230_v14  ;;  %6328 = vmatmul.msk.f32.gmra.mxu3 %vm359_vm1, %v323_v7  ;;  %v324_v14 = vld [vmem:[%s12624_s0 + $0x908] sm:$0xff]  ;;  %v159_v7 = vld [vmem:[%s12624_s0 + $0x3e0] sm:$0xff] }
 0x213   :  { %6164 = vmatmul.msk.f32.gmra.mxu1 %vm359_vm1, %v159_v7 }
 0x215   :  { %v7735_v36 = vpop.f32.mrf.mxu2  ;;  %v7768_v55 = vpop.f32.mrf.mxu3 }
 0x216   :  { %12858 = vst [vmem:[#allocation107_spill] sm:$0xff] %v7735_v36  ;;  %v7748_v23 = vpop.f32.mrf.mxu0  ;;  %v102_v36 = vld [vmem:[%s12624_s0 + $0x218] sm:$0xff] }
 0x219   :  { %6106 = vmatmul.msk.f32.gmra.mxu0 %vm359_vm1, %v101_v30  ;;  %v232_v30 = vld [vmem:[%s12624_s0 + $0x628] sm:$0xff] }
 0x21a   :  { %6236 = vmatmul.msk.f32.gmra.mxu2 %vm359_vm1, %v231_v59  ;;  %6329 = vmatmul.msk.f32.gmra.mxu3 %vm359_vm1, %v324_v14  ;;  %v160_v59 = vld [vmem:[%s12624_s0 + $0x3e8] sm:$0xff] }
 0x21b   :  { %6165 = vmatmul.msk.f32.gmra.mxu1 %vm359_vm1, %v160_v59 }
 0x21d   :  { %v7757_v16 = vpop.f32.mrf.mxu2  ;;  %v7796_v59 = vpop.f32.mrf.mxu3 }
 0x21e   :  { %12859 = vst [vmem:[#allocation108_spill] sm:$0xff] %v7757_v16  ;;  %v7776_v14 = vpop.f32.mrf.mxu0  ;;  %v103_v16 = vld [vmem:[%s12624_s0 + $0x220] sm:$0xff] }
 0x21f   :  { %12860 = vst [vmem:[#allocation109_spill] sm:$0xff] %v7776_v14  ;;  %v1662_v14 = vpop.f32.mrf.mxu1 }
 0x221   :  { %6107 = vmatmul.msk.f32.gmra.mxu0 %vm359_vm1, %v102_v36  ;;  %v233_v36 = vld [vmem:[%s12624_s0 + $0x630] sm:$0xff] }
 0x222   :  { %6237 = vmatmul.msk.f32.gmra.mxu2 %vm359_vm1, %v232_v30  ;;  %6330 = vmatmul.msk.f32.gmra.mxu3 %vm359_vm1, %v325_v17  ;;  %v326_v30 = vld [vmem:[%s12624_s0 + $0x918] sm:$0xff]  ;;  %v161_v17 = vld [vmem:[%s12624_s0 + $0x3f0] sm:$0xff] }
 0x223   :  { %6166 = vmatmul.msk.f32.gmra.mxu1 %vm359_vm1, %v161_v17  ;;  %v162_v17 = vld [vmem:[%s12624_s0 + $0x3f8] sm:$0xff] }
 0x225   :  { %v7779_v7 = vpop.f32.mrf.mxu2 }
 0x226   :  { %12861 = vst [vmem:[#allocation110_spill] sm:$0xff] %v7779_v7  ;;  %v12634_v7 = vmov 0.0   ;;  %v7801_v50 = vpop.f32.mrf.mxu0 }
 0x227   :  { %2693 = vrot.lane.b32.xlu0 %v12634_v7, %s6503_s13  ;;  %12862 = vst [vmem:[#allocation111_spill] sm:$0xff] %v7801_v50  ;;  %v109_v50 = vld [vmem:[%s12624_s0 + $0x250] sm:$0xff] }
 0x229   :  { %6108 = vmatmul.msk.f32.gmra.mxu0 %vm359_vm1, %v103_v16 }
 0x22a   :  { %6238 = vmatmul.msk.f32.gmra.mxu2 %vm359_vm1, %v233_v36  ;;  %6331 = vmatmul.msk.f32.gmra.mxu3 %vm359_vm1, %v326_v30  ;;  %v234_v36 = vld [vmem:[%s12624_s0 + $0x638] sm:$0xff]  ;;  %v327_v30 = vld [vmem:[%s12624_s0 + $0x920] sm:$0xff] }
 0x22b   :  { %6167 = vmatmul.msk.f32.gmra.mxu1 %vm359_vm1, %v162_v17  ;;  %v163_v17 = vld [vmem:[%s12624_s0 + $0x400] sm:$0xff] }
 0x22d   :  { %v7803_v16 = vpop.f32.mrf.mxu2 }
 0x22e   :  { %12863 = vst [vmem:[#allocation112_spill] sm:$0xff] %v7803_v16  ;;  %v7823_v16 = vpop.f32.mrf.mxu3  ;;  %v7830_v19 = vpop.f32.mrf.mxu0 }
 0x22f   :  { %2910 = vrot.lane.b32.xlu0 %v12634_v7, %s6504_s22  ;;  %12865 = vst [vmem:[#allocation114_spill] sm:$0xff] %v7830_v19 }
 0x231   :  { %6109 = vmatmul.msk.f32.gmra.mxu0 %vm359_vm1, %v104_v18  ;;  %v105_v18 = vld [vmem:[%s12624_s0 + $0x230] sm:$0xff] }
 0x232   :  { %6239 = vmatmul.msk.f32.gmra.mxu2 %vm359_vm1, %v234_v36  ;;  %6332 = vmatmul.msk.f32.gmra.mxu3 %vm359_vm1, %v327_v30  ;;  %v235_v36 = vld [vmem:[%s12624_s0 + $0x640] sm:$0xff]  ;;  %v328_v30 = vld [vmem:[%s12624_s0 + $0x928] sm:$0xff] }
 0x233   :  { %6168 = vmatmul.msk.f32.gmra.mxu1 %vm359_vm1, %v163_v17 }
 0x235   :  { %v7825_v9 = vpop.f32.mrf.mxu2 }
 0x236   :  { %12864 = vst [vmem:[#allocation113_spill] sm:$0xff] %v7825_v9  ;;  %v106_v9 = vld [vmem:[%s12624_s0 + $0x238] sm:$0xff]  ;;  %v7850_v12 = vpop.f32.mrf.mxu3  ;;  %v7858_v19 = vpop.f32.mrf.mxu0 }
 0x237   :  { %12867 = vst [vmem:[#allocation116_spill] sm:$0xff] %v7858_v19  ;;  %v108_v19 = vld [vmem:[%s12624_s0 + $0x248] sm:$0xff] }
 0x239   :  { %6110 = vmatmul.msk.f32.gmra.mxu0 %vm359_vm1, %v105_v18  ;;  %v236_v18 = vld [vmem:[%s12624_s0 + $0x648] sm:$0xff] }
 0x23a   :  { %6240 = vmatmul.msk.f32.gmra.mxu2 %vm359_vm1, %v235_v36  ;;  %6333 = vmatmul.msk.f32.gmra.mxu3 %vm359_vm1, %v328_v30  ;;  %v329_v36 = vld [vmem:[%s12624_s0 + $0x930] sm:$0xff]  ;;  %v164_v30 = vld [vmem:[%s12624_s0 + $0x408] sm:$0xff] }
 0x23b   :  { %6169 = vmatmul.msk.f32.gmra.mxu1 %vm359_vm1, %v164_v30 }
 0x23d   :  { %v7845_v7 = vpop.f32.mrf.mxu2 }
 0x23e   :  { %12866 = vst [vmem:[#allocation115_spill] sm:$0xff] %v7845_v7  ;;  %v107_v7 = vld [vmem:[%s12624_s0 + $0x240] sm:$0xff]  ;;  %v7883_v30 = vpop.f32.mrf.mxu0 }
 0x23f   :  { %12869 = vst [vmem:[#allocation118_spill] sm:$0xff] %v7883_v30  ;;  %v2328_v30 = vmax.f32 %v7259_v61, %v1662_v14 }
 0x241   :  { %6111 = vmatmul.msk.f32.gmra.mxu0 %vm359_vm1, %v106_v9  ;;  %v237_v9 = vld [vmem:[%s12624_s0 + $0x650] sm:$0xff] }
 0x242   :  { %6241 = vmatmul.msk.f32.gmra.mxu2 %vm359_vm1, %v236_v18  ;;  %6334 = vmatmul.msk.f32.gmra.mxu3 %vm359_vm1, %v329_v36  ;;  %v330_v18 = vld [vmem:[%s12624_s0 + $0x938] sm:$0xff]  ;;  %v7878_v36 = vpop.f32.mrf.mxu3 }
 0x245   :  { %v7867_v17 = vpop.f32.mrf.mxu2 }
 0x246   :  { %12868 = vst [vmem:[#allocation117_spill] sm:$0xff] %v7867_v17 }
 0x249   :  { %6112 = vmatmul.msk.f32.gmra.mxu0 %vm359_vm1, %v107_v7  ;;  %v331_v7 = vld [vmem:[%s12624_s0 + $0x940] sm:$0xff] }
 0x24a   :  { %6242 = vmatmul.msk.f32.gmra.mxu2 %vm359_vm1, %v237_v9  ;;  %6335 = vmatmul.msk.f32.gmra.mxu3 %vm359_vm1, %v330_v18  ;;  %v7899_v9 = vpop.f32.mrf.mxu3  ;;  %v7901_v18 = vpop.f32.mrf.mxu0 }
 0x24b   :  { %12871 = vst [vmem:[#allocation120_spill] sm:$0xff] %v7901_v18 }
 0x24d   :  { %v7885_v17 = vpop.f32.mrf.mxu2 }
 0x24e   :  { %12870 = vst [vmem:[#allocation119_spill] sm:$0xff] %v7885_v17 }
 0x251   :  { %6113 = vmatmul.msk.f32.gmra.mxu0 %vm359_vm1, %v108_v19  ;;  %v239_v19 = vld [vmem:[%s12624_s0 + $0x660] sm:$0xff] }
 0x252   :  { %6243 = vmatmul.msk.f32.gmra.mxu2 %vm359_vm1, %v238_v10  ;;  %6336 = vmatmul.msk.f32.gmra.mxu3 %vm359_vm1, %v331_v7  ;;  %v332_v10 = vld [vmem:[%s12624_s0 + $0x948] sm:$0xff]  ;;  %v7923_v61 = vpop.f32.mrf.mxu3 }
 0x255   :  { %v1902_v17 = vpop.f32.mrf.mxu2 }
 0x256   :  { %v2408_v62 = vmax.f32 %v1902_v17, %v7634_v22  ;;  %v1665_v22 = vpop.f32.mrf.mxu1  ;;  %v110_v17 = vld [vmem:[%s12624_s0 + $0x258] sm:$0xff] }
 0x258   :  { %v2488_v7 = vmax.f32 %v2328_v30, %v2408_v62  ;;  %v7932_v30 = vpop.f32.mrf.mxu0 }
 0x259   :  { %6114 = vmatmul.msk.f32.gmra.mxu0 %vm359_vm1, %v109_v50  ;;  %v2329_v50 = vmax.f32 %v7277_v26, %v1665_v22  ;;  %12873 = vst [vmem:[#allocation122_spill] sm:$0xff] %v7932_v30 }
 0x25a   :  { %v7915_v18 = vmax.f32 %v2488_v7, 0.0  ;;  %6244 = vmatmul.msk.f32.gmra.mxu2 %vm359_vm1, %v239_v19  ;;  %6337 = vmatmul.msk.f32.gmra.mxu3 %vm359_vm1, %v332_v10  ;;  %v240_v19 = vld [vmem:[%s12624_s0 + $0x668] sm:$0xff]  ;;  %v333_v10 = vld [vmem:[%s12624_s0 + $0x950] sm:$0xff]  ;;  %v7954_v22 = vpop.f32.mrf.mxu3 }
 0x25c   :  { %12872 = vst [vmem:[#allocation121_spill] sm:$0xff] %v7915_v18  ;;  %3888 = vrot.lane.b32.xlu0 %v7915_v18, %s6505_s18  ;;  %4099 = vrot.lane.b32.xlu2 %v7915_v18, %s6506_s19 }
 0x25d   :  { %2749 = vrot.lane.b32.xlu1 %v7915_v18, %s6503_s13  ;;  %v1905_v62 = vpop.f32.mrf.mxu2 }
 0x25e   :  { %v2409_v14 = vmax.f32 %v1905_v62, %v7662_v48  ;;  %v111_v48 = vld [vmem:[%s12624_s0 + $0x260] sm:$0xff]  ;;  %v241_v62 = vld [vmem:[%s12624_s0 + $0x670] sm:$0xff] }
 0x260   :  { %v2489_v7 = vmax.f32 %v2329_v50, %v2409_v14  ;;  %v334_v50 = vld [vmem:[%s12624_s0 + $0x958] sm:$0xff]  ;;  %v7962_v14 = vpop.f32.mrf.mxu0 }
 0x261   :  { %6115 = vmatmul.msk.f32.gmra.mxu0 %vm359_vm1, %v110_v17  ;;  %12875 = vst [vmem:[#allocation124_spill] sm:$0xff] %v7962_v14  ;;  %v112_v17 = vld [vmem:[%s12624_s0 + $0x268] sm:$0xff] }
 0x262   :  { %v7941_v26 = vmax.f32 %v2489_v7, 0.0  ;;  %6245 = vmatmul.msk.f32.gmra.mxu2 %vm359_vm1, %v240_v19  ;;  %6338 = vmatmul.msk.f32.gmra.mxu3 %vm359_vm1, %v333_v10  ;;  %v242_v10 = vld [vmem:[%s12624_s0 + $0x678] sm:$0xff]  ;;  %v335_v7 = vld [vmem:[%s12624_s0 + $0x960] sm:$0xff] }
 0x264   :  { %12874 = vst [vmem:[#allocation123_spill] sm:$0xff] %v7941_v26  ;;  %3667 = vrot.lane.b32.xlu0 %v7915_v18, %s6507_s1  ;;  %2751 = vrot.lane.b32.xlu2 %v7941_v26, %s6503_s13 }
 0x265   :  { %2966 = vrot.lane.b32.xlu1 %v7915_v18, %s6504_s22  ;;  %v1908_v19 = vpop.f32.mrf.mxu2 }
 0x268   :  { %v7988_v14 = vpop.f32.mrf.mxu0 }
 0x269   :  { %6116 = vmatmul.msk.f32.gmra.mxu0 %vm359_vm1, %v111_v48  ;;  %v1668_v48 = vpop.f32.mrf.mxu1  ;;  %12876 = vst [vmem:[#allocation125_spill] sm:$0xff] %v7988_v14 }
 0x26a   :  { %6246 = vmatmul.msk.f32.gmra.mxu2 %vm359_vm1, %v241_v62  ;;  %6339 = vmatmul.msk.f32.gmra.mxu3 %vm359_vm1, %v334_v50  ;;  %v7982_v62 = vpop.f32.mrf.mxu3  ;;  %v2410_v50 = vmax.f32 %v1908_v19, %v7690_v28  ;;  %v2330_v30 = vmax.f32 %v7295_v54, %v1668_v48  ;;  %v113_v28 = vld [vmem:[%s12624_s0 + $0x270] sm:$0xff]  ;;  %v243_v19 = vld [vmem:[%s12624_s0 + $0x680] sm:$0xff]  ;;  %v336_v54 = vld [vmem:[%s12624_s0 + $0x968] sm:$0xff] }
 0x26b   :  { %v114_v48 = vld [vmem:[%s12624_s0 + $0x278] sm:$0xff] }
 0x26c   :  { %4309 = vrot.lane.b32.xlu0 %v7941_v26, %s6508_s14  ;;  %2968 = vrot.lane.b32.xlu2 %v7941_v26, %s6504_s22 }
 0x26d   :  { %3191 = vrot.lane.b32.xlu1 %v7915_v18, %s6509_s15 }
 0x271   :  { %6117 = vmatmul.msk.f32.gmra.mxu0 %vm359_vm1, %v112_v17  ;;  %v2490_v17 = vmax.f32 %v2330_v30, %v2410_v50  ;;  %v244_v50 = vld [vmem:[%s12624_s0 + $0x688] sm:$0xff] }
 0x272   :  { %6247 = vmatmul.msk.f32.gmra.mxu2 %vm359_vm1, %v242_v10  ;;  %6340 = vmatmul.msk.f32.gmra.mxu3 %vm359_vm1, %v335_v7  ;;  %v8011_v30 = vpop.f32.mrf.mxu3  ;;  %v8017_v7 = vpop.f32.mrf.mxu0 }
 0x273   :  { %v8007_v10 = vmax.f32 %v2490_v17, 0.0  ;;  %12878 = vst [vmem:[#allocation127_spill] sm:$0xff] %v8017_v7  ;;  %v337_v17 = vld [vmem:[%s12624_s0 + $0x970] sm:$0xff] }
 0x274   :  { %3431 = vrot.lane.b32.xlu0 %v7941_v26, %s6510_s25  ;;  %3193 = vrot.lane.b32.xlu2 %v7941_v26, %s6509_s15 }
 0x275   :  { %4307 = vrot.lane.b32.xlu1 %v7915_v18, %s6508_s14  ;;  %12877 = vst [vmem:[#allocation126_spill] sm:$0xff] %v8007_v10 }
 0x279   :  { %6118 = vmatmul.msk.f32.gmra.mxu0 %vm359_vm1, %v113_v28 }
 0x27a   :  { %6248 = vmatmul.msk.f32.gmra.mxu2 %vm359_vm1, %v243_v19  ;;  %6341 = vmatmul.msk.f32.gmra.mxu3 %vm359_vm1, %v336_v54  ;;  %v8037_v28 = vpop.f32.mrf.mxu3  ;;  %v115_v19 = vld [vmem:[%s12624_s0 + $0x280] sm:$0xff]  ;;  %v8044_v54 = vpop.f32.mrf.mxu0 }
 0x27b   :  { %12879 = vst [vmem:[#allocation128_spill] sm:$0xff] %v8044_v54 }
 0x27c   :  { %3890 = vrot.lane.b32.xlu2 %v7941_v26, %s6505_s18  ;;  %2753 = vrot.lane.b32.xlu0 %v8007_v10, %s6503_s13 }
 0x27d   :  { %3429 = vrot.lane.b32.xlu1 %v7915_v18, %s6510_s25  ;;  %v1671_v18 = vpop.f32.mrf.mxu1 }
 0x27e   :  { %v2331_v14 = vmax.f32 %v7313_v45, %v1671_v18  ;;  %v340_v45 = vld [vmem:[%s12624_s0 + $0x988] sm:$0xff] }
 0x281   :  { %6119 = vmatmul.msk.f32.gmra.mxu0 %vm359_vm1, %v114_v48  ;;  %v245_v48 = vld [vmem:[%s12624_s0 + $0x690] sm:$0xff] }
 0x282   :  { %6249 = vmatmul.msk.f32.gmra.mxu2 %vm359_vm1, %v244_v50  ;;  %6342 = vmatmul.msk.f32.gmra.mxu3 %vm359_vm1, %v337_v17  ;;  %v338_v50 = vld [vmem:[%s12624_s0 + $0x978] sm:$0xff]  ;;  %v1911_v17 = vpop.f32.mrf.mxu2  ;;  %v8072_v54 = vpop.f32.mrf.mxu0 }
 0x283   :  { %12880 = vst [vmem:[#allocation129_spill] sm:$0xff] %v8072_v54  ;;  %v2411_v7 = vmax.f32 %v1911_v17, %v7713_v33  ;;  %v117_v33 = vld [vmem:[%s12624_s0 + $0x290] sm:$0xff]  ;;  %v247_v17 = vld [vmem:[%s12624_s0 + $0x6a0] sm:$0xff] }
 0x284   :  { %3669 = vrot.lane.b32.xlu2 %v7941_v26, %s6507_s1  ;;  %2970 = vrot.lane.b32.xlu0 %v8007_v10, %s6504_s22 }
 0x285   :  { %4101 = vrot.lane.b32.xlu1 %v7941_v26, %s6506_s19  ;;  %v116_v26 = vld [vmem:[%s12624_s0 + $0x288] sm:$0xff]  ;;  %v2491_v54 = vmax.f32 %v2331_v14, %v2411_v7  ;;  %v1674_v18 = vpop.f32.mrf.mxu1 }
 0x289   :  { %6120 = vmatmul.msk.f32.gmra.mxu0 %vm359_vm1, %v115_v19  ;;  %v8064_v19 = vpop.f32.mrf.mxu3 }
 0x28a   :  { %6250 = vmatmul.msk.f32.gmra.mxu2 %vm359_vm1, %v245_v48  ;;  %6343 = vmatmul.msk.f32.gmra.mxu3 %vm359_vm1, %v338_v50  ;;  %v246_v48 = vld [vmem:[%s12624_s0 + $0x698] sm:$0xff]  ;;  %v339_v50 = vld [vmem:[%s12624_s0 + $0x980] sm:$0xff]  ;;  %v8102_v7 = vpop.f32.mrf.mxu0 }
 0x28c   :  { %4311 = vrot.lane.b32.xlu2 %v8007_v10, %s6508_s14  ;;  %3195 = vrot.lane.b32.xlu0 %v8007_v10, %s6509_s15 }
 0x28d   :  { %3892 = vrot.lane.b32.xlu1 %v8007_v10, %s6505_s18 }
 0x291   :  { %6121 = vmatmul.msk.f32.gmra.mxu0 %vm359_vm1, %v116_v26  ;;  %v1914_v26 = vpop.f32.mrf.mxu2 }
 0x292   :  { %6251 = vmatmul.msk.f32.gmra.mxu2 %vm359_vm1, %v246_v48  ;;  %6344 = vmatmul.msk.f32.gmra.mxu3 %vm359_vm1, %v339_v50  ;;  %v8094_v48 = vpop.f32.mrf.mxu3  ;;  %v8097_v50 = vmax.f32 %v2491_v54, 0.0  ;;  %v2412_v14 = vmax.f32 %v1914_v26, %v7740_v11  ;;  %v118_v11 = vld [vmem:[%s12624_s0 + $0x298] sm:$0xff] }
 0x294   :  { %3433 = vrot.lane.b32.xlu2 %v8007_v10, %s6510_s25  ;;  %4103 = vrot.lane.b32.xlu0 %v8007_v10, %s6506_s19  ;;  %12881 = vst [vmem:[#allocation130_spill] sm:$0xff] %v8097_v50 }
 0x295   :  { %3671 = vrot.lane.b32.xlu1 %v8007_v10, %s6507_s1  ;;  %v2332_v10 = vmax.f32 %v7331_v39, %v1674_v18  ;;  %v341_v39 = vld [vmem:[%s12624_s0 + $0x990] sm:$0xff] }
 0x296   :  { %v249_v18 = vld [vmem:[%s12624_s0 + $0x6b0] sm:$0xff] }
 0x297   :  { %v2492_v54 = vmax.f32 %v2332_v10, %v2412_v14  ;;  %v342_v14 = vld [vmem:[%s12624_s0 + $0x998] sm:$0xff] }
 0x299   :  { %6122 = vmatmul.msk.f32.gmra.mxu0 %vm359_vm1, %v117_v33  ;;  %v248_v33 = vld [vmem:[%s12624_s0 + $0x6a8] sm:$0xff]  ;;  %v8121_v26 = vmax.f32 %v2492_v54, 0.0  ;;  %v1917_v54 = vpop.f32.mrf.mxu2 }
 0x29a   :  { %6252 = vmatmul.msk.f32.gmra.mxu2 %vm359_vm1, %v247_v17  ;;  %6345 = vmatmul.msk.f32.gmra.mxu3 %vm359_vm1, %v340_v45  ;;  %v8125_v10 = vpop.f32.mrf.mxu3  ;;  %v8131_v17 = vpop.f32.mrf.mxu0  ;;  %v119_v45 = vld [vmem:[%s12624_s0 + $0x2a0] sm:$0xff]  ;;  %v2413_v4 = vmax.f32 %v1917_v54, %v7768_v55  ;;  %v121_v55 = vld [vmem:[%s12624_s0 + $0x2b0] sm:$0xff] }
 0x29b   :  { %12882 = vst [vmem:[#allocation131_spill] sm:$0xff] %v8121_v26 }
 0x29c   :  { %3894 = vrot.lane.b32.xlu0 %v8097_v50, %s6505_s18  ;;  %4105 = vrot.lane.b32.xlu2 %v8097_v50, %s6506_s19 }
 0x29d   :  { %2755 = vrot.lane.b32.xlu1 %v8097_v50, %s6503_s13 }
 0x2a1   :  { %6123 = vmatmul.msk.f32.gmra.mxu0 %vm359_vm1, %v118_v11  ;;  %v1920_v54 = vpop.f32.mrf.mxu2 }
 0x2a2   :  { %6253 = vmatmul.msk.f32.gmra.mxu2 %vm359_vm1, %v248_v33  ;;  %6346 = vmatmul.msk.f32.gmra.mxu3 %vm359_vm1, %v341_v39  ;;  %v8151_v11 = vpop.f32.mrf.mxu3  ;;  %v120_v33 = vld [vmem:[%s12624_s0 + $0x2a8] sm:$0xff]  ;;  %v8158_v39 = vpop.f32.mrf.mxu0 }
 0x2a3   :  { %12883 = vst [vmem:[#allocation132_spill] sm:$0xff] %v8158_v39  ;;  %v254_v39 = vld [vmem:[%s12624_s0 + $0x6d8] sm:$0xff] }
 0x2a4   :  { %3673 = vrot.lane.b32.xlu0 %v8097_v50, %s6507_s1  ;;  %2757 = vrot.lane.b32.xlu2 %v8121_v26, %s6503_s13 }
 0x2a5   :  { %2972 = vrot.lane.b32.xlu1 %v8097_v50, %s6504_s22 }
 0x2a9   :  { %6124 = vmatmul.msk.f32.gmra.mxu0 %vm359_vm1, %v119_v45  ;;  %v250_v45 = vld [vmem:[%s12624_s0 + $0x6b8] sm:$0xff] }
 0x2aa   :  { %6254 = vmatmul.msk.f32.gmra.mxu2 %vm359_vm1, %v249_v18  ;;  %6347 = vmatmul.msk.f32.gmra.mxu3 %vm359_vm1, %v342_v14  ;;  %v343_v18 = vld [vmem:[%s12624_s0 + $0x9a0] sm:$0xff]  ;;  %v1677_v14 = vpop.f32.mrf.mxu1 }
 0x2ab   :  { %v2333_v3 = vmax.f32 %v7349_v27, %v1677_v14  ;;  %v251_v27 = vld [vmem:[%s12624_s0 + $0x6c0] sm:$0xff] }
 0x2ac   :  { %4315 = vrot.lane.b32.xlu0 %v8121_v26, %s6508_s14  ;;  %2974 = vrot.lane.b32.xlu2 %v8121_v26, %s6504_s22 }
 0x2ad   :  { %3197 = vrot.lane.b32.xlu1 %v8097_v50, %s6509_s15  ;;  %v2493_v21 = vmax.f32 %v2333_v3, %v2413_v4  ;;  %v8197_v3 = vpop.permute.xlu0 %2693 }
 0x2ae   :  { %12887 = vst [vmem:[#allocation136_spill] sm:$0xff] %v8197_v3 }
 0x2af   :  { %v8193_v4 = vmax.f32 %v2493_v21, 0.0  ;;  %v122_v21 = vld [vmem:[%s12624_s0 + $0x2b8] sm:$0xff] }
 0x2b1   :  { %6125 = vmatmul.msk.f32.gmra.mxu0 %vm359_vm1, %v120_v33  ;;  %v8182_v33 = vpop.f32.mrf.mxu3  ;;  %12886 = vst [vmem:[#allocation135_spill] sm:$0xff] %v8193_v4 }
 0x2b2   :  { %6255 = vmatmul.msk.f32.gmra.mxu2 %vm359_vm1, %v250_v45  ;;  %6348 = vmatmul.msk.f32.gmra.mxu3 %vm359_vm1, %v343_v18  ;;  %v344_v45 = vld [vmem:[%s12624_s0 + $0x9a8] sm:$0xff]  ;;  %v8190_v18 = vpop.f32.mrf.mxu0 }
 0x2b3   :  { %12885 = vst [vmem:[#allocation134_spill] sm:$0xff] %v8190_v18  ;;  %v1680_v18 = vpop.f32.mrf.mxu1 }
 0x2b4   :  { %3437 = vrot.lane.b32.xlu0 %v8121_v26, %s6510_s25  ;;  %3199 = vrot.lane.b32.xlu2 %v8121_v26, %s6509_s15 }
 0x2b5   :  { %4313 = vrot.lane.b32.xlu1 %v8097_v50, %s6508_s14 }
 0x2b6   :  { %v8177_v6 = vpop.permute.xlu2 %4099 }
 0x2b7   :  { %12884 = vst [vmem:[#allocation133_spill] sm:$0xff] %v8177_v6 }
 0x2b9   :  { %6126 = vmatmul.msk.f32.gmra.mxu0 %vm359_vm1, %v121_v55  ;;  %v252_v55 = vld [vmem:[%s12624_s0 + $0x6c8] sm:$0xff]  ;;  %v8216_v6 = vpop.f32.mrf.mxu3 }
 0x2ba   :  { %6256 = vmatmul.msk.f32.gmra.mxu2 %vm359_vm1, %v251_v27  ;;  %6349 = vmatmul.msk.f32.gmra.mxu3 %vm359_vm1, %v344_v45  ;;  %v345_v27 = vld [vmem:[%s12624_s0 + $0x9b0] sm:$0xff]  ;;  %v1923_v45 = vpop.f32.mrf.mxu2 }
 0x2bc   :  { %3896 = vrot.lane.b32.xlu2 %v8121_v26, %s6505_s18  ;;  %2759 = vrot.lane.b32.xlu0 %v8193_v4, %s6503_s13 }
 0x2bd   :  { %3435 = vrot.lane.b32.xlu1 %v8097_v50, %s6510_s25  ;;  %v8221_v50 = vpop.f32.mrf.mxu0 }
 0x2be   :  { %v8205_v14 = vpop.permute.xlu2 %2751  ;;  %12889 = vst [vmem:[#allocation138_spill] sm:$0xff] %v8221_v50 }
 0x2bf   :  { %12888 = vst [vmem:[#allocation137_spill] sm:$0xff] %v8205_v14  ;;  %v8227_v14 = vpop.permute.xlu0 %2910 }
 0x2c0   :  { %12890 = vst [vmem:[#allocation139_spill] sm:$0xff] %v8227_v14 }
 0x2c1   :  { %6127 = vmatmul.msk.f32.gmra.mxu0 %vm359_vm1, %v122_v21  ;;  %v123_v21 = vld [vmem:[%s12624_s0 + $0x2c0] sm:$0xff] }
 0x2c2   :  { %6257 = vmatmul.msk.f32.gmra.mxu2 %vm359_vm1, %v252_v55  ;;  %6350 = vmatmul.msk.f32.gmra.mxu3 %vm359_vm1, %v345_v27  ;;  %v253_v55 = vld [vmem:[%s12624_s0 + $0x6d0] sm:$0xff]  ;;  %v346_v27 = vld [vmem:[%s12624_s0 + $0x9b8] sm:$0xff] }
 0x2c4   :  { %3675 = vrot.lane.b32.xlu2 %v8121_v26, %s6507_s1  ;;  %2976 = vrot.lane.b32.xlu0 %v8193_v4, %s6504_s22 }
 0x2c5   :  { %4107 = vrot.lane.b32.xlu1 %v8121_v26, %s6506_s19  ;;  %v8245_v26 = vpop.f32.mrf.mxu2  ;;  %v8253_v14 = vpop.f32.mrf.mxu0 }
 0x2c6   :  { %v8231_v3 = vpop.permute.xlu2 %2968  ;;  %12892 = vst [vmem:[#allocation141_spill] sm:$0xff] %v8253_v14  ;;  %v347_v14 = vld [vmem:[%s12624_s0 + $0x9c0] sm:$0xff] }
 0x2c7   :  { %12891 = vst [vmem:[#allocation140_spill] sm:$0xff] %v8231_v3  ;;  %v8247_v3 = vpop.f32.mrf.mxu3 }
 0x2c9   :  { %6128 = vmatmul.msk.f32.gmra.mxu0 %vm359_vm1, %v123_v21 }
 0x2ca   :  { %6258 = vmatmul.msk.f32.gmra.mxu2 %vm359_vm1, %v253_v55  ;;  %6351 = vmatmul.msk.f32.gmra.mxu3 %vm359_vm1, %v346_v27  ;;  %v124_v27 = vld [vmem:[%s12624_s0 + $0x2c8] sm:$0xff] }
 0x2cc   :  { %4317 = vrot.lane.b32.xlu2 %v8193_v4, %s6508_s14  ;;  %3201 = vrot.lane.b32.xlu0 %v8193_v4, %s6509_s15 }
 0x2cd   :  { %3898 = vrot.lane.b32.xlu1 %v8193_v4, %s6505_s18 }
 0x2ce   :  { %v8257_v21 = vpop.permute.xlu0 %3888  ;;  %v8259_v55 = vpop.permute.xlu2 %3193 }
 0x2cf   :  { %12893 = vst [vmem:[#allocation142_spill] sm:$0xff] %v8257_v21  ;;  %v8264_v50 = vpop.permute.xlu1 %2749  ;;  %v2414_v21 = vmax.f32 %v1920_v54, %v7796_v59  ;;  %v8283_v49 = vpop.f32.mrf.mxu3 }
 0x2d0   :  { %12894 = vst [vmem:[#allocation143_spill] sm:$0xff] %v8259_v55  ;;  %v2334_v55 = vmax.f32 %v7367_v13, %v1680_v18  ;;  %v125_v13 = vld [vmem:[%s12624_s0 + $0x2d0] sm:$0xff]  ;;  %v8294_v18 = vpop.f32.mrf.mxu0 }
 0x2d1   :  { %12895 = vst [vmem:[#allocation144_spill] sm:$0xff] %v8264_v50  ;;  %6129 = vmatmul.msk.f32.gmra.mxu0 %vm359_vm1, %v124_v27  ;;  %v8281_v50 = vpop.f32.mrf.mxu2  ;;  %v255_v27 = vld [vmem:[%s12624_s0 + $0x6e0] sm:$0xff] }
 0x2d2   :  { %6259 = vmatmul.msk.f32.gmra.mxu2 %vm359_vm1, %v254_v39  ;;  %6352 = vmatmul.msk.f32.gmra.mxu3 %vm359_vm1, %v347_v14  ;;  %v2494_v59 = vmax.f32 %v2334_v55, %v2414_v21  ;;  %12898 = vst [vmem:[#allocation147_spill] sm:$0xff] %v8294_v18  ;;  %v348_v21 = vld [vmem:[%s12624_s0 + $0x9c8] sm:$0xff]  ;;  %v1683_v55 = vpop.f32.mrf.mxu1  ;;  %v351_v18 = vld [vmem:[%s12624_s0 + $0x9e0] sm:$0xff] }
 0x2d4   :  { %3439 = vrot.lane.b32.xlu2 %v8193_v4, %s6510_s25  ;;  %4109 = vrot.lane.b32.xlu0 %v8193_v4, %s6506_s19 }
 0x2d5   :  { %3677 = vrot.lane.b32.xlu1 %v8193_v4, %s6507_s1  ;;  %v8305_v4 = vmax.f32 %v2494_v59, 0.0 }
 0x2d6   :  { %v8287_v54 = vpop.permute.xlu0 %3667  ;;  %v8289_v39 = vpop.permute.xlu2 %3890 }
 0x2d7   :  { %12896 = vst [vmem:[#allocation145_spill] sm:$0xff] %v8287_v54  ;;  %v8296_v14 = vpop.permute.xlu1 %2966  ;;  %v2415_v54 = vmax.f32 %v1923_v45, %v7823_v16  ;;  %v126_v16 = vld [vmem:[%s12624_s0 + $0x2d8] sm:$0xff] }
 0x2d8   :  { %12897 = vst [vmem:[#allocation146_spill] sm:$0xff] %v8289_v39 }
 0x2d9   :  { %12899 = vst [vmem:[#allocation148_spill] sm:$0xff] %v8296_v14  ;;  %6130 = vmatmul.msk.f32.gmra.mxu0 %vm359_vm1, %v125_v13  ;;  %v2335_v14 = vmax.f32 %v7389_v40, %v1683_v55  ;;  %v256_v40 = vld [vmem:[%s12624_s0 + $0x6e8] sm:$0xff] }
 0x2da   :  { %12900 = vst [vmem:[#allocation149_spill] sm:$0xff] %v8305_v4  ;;  %6260 = vmatmul.msk.f32.gmra.mxu2 %vm359_vm1, %v255_v27  ;;  %6353 = vmatmul.msk.f32.gmra.mxu3 %vm359_vm1, %v348_v21  ;;  %v349_v27 = vld [vmem:[%s12624_s0 + $0x9d0] sm:$0xff]  ;;  %v8332_v21 = vpop.f32.mrf.mxu2 }
 0x2db   :  { %v2495_v13 = vmax.f32 %v2335_v14, %v2415_v54  ;;  %v8334_v54 = vpop.f32.mrf.mxu3  ;;  %v8336_v14 = vpop.f32.mrf.mxu0 }
 0x2dc   :  { %3900 = vrot.lane.b32.xlu0 %v8305_v4, %s6505_s18  ;;  %4111 = vrot.lane.b32.xlu2 %v8305_v4, %s6506_s19  ;;  %12904 = vst [vmem:[#allocation153_spill] sm:$0xff] %v8334_v54 }
 0x2dd   :  { %2761 = vrot.lane.b32.xlu1 %v8305_v4, %s6503_s13  ;;  %12905 = vst [vmem:[#allocation154_spill] sm:$0xff] %v8336_v14  ;;  %v8339_v55 = vmax.f32 %v2495_v13, 0.0  ;;  %v127_v13 = vld [vmem:[%s12624_s0 + $0x2e0] sm:$0xff]  ;;  %v2416_v14 = vmax.f32 %v8245_v26, %v7850_v12 }
 0x2de   :  { %v8317_v59 = vpop.permute.xlu0 %4309  ;;  %v8319_v39 = vpop.permute.xlu2 %3669 }
 0x2df   :  { %12901 = vst [vmem:[#allocation150_spill] sm:$0xff] %v8317_v59  ;;  %v8324_v45 = vpop.permute.xlu1 %3191 }
 0x2e0   :  { %12902 = vst [vmem:[#allocation151_spill] sm:$0xff] %v8319_v39 }
 0x2e1   :  { %12903 = vst [vmem:[#allocation152_spill] sm:$0xff] %v8324_v45  ;;  %6131 = vmatmul.msk.f32.gmra.mxu0 %vm359_vm1, %v126_v16 }
 0x2e2   :  { %12906 = vst [vmem:[#allocation155_spill] sm:$0xff] %v8339_v55  ;;  %6261 = vmatmul.msk.f32.gmra.mxu2 %vm359_vm1, %v256_v40  ;;  %6354 = vmatmul.msk.f32.gmra.mxu3 %vm359_vm1, %v349_v27  ;;  %v257_v40 = vld [vmem:[%s12624_s0 + $0x6f0] sm:$0xff]  ;;  %v350_v27 = vld [vmem:[%s12624_s0 + $0x9d8] sm:$0xff]  ;;  %v8365_v59 = vpop.f32.mrf.mxu2 }
 0x2e4   :  { %3679 = vrot.lane.b32.xlu0 %v8305_v4, %s6507_s1  ;;  %2763 = vrot.lane.b32.xlu2 %v8339_v55, %s6503_s13 }
 0x2e5   :  { %2978 = vrot.lane.b32.xlu1 %v8305_v4, %s6504_s22 }
 0x2e6   :  { %v8349_v45 = vpop.permute.xlu0 %3431  ;;  %v8351_v39 = vpop.permute.xlu2 %4311 }
 0x2e7   :  { %12907 = vst [vmem:[#allocation156_spill] sm:$0xff] %v8349_v45  ;;  %v8356_v16 = vpop.permute.xlu1 %4307  ;;  %v8369_v45 = vpop.f32.mrf.mxu3 }
 0x2e8   :  { %12908 = vst [vmem:[#allocation157_spill] sm:$0xff] %v8351_v39  ;;  %v8371_v39 = vpop.f32.mrf.mxu0 }
 0x2e9   :  { %12909 = vst [vmem:[#allocation158_spill] sm:$0xff] %v8356_v16  ;;  %6132 = vmatmul.msk.f32.gmra.mxu0 %vm359_vm1, %v127_v13 }
 0x2ea   :  { %6262 = vmatmul.msk.f32.gmra.mxu2 %vm359_vm1, %v257_v40  ;;  %6355 = vmatmul.msk.f32.gmra.mxu3 %vm359_vm1, %v350_v27  ;;  %12910 = vst [vmem:[#allocation159_spill] sm:$0xff] %v8371_v39  ;;  %v128_v40 = vld [vmem:[%s12624_s0 + $0x2e8] sm:$0xff]  ;;  %v1686_v39 = vpop.f32.mrf.mxu1 }
 0x2ec   :  { %4321 = vrot.lane.b32.xlu0 %v8339_v55, %s6508_s14  ;;  %2980 = vrot.lane.b32.xlu2 %v8339_v55, %s6504_s22 }
 0x2ed   :  { %3203 = vrot.lane.b32.xlu1 %v8305_v4, %s6509_s15 }
 0x2ee   :  { %v8379_v13 = vpop.permute.xlu2 %3433  ;;  %v8381_v16 = vpop.permute.xlu0 %2753 }
 0x2ef   :  { %12911 = vst [vmem:[#allocation160_spill] sm:$0xff] %v8379_v13  ;;  %v8386_v27 = vpop.permute.xlu1 %3429  ;;  %v8400_v13 = vpop.f32.mrf.mxu3 }
 0x2f0   :  { %12912 = vst [vmem:[#allocation161_spill] sm:$0xff] %v8381_v16  ;;  %v2336_v16 = vmax.f32 %v7411_v46, %v1686_v39  ;;  %v129_v46 = vld [vmem:[%s12624_s0 + $0x2f0] sm:$0xff]  ;;  %v352_v39 = vld [vmem:[%s12624_s0 + $0x9e8] sm:$0xff] }
 0x2f1   :  { %12913 = vst [vmem:[#allocation162_spill] sm:$0xff] %v8386_v27  ;;  %6133 = vmatmul.msk.f32.gmra.mxu0 %vm359_vm1, %v128_v40  ;;  %v8402_v27 = vpop.f32.mrf.mxu0 }
 0x2f2   :  { %6356 = vmatmul.msk.f32.gmra.mxu3 %vm359_vm1, %v351_v18  ;;  %12914 = vst [vmem:[#allocation163_spill] sm:$0xff] %v8402_v27  ;;  %v2496_v40 = vmax.f32 %v2336_v16, %v2416_v14  ;;  %v353_v27 = vld [vmem:[%s12624_s0 + $0x9f0] sm:$0xff] }
 0x2f4   :  { %3443 = vrot.lane.b32.xlu0 %v8339_v55, %s6510_s25  ;;  %3205 = vrot.lane.b32.xlu2 %v8339_v55, %s6509_s15  ;;  %v8419_v18 = vmax.f32 %v2496_v40, 0.0  ;;  %v130_v40 = vld [vmem:[%s12624_s0 + $0x2f8] sm:$0xff] }
 0x2f5   :  { %4319 = vrot.lane.b32.xlu1 %v8305_v4, %s6508_s14 }
 0x2f6   :  { %v8406_v54 = vpop.permute.xlu0 %2970  ;;  %v8408_v12 = vpop.permute.xlu2 %4105  ;;  %12918 = vst [vmem:[#allocation167_spill] sm:$0xff] %v8419_v18 }
 0x2f7   :  { %12915 = vst [vmem:[#allocation164_spill] sm:$0xff] %v8406_v54  ;;  %v8413_v26 = vpop.permute.xlu1 %4101  ;;  %v8442_v54 = vpop.f32.mrf.mxu3 }
 0x2f8   :  { %12916 = vst [vmem:[#allocation165_spill] sm:$0xff] %v8408_v12 }
 0x2f9   :  { %12917 = vst [vmem:[#allocation166_spill] sm:$0xff] %v8413_v26  ;;  %6134 = vmatmul.msk.f32.gmra.mxu0 %vm359_vm1, %v129_v46  ;;  %v8435_v46 = vpop.f32.mrf.mxu0  ;;  %v13148_v26 = vld [vmem:[#allocation159_spill] sm:$0xff] }
 0x2fa   :  { %6357 = vmatmul.msk.f32.gmra.mxu3 %vm359_vm1, %v352_v39  ;;  %12921 = vst [vmem:[#allocation170_spill] sm:$0xff] %v8435_v46 }
 0x2fc   :  { %3902 = vrot.lane.b32.xlu2 %v8339_v55, %s6505_s18  ;;  %2765 = vrot.lane.b32.xlu0 %v8419_v18, %s6503_s13 }
 0x2fd   :  { %3441 = vrot.lane.b32.xlu1 %v8305_v4, %s6510_s25 }
 0x2fe   :  { %v8428_v14 = vpop.permute.xlu0 %3195  ;;  %v8430_v16 = vpop.permute.xlu2 %2757 }
 0x2ff   :  { %12919 = vst [vmem:[#allocation168_spill] sm:$0xff] %v8428_v14  ;;  %v8437_v39 = vpop.permute.xlu1 %3892  ;;  %v8467_v12 = vpop.f32.mrf.mxu3 }
 0x300   :  { %12920 = vst [vmem:[#allocation169_spill] sm:$0xff] %v8430_v16  ;;  %v131_v16 = vld [vmem:[%s12624_s0 + $0x300] sm:$0xff] }
 0x301   :  { %12922 = vst [vmem:[#allocation171_spill] sm:$0xff] %v8437_v39  ;;  %6135 = vmatmul.msk.f32.gmra.mxu0 %vm359_vm1, %v130_v40  ;;  %v8464_v14 = vpop.f32.mrf.mxu0 }
 0x302   :  { %6358 = vmatmul.msk.f32.gmra.mxu3 %vm359_vm1, %v353_v27  ;;  %v354_v27 = vld [vmem:[%s12624_s0 + $0x9f8] sm:$0xff]  ;;  %12926 = vst [vmem:[#allocation175_spill] sm:$0xff] %v8464_v14  ;;  %v1689_v14 = vpop.f32.mrf.mxu1 }
 0x304   :  { %3681 = vrot.lane.b32.xlu2 %v8339_v55, %s6507_s1  ;;  %2982 = vrot.lane.b32.xlu0 %v8419_v18, %s6504_s22 }
 0x305   :  { %4113 = vrot.lane.b32.xlu1 %v8339_v55, %s6506_s19 }
 0x306   :  { %v8452_v46 = vpop.permute.xlu0 %4103  ;;  %v8454_v4 = vpop.permute.xlu2 %2974 }
 0x307   :  { %12923 = vst [vmem:[#allocation172_spill] sm:$0xff] %v8452_v46  ;;  %v8459_v40 = vpop.permute.xlu1 %3671  ;;  %v2337_v46 = vmax.f32 %v7433_v42, %v1689_v14 }
 0x308   :  { %12924 = vst [vmem:[#allocation173_spill] sm:$0xff] %v8454_v4 }
 0x309   :  { %12925 = vst [vmem:[#allocation174_spill] sm:$0xff] %v8459_v40  ;;  %6136 = vmatmul.msk.f32.gmra.mxu0 %vm359_vm1, %v131_v16  ;;  %v132_v16 = vld [vmem:[%s12624_s0 + $0x308] sm:$0xff]  ;;  %v8488_v39 = vpop.f32.mrf.mxu0 }
 0x30a   :  { %6359 = vmatmul.msk.f32.gmra.mxu3 %vm359_vm1, %v354_v27  ;;  %v2417_v27 = vmax.f32 %v8281_v50, %v7878_v36  ;;  %12930 = vst [vmem:[#allocation179_spill] sm:$0xff] %v8488_v39  ;;  %v133_v36 = vld [vmem:[%s12624_s0 + $0x310] sm:$0xff]  ;;  %v1692_v42 = vpop.f32.mrf.mxu1  ;;  %v2418_v39 = vmax.f32 %v8332_v21, %v7899_v9 }
 0x30c   :  { %4323 = vrot.lane.b32.xlu2 %v8419_v18, %s6508_s14  ;;  %3207 = vrot.lane.b32.xlu0 %v8419_v18, %s6509_s15 }
 0x30d   :  { %3904 = vrot.lane.b32.xlu1 %v8419_v18, %s6505_s18 }
 0x30e   :  { %v8476_v55 = vpop.permute.xlu0 %3894  ;;  %v8478_v4 = vpop.permute.xlu2 %3199 }
 0x30f   :  { %12927 = vst [vmem:[#allocation176_spill] sm:$0xff] %v8476_v55  ;;  %v8483_v40 = vpop.permute.xlu1 %2755  ;;  %v13146_v55 = vld [vmem:[#allocation154_spill] sm:$0xff] }
 0x310   :  { %12928 = vst [vmem:[#allocation177_spill] sm:$0xff] %v8478_v4  ;;  %v2497_v4 = vmax.f32 %v2337_v46, %v2417_v27  ;;  %v2338_v46 = vmax.f32 %v7455_v8, %v1692_v42  ;;  %v134_v8 = vld [vmem:[%s12624_s0 + $0x318] sm:$0xff] }
 0x311   :  { %12929 = vst [vmem:[#allocation178_spill] sm:$0xff] %v8483_v40  ;;  %6137 = vmatmul.msk.f32.gmra.mxu0 %vm359_vm1, %v132_v16  ;;  %v8516_v27 = vpop.f32.mrf.mxu0 }
 0x312   :  { %v8507_v14 = vmax.f32 %v2497_v4, 0.0  ;;  %12935 = vst [vmem:[#allocation184_spill] sm:$0xff] %v8516_v27  ;;  %v1695_v27 = vpop.f32.mrf.mxu1 }
 0x314   :  { %3445 = vrot.lane.b32.xlu2 %v8419_v18, %s6510_s25  ;;  %4115 = vrot.lane.b32.xlu0 %v8419_v18, %s6506_s19  ;;  %12934 = vst [vmem:[#allocation183_spill] sm:$0xff] %v8507_v14 }
 0x315   :  { %3683 = vrot.lane.b32.xlu1 %v8419_v18, %s6507_s1  ;;  %v2498_v18 = vmax.f32 %v2338_v46, %v2418_v39  ;;  %v135_v46 = vld [vmem:[%s12624_s0 + $0x320] sm:$0xff] }
 0x316   :  { %v8497_v40 = vpop.permute.xlu0 %3673  ;;  %v8499_v16 = vpop.permute.xlu2 %3896 }
 0x317   :  { %12931 = vst [vmem:[#allocation180_spill] sm:$0xff] %v8497_v40  ;;  %v8504_v50 = vpop.permute.xlu1 %2972  ;;  %v8530_v21 = vmax.f32 %v2498_v18, 0.0 }
 0x318   :  { %12932 = vst [vmem:[#allocation181_spill] sm:$0xff] %v8499_v16 }
 0x319   :  { %12933 = vst [vmem:[#allocation182_spill] sm:$0xff] %v8504_v50  ;;  %6138 = vmatmul.msk.f32.gmra.mxu0 %vm359_vm1, %v133_v36  ;;  %v2419_v50 = vmax.f32 %v8365_v59, %v7923_v61  ;;  %v136_v61 = vld [vmem:[%s12624_s0 + $0x328] sm:$0xff] }
 0x31a   :  { %12939 = vst [vmem:[#allocation188_spill] sm:$0xff] %v8530_v21 }
 0x31c   :  { %3906 = vrot.lane.b32.xlu0 %v8507_v14, %s6505_s18  ;;  %4117 = vrot.lane.b32.xlu2 %v8507_v14, %s6506_s19 }
 0x31d   :  { %2767 = vrot.lane.b32.xlu1 %v8507_v14, %s6503_s13 }
 0x31e   :  { %v8520_v36 = vpop.permute.xlu0 %4315  ;;  %v8522_v4 = vpop.permute.xlu2 %3675 }
 0x31f   :  { %12936 = vst [vmem:[#allocation185_spill] sm:$0xff] %v8520_v36  ;;  %v8527_v9 = vpop.permute.xlu1 %3197 }
 0x320   :  { %12937 = vst [vmem:[#allocation186_spill] sm:$0xff] %v8522_v4 }
 0x321   :  { %12938 = vst [vmem:[#allocation187_spill] sm:$0xff] %v8527_v9  ;;  %6139 = vmatmul.msk.f32.gmra.mxu0 %vm359_vm1, %v134_v8  ;;  %v8545_v8 = vpop.f32.mrf.mxu0  ;;  %v2339_v9 = vmax.f32 %v7477_v29, %v1695_v27 }
 0x322   :  { %12942 = vst [vmem:[#allocation191_spill] sm:$0xff] %v8545_v8 }
 0x323   :  { %v2499_v8 = vmax.f32 %v2339_v9, %v2419_v50 }
 0x324   :  { %3685 = vrot.lane.b32.xlu0 %v8507_v14, %s6507_s1  ;;  %2769 = vrot.lane.b32.xlu2 %v8530_v21, %s6503_s13 }
 0x325   :  { %2984 = vrot.lane.b32.xlu1 %v8507_v14, %s6504_s22  ;;  %v8571_v27 = vmax.f32 %v2499_v8, 0.0 }
 0x326   :  { %v8538_v39 = vpop.permute.xlu0 %3437  ;;  %v8540_v42 = vpop.permute.xlu2 %4317 }
 0x327   :  { %12940 = vst [vmem:[#allocation189_spill] sm:$0xff] %v8538_v39  ;;  %v8547_v18 = vpop.permute.xlu1 %4313 }
 0x328   :  { %12941 = vst [vmem:[#allocation190_spill] sm:$0xff] %v8540_v42  ;;  %v2351_v42 = vmax.f32 %v7748_v23, %v6787_v56 }
 0x329   :  { %12943 = vst [vmem:[#allocation192_spill] sm:$0xff] %v8547_v18  ;;  %6140 = vmatmul.msk.f32.gmra.mxu0 %vm359_vm1, %v135_v46  ;;  %v8568_v29 = vpop.f32.mrf.mxu0  ;;  %v137_v46 = vld [vmem:[%s12624_s0 + $0x330] sm:$0xff]  ;;  %v13147_v18 = vld [vmem:[#allocation54_spill] sm:$0xff] }
 0x32a   :  { %12947 = vst [vmem:[#allocation196_spill] sm:$0xff] %v8568_v29 }
 0x32b   :  { %12948 = vst [vmem:[#allocation197_spill] sm:$0xff] %v8571_v27 }
 0x32c   :  { %4327 = vrot.lane.b32.xlu0 %v8530_v21, %s6508_s14  ;;  %2986 = vrot.lane.b32.xlu2 %v8530_v21, %s6504_s22 }
 0x32d   :  { %3209 = vrot.lane.b32.xlu1 %v8507_v14, %s6509_s15 }
 0x32e   :  { %v8559_v39 = vpop.permute.xlu2 %3439  ;;  %v8561_v4 = vpop.permute.xlu0 %2759 }
 0x32f   :  { %12944 = vst [vmem:[#allocation193_spill] sm:$0xff] %v8559_v39  ;;  %v8566_v59 = vpop.permute.xlu1 %3435  ;;  %v1938_v39 = vpop.f32.mrf.mxu2 }
 0x330   :  { %12945 = vst [vmem:[#allocation194_spill] sm:$0xff] %v8561_v4  ;;  %v2420_v40 = vmax.f32 %v1938_v39, %v7954_v22 }
 0x331   :  { %12946 = vst [vmem:[#allocation195_spill] sm:$0xff] %v8566_v59  ;;  %6141 = vmatmul.msk.f32.gmra.mxu0 %vm359_vm1, %v136_v61  ;;  %v8589_v8 = vpop.f32.mrf.mxu0 }
 0x332   :  { %12952 = vst [vmem:[#allocation201_spill] sm:$0xff] %v8589_v8  ;;  %v1698_v8 = vpop.f32.mrf.mxu1 }
 0x334   :  { %3211 = vrot.lane.b32.xlu2 %v8530_v21, %s6509_s15  ;;  %2771 = vrot.lane.b32.xlu0 %v8571_v27, %s6503_s13 }
 0x335   :  { %4325 = vrot.lane.b32.xlu1 %v8507_v14, %s6508_s14 }
 0x336   :  { %v8579_v50 = vpop.permute.xlu0 %2976  ;;  %v8581_v9 = vpop.permute.xlu2 %4111 }
 0x337   :  { %12949 = vst [vmem:[#allocation198_spill] sm:$0xff] %v8579_v50  ;;  %v8586_v61 = vpop.permute.xlu1 %4107  ;;  %v138_v50 = vld [vmem:[%s12624_s0 + $0x338] sm:$0xff] }
 0x338   :  { %12950 = vst [vmem:[#allocation199_spill] sm:$0xff] %v8581_v9  ;;  %v2340_v9 = vmax.f32 %v7499_v35, %v1698_v8  ;;  %v140_v35 = vld [vmem:[%s12624_s0 + $0x348] sm:$0xff] }
 0x339   :  { %12951 = vst [vmem:[#allocation200_spill] sm:$0xff] %v8586_v61  ;;  %6142 = vmatmul.msk.f32.gmra.mxu0 %vm359_vm1, %v137_v46  ;;  %v13145_v61 = vld [vmem:[#allocation51_spill] sm:$0xff] }
 0x33a   :  { %v2371_v36 = vmax.f32 %v13146_v55, %v13145_v61 }
 0x33c   :  { %3908 = vrot.lane.b32.xlu2 %v8530_v21, %s6505_s18  ;;  %2988 = vrot.lane.b32.xlu0 %v8571_v27, %s6504_s22 }
 0x33d   :  { %3447 = vrot.lane.b32.xlu1 %v8507_v14, %s6510_s25  ;;  %v8611_v14 = vpop.f32.mrf.mxu0 }
 0x33e   :  { %v8597_v29 = vpop.permute.xlu0 %3201  ;;  %v8599_v4 = vpop.permute.xlu2 %2763 }
 0x33f   :  { %12953 = vst [vmem:[#allocation202_spill] sm:$0xff] %v8597_v29  ;;  %v8604_v46 = vpop.permute.xlu1 %3898 }
 0x340   :  { %12954 = vst [vmem:[#allocation203_spill] sm:$0xff] %v8599_v4 }
 0x341   :  { %12955 = vst [vmem:[#allocation204_spill] sm:$0xff] %v8604_v46  ;;  %6143 = vmatmul.msk.f32.gmra.mxu0 %vm359_vm1, %v138_v50  ;;  %v139_v50 = vld [vmem:[%s12624_s0 + $0x340] sm:$0xff]  ;;  %v1701_v46 = vpop.f32.mrf.mxu1 }
 0x344   :  { %3687 = vrot.lane.b32.xlu2 %v8530_v21, %s6507_s1  ;;  %3213 = vrot.lane.b32.xlu0 %v8571_v27, %s6509_s15 }
 0x345   :  { %4119 = vrot.lane.b32.xlu1 %v8530_v21, %s6506_s19  ;;  %v8640_v22 = vpop.f32.mrf.mxu0 }
 0x346   :  { %v8615_v4 = vpop.permute.xlu0 %4109  ;;  %v8617_v29 = vpop.permute.xlu2 %2980 }
 0x347   :  { %12956 = vst [vmem:[#allocation205_spill] sm:$0xff] %v8615_v4  ;;  %v8622_v59 = vpop.permute.xlu1 %3677  ;;  %v2500_v4 = vmax.f32 %v2340_v9, %v2420_v40  ;;  %v2341_v40 = vmax.f32 %v7521_v2, %v1701_v46 }
 0x348   :  { %12957 = vst [vmem:[#allocation206_spill] sm:$0xff] %v8617_v29  ;;  %v1941_v29 = vpop.f32.mrf.mxu2 }
 0x349   :  { %12958 = vst [vmem:[#allocation207_spill] sm:$0xff] %v8622_v59  ;;  %6144 = vmatmul.msk.f32.gmra.mxu0 %vm359_vm1, %v139_v50  ;;  %v8645_v8 = vmax.f32 %v2500_v4, 0.0  ;;  %v2421_v50 = vmax.f32 %v1941_v29, %v7982_v62  ;;  %v141_v62 = vld [vmem:[%s12624_s0 + $0x350] sm:$0xff]  ;;  %v1704_v29 = vpop.f32.mrf.mxu1 }
 0x34b   :  { %12962 = vst [vmem:[#allocation211_spill] sm:$0xff] %v8645_v8  ;;  %v2501_v9 = vmax.f32 %v2341_v40, %v2421_v50  ;;  %v2342_v40 = vmax.f32 %v7543_v43, %v1704_v29 }
 0x34c   :  { %4329 = vrot.lane.b32.xlu2 %v8571_v27, %s6508_s14  ;;  %4121 = vrot.lane.b32.xlu0 %v8571_v27, %s6506_s19 }
 0x34d   :  { %3910 = vrot.lane.b32.xlu1 %v8571_v27, %s6505_s18  ;;  %v8664_v46 = vpop.f32.mrf.mxu0 }
 0x34e   :  { %v8633_v16 = vpop.permute.xlu0 %3900  ;;  %v8635_v59 = vpop.permute.xlu2 %3205 }
 0x34f   :  { %12959 = vst [vmem:[#allocation208_spill] sm:$0xff] %v8633_v16  ;;  %v8642_v39 = vpop.permute.xlu1 %2761 }
 0x350   :  { %12960 = vst [vmem:[#allocation209_spill] sm:$0xff] %v8635_v59  ;;  %v1944_v4 = vpop.f32.mrf.mxu2 }
 0x351   :  { %12961 = vst [vmem:[#allocation210_spill] sm:$0xff] %v8642_v39  ;;  %6145 = vmatmul.msk.f32.gmra.mxu0 %vm359_vm1, %v140_v35  ;;  %v8667_v35 = vmax.f32 %v2501_v9, 0.0  ;;  %v2422_v50 = vmax.f32 %v1944_v4, %v8011_v30 }
 0x353   :  { %12966 = vst [vmem:[#allocation215_spill] sm:$0xff] %v8667_v35 }
 0x354   :  { %3912 = vrot.lane.b32.xlu0 %v8645_v8, %s6505_s18  ;;  %4123 = vrot.lane.b32.xlu2 %v8645_v8, %s6506_s19 }
 0x355   :  { %2773 = vrot.lane.b32.xlu1 %v8645_v8, %s6503_s13 }
 0x356   :  { %v8655_v59 = vpop.permute.xlu0 %3679  ;;  %v8657_v39 = vpop.permute.xlu2 %3902 }
 0x357   :  { %12963 = vst [vmem:[#allocation212_spill] sm:$0xff] %v8655_v59  ;;  %v8662_v2 = vpop.permute.xlu1 %2978 }
 0x358   :  { %12964 = vst [vmem:[#allocation213_spill] sm:$0xff] %v8657_v39 }
 0x359   :  { %12965 = vst [vmem:[#allocation214_spill] sm:$0xff] %v8662_v2  ;;  %6146 = vmatmul.msk.f32.gmra.mxu0 %vm359_vm1, %v141_v62  ;;  %v2502_v2 = vmax.f32 %v2342_v40, %v2422_v50  ;;  %v1947_v40 = vpop.f32.mrf.mxu2 }
 0x35b   :  { %v8683_v62 = vmax.f32 %v2502_v2, 0.0 }
 0x35c   :  { %4333 = vrot.lane.b32.xlu0 %v8667_v35, %s6508_s14  ;;  %2775 = vrot.lane.b32.xlu2 %v8667_v35, %s6503_s13 }
 0x35d   :  { %2990 = vrot.lane.b32.xlu1 %v8645_v8, %s6504_s22  ;;  %12970 = vst [vmem:[#allocation219_spill] sm:$0xff] %v8683_v62 }
 0x35e   :  { %v8677_v59 = vpop.permute.xlu0 %4321  ;;  %v8679_v39 = vpop.permute.xlu2 %3681 }
 0x35f   :  { %12967 = vst [vmem:[#allocation216_spill] sm:$0xff] %v8677_v59  ;;  %v8681_v9 = vpop.permute.xlu1 %3203 }
 0x360   :  { %12968 = vst [vmem:[#allocation217_spill] sm:$0xff] %v8679_v39 }
 0x361   :  { %12969 = vst [vmem:[#allocation218_spill] sm:$0xff] %v8681_v9 }
 0x364   :  { %2992 = vrot.lane.b32.xlu2 %v8667_v35, %s6504_s22  ;;  %2777 = vrot.lane.b32.xlu0 %v8683_v62, %s6503_s13 }
 0x365   :  { %3215 = vrot.lane.b32.xlu1 %v8645_v8, %s6509_s15 }
 0x366   :  { %v8691_v43 = vpop.permute.xlu0 %3443  ;;  %v8693_v30 = vpop.permute.xlu2 %4323 }
 0x367   :  { %12971 = vst [vmem:[#allocation220_spill] sm:$0xff] %v8691_v43  ;;  %v8695_v4 = vpop.permute.xlu1 %4319  ;;  %v1707_v43 = vpop.f32.mrf.mxu1 }
 0x368   :  { %12972 = vst [vmem:[#allocation221_spill] sm:$0xff] %v8693_v30  ;;  %v1950_v30 = vpop.f32.mrf.mxu2 }
 0x369   :  { %12973 = vst [vmem:[#allocation222_spill] sm:$0xff] %v8695_v4 }
 0x36c   :  { %3217 = vrot.lane.b32.xlu2 %v8667_v35, %s6509_s15  ;;  %2994 = vrot.lane.b32.xlu0 %v8683_v62, %s6504_s22 }
 0x36d   :  { %4331 = vrot.lane.b32.xlu1 %v8645_v8, %s6508_s14 }
 0x36e   :  { %v8703_v2 = vpop.permute.xlu2 %3445  ;;  %v8705_v29 = vpop.permute.xlu0 %2765 }
 0x36f   :  { %12974 = vst [vmem:[#allocation223_spill] sm:$0xff] %v8703_v2  ;;  %v8707_v50 = vpop.permute.xlu1 %3441 }
 0x370   :  { %12975 = vst [vmem:[#allocation224_spill] sm:$0xff] %v8705_v29  ;;  %v2423_v29 = vmax.f32 %v1947_v40, %v8037_v28 }
 0x371   :  { %12976 = vst [vmem:[#allocation225_spill] sm:$0xff] %v8707_v50  ;;  %v2343_v50 = vmax.f32 %v7565_v20, %v1707_v43  ;;  %v2424_v20 = vmax.f32 %v1950_v30, %v8064_v19 }
 0x373   :  { %v2503_v16 = vmax.f32 %v2343_v50, %v2423_v29 }
 0x374   :  { %3914 = vrot.lane.b32.xlu2 %v8667_v35, %s6505_s18  ;;  %3219 = vrot.lane.b32.xlu0 %v8683_v62, %s6509_s15 }
 0x375   :  { %4125 = vrot.lane.b32.xlu1 %v8667_v35, %s6506_s19  ;;  %v8735_v28 = vmax.f32 %v2503_v16, 0.0  ;;  %v1953_v16 = vpop.f32.mrf.mxu2 }
 0x376   :  { %v8715_v9 = vpop.permute.xlu0 %2982  ;;  %v8717_v39 = vpop.permute.xlu2 %4117 }
 0x377   :  { %12977 = vst [vmem:[#allocation226_spill] sm:$0xff] %v8715_v9  ;;  %v8719_v2 = vpop.permute.xlu1 %4113 }
 0x378   :  { %12978 = vst [vmem:[#allocation227_spill] sm:$0xff] %v8717_v39 }
 0x379   :  { %12979 = vst [vmem:[#allocation228_spill] sm:$0xff] %v8719_v2  ;;  %v1710_v2 = vpop.f32.mrf.mxu1 }
 0x37a   :  { %12983 = vst [vmem:[#allocation232_spill] sm:$0xff] %v8735_v28  ;;  %v2344_v43 = vmax.f32 %v7587_v41, %v1710_v2  ;;  %v2425_v41 = vmax.f32 %v1953_v16, %v8094_v48 }
 0x37c   :  { %4335 = vrot.lane.b32.xlu2 %v8683_v62, %s6508_s14  ;;  %4127 = vrot.lane.b32.xlu0 %v8683_v62, %s6506_s19  ;;  %v2504_v29 = vmax.f32 %v2344_v43, %v2424_v20 }
 0x37d   :  { %3916 = vrot.lane.b32.xlu1 %v8683_v62, %s6505_s18 }
 0x37e   :  { %v8729_v9 = vpop.permute.xlu0 %3207  ;;  %v8731_v39 = vpop.permute.xlu2 %2769  ;;  %v8751_v30 = vmax.f32 %v2504_v29, 0.0 }
 0x37f   :  { %12980 = vst [vmem:[#allocation229_spill] sm:$0xff] %v8729_v9  ;;  %v8733_v59 = vpop.permute.xlu1 %3904 }
 0x380   :  { %12981 = vst [vmem:[#allocation230_spill] sm:$0xff] %v8731_v39 }
 0x381   :  { %12982 = vst [vmem:[#allocation231_spill] sm:$0xff] %v8733_v59  ;;  %v1713_v19 = vpop.f32.mrf.mxu1 }
 0x382   :  { %12987 = vst [vmem:[#allocation236_spill] sm:$0xff] %v8751_v30  ;;  %v2345_v2 = vmax.f32 %v7609_v38, %v1713_v19  ;;  %v8781_v19 = vpop.f32.mrf.mxu3 }
 0x384   :  { %3918 = vrot.lane.b32.xlu0 %v8735_v28, %s6505_s18  ;;  %4129 = vrot.lane.b32.xlu2 %v8735_v28, %s6506_s19  ;;  %v2505_v20 = vmax.f32 %v2345_v2, %v2425_v41  ;;  %v1956_v41 = vpop.f32.mrf.mxu2 }
 0x385   :  { %2779 = vrot.lane.b32.xlu1 %v8735_v28, %s6503_s13 }
 0x386   :  { %v8745_v50 = vpop.permute.xlu0 %4115  ;;  %v8747_v40 = vpop.permute.xlu2 %2986  ;;  %v8767_v9 = vmax.f32 %v2505_v20, 0.0 }
 0x387   :  { %12984 = vst [vmem:[#allocation233_spill] sm:$0xff] %v8745_v50  ;;  %v8749_v39 = vpop.permute.xlu1 %3683 }
 0x388   :  { %12985 = vst [vmem:[#allocation234_spill] sm:$0xff] %v8747_v40 }
 0x389   :  { %12986 = vst [vmem:[#allocation235_spill] sm:$0xff] %v8749_v39 }
 0x38a   :  { %12991 = vst [vmem:[#allocation240_spill] sm:$0xff] %v8767_v9 }
 0x38c   :  { %4339 = vrot.lane.b32.xlu0 %v8751_v30, %s6508_s14  ;;  %2781 = vrot.lane.b32.xlu2 %v8751_v30, %s6503_s13 }
 0x38d   :  { %2996 = vrot.lane.b32.xlu1 %v8735_v28, %s6504_s22 }
 0x38e   :  { %v8761_v43 = vpop.permute.xlu0 %3906  ;;  %v8763_v40 = vpop.permute.xlu2 %3211 }
 0x38f   :  { %12988 = vst [vmem:[#allocation237_spill] sm:$0xff] %v8761_v43  ;;  %v8765_v29 = vpop.permute.xlu1 %2767 }
 0x390   :  { %12989 = vst [vmem:[#allocation238_spill] sm:$0xff] %v8763_v40  ;;  %v1716_v40 = vpop.f32.mrf.mxu1 }
 0x391   :  { %12990 = vst [vmem:[#allocation239_spill] sm:$0xff] %v8765_v29  ;;  %v2346_v43 = vmax.f32 %v7629_v53, %v1716_v40 }
 0x394   :  { %2998 = vrot.lane.b32.xlu2 %v8751_v30, %s6504_s22  ;;  %2783 = vrot.lane.b32.xlu0 %v8767_v9, %s6503_s13 }
 0x395   :  { %3221 = vrot.lane.b32.xlu1 %v8735_v28, %s6509_s15 }
 0x396   :  { %v8775_v38 = vpop.permute.xlu0 %3685  ;;  %v8777_v48 = vpop.permute.xlu2 %3908 }
 0x397   :  { %12992 = vst [vmem:[#allocation241_spill] sm:$0xff] %v8775_v38  ;;  %v8779_v16 = vpop.permute.xlu1 %2984 }
 0x398   :  { %12993 = vst [vmem:[#allocation242_spill] sm:$0xff] %v8777_v48  ;;  %v1959_v48 = vpop.f32.mrf.mxu2 }
 0x399   :  { %12994 = vst [vmem:[#allocation243_spill] sm:$0xff] %v8779_v16  ;;  %v8799_v16 = vpop.f32.mrf.mxu3 }
 0x39c   :  { %3223 = vrot.lane.b32.xlu2 %v8751_v30, %s6509_s15  ;;  %3000 = vrot.lane.b32.xlu0 %v8767_v9, %s6504_s22 }
 0x39d   :  { %4337 = vrot.lane.b32.xlu1 %v8735_v28, %s6508_s14 }
 0x39e   :  { %v8789_v2 = vpop.permute.xlu0 %4327  ;;  %v8791_v20 = vpop.permute.xlu2 %3687 }
 0x39f   :  { %12995 = vst [vmem:[#allocation244_spill] sm:$0xff] %v8789_v2  ;;  %v8793_v29 = vpop.permute.xlu1 %3209  ;;  %v1719_v2 = vpop.f32.mrf.mxu1 }
 0x3a0   :  { %12996 = vst [vmem:[#allocation245_spill] sm:$0xff] %v8791_v20  ;;  %v1962_v53 = vpop.f32.mrf.mxu2  ;;  %v2347_v50 = vmax.f32 %v7651_v34, %v1719_v2 }
 0x3a1   :  { %12997 = vst [vmem:[#allocation246_spill] sm:$0xff] %v8793_v29  ;;  %v2426_v29 = vmax.f32 %v1956_v41, %v8125_v10  ;;  %v2427_v41 = vmax.f32 %v1959_v48, %v8151_v11  ;;  %v2428_v48 = vmax.f32 %v1962_v53, %v8182_v33 }
 0x3a4   :  { %3920 = vrot.lane.b32.xlu2 %v8751_v30, %s6505_s18  ;;  %3225 = vrot.lane.b32.xlu0 %v8767_v9, %s6509_s15 }
 0x3a5   :  { %4131 = vrot.lane.b32.xlu1 %v8751_v30, %s6506_s19 }
 0x3a6   :  { %v8803_v38 = vpop.permute.xlu2 %4329  ;;  %v8805_v39 = vpop.permute.xlu0 %2771 }
 0x3a7   :  { %12998 = vst [vmem:[#allocation247_spill] sm:$0xff] %v8803_v38  ;;  %v8807_v20 = vpop.permute.xlu1 %4325  ;;  %v2506_v38 = vmax.f32 %v2346_v43, %v2426_v29  ;;  %v2507_v43 = vmax.f32 %v2347_v50, %v2427_v41 }
 0x3a8   :  { %12999 = vst [vmem:[#allocation248_spill] sm:$0xff] %v8805_v39  ;;  %v1965_v2 = vpop.f32.mrf.mxu2 }
 0x3a9   :  { %13000 = vst [vmem:[#allocation249_spill] sm:$0xff] %v8807_v20  ;;  %v8821_v20 = vpop.f32.mrf.mxu3  ;;  %v8825_v40 = vmax.f32 %v2506_v38, 0.0  ;;  %v8843_v34 = vmax.f32 %v2507_v43, 0.0  ;;  %v2429_v4 = vmax.f32 %v1965_v2, %v8216_v6 }
 0x3ab   :  { %13004 = vst [vmem:[#allocation253_spill] sm:$0xff] %v8825_v40 }
 0x3ac   :  { %4341 = vrot.lane.b32.xlu2 %v8767_v9, %s6508_s14  ;;  %4133 = vrot.lane.b32.xlu0 %v8767_v9, %s6506_s19  ;;  %13008 = vst [vmem:[#allocation257_spill] sm:$0xff] %v8843_v34 }
 0x3ad   :  { %3922 = vrot.lane.b32.xlu1 %v8767_v9, %s6505_s18  ;;  %v13197_v9 = vld [vmem:[#allocation127_spill] sm:$0xff] }
 0x3ae   :  { %v8817_v59 = vpop.permute.xlu0 %2988  ;;  %v8819_v39 = vpop.permute.xlu2 %4123 }
 0x3af   :  { %13001 = vst [vmem:[#allocation250_spill] sm:$0xff] %v8817_v59  ;;  %v8823_v10 = vpop.permute.xlu1 %3447 }
 0x3b0   :  { %13002 = vst [vmem:[#allocation251_spill] sm:$0xff] %v8819_v39 }
 0x3b1   :  { %13003 = vst [vmem:[#allocation252_spill] sm:$0xff] %v8823_v10  ;;  %v1722_v10 = vpop.f32.mrf.mxu1  ;;  %v8841_v11 = vpop.f32.mrf.mxu3 }
 0x3b2   :  { %v2348_v39 = vmax.f32 %v7673_v47, %v1722_v10  ;;  %v1968_v47 = vpop.f32.mrf.mxu2 }
 0x3b4   :  { %3924 = vrot.lane.b32.xlu0 %v8825_v40, %s6505_s18  ;;  %4135 = vrot.lane.b32.xlu2 %v8825_v40, %s6506_s19  ;;  %v2508_v50 = vmax.f32 %v2348_v39, %v2428_v48 }
 0x3b5   :  { %2785 = vrot.lane.b32.xlu1 %v8825_v40, %s6503_s13 }
 0x3b6   :  { %v8835_v29 = vpop.permute.xlu0 %3213  ;;  %v8837_v59 = vpop.permute.xlu2 %2775  ;;  %v8859_v33 = vmax.f32 %v2508_v50, 0.0  ;;  %v2301_v50 = vmax.f32 %v6773_v52, %v8611_v14 }
 0x3b7   :  { %13005 = vst [vmem:[#allocation254_spill] sm:$0xff] %v8835_v29  ;;  %v8839_v38 = vpop.permute.xlu1 %4119  ;;  %v2381_v29 = vmax.f32 %v7327_v15, %v7095_v32  ;;  %v2430_v15 = vmax.f32 %v1968_v47, %v8247_v3 }
 0x3b8   :  { %13006 = vst [vmem:[#allocation255_spill] sm:$0xff] %v8837_v59 }
 0x3b9   :  { %13007 = vst [vmem:[#allocation256_spill] sm:$0xff] %v8839_v38  ;;  %v8861_v53 = vpop.f32.mrf.mxu3  ;;  %v1725_v48 = vpop.f32.mrf.mxu1 }
 0x3ba   :  { %13012 = vst [vmem:[#allocation261_spill] sm:$0xff] %v8859_v33  ;;  %v1971_v52 = vpop.f32.mrf.mxu2 }
 0x3bb   :  { %v2431_v38 = vmax.f32 %v1971_v52, %v8283_v49 }
 0x3bc   :  { %4345 = vrot.lane.b32.xlu0 %v8843_v34, %s6508_s14  ;;  %2787 = vrot.lane.b32.xlu2 %v8843_v34, %s6503_s13 }
 0x3bd   :  { %3002 = vrot.lane.b32.xlu1 %v8825_v40, %s6504_s22  ;;  %v2511_v49 = vmax.f32 %v2351_v42, %v2431_v38  ;;  %v2302_v38 = vmax.f32 %v6791_v58, %v8640_v22 }
 0x3be   :  { %v8853_v41 = vpop.permute.xlu0 %4121  ;;  %v8855_v59 = vpop.permute.xlu2 %2992 }
 0x3bf   :  { %13009 = vst [vmem:[#allocation258_spill] sm:$0xff] %v8853_v41  ;;  %v8857_v43 = vpop.permute.xlu1 %3910 }
 0x3c0   :  { %13010 = vst [vmem:[#allocation259_spill] sm:$0xff] %v8855_v59 }
 0x3c1   :  { %13011 = vst [vmem:[#allocation260_spill] sm:$0xff] %v8857_v43  ;;  %v8883_v43 = vpop.f32.mrf.mxu3  ;;  %v1728_v32 = vpop.f32.mrf.mxu1 }
 0x3c4   :  { %3004 = vrot.lane.b32.xlu2 %v8843_v34, %s6504_s22  ;;  %2789 = vrot.lane.b32.xlu0 %v8859_v33, %s6503_s13 }
 0x3c5   :  { %3227 = vrot.lane.b32.xlu1 %v8825_v40, %s6509_s15 }
 0x3c6   :  { %v8869_v39 = vpop.permute.xlu0 %3912  ;;  %v8871_v10 = vpop.permute.xlu2 %3217 }
 0x3c7   :  { %13013 = vst [vmem:[#allocation262_spill] sm:$0xff] %v8869_v39  ;;  %v8873_v59 = vpop.permute.xlu1 %2773 }
 0x3c8   :  { %13014 = vst [vmem:[#allocation263_spill] sm:$0xff] %v8871_v10  ;;  %v2461_v10 = vmax.f32 %v2301_v50, %v2381_v29  ;;  %v2350_v29 = vmax.f32 %v7720_v31, %v1728_v32  ;;  %v2349_v50 = vmax.f32 %v7695_v24, %v1725_v48  ;;  %v2382_v32 = vmax.f32 %v7345_v1, %v7113_v60 }
 0x3c9   :  { %13015 = vst [vmem:[#allocation264_spill] sm:$0xff] %v8873_v59  ;;  %v8914_v31 = vpop.f32.mrf.mxu3  ;;  %v2303_v60 = vmax.f32 %v6809_v0, %v8664_v46  ;;  %v2383_v1 = vmax.f32 %v7363_v51, %v7131_v44  ;;  %v2365_v46 = vmax.f32 %v8131_v17, %v7039_v37 }
 0x3ca   :  { %v8894_v41 = vmax.f32 %v2461_v10, 0.0  ;;  %v2510_v3 = vmax.f32 %v2350_v29, %v2430_v15  ;;  %v2509_v56 = vmax.f32 %v2349_v50, %v2429_v4  ;;  %v8918_v10 = vmax.f32 %v2511_v49, 0.0 }
 0x3cb   :  { %v2462_v15 = vmax.f32 %v2302_v38, %v2382_v32  ;;  %v2463_v49 = vmax.f32 %v2303_v60, %v2383_v1 }
 0x3cc   :  { %3229 = vrot.lane.b32.xlu2 %v8843_v34, %s6509_s15  ;;  %3006 = vrot.lane.b32.xlu0 %v8859_v33, %s6504_s22  ;;  %v8916_v2 = vmax.f32 %v2510_v3, 0.0  ;;  %13023 = vst [vmem:[#allocation272_spill] sm:$0xff] %v8918_v10  ;;  %v8920_v52 = vmax.f32 %v2509_v56, 0.0 }
 0x3cd   :  { %4343 = vrot.lane.b32.xlu1 %v8825_v40, %s6508_s14  ;;  %v8950_v58 = vmax.f32 %v2462_v15, 0.0  ;;  %v8969_v44 = vmax.f32 %v2463_v49, 0.0  ;;  %v2364_v15 = vmax.f32 %v8102_v7, %v7021_v25  ;;  %v13041_v25 = vld [vmem:[#allocation39_spill] sm:$0xff]  ;;  %v13042_v7 = vld [vmem:[#allocation132_spill] sm:$0xff] }
 0x3ce   :  { %v8887_v39 = vpop.permute.xlu0 %4333  ;;  %v8889_v59 = vpop.permute.xlu2 %3914  ;;  %13022 = vst [vmem:[#allocation271_spill] sm:$0xff] %v8916_v2 }
 0x3cf   :  { %13016 = vst [vmem:[#allocation265_spill] sm:$0xff] %v8887_v39  ;;  %v8891_v14 = vpop.permute.xlu1 %2990  ;;  %v13144_v39 = vld [vmem:[#allocation15_spill] sm:$0xff] }
 0x3d0   :  { %13017 = vst [vmem:[#allocation266_spill] sm:$0xff] %v8889_v59  ;;  %v13133_v59 = vld [vmem:[#allocation90_spill] sm:$0xff] }
 0x3d1   :  { %13018 = vst [vmem:[#allocation267_spill] sm:$0xff] %v8891_v14  ;;  %v2250_v48 = vpop.f32.mrf.mxu3 }
 0x3d2   :  { %13024 = vst [vmem:[#allocation273_spill] sm:$0xff] %v8920_v52  ;;  %v2444_v51 = vmax.f32 %v6789_v57, %v2250_v48 }
 0x3d3   :  { %13031 = vst [vmem:[#allocation280_spill] sm:$0xff] %v8950_v58 }
 0x3d4   :  { %4347 = vrot.lane.b32.xlu2 %v8859_v33, %s6508_s14  ;;  %2695 = vrot.lane.b32.xlu0 %v8894_v41, %s6503_s13  ;;  %13035 = vst [vmem:[#allocation284_spill] sm:$0xff] %v8969_v44  ;;  %v2524_v57 = vmax.f32 %v2364_v15, %v2444_v51 }
 0x3d5   :  { %4137 = vrot.lane.b32.xlu1 %v8843_v34, %s6506_s19 }
 0x3d6   :  { %v8908_v47 = vpop.permute.xlu2 %4335  ;;  %v8910_v6 = vpop.permute.xlu0 %2777  ;;  %v8991_v49 = vmax.f32 %v2524_v57, 0.0 }
 0x3d7   :  { %13019 = vst [vmem:[#allocation268_spill] sm:$0xff] %v8908_v47  ;;  %v8912_v23 = vpop.permute.xlu1 %3215 }
 0x3d8   :  { %13020 = vst [vmem:[#allocation269_spill] sm:$0xff] %v8910_v6  ;;  %v13052_v6 = vld [vmem:[#allocation52_spill] sm:$0xff] }
 0x3d9   :  { %13021 = vst [vmem:[#allocation270_spill] sm:$0xff] %v8912_v23  ;;  %v2253_v22 = vpop.f32.mrf.mxu3 }
 0x3da   :  { %v2445_v0 = vmax.f32 %v6807_v63, %v2253_v22  ;;  %13040 = vst [vmem:[#allocation289_spill] sm:$0xff] %v8991_v49 }
 0x3dc   :  { %2793 = vrot.lane.b32.xlu2 %v8916_v2, %s6503_s13  ;;  %2795 = vrot.lane.b32.xlu0 %v8918_v10, %s6503_s13  ;;  %v2525_v63 = vmax.f32 %v2365_v46, %v2445_v0 }
 0x3dd   :  { %2791 = vrot.lane.b32.xlu1 %v8920_v52, %s6503_s13 }
 0x3de   :  { %v8928_v24 = vpop.permute.xlu0 %2994  ;;  %v8930_v42 = vpop.permute.xlu2 %4129  ;;  %v8988_v17 = vmax.f32 %v2525_v63, 0.0 }
 0x3df   :  { %13025 = vst [vmem:[#allocation274_spill] sm:$0xff] %v8928_v24  ;;  %v8932_v4 = vpop.permute.xlu1 %4331  ;;  %v13053_v24 = vld [vmem:[#allocation80_spill] sm:$0xff] }
 0x3e0   :  { %13026 = vst [vmem:[#allocation275_spill] sm:$0xff] %v8930_v42  ;;  %v2384_v14 = vmax.f32 %v13053_v24, %v13052_v6  ;;  %v13098_v42 = vld [vmem:[#allocation47_spill] sm:$0xff] }
 0x3e1   :  { %13027 = vst [vmem:[#allocation276_spill] sm:$0xff] %v8932_v4  ;;  %v2256_v48 = vpop.f32.mrf.mxu3 }
 0x3e2   :  { %13039 = vst [vmem:[#allocation288_spill] sm:$0xff] %v8988_v17  ;;  %v2446_v22 = vmax.f32 %v6825_v5, %v2256_v48  ;;  %v1590_v48 = vpop.f32.mrf.mxu0 }
 0x3e4   :  { %3010 = vrot.lane.b32.xlu2 %v8916_v2, %s6504_s22  ;;  %3012 = vrot.lane.b32.xlu0 %v8918_v10, %s6504_s22  ;;  %v5121_v10 = vld [vmem:[%s12625_s2 + $0x20] sm:$0xff] }
 0x3e5   :  { %3008 = vrot.lane.b32.xlu1 %v8920_v52, %s6504_s22 }
 0x3e6   :  { %v8944_v29 = vpop.permute.xlu0 %3219  ;;  %v8946_v50 = vpop.permute.xlu2 %2781 }
 0x3e7   :  { %13028 = vst [vmem:[#allocation277_spill] sm:$0xff] %v8944_v29  ;;  %v8948_v3 = vpop.permute.xlu1 %4125  ;;  %v13055_v29 = vld [vmem:[#allocation111_spill] sm:$0xff] }
 0x3e8   :  { %13029 = vst [vmem:[#allocation278_spill] sm:$0xff] %v8946_v50  ;;  %v1974_v50 = vpop.f32.mrf.mxu2 }
 0x3e9   :  { %13030 = vst [vmem:[#allocation279_spill] sm:$0xff] %v8948_v3  ;;  %v13143_v3 = vld [vmem:[#allocation21_spill] sm:$0xff] }
 0x3ec   :  { %3377 = vrot.lane.b32.xlu0 %v8950_v58, %s6510_s25  ;;  %2914 = vrot.lane.b32.xlu2 %v8950_v58, %s6504_s22 }
 0x3ed   :  { %2912 = vrot.lane.b32.xlu1 %v8894_v41, %s6504_s22 }
 0x3ee   :  { %v8962_v56 = vpop.permute.xlu0 %4127  ;;  %v8964_v38 = vpop.permute.xlu2 %2998 }
 0x3ef   :  { %13032 = vst [vmem:[#allocation281_spill] sm:$0xff] %v8962_v56  ;;  %v8966_v32 = vpop.permute.xlu1 %3916  ;;  %v13132_v56 = vld [vmem:[#allocation67_spill] sm:$0xff] }
 0x3f0   :  { %13033 = vst [vmem:[#allocation282_spill] sm:$0xff] %v8964_v38  ;;  %v2366_v38 = vmax.f32 %v13042_v7, %v13041_v25  ;;  %v1977_v63 = vpop.f32.mrf.mxu2  ;;  %v13050_v7 = vld [vmem:[#allocation4_spill] sm:$0xff]  ;;  %v2389_v47 = vmax.f32 %v13133_v59, %v13132_v56 }
 0x3f1   :  { %13034 = vst [vmem:[#allocation283_spill] sm:$0xff] %v8966_v32  ;;  %v2433_v25 = vmax.f32 %v1977_v63, %v8369_v45 }
 0x3f2   :  { %v2526_v0 = vmax.f32 %v2366_v38, %v2446_v22 }
 0x3f4   :  { %3139 = vrot.lane.b32.xlu2 %v8950_v58, %s6509_s15  ;;  %2916 = vrot.lane.b32.xlu0 %v8969_v44, %s6504_s22  ;;  %v9007_v15 = vmax.f32 %v2526_v0, 0.0  ;;  %v2304_v0 = vmax.f32 %v13050_v7, %v1590_v48 }
 0x3f5   :  { %3137 = vrot.lane.b32.xlu1 %v8894_v41, %s6509_s15 }
 0x3f6   :  { %v8982_v60 = vpop.permute.xlu0 %3918  ;;  %v8984_v1 = vpop.permute.xlu2 %3223  ;;  %13046 = vst [vmem:[#allocation291_spill] sm:$0xff] %v9007_v15 }
 0x3f7   :  { %13036 = vst [vmem:[#allocation285_spill] sm:$0xff] %v8982_v60  ;;  %v8986_v37 = vpop.permute.xlu1 %2779  ;;  %v13097_v60 = vld [vmem:[#allocation138_spill] sm:$0xff] }
 0x3f8   :  { %13037 = vst [vmem:[#allocation286_spill] sm:$0xff] %v8984_v1  ;;  %v13054_v1 = vld [vmem:[#allocation3_spill] sm:$0xff] }
 0x3f9   :  { %13038 = vst [vmem:[#allocation287_spill] sm:$0xff] %v8986_v37  ;;  %v13051_v37 = vld [vmem:[#allocation153_spill] sm:$0xff]  ;;  %v2353_v23 = vmax.f32 %v13055_v29, %v13054_v1  ;;  %v1980_v29 = vpop.f32.mrf.mxu2 }
 0x3fa   :  { %v2434_v7 = vmax.f32 %v1980_v29, %v8400_v13 }
 0x3fb   :  { %v2513_v45 = vmax.f32 %v2353_v23, %v2433_v25 }
 0x3fc   :  { %2823 = vrot.lane.b32.xlu2 %v8988_v17, %s6503_s13  ;;  %3141 = vrot.lane.b32.xlu0 %v8969_v44, %s6509_s15 }
 0x3fd   :  { %2821 = vrot.lane.b32.xlu1 %v8991_v49, %s6503_s13  ;;  %v9042_v63 = vmax.f32 %v2513_v45, 0.0 }
 0x3fe   :  { %v9001_v51 = vpop.permute.xlu0 %4339  ;;  %v9003_v46 = vpop.permute.xlu2 %3920 }
 0x3ff   :  { %13043 = vst [vmem:[#allocation39_spill] sm:$0xff] %v9001_v51  ;;  %v9005_v5 = vpop.permute.xlu1 %2996 }
 0x400   :  { %13044 = vst [vmem:[#allocation132_spill] sm:$0xff] %v9003_v46 }
 0x401   :  { %13045 = vst [vmem:[#allocation290_spill] sm:$0xff] %v9005_v5  ;;  %v2432_v5 = vmax.f32 %v1974_v50, %v13051_v37  ;;  %v2464_v50 = vmax.f32 %v2304_v0, %v2384_v14 }
 0x402   :  { %13061 = vst [vmem:[#allocation80_spill] sm:$0xff] %v9042_v63 }
 0x403   :  { %v9044_v48 = vmax.f32 %v2464_v50, 0.0 }
 0x404   :  { %3040 = vrot.lane.b32.xlu2 %v8988_v17, %s6504_s22  ;;  %2825 = vrot.lane.b32.xlu0 %v9007_v15, %s6503_s13  ;;  %v13099_v17 = vld [vmem:[#allocation141_spill] sm:$0xff] }
 0x405   :  { %3038 = vrot.lane.b32.xlu1 %v8991_v49, %s6504_s22  ;;  %13062 = vst [vmem:[#allocation3_spill] sm:$0xff] %v9044_v48  ;;  %v2369_v32 = vmax.f32 %v13099_v17, %v13098_v42 }
 0x406   :  { %v9015_v57 = vpop.permute.xlu2 %4341  ;;  %v9017_v38 = vpop.permute.xlu0 %2783 }
 0x407   :  { %13047 = vst [vmem:[#allocation292_spill] sm:$0xff] %v9015_v57  ;;  %v9019_v22 = vpop.permute.xlu1 %3221  ;;  %v1983_v57 = vpop.f32.mrf.mxu2 }
 0x408   :  { %13048 = vst [vmem:[#allocation293_spill] sm:$0xff] %v9017_v38  ;;  %v13056_v38 = vld [vmem:[#allocation2_spill] sm:$0xff] }
 0x409   :  { %13049 = vst [vmem:[#allocation294_spill] sm:$0xff] %v9019_v22  ;;  %v13057_v22 = vld [vmem:[#allocation109_spill] sm:$0xff] }
 0x40a   :  { %v2352_v46 = vmax.f32 %v13057_v22, %v13056_v38  ;;  %v13064_v22 = vld [vmem:[#allocation5_spill] sm:$0xff] }
 0x40c   :  { %3379 = vrot.lane.b32.xlu2 %v8969_v44, %s6510_s25  ;;  %3042 = vrot.lane.b32.xlu0 %v9007_v15, %s6504_s22  ;;  %v2512_v24 = vmax.f32 %v2352_v46, %v2432_v5  ;;  %v13065_v15 = vld [vmem:[#allocation114_spill] sm:$0xff] }
 0x40d   :  { %2697 = vrot.lane.b32.xlu1 %v8950_v58, %s6503_s13  ;;  %v2354_v23 = vmax.f32 %v13065_v15, %v13064_v22  ;;  %v1593_v15 = vpop.f32.mrf.mxu0  ;;  %v13075_v22 = vld [vmem:[#allocation82_spill] sm:$0xff] }
 0x40e   :  { %v9036_v37 = vpop.permute.xlu0 %3000  ;;  %v9038_v6 = vpop.permute.xlu2 %4135  ;;  %v9047_v38 = vmax.f32 %v2512_v24, 0.0  ;;  %v13073_v24 = vld [vmem:[#allocation7_spill] sm:$0xff] }
 0x40f   :  { %13058 = vst [vmem:[#allocation4_spill] sm:$0xff] %v9036_v37  ;;  %v9040_v1 = vpop.permute.xlu1 %4337  ;;  %v2514_v14 = vmax.f32 %v2354_v23, %v2434_v7  ;;  %v2305_v29 = vmax.f32 %v13073_v24, %v1593_v15  ;;  %v13074_v7 = vld [vmem:[#allocation55_spill] sm:$0xff]  ;;  %v13080_v24 = vld [vmem:[#allocation10_spill] sm:$0xff] }
 0x410   :  { %13059 = vst [vmem:[#allocation153_spill] sm:$0xff] %v9038_v6  ;;  %v2385_v23 = vmax.f32 %v13075_v22, %v13074_v7  ;;  %v2259_v22 = vpop.f32.mrf.mxu3  ;;  %v13081_v6 = vld [vmem:[#allocation58_spill] sm:$0xff] }
 0x411   :  { %13060 = vst [vmem:[#allocation52_spill] sm:$0xff] %v9040_v1  ;;  %v9063_v25 = vmax.f32 %v2514_v14, 0.0 }
 0x412   :  { %13063 = vst [vmem:[#allocation111_spill] sm:$0xff] %v9047_v38  ;;  %v2465_v14 = vmax.f32 %v2305_v29, %v2385_v23 }
 0x413   :  { %13069 = vst [vmem:[#allocation114_spill] sm:$0xff] %v9063_v25 }
 0x414   :  { %2799 = vrot.lane.b32.xlu2 %v9042_v63, %s6503_s13  ;;  %3619 = vrot.lane.b32.xlu0 %v9044_v48, %s6507_s1  ;;  %v9092_v15 = vmax.f32 %v2465_v14, 0.0 }
 0x415   :  { %2797 = vrot.lane.b32.xlu1 %v9047_v38, %s6503_s13  ;;  %v1596_v37 = vpop.f32.mrf.mxu0 }
 0x416   :  { %v9057_v46 = vpop.permute.xlu0 %3225  ;;  %v9059_v5 = vpop.permute.xlu2 %2787  ;;  %13079 = vst [vmem:[#allocation298_spill] sm:$0xff] %v9092_v15  ;;  %v2306_v7 = vmax.f32 %v13080_v24, %v1596_v37 }
 0x417   :  { %13066 = vst [vmem:[#allocation2_spill] sm:$0xff] %v9057_v46  ;;  %v9061_v13 = vpop.permute.xlu1 %4131 }
 0x418   :  { %13067 = vst [vmem:[#allocation109_spill] sm:$0xff] %v9059_v5 }
 0x419   :  { %13068 = vst [vmem:[#allocation5_spill] sm:$0xff] %v9061_v13  ;;  %v13096_v13 = vld [vmem:[#allocation45_spill] sm:$0xff] }
 0x41a   :  { %v2368_v51 = vmax.f32 %v13097_v60, %v13096_v13 }
 0x41c   :  { %3016 = vrot.lane.b32.xlu2 %v9042_v63, %s6504_s22  ;;  %2801 = vrot.lane.b32.xlu0 %v9063_v25, %s6503_s13 }
 0x41d   :  { %3014 = vrot.lane.b32.xlu1 %v9047_v38, %s6504_s22 }
 0x41e   :  { %v9071_v0 = vpop.permute.xlu0 %4133  ;;  %v9073_v45 = vpop.permute.xlu2 %3004 }
 0x41f   :  { %13070 = vst [vmem:[#allocation295_spill] sm:$0xff] %v9071_v0  ;;  %v9075_v50 = vpop.permute.xlu1 %3922 }
 0x420   :  { %13071 = vst [vmem:[#allocation296_spill] sm:$0xff] %v9073_v45 }
 0x421   :  { %13072 = vst [vmem:[#allocation297_spill] sm:$0xff] %v9075_v50  ;;  %v13082_v50 = vld [vmem:[#allocation84_spill] sm:$0xff] }
 0x422   :  { %v2386_v0 = vmax.f32 %v13082_v50, %v13081_v6  ;;  %v2262_v6 = vpop.f32.mrf.mxu3 }
 0x424   :  { %3018 = vrot.lane.b32.xlu0 %v9063_v25, %s6504_s22  ;;  %2701 = vrot.lane.b32.xlu2 %v9044_v48, %s6503_s13  ;;  %v2466_v29 = vmax.f32 %v2306_v7, %v2386_v0 }
 0x425   :  { %2699 = vrot.lane.b32.xlu1 %v8969_v44, %s6503_s13 }
 0x426   :  { %v9086_v5 = vpop.permute.xlu0 %3924  ;;  %v9088_v45 = vpop.permute.xlu2 %3229  ;;  %v9109_v37 = vmax.f32 %v2466_v29, 0.0 }
 0x427   :  { %13076 = vst [vmem:[#allocation7_spill] sm:$0xff] %v9086_v5  ;;  %v9090_v46 = vpop.permute.xlu1 %2785  ;;  %v13095_v5 = vld [vmem:[#allocation6_spill] sm:$0xff] }
 0x428   :  { %13077 = vst [vmem:[#allocation55_spill] sm:$0xff] %v9088_v45 }
 0x429   :  { %13078 = vst [vmem:[#allocation82_spill] sm:$0xff] %v9090_v46 }
 0x42a   :  { %13086 = vst [vmem:[#allocation299_spill] sm:$0xff] %v9109_v37 }
 0x42c   :  { %3383 = vrot.lane.b32.xlu0 %v9092_v15, %s6510_s25  ;;  %2703 = vrot.lane.b32.xlu2 %v9092_v15, %s6503_s13 }
 0x42d   :  { %3617 = vrot.lane.b32.xlu1 %v8969_v44, %s6507_s1 }
 0x42e   :  { %v9103_v23 = vpop.permute.xlu0 %4345  ;;  %v9105_v14 = vpop.permute.xlu2 %4347 }
 0x42f   :  { %13083 = vst [vmem:[#allocation10_spill] sm:$0xff] %v9103_v23  ;;  %v9107_v46 = vpop.permute.xlu1 %3002  ;;  %v2447_v23 = vmax.f32 %v13095_v5, %v2259_v22 }
 0x430   :  { %13084 = vst [vmem:[#allocation58_spill] sm:$0xff] %v9105_v14  ;;  %v13094_v14 = vld [vmem:[#allocation12_spill] sm:$0xff] }
 0x431   :  { %13085 = vst [vmem:[#allocation84_spill] sm:$0xff] %v9107_v46  ;;  %v2265_v46 = vpop.f32.mrf.mxu3 }
 0x434   :  { %2920 = vrot.lane.b32.xlu2 %v9092_v15, %s6504_s22  ;;  %2705 = vrot.lane.b32.xlu0 %v9109_v37, %s6503_s13 }
 0x435   :  { %2918 = vrot.lane.b32.xlu1 %v9044_v48, %s6504_s22 }
 0x436   :  { %v9117_v50 = vpop.permute.xlu0 %2789  ;;  %v9119_v0 = vpop.permute.xlu2 %2793 }
 0x437   :  { %13087 = vst [vmem:[#allocation300_spill] sm:$0xff] %v9117_v50  ;;  %v9121_v24 = vpop.permute.xlu1 %3227  ;;  %v13093_v50 = vld [vmem:[#allocation9_spill] sm:$0xff] }
 0x438   :  { %13088 = vst [vmem:[#allocation301_spill] sm:$0xff] %v9119_v0  ;;  %v2448_v0 = vmax.f32 %v13093_v50, %v2262_v6 }
 0x439   :  { %13089 = vst [vmem:[#allocation302_spill] sm:$0xff] %v9121_v24  ;;  %v2449_v24 = vmax.f32 %v13094_v14, %v2265_v46 }
 0x43a   :  { %v2528_v46 = vmax.f32 %v2368_v51, %v2448_v0  ;;  %v1599_v0 = vpop.f32.mrf.mxu0 }
 0x43b   :  { %v2529_v5 = vmax.f32 %v2369_v32, %v2449_v24  ;;  %v1986_v32 = vpop.f32.mrf.mxu2 }
 0x43c   :  { %3145 = vrot.lane.b32.xlu2 %v9092_v15, %s6509_s15  ;;  %2922 = vrot.lane.b32.xlu0 %v9109_v37, %s6504_s22  ;;  %v9156_v17 = vmax.f32 %v2528_v46, 0.0  ;;  %v13109_v46 = vld [vmem:[#allocation61_spill] sm:$0xff] }
 0x43d   :  { %3143 = vrot.lane.b32.xlu1 %v9044_v48, %s6509_s15  ;;  %v9158_v14 = vmax.f32 %v2529_v5, 0.0  ;;  %v13110_v5 = vld [vmem:[#allocation86_spill] sm:$0xff] }
 0x43e   :  { %v9129_v7 = vpop.permute.xlu0 %3006  ;;  %v9131_v29 = vpop.permute.xlu2 %3010  ;;  %13103 = vst [vmem:[#allocation12_spill] sm:$0xff] %v9156_v17 }
 0x43f   :  { %13090 = vst [vmem:[#allocation303_spill] sm:$0xff] %v9129_v7  ;;  %v9133_v45 = vpop.permute.xlu1 %4343  ;;  %v13101_v7 = vld [vmem:[#allocation134_spill] sm:$0xff] }
 0x440   :  { %13091 = vst [vmem:[#allocation304_spill] sm:$0xff] %v9131_v29  ;;  %v13100_v29 = vld [vmem:[#allocation42_spill] sm:$0xff] }
 0x441   :  { %13092 = vst [vmem:[#allocation305_spill] sm:$0xff] %v9133_v45  ;;  %v2367_v6 = vmax.f32 %v13101_v7, %v13100_v29  ;;  %v13108_v7 = vld [vmem:[#allocation13_spill] sm:$0xff] }
 0x442   :  { %13104 = vst [vmem:[#allocation6_spill] sm:$0xff] %v9158_v14  ;;  %v2307_v29 = vmax.f32 %v13108_v7, %v1599_v0 }
 0x443   :  { %v2527_v13 = vmax.f32 %v2367_v6, %v2447_v23  ;;  %v2435_v6 = vmax.f32 %v1983_v57, %v8442_v54  ;;  %v1989_v57 = vpop.f32.mrf.mxu2 }
 0x444   :  { %3621 = vrot.lane.b32.xlu2 %v9092_v15, %s6507_s1  ;;  %3147 = vrot.lane.b32.xlu0 %v9109_v37, %s6509_s15 }
 0x445   :  { %3381 = vrot.lane.b32.xlu1 %v9044_v48, %s6510_s25  ;;  %v9160_v50 = vmax.f32 %v2527_v13, 0.0  ;;  %v2387_v13 = vmax.f32 %v13110_v5, %v13109_v46  ;;  %v2436_v46 = vmax.f32 %v1986_v32, %v8467_v12 }
 0x446   :  { %v9150_v22 = vpop.permute.xlu0 %2695  ;;  %v9152_v60 = vpop.permute.xlu2 %2914 }
 0x447   :  { %v9154_v42 = vpop.permute.xlu1 %4137  ;;  %13105 = vst [vmem:[#allocation45_spill] sm:$0xff] %v9160_v50 }
 0x448   :  { %13102 = vst [vmem:[#allocation9_spill] sm:$0xff] %v9154_v42  ;;  %v13111_v42 = vld [vmem:[#allocation8_spill] sm:$0xff] }
 0x44c   :  { %2829 = vrot.lane.b32.xlu2 %v9156_v17, %s6503_s13  ;;  %2831 = vrot.lane.b32.xlu0 %v9158_v14, %s6503_s13 }
 0x44d   :  { %2827 = vrot.lane.b32.xlu1 %v9160_v50, %s6503_s13 }
 0x44e   :  { %v9168_v51 = vpop.permute.xlu0 %2795  ;;  %v9170_v23 = vpop.permute.xlu2 %3139 }
 0x44f   :  { %13106 = vst [vmem:[#allocation138_spill] sm:$0xff] %v9168_v51  ;;  %v9172_v24 = vpop.permute.xlu1 %2791  ;;  %v13112_v51 = vld [vmem:[#allocation116_spill] sm:$0xff] }
 0x450   :  { %13107 = vst [vmem:[#allocation47_spill] sm:$0xff] %v9172_v24  ;;  %v2355_v45 = vmax.f32 %v13112_v51, %v13111_v42  ;;  %v2467_v24 = vmax.f32 %v2307_v29, %v2387_v13  ;;  %v13118_v42 = vld [vmem:[#allocation11_spill] sm:$0xff]  ;;  %v13119_v51 = vld [vmem:[#allocation118_spill] sm:$0xff]  ;;  %v13121_v13 = vld [vmem:[#allocation120_spill] sm:$0xff] }
 0x451   :  { %v13120_v29 = vld [vmem:[#allocation14_spill] sm:$0xff] }
 0x452   :  { %v2515_v54 = vmax.f32 %v2355_v45, %v2435_v6  ;;  %v9193_v5 = vmax.f32 %v2467_v24, 0.0 }
 0x454   :  { %3046 = vrot.lane.b32.xlu2 %v9156_v17, %s6504_s22  ;;  %3048 = vrot.lane.b32.xlu0 %v9158_v14, %s6504_s22  ;;  %13116 = vst [vmem:[#allocation13_spill] sm:$0xff] %v9193_v5  ;;  %v2437_v14 = vmax.f32 %v1989_v57, %v8781_v19  ;;  %v9196_v17 = vmax.f32 %v2515_v54, 0.0  ;;  %v1602_v57 = vpop.f32.mrf.mxu0 }
 0x455   :  { %3044 = vrot.lane.b32.xlu1 %v9160_v50, %s6504_s22  ;;  %v2356_v50 = vmax.f32 %v13119_v51, %v13118_v42  ;;  %v13126_v51 = vld [vmem:[#allocation64_spill] sm:$0xff] }
 0x456   :  { %v9186_v1 = vpop.permute.xlu0 %3012  ;;  %v9188_v0 = vpop.permute.xlu2 %2823  ;;  %13117 = vst [vmem:[#allocation61_spill] sm:$0xff] %v9196_v17 }
 0x457   :  { %13113 = vst [vmem:[#allocation141_spill] sm:$0xff] %v9186_v1  ;;  %v9190_v7 = vpop.permute.xlu1 %3008  ;;  %v2357_v1 = vmax.f32 %v13121_v13, %v13120_v29  ;;  %v2516_v12 = vmax.f32 %v2356_v50, %v2436_v46  ;;  %v13125_v46 = vld [vmem:[#allocation16_spill] sm:$0xff] }
 0x458   :  { %13114 = vst [vmem:[#allocation42_spill] sm:$0xff] %v9188_v0  ;;  %v2308_v42 = vmax.f32 %v13125_v46, %v1602_v57  ;;  %v13127_v29 = vld [vmem:[#allocation88_spill] sm:$0xff]  ;;  %v13131_v46 = vld [vmem:[#allocation19_spill] sm:$0xff] }
 0x459   :  { %13115 = vst [vmem:[#allocation134_spill] sm:$0xff] %v9190_v7  ;;  %v2517_v45 = vmax.f32 %v2357_v1, %v2437_v14  ;;  %v9214_v6 = vmax.f32 %v2516_v12, 0.0  ;;  %v2388_v13 = vmax.f32 %v13127_v29, %v13126_v51  ;;  %v2268_v29 = vpop.f32.mrf.mxu3 }
 0x45a   :  { %v2450_v4 = vmax.f32 %v13144_v39, %v2268_v29 }
 0x45b   :  { %13123 = vst [vmem:[#allocation8_spill] sm:$0xff] %v9214_v6  ;;  %v9216_v54 = vmax.f32 %v2517_v45, 0.0  ;;  %v2468_v12 = vmax.f32 %v2308_v42, %v2388_v13 }
 0x45c   :  { %3385 = vrot.lane.b32.xlu2 %v9109_v37, %s6510_s25  ;;  %3625 = vrot.lane.b32.xlu0 %v9193_v5, %s6507_s1 }
 0x45d   :  { %2803 = vrot.lane.b32.xlu1 %v9196_v17, %s6503_s13  ;;  %13124 = vst [vmem:[#allocation116_spill] sm:$0xff] %v9216_v54  ;;  %v9245_v57 = vmax.f32 %v2468_v12, 0.0 }
 0x45e   :  { %v9208_v19 = vpop.permute.xlu0 %3377  ;;  %v9210_v32 = vpop.permute.xlu2 %3040 }
 0x45f   :  { %13122 = vst [vmem:[#allocation86_spill] sm:$0xff] %v9210_v32  ;;  %v9212_v24 = vpop.permute.xlu1 %2912  ;;  %v1605_v32 = vpop.f32.mrf.mxu0 }
 0x460   :  { %13130 = vst [vmem:[#allocation14_spill] sm:$0xff] %v9245_v57  ;;  %v2309_v51 = vmax.f32 %v13131_v46, %v1605_v32 }
 0x461   :  { %v2271_v59 = vpop.f32.mrf.mxu3 }
 0x462   :  { %v2469_v42 = vmax.f32 %v2309_v51, %v2389_v47  ;;  %v1992_v51 = vpop.f32.mrf.mxu2 }
 0x464   :  { %2805 = vrot.lane.b32.xlu2 %v9214_v6, %s6503_s13  ;;  %2807 = vrot.lane.b32.xlu0 %v9216_v54, %s6503_s13  ;;  %v9262_v32 = vmax.f32 %v2469_v42, 0.0 }
 0x465   :  { %3020 = vrot.lane.b32.xlu1 %v9196_v17, %s6504_s22  ;;  %v13149_v17 = vld [vmem:[#allocation49_spill] sm:$0xff] }
 0x466   :  { %v9224_v1 = vpop.permute.xlu2 %3379  ;;  %v9226_v14 = vpop.permute.xlu0 %2916  ;;  %13137 = vst [vmem:[#allocation88_spill] sm:$0xff] %v9262_v32 }
 0x467   :  { %v9228_v50 = vpop.permute.xlu1 %3137 }
 0x46c   :  { %3022 = vrot.lane.b32.xlu2 %v9214_v6, %s6504_s22  ;;  %3024 = vrot.lane.b32.xlu0 %v9216_v54, %s6504_s22  ;;  %v2372_v54 = vmax.f32 %v13148_v26, %v13147_v18  ;;  %v1608_v18 = vpop.f32.mrf.mxu0 }
 0x46d   :  { %3623 = vrot.lane.b32.xlu1 %v9109_v37, %s6507_s1  ;;  %v13158_v37 = vld [vmem:[#allocation70_spill] sm:$0xff] }
 0x46e   :  { %v9239_v45 = vpop.permute.xlu2 %2799  ;;  %v9241_v0 = vpop.permute.xlu0 %3141 }
 0x46f   :  { %13128 = vst [vmem:[#allocation11_spill] sm:$0xff] %v9239_v45  ;;  %v9243_v7 = vpop.permute.xlu1 %2821  ;;  %v13142_v45 = vld [vmem:[#allocation18_spill] sm:$0xff] }
 0x470   :  { %13129 = vst [vmem:[#allocation118_spill] sm:$0xff] %v9243_v7 }
 0x474   :  { %3389 = vrot.lane.b32.xlu0 %v9245_v57, %s6510_s25  ;;  %2709 = vrot.lane.b32.xlu2 %v9245_v57, %s6503_s13 }
 0x475   :  { %2707 = vrot.lane.b32.xlu1 %v9193_v5, %s6503_s13 }
 0x476   :  { %v9256_v13 = vpop.permute.xlu2 %3016  ;;  %v9258_v12 = vpop.permute.xlu0 %2825 }
 0x477   :  { %13134 = vst [vmem:[#allocation120_spill] sm:$0xff] %v9256_v13  ;;  %v9260_v7 = vpop.permute.xlu1 %3038  ;;  %v2451_v13 = vmax.f32 %v13142_v45, %v2271_v59  ;;  %v1995_v45 = vpop.f32.mrf.mxu2 }
 0x478   :  { %13135 = vst [vmem:[#allocation16_spill] sm:$0xff] %v9258_v12 }
 0x479   :  { %13136 = vst [vmem:[#allocation64_spill] sm:$0xff] %v9260_v7  ;;  %v2274_v7 = vpop.f32.mrf.mxu3  ;;  %v2531_v39 = vmax.f32 %v2371_v36, %v2451_v13 }
 0x47a   :  { %v2452_v49 = vmax.f32 %v13143_v3, %v2274_v7 }
 0x47b   :  { %v9309_v29 = vmax.f32 %v2531_v39, 0.0  ;;  %v13163_v39 = vld [vmem:[#allocation23_spill] sm:$0xff] }
 0x47c   :  { %2926 = vrot.lane.b32.xlu2 %v9245_v57, %s6504_s22  ;;  %2711 = vrot.lane.b32.xlu0 %v9262_v32, %s6503_s13  ;;  %v2532_v3 = vmax.f32 %v2372_v54, %v2452_v49 }
 0x47d   :  { %2924 = vrot.lane.b32.xlu1 %v9193_v5, %s6504_s22  ;;  %13154 = vst [vmem:[#allocation51_spill] sm:$0xff] %v9309_v29 }
 0x47e   :  { %v9270_v56 = vpop.permute.xlu0 %3042  ;;  %v9272_v47 = vpop.permute.xlu2 %2701  ;;  %v9311_v59 = vmax.f32 %v2532_v3, 0.0  ;;  %v13164_v3 = vld [vmem:[#allocation125_spill] sm:$0xff] }
 0x47f   :  { %13138 = vst [vmem:[#allocation19_spill] sm:$0xff] %v9270_v56  ;;  %v9274_v46 = vpop.permute.xlu1 %2697  ;;  %v1998_v54 = vpop.f32.mrf.mxu2 }
 0x480   :  { %13139 = vst [vmem:[#allocation67_spill] sm:$0xff] %v9272_v47 }
 0x481   :  { %13155 = vst [vmem:[#allocation154_spill] sm:$0xff] %v9311_v59 }
 0x484   :  { %3151 = vrot.lane.b32.xlu2 %v9245_v57, %s6509_s15  ;;  %2928 = vrot.lane.b32.xlu0 %v9262_v32, %s6504_s22 }
 0x485   :  { %3149 = vrot.lane.b32.xlu1 %v9193_v5, %s6509_s15 }
 0x486   :  { %v9282_v42 = vpop.permute.xlu0 %3619  ;;  %v9284_v12 = vpop.permute.xlu2 %2703 }
 0x487   :  { %13140 = vst [vmem:[#allocation90_spill] sm:$0xff] %v9284_v12  ;;  %v9286_v56 = vpop.permute.xlu1 %2797  ;;  %v13243_v12 = vld [vmem:[#allocation104_spill] sm:$0xff] }
 0x488   :  { %13141 = vst [vmem:[#allocation306_spill] sm:$0xff] %v9286_v56  ;;  %v13150_v56 = vld [vmem:[#allocation147_spill] sm:$0xff] }
 0x489   :  { %v2370_v6 = vmax.f32 %v13150_v56, %v13149_v17 }
 0x48b   :  { %v2530_v26 = vmax.f32 %v2370_v6, %v2450_v4 }
 0x48c   :  { %3627 = vrot.lane.b32.xlu2 %v9245_v57, %s6507_s1  ;;  %3153 = vrot.lane.b32.xlu0 %v9262_v32, %s6509_s15  ;;  %v13156_v57 = vld [vmem:[#allocation22_spill] sm:$0xff] }
 0x48d   :  { %3387 = vrot.lane.b32.xlu1 %v9193_v5, %s6510_s25  ;;  %v2310_v17 = vmax.f32 %v13156_v57, %v1608_v18  ;;  %v9314_v56 = vmax.f32 %v2530_v26, 0.0  ;;  %v13159_v5 = vld [vmem:[#allocation92_spill] sm:$0xff]  ;;  %v2360_v26 = vmax.f32 %v13164_v3, %v13163_v39  ;;  %v13165_v18 = vld [vmem:[#allocation17_spill] sm:$0xff] }
 0x48e   :  { %v9303_v7 = vpop.permute.xlu0 %2801  ;;  %v9305_v55 = vpop.permute.xlu2 %2920  ;;  %v2390_v36 = vmax.f32 %v13159_v5, %v13158_v37  ;;  %v2440_v37 = vmax.f32 %v1998_v54, %v8841_v11  ;;  %v2438_v5 = vmax.f32 %v1992_v51, %v8799_v16  ;;  %v2439_v54 = vmax.f32 %v1995_v45, %v8821_v20 }
 0x48f   :  { %13151 = vst [vmem:[#allocation18_spill] sm:$0xff] %v9303_v7  ;;  %v9307_v61 = vpop.permute.xlu1 %3014 }
 0x490   :  { %13152 = vst [vmem:[#allocation21_spill] sm:$0xff] %v9305_v55  ;;  %v2470_v4 = vmax.f32 %v2310_v17, %v2390_v36  ;;  %v13166_v17 = vld [vmem:[#allocation122_spill] sm:$0xff] }
 0x491   :  { %13153 = vst [vmem:[#allocation15_spill] sm:$0xff] %v9307_v61  ;;  %v2358_v36 = vmax.f32 %v13166_v17, %v13165_v18  ;;  %v13170_v61 = vld [vmem:[#allocation124_spill] sm:$0xff] }
 0x492   :  { %13157 = vst [vmem:[#allocation54_spill] sm:$0xff] %v9314_v56  ;;  %v9330_v13 = vmax.f32 %v2470_v4, 0.0  ;;  %v2520_v4 = vmax.f32 %v2360_v26, %v2440_v37  ;;  %v1611_v37 = vpop.f32.mrf.mxu0 }
 0x493   :  { %v2518_v16 = vmax.f32 %v2358_v36, %v2438_v5  ;;  %v13176_v36 = vld [vmem:[#allocation72_spill] sm:$0xff] }
 0x494   :  { %2835 = vrot.lane.b32.xlu2 %v9309_v29, %s6503_s13  ;;  %3054 = vrot.lane.b32.xlu0 %v9311_v59, %s6504_s22  ;;  %13162 = vst [vmem:[#allocation147_spill] sm:$0xff] %v9330_v13  ;;  %v9351_v39 = vmax.f32 %v2520_v4, 0.0  ;;  %v13177_v4 = vld [vmem:[#allocation94_spill] sm:$0xff] }
 0x495   :  { %2833 = vrot.lane.b32.xlu1 %v9314_v56, %s6503_s13  ;;  %v9353_v3 = vmax.f32 %v2518_v16, 0.0  ;;  %v2391_v16 = vmax.f32 %v13177_v4, %v13176_v36  ;;  %v13182_v4 = vld [vmem:[#allocation74_spill] sm:$0xff] }
 0x496   :  { %v9324_v49 = vpop.permute.xlu0 %3018  ;;  %v9326_v6 = vpop.permute.xlu2 %3145  ;;  %13167 = vst [vmem:[#allocation22_spill] sm:$0xff] %v9351_v39 }
 0x497   :  { %13160 = vst [vmem:[#allocation159_spill] sm:$0xff] %v9324_v49  ;;  %v9328_v57 = vpop.permute.xlu1 %2699  ;;  %v13169_v49 = vld [vmem:[#allocation20_spill] sm:$0xff] }
 0x498   :  { %13161 = vst [vmem:[#allocation49_spill] sm:$0xff] %v9328_v57  ;;  %v2359_v18 = vmax.f32 %v13170_v61, %v13169_v49  ;;  %v13175_v61 = vld [vmem:[#allocation25_spill] sm:$0xff] }
 0x499   :  { %13168 = vst [vmem:[#allocation70_spill] sm:$0xff] %v9353_v3  ;;  %v2311_v49 = vmax.f32 %v13175_v61, %v1611_v37  ;;  %v13181_v61 = vld [vmem:[#allocation28_spill] sm:$0xff] }
 0x49a   :  { %v2519_v5 = vmax.f32 %v2359_v18, %v2439_v54 }
 0x49b   :  { %v2471_v54 = vmax.f32 %v2311_v49, %v2391_v16 }
 0x49c   :  { %3052 = vrot.lane.b32.xlu2 %v9309_v29, %s6504_s22  ;;  %3631 = vrot.lane.b32.xlu0 %v9330_v13, %s6507_s1  ;;  %v9369_v17 = vmax.f32 %v2519_v5, 0.0  ;;  %v1614_v5 = vpop.f32.mrf.mxu0  ;;  %v13183_v29 = vld [vmem:[#allocation96_spill] sm:$0xff] }
 0x49d   :  { %3050 = vrot.lane.b32.xlu1 %v9314_v56, %s6504_s22  ;;  %v9386_v37 = vmax.f32 %v2471_v54, 0.0  ;;  %v2312_v36 = vmax.f32 %v13181_v61, %v1614_v5  ;;  %v2392_v56 = vmax.f32 %v13183_v29, %v13182_v4 }
 0x49e   :  { %v9344_v7 = vpop.permute.xlu0 %3383  ;;  %v9346_v11 = vpop.permute.xlu2 %3621  ;;  %13174 = vst [vmem:[#allocation17_spill] sm:$0xff] %v9369_v17 }
 0x49f   :  { %v9348_v51 = vpop.permute.xlu1 %3617  ;;  %13180 = vst [vmem:[#allocation124_spill] sm:$0xff] %v9386_v37  ;;  %v2472_v49 = vmax.f32 %v2312_v36, %v2392_v56 }
 0x4a1   :  { %v9403_v5 = vmax.f32 %v2472_v49, 0.0 }
 0x4a3   :  { %13184 = vst [vmem:[#allocation25_spill] sm:$0xff] %v9403_v5 }
 0x4a4   :  { %3391 = vrot.lane.b32.xlu2 %v9262_v32, %s6510_s25  ;;  %2813 = vrot.lane.b32.xlu0 %v9351_v39, %s6503_s13 }
 0x4a5   :  { %2809 = vrot.lane.b32.xlu1 %v9353_v3, %s6503_s13 }
 0x4a6   :  { %v9363_v26 = vpop.permute.xlu2 %2829  ;;  %v9365_v20 = vpop.permute.xlu0 %2705 }
 0x4a7   :  { %13171 = vst [vmem:[#allocation92_spill] sm:$0xff] %v9363_v26  ;;  %v9367_v45 = vpop.permute.xlu1 %2918 }
 0x4a8   :  { %13172 = vst [vmem:[#allocation23_spill] sm:$0xff] %v9365_v20  ;;  %v13196_v20 = vld [vmem:[#allocation26_spill] sm:$0xff] }
 0x4a9   :  { %13173 = vst [vmem:[#allocation125_spill] sm:$0xff] %v9367_v45  ;;  %v2361_v40 = vmax.f32 %v13197_v9, %v13196_v20 }
 0x4ac   :  { %2811 = vrot.lane.b32.xlu2 %v9369_v17, %s6503_s13  ;;  %3030 = vrot.lane.b32.xlu0 %v9351_v39, %s6504_s22  ;;  %v1617_v39 = vpop.f32.mrf.mxu0 }
 0x4ad   :  { %3026 = vrot.lane.b32.xlu1 %v9353_v3, %s6504_s22 }
 0x4ae   :  { %v9380_v18 = vpop.permute.xlu2 %3046  ;;  %v9382_v26 = vpop.permute.xlu0 %2922 }
 0x4af   :  { %13178 = vst [vmem:[#allocation122_spill] sm:$0xff] %v9380_v18  ;;  %v9384_v59 = vpop.permute.xlu1 %3143 }
 0x4b0   :  { %13179 = vst [vmem:[#allocation20_spill] sm:$0xff] %v9382_v26 }
 0x4b4   :  { %3028 = vrot.lane.b32.xlu2 %v9369_v17, %s6504_s22  ;;  %3395 = vrot.lane.b32.xlu0 %v9386_v37, %s6510_s25  ;;  %v13194_v17 = vld [vmem:[#allocation76_spill] sm:$0xff] }
 0x4b5   :  { %3629 = vrot.lane.b32.xlu1 %v9262_v32, %s6507_s1  ;;  %v13195_v32 = vld [vmem:[#allocation98_spill] sm:$0xff] }
 0x4b6   :  { %v9397_v16 = vpop.permute.xlu2 %3385  ;;  %v9399_v18 = vpop.permute.xlu0 %3147  ;;  %v2393_v15 = vmax.f32 %v13195_v32, %v13194_v17 }
 0x4b7   :  { %v9401_v54 = vpop.permute.xlu1 %3381 }
 0x4bc   :  { %2715 = vrot.lane.b32.xlu2 %v9386_v37, %s6503_s13  ;;  %2717 = vrot.lane.b32.xlu0 %v9403_v5, %s6503_s13 }
 0x4bd   :  { %2713 = vrot.lane.b32.xlu1 %v9330_v13, %s6503_s13 }
 0x4be   :  { %v9411_v29 = vpop.permute.xlu2 %2805  ;;  %v9413_v56 = vpop.permute.xlu0 %2831 }
 0x4bf   :  { %13185 = vst [vmem:[#allocation72_spill] sm:$0xff] %v9411_v29  ;;  %v9415_v61 = vpop.permute.xlu1 %2827  ;;  %v2001_v29 = vpop.f32.mrf.mxu2 }
 0x4c0   :  { %13186 = vst [vmem:[#allocation94_spill] sm:$0xff] %v9413_v56 }
 0x4c1   :  { %13187 = vst [vmem:[#allocation28_spill] sm:$0xff] %v9415_v61 }
 0x4c4   :  { %2932 = vrot.lane.b32.xlu2 %v9386_v37, %s6504_s22  ;;  %2934 = vrot.lane.b32.xlu0 %v9403_v5, %s6504_s22 }
 0x4c5   :  { %2930 = vrot.lane.b32.xlu1 %v9330_v13, %s6504_s22 }
 0x4c6   :  { %v9423_v36 = vpop.permute.xlu2 %3022  ;;  %v9425_v4 = vpop.permute.xlu0 %3048 }
 0x4c7   :  { %13188 = vst [vmem:[#allocation74_spill] sm:$0xff] %v9423_v36  ;;  %v9427_v49 = vpop.permute.xlu1 %3044 }
 0x4c8   :  { %13189 = vst [vmem:[#allocation96_spill] sm:$0xff] %v9425_v4  ;;  %v13193_v4 = vld [vmem:[#allocation31_spill] sm:$0xff] }
 0x4c9   :  { %13190 = vst [vmem:[#allocation307_spill] sm:$0xff] %v9427_v49  ;;  %v2313_v3 = vmax.f32 %v13193_v4, %v1617_v39  ;;  %v2441_v49 = vmax.f32 %v2001_v29, %v8861_v53 }
 0x4cb   :  { %v2521_v29 = vmax.f32 %v2361_v40, %v2441_v49  ;;  %v13204_v49 = vld [vmem:[#allocation29_spill] sm:$0xff] }
 0x4cc   :  { %3157 = vrot.lane.b32.xlu2 %v9386_v37, %s6509_s15  ;;  %3159 = vrot.lane.b32.xlu0 %v9403_v5, %s6509_s15 }
 0x4cd   :  { %3155 = vrot.lane.b32.xlu1 %v9330_v13, %s6509_s15  ;;  %v9461_v4 = vmax.f32 %v2521_v29, 0.0  ;;  %v13205_v29 = vld [vmem:[#allocation128_spill] sm:$0xff] }
 0x4ce   :  { %v9435_v56 = vpop.permute.xlu0 %3625  ;;  %v9437_v61 = vpop.permute.xlu2 %2709 }
 0x4cf   :  { %13191 = vst [vmem:[#allocation308_spill] sm:$0xff] %v9437_v61  ;;  %v9439_v36 = vpop.permute.xlu1 %2803  ;;  %v2004_v61 = vpop.f32.mrf.mxu2 }
 0x4d0   :  { %13192 = vst [vmem:[#allocation309_spill] sm:$0xff] %v9439_v36  ;;  %v2473_v36 = vmax.f32 %v2313_v3, %v2393_v15  ;;  %v2442_v20 = vmax.f32 %v2004_v61, %v8883_v43 }
 0x4d1   :  { %13202 = vst [vmem:[#allocation127_spill] sm:$0xff] %v9461_v4 }
 0x4d2   :  { %v9459_v17 = vmax.f32 %v2473_v36, 0.0 }
 0x4d4   :  { %3854 = vrot.lane.b32.xlu2 %v9386_v37, %s6505_s18  ;;  %4067 = vrot.lane.b32.xlu0 %v9403_v5, %s6506_s19  ;;  %13201 = vst [vmem:[#allocation26_spill] sm:$0xff] %v9459_v17 }
 0x4d5   :  { %3393 = vrot.lane.b32.xlu1 %v9330_v13, %s6510_s25 }
 0x4d6   :  { %v9453_v39 = vpop.permute.xlu0 %2807  ;;  %v9455_v53 = vpop.permute.xlu2 %2926 }
 0x4d7   :  { %13198 = vst [vmem:[#allocation31_spill] sm:$0xff] %v9453_v39  ;;  %v9457_v32 = vpop.permute.xlu1 %3020  ;;  %v2007_v40 = vpop.f32.mrf.mxu2  ;;  %v2362_v39 = vmax.f32 %v13205_v29, %v13204_v49  ;;  %v13216_v49 = vld [vmem:[#allocation100_spill] sm:$0xff] }
 0x4d8   :  { %13199 = vst [vmem:[#allocation76_spill] sm:$0xff] %v9455_v53  ;;  %v2443_v36 = vmax.f32 %v2007_v40, %v8914_v31 }
 0x4d9   :  { %13200 = vst [vmem:[#allocation98_spill] sm:$0xff] %v9457_v32  ;;  %v13206_v32 = vld [vmem:[#allocation32_spill] sm:$0xff] }
 0x4dc   :  { %3633 = vrot.lane.b32.xlu2 %v9386_v37, %s6507_s1  ;;  %3858 = vrot.lane.b32.xlu0 %v9459_v17, %s6505_s18  ;;  %v13207_v37 = vld [vmem:[#allocation129_spill] sm:$0xff] }
 0x4dd   :  { %2815 = vrot.lane.b32.xlu1 %v9461_v4, %s6503_s13  ;;  %v2363_v13 = vmax.f32 %v13207_v37, %v13206_v32  ;;  %v1620_v32 = vpop.f32.mrf.mxu0 }
 0x4de   :  { %v9469_v9 = vpop.permute.xlu0 %3024  ;;  %v9471_v15 = vpop.permute.xlu2 %3151 }
 0x4df   :  { %13203 = vst [vmem:[#allocation310_spill] sm:$0xff] %v9469_v9  ;;  %v9473_v3 = vpop.permute.xlu1 %3623  ;;  %v2522_v9 = vmax.f32 %v2362_v39, %v2442_v20  ;;  %v2523_v53 = vmax.f32 %v2363_v13, %v2443_v36 }
 0x4e1   :  { %v9493_v40 = vmax.f32 %v2522_v9, 0.0  ;;  %v9495_v37 = vmax.f32 %v2523_v53, 0.0  ;;  %v13214_v9 = vld [vmem:[#allocation34_spill] sm:$0xff]  ;;  %v13215_v53 = vld [vmem:[#allocation77_spill] sm:$0xff] }
 0x4e2   :  { %v2314_v36 = vmax.f32 %v13214_v9, %v1620_v32  ;;  %v2394_v29 = vmax.f32 %v13216_v49, %v13215_v53 }
 0x4e3   :  { %13209 = vst [vmem:[#allocation128_spill] sm:$0xff] %v9493_v40 }
 0x4e4   :  { %3397 = vrot.lane.b32.xlu2 %v9403_v5, %s6510_s25  ;;  %3637 = vrot.lane.b32.xlu0 %v9459_v17, %s6507_s1  ;;  %13210 = vst [vmem:[#allocation32_spill] sm:$0xff] %v9495_v37 }
 0x4e5   :  { %3032 = vrot.lane.b32.xlu1 %v9461_v4, %s6504_s22  ;;  %v1623_v53 = vpop.f32.mrf.mxu0 }
 0x4e6   :  { %v9487_v43 = vpop.permute.xlu0 %3389  ;;  %v9489_v31 = vpop.permute.xlu2 %3627 }
 0x4e7   :  { %v9491_v61 = vpop.permute.xlu1 %2707 }
 0x4e8   :  { %13208 = vst [vmem:[#allocation29_spill] sm:$0xff] %v9491_v61 }
 0x4ec   :  { %2817 = vrot.lane.b32.xlu2 %v9493_v40, %s6503_s13  ;;  %2819 = vrot.lane.b32.xlu0 %v9495_v37, %s6503_s13 }
 0x4ed   :  { %3856 = vrot.lane.b32.xlu1 %v9403_v5, %s6505_s18 }
 0x4ee   :  { %v9503_v13 = vpop.permute.xlu2 %2835  ;;  %v9505_v39 = vpop.permute.xlu0 %2711 }
 0x4ef   :  { %13211 = vst [vmem:[#allocation129_spill] sm:$0xff] %v9503_v13  ;;  %v9507_v20 = vpop.permute.xlu1 %2924  ;;  %v2474_v13 = vmax.f32 %v2314_v36, %v2394_v29  ;;  %v13220_v29 = vld [vmem:[#allocation36_spill] sm:$0xff] }
 0x4f0   :  { %13212 = vst [vmem:[#allocation311_spill] sm:$0xff] %v9505_v39 }
 0x4f1   :  { %13213 = vst [vmem:[#allocation312_spill] sm:$0xff] %v9507_v20  ;;  %v9524_v32 = vmax.f32 %v2474_v13, 0.0  ;;  %v13221_v13 = vld [vmem:[#allocation78_spill] sm:$0xff] }
 0x4f3   :  { %13219 = vst [vmem:[#allocation100_spill] sm:$0xff] %v9524_v32 }
 0x4f4   :  { %3034 = vrot.lane.b32.xlu2 %v9493_v40, %s6504_s22  ;;  %3036 = vrot.lane.b32.xlu0 %v9495_v37, %s6504_s22  ;;  %v13222_v37 = vld [vmem:[#allocation102_spill] sm:$0xff] }
 0x4f5   :  { %3635 = vrot.lane.b32.xlu1 %v9403_v5, %s6507_s1  ;;  %v2395_v40 = vmax.f32 %v13222_v37, %v13221_v13 }
 0x4f6   :  { %v9518_v4 = vpop.permute.xlu2 %3052  ;;  %v9520_v39 = vpop.permute.xlu0 %2928 }
 0x4f7   :  { %13217 = vst [vmem:[#allocation34_spill] sm:$0xff] %v9518_v4  ;;  %v9522_v61 = vpop.permute.xlu1 %3149  ;;  %v2315_v4 = vmax.f32 %v13220_v29, %v1623_v53 }
 0x4f8   :  { %13218 = vst [vmem:[#allocation77_spill] sm:$0xff] %v9520_v39 }
 0x4f9   :  { %v2475_v5 = vmax.f32 %v2315_v4, %v2395_v40 }
 0x4fb   :  { %v9553_v53 = vmax.f32 %v2475_v5, 0.0 }
 0x4fc   :  { %4069 = vrot.lane.b32.xlu2 %v9459_v17, %s6506_s19  ;;  %4279 = vrot.lane.b32.xlu0 %v9524_v32, %s6508_s14 }
 0x4fd   :  { %2719 = vrot.lane.b32.xlu1 %v9459_v17, %s6503_s13  ;;  %13226 = vst [vmem:[#allocation313_spill] sm:$0xff] %v9553_v53 }
 0x4fe   :  { %v9532_v9 = vpop.permute.xlu2 %3391  ;;  %v9534_v36 = vpop.permute.xlu0 %3153 }
 0x4ff   :  { %v9536_v49 = vpop.permute.xlu1 %3387 }
 0x504   :  { %3401 = vrot.lane.b32.xlu0 %v9524_v32, %s6510_s25  ;;  %2721 = vrot.lane.b32.xlu2 %v9524_v32, %s6503_s13 }
 0x505   :  { %2936 = vrot.lane.b32.xlu1 %v9459_v17, %s6504_s22 }
 0x506   :  { %v9547_v39 = vpop.permute.xlu2 %2811  ;;  %v9549_v20 = vpop.permute.xlu0 %3054 }
 0x507   :  { %13223 = vst [vmem:[#allocation36_spill] sm:$0xff] %v9547_v39  ;;  %v9551_v26 = vpop.permute.xlu1 %2833 }
 0x508   :  { %13224 = vst [vmem:[#allocation78_spill] sm:$0xff] %v9549_v20 }
 0x509   :  { %13225 = vst [vmem:[#allocation102_spill] sm:$0xff] %v9551_v26 }
 0x50c   :  { %2938 = vrot.lane.b32.xlu2 %v9524_v32, %s6504_s22  ;;  %2723 = vrot.lane.b32.xlu0 %v9553_v53, %s6503_s13 }
 0x50d   :  { %3161 = vrot.lane.b32.xlu1 %v9459_v17, %s6509_s15 }
 0x50e   :  { %v9561_v37 = vpop.permute.xlu2 %3028  ;;  %v9563_v4 = vpop.permute.xlu0 %3631 }
 0x50f   :  { %13227 = vst [vmem:[#allocation314_spill] sm:$0xff] %v9561_v37  ;;  %v9565_v40 = vpop.permute.xlu1 %3050 }
 0x510   :  { %13228 = vst [vmem:[#allocation315_spill] sm:$0xff] %v9565_v40  ;;  %v1626_v40 = vpop.f32.mrf.mxu0 }
 0x514   :  { %3163 = vrot.lane.b32.xlu2 %v9524_v32, %s6509_s15  ;;  %2940 = vrot.lane.b32.xlu0 %v9553_v53, %s6504_s22 }
 0x515   :  { %4277 = vrot.lane.b32.xlu1 %v9459_v17, %s6508_s14 }
 0x516   :  { %v9573_v5 = vpop.permute.xlu0 %2813  ;;  %v9575_v29 = vpop.permute.xlu2 %2715 }
 0x517   :  { %13229 = vst [vmem:[#allocation316_spill] sm:$0xff] %v9573_v5  ;;  %v9577_v13 = vpop.permute.xlu1 %2809  ;;  %v13235_v5 = vld [vmem:[#allocation38_spill] sm:$0xff] }
 0x518   :  { %13230 = vst [vmem:[#allocation317_spill] sm:$0xff] %v9575_v29  ;;  %v2316_v37 = vmax.f32 %v13235_v5, %v1626_v40  ;;  %v13236_v29 = vld [vmem:[#allocation79_spill] sm:$0xff] }
 0x519   :  { %13231 = vst [vmem:[#allocation318_spill] sm:$0xff] %v9577_v13  ;;  %v13237_v13 = vld [vmem:[#allocation103_spill] sm:$0xff] }
 0x51a   :  { %v2396_v48 = vmax.f32 %v13237_v13, %v13236_v29  ;;  %v13241_v13 = vld [vmem:[#allocation41_spill] sm:$0xff] }
 0x51c   :  { %3860 = vrot.lane.b32.xlu2 %v9524_v32, %s6505_s18  ;;  %3165 = vrot.lane.b32.xlu0 %v9553_v53, %s6509_s15 }
 0x51d   :  { %3399 = vrot.lane.b32.xlu1 %v9459_v17, %s6510_s25 }
 0x51e   :  { %v9585_v20 = vpop.permute.xlu0 %3030  ;;  %v9587_v26 = vpop.permute.xlu2 %2932 }
 0x51f   :  { %13232 = vst [vmem:[#allocation319_spill] sm:$0xff] %v9585_v20  ;;  %v9589_v39 = vpop.permute.xlu1 %3026  ;;  %v2476_v20 = vmax.f32 %v2316_v37, %v2396_v48  ;;  %v1629_v37 = vpop.f32.mrf.mxu0 }
 0x520   :  { %13233 = vst [vmem:[#allocation320_spill] sm:$0xff] %v9587_v26 }
 0x521   :  { %13234 = vst [vmem:[#allocation321_spill] sm:$0xff] %v9589_v39  ;;  %v9606_v40 = vmax.f32 %v2476_v20, 0.0  ;;  %v13242_v20 = vld [vmem:[#allocation81_spill] sm:$0xff] }
 0x522   :  { %v2397_v25 = vmax.f32 %v13243_v12, %v13242_v20  ;;  %v13249_v20 = vld [vmem:[#allocation44_spill] sm:$0xff] }
 0x523   :  { %13238 = vst [vmem:[#allocation38_spill] sm:$0xff] %v9606_v40 }
 0x524   :  { %3639 = vrot.lane.b32.xlu2 %v9524_v32, %s6507_s1  ;;  %4073 = vrot.lane.b32.xlu0 %v9553_v53, %s6506_s19 }
 0x525   :  { %4071 = vrot.lane.b32.xlu1 %v9524_v32, %s6506_s19  ;;  %v2317_v32 = vmax.f32 %v13241_v13, %v1629_v37 }
 0x526   :  { %v9600_v17 = vpop.permute.xlu0 %3395  ;;  %v9602_v26 = vpop.permute.xlu2 %3157 }
 0x527   :  { %v9604_v39 = vpop.permute.xlu1 %3629  ;;  %v2477_v55 = vmax.f32 %v2317_v32, %v2397_v25  ;;  %v1632_v32 = vpop.f32.mrf.mxu0 }
 0x529   :  { %v9635_v37 = vmax.f32 %v2477_v55, 0.0  ;;  %v13250_v55 = vld [vmem:[#allocation83_spill] sm:$0xff] }
 0x52b   :  { %13246 = vst [vmem:[#allocation104_spill] sm:$0xff] %v9635_v37 }
 0x52c   :  { %4281 = vrot.lane.b32.xlu2 %v9553_v53, %s6508_s14  ;;  %3864 = vrot.lane.b32.xlu0 %v9606_v40, %s6505_s18 }
 0x52d   :  { %3862 = vrot.lane.b32.xlu1 %v9553_v53, %s6505_s18 }
 0x52e   :  { %v9614_v5 = vpop.permute.xlu2 %3854  ;;  %v9616_v48 = vpop.permute.xlu0 %2717 }
 0x52f   :  { %13239 = vst [vmem:[#allocation79_spill] sm:$0xff] %v9616_v48  ;;  %v9618_v29 = vpop.permute.xlu1 %2713  ;;  %v1635_v62 = vpop.f32.mrf.mxu0 }
 0x530   :  { %13240 = vst [vmem:[#allocation103_spill] sm:$0xff] %v9618_v29 }
 0x534   :  { %3403 = vrot.lane.b32.xlu2 %v9553_v53, %s6510_s25  ;;  %3643 = vrot.lane.b32.xlu0 %v9606_v40, %s6507_s1 }
 0x535   :  { %3641 = vrot.lane.b32.xlu1 %v9553_v53, %s6507_s1  ;;  %v2318_v53 = vmax.f32 %v13249_v20, %v1632_v32 }
 0x536   :  { %v9629_v44 = vpop.permute.xlu2 %3633  ;;  %v9631_v48 = vpop.permute.xlu0 %2934 }
 0x537   :  { %13244 = vst [vmem:[#allocation41_spill] sm:$0xff] %v9631_v48  ;;  %v9633_v29 = vpop.permute.xlu1 %2930  ;;  %v13251_v48 = vld [vmem:[#allocation105_spill] sm:$0xff] }
 0x538   :  { %13245 = vst [vmem:[#allocation81_spill] sm:$0xff] %v9633_v29  ;;  %v2398_v29 = vmax.f32 %v13251_v48, %v13250_v55 }
 0x53a   :  { %v2478_v47 = vmax.f32 %v2318_v53, %v2398_v29 }
 0x53c   :  { %4075 = vrot.lane.b32.xlu2 %v9606_v40, %s6506_s19  ;;  %4285 = vrot.lane.b32.xlu0 %v9635_v37, %s6508_s14  ;;  %v9664_v32 = vmax.f32 %v2478_v47, 0.0 }
 0x53d   :  { %2725 = vrot.lane.b32.xlu1 %v9606_v40, %s6503_s13 }
 0x53e   :  { %v9643_v12 = vpop.permute.xlu2 %3397  ;;  %v9645_v25 = vpop.permute.xlu0 %3159  ;;  %13253 = vst [vmem:[#allocation83_spill] sm:$0xff] %v9664_v32 }
 0x53f   :  { %13247 = vst [vmem:[#allocation322_spill] sm:$0xff] %v9643_v12  ;;  %v9647_v13 = vpop.permute.xlu1 %3155  ;;  %v13281_v12 = vld [vmem:[#allocation108_spill] sm:$0xff] }
 0x540   :  { %13248 = vst [vmem:[#allocation323_spill] sm:$0xff] %v9645_v25  ;;  %v13262_v25 = vld [vmem:[#allocation106_spill] sm:$0xff] }
 0x544   :  { %3407 = vrot.lane.b32.xlu0 %v9635_v37, %s6510_s25  ;;  %2727 = vrot.lane.b32.xlu2 %v9635_v37, %s6503_s13 }
 0x545   :  { %2942 = vrot.lane.b32.xlu1 %v9606_v40, %s6504_s22 }
 0x546   :  { %v9658_v30 = vpop.permute.xlu2 %2817  ;;  %v9660_v38 = vpop.permute.xlu0 %4067 }
 0x547   :  { %13252 = vst [vmem:[#allocation44_spill] sm:$0xff] %v9658_v30  ;;  %v9662_v63 = vpop.permute.xlu1 %3393  ;;  %v5125_v30 = vld [vmem:[%s12625_s2 + $0x40] sm:$0xff] }
 0x548   :  { %5374 = vmatpush.msrb.mxu1 %v5125_v30  ;;  %v5122_v30 = vld [vmem:[%s12625_s2 + $0x28] sm:$0xff] }
 0x54c   :  { %2944 = vrot.lane.b32.xlu2 %v9635_v37, %s6504_s22  ;;  %2729 = vrot.lane.b32.xlu0 %v9664_v32, %s6503_s13 }
 0x54d   :  { %3167 = vrot.lane.b32.xlu1 %v9606_v40, %s6509_s15 }
 0x54e   :  { %v9672_v48 = vpop.permute.xlu2 %3034  ;;  %v9674_v53 = vpop.permute.xlu0 %3858 }
 0x54f   :  { %13254 = vst [vmem:[#allocation105_spill] sm:$0xff] %v9672_v48  ;;  %v9676_v29 = vpop.permute.xlu1 %2815  ;;  %v5124_v48 = vld [vmem:[%s12625_s2 + $0x38] sm:$0xff] }
 0x550   :  { %13255 = vst [vmem:[#allocation324_spill] sm:$0xff] %v9676_v29  ;;  %5375 = vmatpush.msrb.mxu1 %v5124_v48  ;;  %v5123_v29 = vld [vmem:[%s12625_s2 + $0x30] sm:$0xff] }
 0x552   :  { %5376 = vmatpush.msrb.mxu1 %v5123_v29  ;;  %v5120_v29 = vld [vmem:[%s12625_s2 + $0x18] sm:$0xff] }
 0x554   :  { %3169 = vrot.lane.b32.xlu2 %v9635_v37, %s6509_s15  ;;  %2946 = vrot.lane.b32.xlu0 %v9664_v32, %s6504_s22 }
 0x555   :  { %4283 = vrot.lane.b32.xlu1 %v9606_v40, %s6508_s14  ;;  %5377 = vmatpush.msrb.mxu1 %v5122_v30 }
 0x556   :  { %v9684_v47 = vpop.permute.xlu0 %3637  ;;  %v9686_v20 = vpop.permute.xlu2 %4069 }
 0x557   :  { %13256 = vst [vmem:[#allocation325_spill] sm:$0xff] %v9684_v47  ;;  %v9688_v55 = vpop.permute.xlu1 %3032  ;;  %5378 = vmatpush.msrb.mxu1 %v5121_v10 }
 0x558   :  { %13257 = vst [vmem:[#allocation326_spill] sm:$0xff] %v9688_v55 }
 0x559   :  { %5379 = vmatpush.msrb.mxu1 %v5120_v29 }
 0x55c   :  { %3866 = vrot.lane.b32.xlu2 %v9635_v37, %s6505_s18  ;;  %3171 = vrot.lane.b32.xlu0 %v9664_v32, %s6509_s15 }
 0x55d   :  { %3405 = vrot.lane.b32.xlu1 %v9606_v40, %s6510_s25  ;;  %v13260_v40 = vld [vmem:[#allocation46_spill] sm:$0xff] }
 0x55e   :  { %v9708_v55 = vpop.permute.xlu0 %2819  ;;  %v9710_v48 = vpop.permute.xlu2 %2721  ;;  %v2319_v35 = vmax.f32 %v13260_v40, %v1635_v62  ;;  %v5118_v62 = vld [vmem:[%s12625_s2 + $0x8] sm:$0xff] }
 0x55f   :  { %13258 = vst [vmem:[#allocation327_spill] sm:$0xff] %v9708_v55  ;;  %v9712_v28 = vpop.permute.xlu1 %3856  ;;  %v5119_v55 = vld [vmem:[%s12625_s2 + $0x10] sm:$0xff] }
 0x560   :  { %13259 = vst [vmem:[#allocation328_spill] sm:$0xff] %v9710_v48  ;;  %v13261_v48 = vld [vmem:[#allocation85_spill] sm:$0xff]  ;;  %5380 = vmatpush.msrb.mxu1 %v5119_v55  ;;  %v1638_v55 = vpop.f32.mrf.mxu0 }
 0x561   :  { %v2399_v45 = vmax.f32 %v13262_v25, %v13261_v48  ;;  %v5117_v48 = vld [vmem:[%s12625_s2] sm:$0xff] }
 0x562   :  { %5381 = vmatpush.msrb.mxu1 %v5118_v62 }
 0x563   :  { %v2479_v10 = vmax.f32 %v2319_v35, %v2399_v45 }
 0x564   :  { %3645 = vrot.lane.b32.xlu2 %v9635_v37, %s6507_s1  ;;  %4079 = vrot.lane.b32.xlu0 %v9664_v32, %s6506_s19 }
 0x565   :  { %4077 = vrot.lane.b32.xlu1 %v9635_v37, %s6506_s19  ;;  %5382 = vmatpush.msrb.mxu1 %v5117_v48  ;;  %v9744_v29 = vmax.f32 %v2479_v10, 0.0  ;;  %v13269_v48 = vld [vmem:[#allocation87_spill] sm:$0xff] }
 0x566   :  { %v9735_v40 = vpop.permute.xlu0 %3036  ;;  %v9737_v30 = vpop.permute.xlu2 %2938  ;;  %v13270_v10 = vld [vmem:[#allocation107_spill] sm:$0xff] }
 0x567   :  { %13263 = vst [vmem:[#allocation46_spill] sm:$0xff] %v9735_v40  ;;  %v9739_v25 = vpop.permute.xlu1 %3635  ;;  %v13268_v40 = vld [vmem:[#allocation48_spill] sm:$0xff] }
 0x568   :  { %13264 = vst [vmem:[#allocation85_spill] sm:$0xff] %v9737_v30  ;;  %v2320_v37 = vmax.f32 %v13268_v40, %v1638_v55  ;;  %v2400_v30 = vmax.f32 %v13270_v10, %v13269_v48  ;;  %v13274_v55 = vld [vmem:[#allocation136_spill] sm:$0xff] }
 0x569   :  { %13265 = vst [vmem:[#allocation106_spill] sm:$0xff] %v9744_v29  ;;  %v9779_v48 = vsel %vm4484_vm2, 0.0, %v13274_v55 }
 0x56a   :  { %v2480_v58 = vmax.f32 %v2320_v37, %v2400_v30 }
 0x56c   :  { %4287 = vrot.lane.b32.xlu2 %v9664_v32, %s6508_s14  ;;  %3870 = vrot.lane.b32.xlu0 %v9744_v29, %s6505_s18  ;;  %v9771_v40 = vmax.f32 %v2480_v58, 0.0  ;;  %v1641_v58 = vpop.f32.mrf.mxu0 }
 0x56d   :  { %3868 = vrot.lane.b32.xlu1 %v9664_v32, %s6505_s18 }
 0x56e   :  { %v4280_v35 = vpop.permute.xlu0 %4279  ;;  %v9752_v45 = vpop.permute.xlu2 %3163  ;;  %13273 = vst [vmem:[#allocation107_spill] sm:$0xff] %v9771_v40 }
 0x56f   :  { %13266 = vst [vmem:[#allocation329_spill] sm:$0xff] %v9752_v45  ;;  %v9754_v62 = vpop.permute.xlu1 %2719 }
 0x570   :  { %13267 = vst [vmem:[#allocation330_spill] sm:$0xff] %v9754_v62 }
 0x574   :  { %3409 = vrot.lane.b32.xlu2 %v9664_v32, %s6510_s25  ;;  %3649 = vrot.lane.b32.xlu0 %v9744_v29, %s6507_s1 }
 0x575   :  { %3647 = vrot.lane.b32.xlu1 %v9664_v32, %s6507_s1  ;;  %v13278_v32 = vld [vmem:[#allocation139_spill] sm:$0xff] }
 0x576   :  { %v9765_v57 = vpop.permute.xlu0 %3401  ;;  %v9767_v45 = vpop.permute.xlu2 %3860 }
 0x577   :  { %13271 = vst [vmem:[#allocation48_spill] sm:$0xff] %v9765_v57  ;;  %v9769_v62 = vpop.permute.xlu1 %2936  ;;  %v13279_v57 = vld [vmem:[#allocation50_spill] sm:$0xff] }
 0x578   :  { %13272 = vst [vmem:[#allocation87_spill] sm:$0xff] %v9769_v62  ;;  %v9792_v62 = vsel %vm4557_vm3, %v9779_v48, %v13278_v32  ;;  %v2321_v47 = vmax.f32 %v13279_v57, %v1641_v58 }
 0x579   :  { %v4632_v55 = vsel %vm4631_vm4, %v9792_v62, %v9228_v50 }
 0x57c   :  { %4081 = vrot.lane.b32.xlu2 %v9744_v29, %s6506_s19  ;;  %4291 = vrot.lane.b32.xlu0 %v9771_v40, %s6508_s14 }
 0x57d   :  { %2731 = vrot.lane.b32.xlu1 %v9744_v29, %s6503_s13 }
 0x57e   :  { %v9783_v37 = vpop.permute.xlu2 %3639  ;;  %v9785_v30 = vpop.permute.xlu0 %2723 }
 0x57f   :  { %13275 = vst [vmem:[#allocation136_spill] sm:$0xff] %v9783_v37  ;;  %v9787_v10 = vpop.permute.xlu1 %3161  ;;  %v13280_v37 = vld [vmem:[#allocation89_spill] sm:$0xff] }
 0x580   :  { %13276 = vst [vmem:[#allocation331_spill] sm:$0xff] %v9785_v30  ;;  %v2401_v30 = vmax.f32 %v13281_v12, %v13280_v37 }
 0x581   :  { %13277 = vst [vmem:[#allocation332_spill] sm:$0xff] %v9787_v10  ;;  %v4713_v10 = vsel %vm4712_vm5, %v4632_v55, %v9208_v19 }
 0x582   :  { %v4794_v50 = vsel %vm4793_vm7, %v4713_v10, %v9348_v51  ;;  %v2481_v57 = vmax.f32 %v2321_v47, %v2401_v30  ;;  %v4633_v51 = vsel %vm4631_vm4, %v9792_v62, %v9170_v23 }
 0x583   :  { %v4875_v12 = vsel %vm4874_vm6, %v4794_v50, %v9614_v5  ;;  %v4714_v5 = vsel %vm4712_vm5, %v4633_v51, %v9224_v1  ;;  %v4634_v50 = vsel %vm4631_vm4, %v9792_v62, %v9241_v0 }
 0x584   :  { %3413 = vrot.lane.b32.xlu0 %v9771_v40, %s6510_s25  ;;  %2733 = vrot.lane.b32.xlu2 %v9771_v40, %s6503_s13  ;;  %v4956_v19 = vsel %vm4955_vm8, %v4875_v12, %v9660_v38  ;;  %v9821_v47 = vmax.f32 %v2481_v57, 0.0  ;;  %v4795_v30 = vsel %vm4793_vm7, %v4714_v5, %v9282_v42  ;;  %v4715_v57 = vsel %vm4712_vm5, %v4634_v50, %v9401_v54  ;;  %v13285_v5 = vld [vmem:[#allocation53_spill] sm:$0xff] }
 0x585   :  { %2948 = vrot.lane.b32.xlu1 %v9744_v29, %s6504_s22  ;;  %v4876_v38 = vsel %vm4874_vm6, %v4795_v30, %v9712_v28 }
 0x586   :  { %v4282_v32 = vpop.permute.xlu2 %4281  ;;  %v9812_v37 = vpop.permute.xlu0 %2940  ;;  %13283 = vst [vmem:[#allocation50_spill] sm:$0xff] %v9821_v47  ;;  %v4957_v1 = vsel %vm4955_vm8, %v4876_v38, %v9686_v20  ;;  %v4796_v20 = vsel %vm4793_vm7, %v4715_v57, %v9346_v11  ;;  %v13287_v38 = vld [vmem:[#allocation110_spill] sm:$0xff] }
 0x587   :  { %13282 = vst [vmem:[#allocation139_spill] sm:$0xff] %v9812_v37  ;;  %v4278_v58 = vpop.permute.xlu1 %4277  ;;  %v5038_v28 = vsel %vm5036_vm10, %v4957_v1, %v4280_v35  ;;  %v4877_v0 = vsel %vm4874_vm6, %v4796_v20, %v9674_v53  ;;  %v1644_v53 = vpop.f32.mrf.mxu0 }
 0x588   :  { %v5037_v55 = vsel %vm5036_vm10, %v4956_v19, %v4278_v58  ;;  %v2322_v30 = vmax.f32 %v13285_v5, %v1644_v53  ;;  %v13292_v5 = vld [vmem:[#allocation56_spill] sm:$0xff] }
 0x589   :  { %6360 = vmatmul.msk.f32.vlgmr.msrb.gmra.mxu1 %vm5126_vm9, %v5037_v55 }
 0x58c   :  { %2950 = vrot.lane.b32.xlu2 %v9771_v40, %s6504_s22  ;;  %2735 = vrot.lane.b32.xlu0 %v9821_v47, %s6503_s13 }
 0x58d   :  { %3173 = vrot.lane.b32.xlu1 %v9744_v29, %s6509_s15 }
 0x58e   :  { %v9835_v23 = vpop.permute.xlu2 %3403  ;;  %v9837_v10 = vpop.permute.xlu0 %3165 }
 0x58f   :  { %v9841_v42 = vpop.permute.xlu1 %3399 }
 0x591   :  { %6361 = vmatmul.msk.f32.gmra.mxu1 %vm5126_vm9, %v5038_v28 }
 0x594   :  { %3175 = vrot.lane.b32.xlu2 %v9771_v40, %s6509_s15  ;;  %2952 = vrot.lane.b32.xlu0 %v9821_v47, %s6504_s22 }
 0x595   :  { %4289 = vrot.lane.b32.xlu1 %v9744_v29, %s6508_s14 }
 0x596   :  { %v4074_v35 = vpop.permute.xlu0 %4073  ;;  %v9858_v12 = vpop.permute.xlu2 %4075 }
 0x597   :  { %v4072_v19 = vpop.permute.xlu1 %4071 }
 0x598   :  { %v4958_v54 = vsel %vm4955_vm8, %v4877_v0, %v4072_v19 }
 0x599   :  { %v5039_v58 = vsel %vm5036_vm10, %v4958_v54, %v4282_v32  ;;  %v13286_v32 = vld [vmem:[#allocation91_spill] sm:$0xff] }
 0x59a   :  { %6362 = vmatmul.msk.f32.gmra.mxu1 %vm5126_vm9, %v5039_v58  ;;  %v2402_v1 = vmax.f32 %v13287_v38, %v13286_v32  ;;  %v1647_v58 = vpop.f32.mrf.mxu0  ;;  %v13293_v32 = vld [vmem:[#allocation93_spill] sm:$0xff]  ;;  %v13294_v38 = vld [vmem:[#allocation112_spill] sm:$0xff] }
 0x59c   :  { %3872 = vrot.lane.b32.xlu2 %v9771_v40, %s6505_s18  ;;  %3177 = vrot.lane.b32.xlu0 %v9821_v47, %s6509_s15  ;;  %v2482_v28 = vmax.f32 %v2322_v30, %v2402_v1  ;;  %v2323_v30 = vmax.f32 %v13292_v5, %v1647_v58  ;;  %v2403_v1 = vmax.f32 %v13294_v38, %v13293_v32 }
 0x59d   :  { %3411 = vrot.lane.b32.xlu1 %v9744_v29, %s6510_s25 }
 0x59e   :  { %v9871_v11 = vpop.permute.xlu0 %3864  ;;  %v9873_v55 = vpop.permute.xlu2 %2727  ;;  %v9890_v0 = vmax.f32 %v2482_v28, 0.0  ;;  %v2483_v28 = vmax.f32 %v2323_v30, %v2403_v1  ;;  %v4635_v1 = vsel %vm4631_vm4, %v9792_v62, %v9384_v59 }
 0x59f   :  { %13284 = vst [vmem:[#allocation89_spill] sm:$0xff] %v9873_v55  ;;  %v3863_v51 = vpop.permute.xlu1 %3862  ;;  %v4716_v37 = vsel %vm4712_vm5, %v4635_v1, %v9344_v7 }
 0x5a0   :  { %13289 = vst [vmem:[#allocation53_spill] sm:$0xff] %v9890_v0  ;;  %v9917_v58 = vmax.f32 %v2483_v28, 0.0  ;;  %v13298_v28 = vld [vmem:[#allocation59_spill] sm:$0xff] }
 0x5a2   :  { %13296 = vst [vmem:[#allocation93_spill] sm:$0xff] %v9917_v58  ;;  %v1650_v32 = vpop.f32.mrf.mxu0 }
 0x5a4   :  { %3651 = vrot.lane.b32.xlu2 %v9771_v40, %s6507_s1  ;;  %4085 = vrot.lane.b32.xlu0 %v9821_v47, %s6506_s19 }
 0x5a5   :  { %4083 = vrot.lane.b32.xlu1 %v9771_v40, %s6506_s19 }
 0x5a6   :  { %v9884_v50 = vpop.permute.xlu0 %3643  ;;  %v9886_v57 = vpop.permute.xlu2 %2944 }
 0x5a7   :  { %13288 = vst [vmem:[#allocation108_spill] sm:$0xff] %v9886_v57  ;;  %v9888_v20 = vpop.permute.xlu1 %3641  ;;  %v13299_v57 = vld [vmem:[#allocation95_spill] sm:$0xff] }
 0x5ac   :  { %4293 = vrot.lane.b32.xlu2 %v9821_v47, %s6508_s14  ;;  %3876 = vrot.lane.b32.xlu0 %v9890_v0, %s6505_s18 }
 0x5ad   :  { %3874 = vrot.lane.b32.xlu1 %v9821_v47, %s6505_s18 }
 0x5ae   :  { %v4286_v19 = vpop.permute.xlu0 %4285  ;;  %v9898_v54 = vpop.permute.xlu2 %3169 }
 0x5af   :  { %13290 = vst [vmem:[#allocation91_spill] sm:$0xff] %v9898_v54  ;;  %v9900_v53 = vpop.permute.xlu1 %2725  ;;  %v4636_v54 = vsel %vm4631_vm4, %v9792_v62, %v9326_v6 }
 0x5b0   :  { %13291 = vst [vmem:[#allocation110_spill] sm:$0xff] %v9900_v53  ;;  %v13300_v53 = vld [vmem:[#allocation113_spill] sm:$0xff] }
 0x5b4   :  { %3415 = vrot.lane.b32.xlu2 %v9821_v47, %s6510_s25  ;;  %3655 = vrot.lane.b32.xlu0 %v9890_v0, %s6507_s1 }
 0x5b5   :  { %3653 = vrot.lane.b32.xlu1 %v9821_v47, %s6507_s1  ;;  %v2324_v47 = vmax.f32 %v13298_v28, %v1650_v32 }
 0x5b6   :  { %v9911_v40 = vpop.permute.xlu0 %3407  ;;  %v9913_v29 = vpop.permute.xlu2 %3866 }
 0x5b7   :  { %v9915_v55 = vpop.permute.xlu1 %2942 }
 0x5b8   :  { %13295 = vst [vmem:[#allocation56_spill] sm:$0xff] %v9915_v55  ;;  %v2404_v55 = vmax.f32 %v13300_v53, %v13299_v57 }
 0x5ba   :  { %v2484_v59 = vmax.f32 %v2324_v47, %v2404_v55 }
 0x5bc   :  { %4087 = vrot.lane.b32.xlu2 %v9890_v0, %s6506_s19  ;;  %4297 = vrot.lane.b32.xlu0 %v9917_v58, %s6508_s14 }
 0x5bd   :  { %2737 = vrot.lane.b32.xlu1 %v9890_v0, %s6503_s13 }
 0x5be   :  { %v9925_v5 = vpop.permute.xlu2 %3645  ;;  %v9927_v30 = vpop.permute.xlu0 %2729 }
 0x5bf   :  { %13297 = vst [vmem:[#allocation112_spill] sm:$0xff] %v9927_v30  ;;  %v9929_v38 = vpop.permute.xlu1 %3167  ;;  %v4797_v30 = vsel %vm4793_vm7, %v4716_v37, %v9473_v3  ;;  %v9957_v3 = vmax.f32 %v2484_v59, 0.0  ;;  %v4717_v37 = vsel %vm4712_vm5, %v4636_v54, %v9397_v16 }
 0x5c0   :  { %v4878_v32 = vsel %vm4874_vm6, %v4797_v30, %v9767_v45  ;;  %v4798_v45 = vsel %vm4793_vm7, %v4717_v37, %v9435_v56 }
 0x5c1   :  { %v4959_v7 = vsel %vm4955_vm8, %v4878_v32, %v4074_v35  ;;  %13302 = vst [vmem:[#allocation95_spill] sm:$0xff] %v9957_v3  ;;  %v4879_v47 = vsel %vm4874_vm6, %v4798_v45, %v3863_v51  ;;  %v4637_v51 = vsel %vm4631_vm4, %v9792_v62, %v9399_v18  ;;  %v13306_v45 = vld [vmem:[#allocation115_spill] sm:$0xff] }
 0x5c2   :  { %v4960_v16 = vsel %vm4955_vm8, %v4879_v47, %v9858_v12  ;;  %v4718_v54 = vsel %vm4712_vm5, %v4637_v51, %v9536_v49 }
 0x5c3   :  { %v5041_v56 = vsel %vm5036_vm10, %v4960_v16, %v4286_v19  ;;  %v4799_v12 = vsel %vm4793_vm7, %v4718_v54, %v9489_v31 }
 0x5c4   :  { %3419 = vrot.lane.b32.xlu0 %v9917_v58, %s6510_s25  ;;  %2739 = vrot.lane.b32.xlu2 %v9917_v58, %s6503_s13  ;;  %v4880_v18 = vsel %vm4874_vm6, %v4799_v12, %v9871_v11  ;;  %v1653_v11 = vpop.f32.mrf.mxu0 }
 0x5c5   :  { %2954 = vrot.lane.b32.xlu1 %v9890_v0, %s6504_s22 }
 0x5c6   :  { %v4288_v57 = vpop.permute.xlu2 %4287  ;;  %v9949_v53 = vpop.permute.xlu0 %2946 }
 0x5c7   :  { %13301 = vst [vmem:[#allocation59_spill] sm:$0xff] %v9949_v53  ;;  %v4284_v1 = vpop.permute.xlu1 %4283  ;;  %v4639_v53 = vsel %vm4631_vm4, %v9792_v62, %v9471_v15 }
 0x5c8   :  { %v5040_v28 = vsel %vm5036_vm10, %v4959_v7, %v4284_v1 }
 0x5c9   :  { %6363 = vmatmul.msk.f32.gmra.mxu1 %vm5126_vm9, %v5040_v28  ;;  %v13304_v28 = vld [vmem:[#allocation62_spill] sm:$0xff] }
 0x5ca   :  { %v2325_v37 = vmax.f32 %v13304_v28, %v1653_v11  ;;  %v13310_v11 = vld [vmem:[#allocation65_spill] sm:$0xff] }
 0x5cc   :  { %2956 = vrot.lane.b32.xlu2 %v9917_v58, %s6504_s22  ;;  %2741 = vrot.lane.b32.xlu0 %v9957_v3, %s6503_s13 }
 0x5cd   :  { %3179 = vrot.lane.b32.xlu1 %v9890_v0, %s6509_s15 }
 0x5ce   :  { %v9970_v6 = vpop.permute.xlu2 %3409  ;;  %v9972_v35 = vpop.permute.xlu0 %3171 }
 0x5cf   :  { %v9976_v55 = vpop.permute.xlu1 %3405 }
 0x5d1   :  { %6364 = vmatmul.msk.f32.gmra.mxu1 %vm5126_vm9, %v5041_v56 }
 0x5d4   :  { %3181 = vrot.lane.b32.xlu2 %v9917_v58, %s6509_s15  ;;  %2958 = vrot.lane.b32.xlu0 %v9957_v3, %s6504_s22 }
 0x5d5   :  { %4295 = vrot.lane.b32.xlu1 %v9890_v0, %s6508_s14 }
 0x5d6   :  { %v4080_v19 = vpop.permute.xlu0 %4079  ;;  %v9993_v30 = vpop.permute.xlu2 %4081 }
 0x5d7   :  { %v4078_v59 = vpop.permute.xlu1 %4077 }
 0x5d8   :  { %v4961_v49 = vsel %vm4955_vm8, %v4880_v18, %v4078_v59 }
 0x5d9   :  { %v5042_v32 = vsel %vm5036_vm10, %v4961_v49, %v4288_v57  ;;  %v13305_v57 = vld [vmem:[#allocation97_spill] sm:$0xff]  ;;  %v1656_v49 = vpop.f32.mrf.mxu0 }
 0x5da   :  { %6365 = vmatmul.msk.f32.gmra.mxu1 %vm5126_vm9, %v5042_v32  ;;  %v2405_v47 = vmax.f32 %v13306_v45, %v13305_v57  ;;  %v2326_v28 = vmax.f32 %v13310_v11, %v1656_v49  ;;  %v13312_v57 = vld [vmem:[#allocation117_spill] sm:$0xff] }
 0x5dc   :  { %3878 = vrot.lane.b32.xlu2 %v9917_v58, %s6505_s18  ;;  %3183 = vrot.lane.b32.xlu0 %v9957_v3, %s6509_s15  ;;  %v2485_v16 = vmax.f32 %v2325_v37, %v2405_v47  ;;  %v13311_v37 = vld [vmem:[#allocation99_spill] sm:$0xff] }
 0x5dd   :  { %3417 = vrot.lane.b32.xlu1 %v9890_v0, %s6510_s25  ;;  %v2406_v45 = vmax.f32 %v13312_v57, %v13311_v37 }
 0x5de   :  { %v10006_v31 = vpop.permute.xlu0 %3870  ;;  %v10008_v7 = vpop.permute.xlu2 %2733  ;;  %v10025_v12 = vmax.f32 %v2485_v16, 0.0 }
 0x5df   :  { %13303 = vst [vmem:[#allocation113_spill] sm:$0xff] %v10008_v7  ;;  %v3869_v1 = vpop.permute.xlu1 %3868  ;;  %v2486_v47 = vmax.f32 %v2326_v28, %v2406_v45  ;;  %v4638_v45 = vsel %vm4631_vm4, %v9792_v62, %v9522_v61  ;;  %v13317_v7 = vld [vmem:[#allocation101_spill] sm:$0xff] }
 0x5e0   :  { %13308 = vst [vmem:[#allocation97_spill] sm:$0xff] %v10025_v12 }
 0x5e1   :  { %v10052_v49 = vmax.f32 %v2486_v47, 0.0  ;;  %v1659_v37 = vpop.f32.mrf.mxu0  ;;  %v13316_v47 = vld [vmem:[#allocation68_spill] sm:$0xff] }
 0x5e3   :  { %13314 = vst [vmem:[#allocation99_spill] sm:$0xff] %v10052_v49 }
 0x5e4   :  { %3657 = vrot.lane.b32.xlu2 %v9917_v58, %s6507_s1  ;;  %4091 = vrot.lane.b32.xlu0 %v9957_v3, %s6506_s19 }
 0x5e5   :  { %4089 = vrot.lane.b32.xlu1 %v9917_v58, %s6506_s19 }
 0x5e6   :  { %v10019_v56 = vpop.permute.xlu0 %3649  ;;  %v10021_v51 = vpop.permute.xlu2 %2950 }
 0x5e7   :  { %13307 = vst [vmem:[#allocation62_spill] sm:$0xff] %v10021_v51  ;;  %v10023_v54 = vpop.permute.xlu1 %3647  ;;  %v13318_v51 = vld [vmem:[#allocation119_spill] sm:$0xff] }
 0x5ec   :  { %4299 = vrot.lane.b32.xlu2 %v9957_v3, %s6508_s14  ;;  %3882 = vrot.lane.b32.xlu0 %v10025_v12, %s6505_s18 }
 0x5ed   :  { %3880 = vrot.lane.b32.xlu1 %v9957_v3, %s6505_s18 }
 0x5ee   :  { %v4292_v18 = vpop.permute.xlu0 %4291  ;;  %v10033_v59 = vpop.permute.xlu2 %3175 }
 0x5ef   :  { %v10035_v32 = vpop.permute.xlu1 %2731 }
 0x5f0   :  { %13309 = vst [vmem:[#allocation115_spill] sm:$0xff] %v10035_v32  ;;  %v2407_v32 = vmax.f32 %v13318_v51, %v13317_v7 }
 0x5f4   :  { %3421 = vrot.lane.b32.xlu2 %v9957_v3, %s6510_s25  ;;  %3661 = vrot.lane.b32.xlu0 %v10025_v12, %s6507_s1 }
 0x5f5   :  { %3659 = vrot.lane.b32.xlu1 %v9957_v3, %s6507_s1  ;;  %v2327_v3 = vmax.f32 %v13316_v47, %v1659_v37 }
 0x5f6   :  { %v10046_v16 = vpop.permute.xlu0 %3413  ;;  %v10048_v58 = vpop.permute.xlu2 %3872 }
 0x5f7   :  { %v10050_v0 = vpop.permute.xlu1 %2948  ;;  %v2487_v61 = vmax.f32 %v2327_v3, %v2407_v32 }
 0x5f8   :  { %13313 = vst [vmem:[#allocation65_spill] sm:$0xff] %v10050_v0  ;;  %v4719_v0 = vsel %vm4712_vm5, %v4638_v45, %v9487_v43 }
 0x5fc   :  { %4093 = vrot.lane.b32.xlu2 %v10025_v12, %s6506_s19  ;;  %4303 = vrot.lane.b32.xlu0 %v10052_v49, %s6508_s14 }
 0x5fd   :  { %2743 = vrot.lane.b32.xlu1 %v10025_v12, %s6503_s13 }
 0x5fe   :  { %v10060_v11 = vpop.permute.xlu2 %3651  ;;  %v10062_v28 = vpop.permute.xlu0 %2735 }
 0x5ff   :  { %13315 = vst [vmem:[#allocation117_spill] sm:$0xff] %v10062_v28  ;;  %v10064_v57 = vpop.permute.xlu1 %3173  ;;  %v4800_v28 = vsel %vm4793_vm7, %v4719_v0, %v9604_v39  ;;  %v10092_v39 = vmax.f32 %v2487_v61, 0.0  ;;  %v4720_v0 = vsel %vm4712_vm5, %v4639_v53, %v9532_v9 }
 0x600   :  { %v4881_v37 = vsel %vm4874_vm6, %v4800_v28, %v9913_v29  ;;  %v4801_v29 = vsel %vm4793_vm7, %v4720_v0, %v9563_v4 }
 0x601   :  { %v4962_v51 = vsel %vm4955_vm8, %v4881_v37, %v4080_v19  ;;  %13319 = vst [vmem:[#allocation68_spill] sm:$0xff] %v10092_v39  ;;  %v4882_v3 = vsel %vm4874_vm6, %v4801_v29, %v3869_v1  ;;  %v4559_v19 = vsel %vm4557_vm3, %v9779_v48, %v9212_v24 }
 0x602   :  { %v4963_v62 = vsel %vm4955_vm8, %v4882_v3, %v9993_v30  ;;  %v4640_v1 = vsel %vm4631_vm4, %v4559_v19, %v9534_v36 }
 0x603   :  { %v5044_v4 = vsel %vm5036_vm10, %v4963_v62, %v4292_v18  ;;  %v4721_v32 = vsel %vm4712_vm5, %v4640_v1, %v9662_v63 }
 0x604   :  { %3425 = vrot.lane.b32.xlu0 %v10052_v49, %s6510_s25  ;;  %2745 = vrot.lane.b32.xlu2 %v10052_v49, %s6503_s13  ;;  %v4802_v24 = vsel %vm4793_vm7, %v4721_v32, %v9629_v44 }
 0x605   :  { %2960 = vrot.lane.b32.xlu1 %v10025_v12, %s6504_s22  ;;  %v4883_v36 = vsel %vm4874_vm6, %v4802_v24, %v10006_v31 }
 0x606   :  { %v4294_v7 = vpop.permute.xlu2 %4293  ;;  %v10085_v45 = vpop.permute.xlu0 %2952 }
 0x607   :  { %v4290_v43 = vpop.permute.xlu1 %4289 }
 0x608   :  { %v5043_v47 = vsel %vm5036_vm10, %v4962_v51, %v4290_v43 }
 0x609   :  { %6366 = vmatmul.msk.f32.gmra.mxu1 %vm5126_vm9, %v5043_v47 }
 0x60c   :  { %2962 = vrot.lane.b32.xlu2 %v10052_v49, %s6504_s22  ;;  %2747 = vrot.lane.b32.xlu0 %v10092_v39, %s6503_s13 }
 0x60d   :  { %3185 = vrot.lane.b32.xlu1 %v10025_v12, %s6509_s15 }
 0x60e   :  { %v10105_v15 = vpop.permute.xlu2 %3415  ;;  %v10111_v53 = vpop.permute.xlu0 %3177 }
 0x60f   :  { %v10109_v9 = vpop.permute.xlu1 %3411 }
 0x611   :  { %6367 = vmatmul.msk.f32.gmra.mxu1 %vm5126_vm9, %v5044_v4  ;;  %v4486_v4 = vsel %vm4484_vm2, 0.0, %v9150_v22  ;;  %v4487_v22 = vsel %vm4484_vm2, %v8894_v41, %v9274_v46  ;;  %v13325_v46 = vld [vmem:[#allocation322_spill] sm:$0xff] }
 0x612   :  { %v4560_v32 = vsel %vm4557_vm3, %v4486_v4, %v9152_v60  ;;  %v4561_v4 = vsel %vm4557_vm3, %v4487_v22, %v9226_v14  ;;  %v10234_v14 = vpop.f32.mrf.mxu1 }
 0x613   :  { %v4642_v41 = vsel %vm4631_vm4, %v4561_v4, %v9602_v26  ;;  %13327 = vst [vmem:[#allocation322_spill] sm:$0xff] %v10234_v14 }
 0x614   :  { %3187 = vrot.lane.b32.xlu2 %v10052_v49, %s6509_s15  ;;  %2964 = vrot.lane.b32.xlu0 %v10092_v39, %s6504_s22 }
 0x615   :  { %4301 = vrot.lane.b32.xlu1 %v10025_v12, %s6508_s14 }
 0x616   :  { %v10130_v48 = vpop.permute.xlu2 %4087  ;;  %v4086_v18 = vpop.permute.xlu0 %4085 }
 0x617   :  { %v4084_v30 = vpop.permute.xlu1 %4083 }
 0x618   :  { %v4964_v63 = vsel %vm4955_vm8, %v4883_v36, %v4084_v30  ;;  %v4641_v36 = vsel %vm4631_vm4, %v4560_v32, %v9647_v13 }
 0x619   :  { %v5045_v28 = vsel %vm5036_vm10, %v4964_v63, %v4294_v7  ;;  %v4722_v30 = vsel %vm4712_vm5, %v4641_v36, %v9600_v17 }
 0x61a   :  { %6368 = vmatmul.msk.f32.gmra.mxu1 %vm5126_vm9, %v5045_v28  ;;  %v4803_v60 = vsel %vm4793_vm7, %v4722_v30, %v9739_v25  ;;  %v4723_v25 = vsel %vm4712_vm5, %v4642_v41, %v13325_v46  ;;  %v13331_v46 = vld [vmem:[#allocation323_spill] sm:$0xff] }
 0x61b   :  { %v4884_v13 = vsel %vm4874_vm6, %v4803_v60, %v10048_v58  ;;  %v13326_v58 = vld [vmem:[#allocation325_spill] sm:$0xff] }
 0x61c   :  { %3884 = vrot.lane.b32.xlu2 %v10052_v49, %s6505_s18  ;;  %3189 = vrot.lane.b32.xlu0 %v10092_v39, %s6509_s15  ;;  %v4965_v63 = vsel %vm4955_vm8, %v4884_v13, %v4086_v18  ;;  %v4804_v30 = vsel %vm4793_vm7, %v4723_v25, %v13326_v58  ;;  %v13328_v13 = vld [vmem:[#allocation49_spill] sm:$0xff]  ;;  %v13332_v58 = vld [vmem:[#allocation215_spill] sm:$0xff] }
 0x61d   :  { %3423 = vrot.lane.b32.xlu1 %v10025_v12, %s6510_s25 }
 0x61e   :  { %v10143_v44 = vpop.permute.xlu2 %2739  ;;  %v10145_v61 = vpop.permute.xlu0 %3876 }
 0x61f   :  { %13320 = vst [vmem:[#allocation101_spill] sm:$0xff] %v10143_v44  ;;  %v3875_v31 = vpop.permute.xlu1 %3874  ;;  %v13359_v44 = vld [vmem:[#allocation20_spill] sm:$0xff] }
 0x620   :  { %v4885_v18 = vsel %vm4874_vm6, %v4804_v30, %v3875_v31  ;;  %v13329_v31 = vld [vmem:[#allocation280_spill] sm:$0xff] }
 0x621   :  { %v4966_v22 = vsel %vm4955_vm8, %v4885_v18, %v10130_v48 }
 0x624   :  { %3663 = vrot.lane.b32.xlu2 %v10052_v49, %s6507_s1  ;;  %4097 = vrot.lane.b32.xlu0 %v10092_v39, %s6506_s19 }
 0x625   :  { %4095 = vrot.lane.b32.xlu1 %v10052_v49, %s6506_s19  ;;  %v13350_v49 = vld [vmem:[#allocation284_spill] sm:$0xff] }
 0x626   :  { %v10153_v37 = vpop.permute.xlu2 %2956  ;;  %v10157_v51 = vpop.permute.xlu0 %3655 }
 0x627   :  { %13321 = vst [vmem:[#allocation119_spill] sm:$0xff] %v10153_v37  ;;  %v10155_v7 = vpop.permute.xlu1 %3653 }
 0x62c   :  { %4305 = vrot.lane.b32.xlu2 %v10092_v39, %s6508_s14  ;;  %3449 = vrot.lane.b32.xlu0 %v8530_v21, %s6510_s25 }
 0x62d   :  { %3886 = vrot.lane.b32.xlu1 %v10092_v39, %s6505_s18 }
 0x62e   :  { %v10165_v43 = vpop.permute.xlu2 %3181  ;;  %v4298_v0 = vpop.permute.xlu0 %4297 }
 0x62f   :  { %v10167_v47 = vpop.permute.xlu1 %2737 }
 0x630   :  { %13322 = vst [vmem:[#allocation333_spill] sm:$0xff] %v10167_v47  ;;  %v13360_v47 = vld [vmem:[#allocation329_spill] sm:$0xff] }
 0x634   :  { %3427 = vrot.lane.b32.xlu2 %v10092_v39, %s6510_s25  ;;  %4139 = vrot.lane.b32.xlu0 %v8859_v33, %s6506_s19 }
 0x635   :  { %3665 = vrot.lane.b32.xlu1 %v10092_v39, %s6507_s1  ;;  %v13349_v39 = vld [vmem:[#allocation67_spill] sm:$0xff] }
 0x636   :  { %v10175_v29 = vpop.permute.xlu2 %3878  ;;  %v10179_v62 = vpop.permute.xlu0 %3419  ;;  %v4489_v12 = vsel %vm4484_vm2, %v13350_v49, %v13349_v39 }
 0x637   :  { %v10177_v3 = vpop.permute.xlu1 %2954 }
 0x63c   :  { %3926 = vrot.lane.b32.xlu2 %v8843_v34, %s6505_s18  ;;  %3691 = vrot.lane.b32.xlu0 %v8645_v8, %s6507_s1 }
 0x63d   :  { %3689 = vrot.lane.b32.xlu1 %v8571_v27, %s6507_s1 }
 0x63e   :  { %v10189_v19 = vpop.permute.xlu2 %3657  ;;  %v10195_v24 = vpop.permute.xlu0 %2741 }
 0x63f   :  { %v10191_v1 = vpop.permute.xlu1 %3179  ;;  %13323 = vst [vmem:[#allocation334_spill] sm:$0xff] %v10195_v24  ;;  %v13353_v24 = vld [vmem:[#allocation332_spill] sm:$0xff] }
 0x644   :  { %3451 = vrot.lane.b32.xlu2 %v8571_v27, %s6510_s25  ;;  %4351 = vrot.lane.b32.xlu0 %v8916_v2, %s6508_s14  ;;  %v13347_v27 = vld [vmem:[#allocation236_spill] sm:$0xff] }
 0x645   :  { %4349 = vrot.lane.b32.xlu1 %v8920_v52, %s6508_s14 }
 0x646   :  { %v4300_v17 = vpop.permute.xlu2 %4299  ;;  %v10218_v36 = vpop.permute.xlu0 %2958 }
 0x647   :  { %v4296_v28 = vpop.permute.xlu1 %4295  ;;  %13324 = vst [vmem:[#allocation335_spill] sm:$0xff] %v10218_v36  ;;  %v13354_v36 = vld [vmem:[#allocation48_spill] sm:$0xff] }
 0x648   :  { %v5046_v32 = vsel %vm5036_vm10, %v4965_v63, %v4296_v28  ;;  %v4488_v63 = vsel %vm4484_vm2, %v13329_v31, %v13328_v13  ;;  %v5047_v28 = vsel %vm5036_vm10, %v4966_v22, %v4298_v0  ;;  %v13333_v0 = vld [vmem:[#allocation136_spill] sm:$0xff]  ;;  %v10267_v31 = vpop.f32.mrf.mxu1 }
 0x649   :  { %6369 = vmatmul.msk.f32.gmra.mxu1 %vm5126_vm9, %v5046_v32  ;;  %v13330_v32 = vld [vmem:[#allocation125_spill] sm:$0xff]  ;;  %13334 = vst [vmem:[#allocation325_spill] sm:$0xff] %v10267_v31 }
 0x64a   :  { %v4562_v41 = vsel %vm4557_vm3, %v4488_v63, %v13330_v32  ;;  %v13335_v32 = vld [vmem:[#allocation272_spill] sm:$0xff] }
 0x64b   :  { %v4643_v25 = vsel %vm4631_vm4, %v4562_v41, %v13331_v46 }
 0x64c   :  { %4141 = vrot.lane.b32.xlu2 %v8920_v52, %s6506_s19  ;;  %3930 = vrot.lane.b32.xlu0 %v8920_v52, %s6505_s18  ;;  %v4724_v48 = vsel %vm4712_vm5, %v4643_v25, %v9841_v42 }
 0x64d   :  { %3928 = vrot.lane.b32.xlu1 %v8859_v33, %s6505_s18  ;;  %v4805_v30 = vsel %vm4793_vm7, %v4724_v48, %v13333_v0  ;;  %v13339_v48 = vld [vmem:[#allocation219_spill] sm:$0xff] }
 0x64e   :  { %v10236_v26 = vpop.permute.xlu2 %3421  ;;  %v10246_v4 = vpop.permute.xlu0 %3183  ;;  %v4886_v22 = vsel %vm4874_vm6, %v4805_v30, %v10145_v61 }
 0x64f   :  { %v10240_v60 = vpop.permute.xlu1 %3417 }
 0x650   :  { %v10282_v25 = vpop.f32.mrf.mxu1 }
 0x651   :  { %6370 = vmatmul.msk.f32.gmra.mxu1 %vm5126_vm9, %v5047_v28  ;;  %13337 = vst [vmem:[#allocation280_spill] sm:$0xff] %v10282_v25 }
 0x654   :  { %3693 = vrot.lane.b32.xlu2 %v13332_v58, %s6507_s1  ;;  %3455 = vrot.lane.b32.xlu0 %v13332_v58, %s6510_s25 }
 0x655   :  { %3453 = vrot.lane.b32.xlu1 %v8645_v8, %s6510_s25 }
 0x656   :  { %v10263_v18 = vpop.permute.xlu2 %4093  ;;  %v4092_v63 = vpop.permute.xlu0 %4091 }
 0x657   :  { %v4090_v13 = vpop.permute.xlu1 %4089 }
 0x658   :  { %v4967_v42 = vsel %vm4955_vm8, %v4886_v22, %v4090_v13  ;;  %v10296_v13 = vpop.f32.mrf.mxu1 }
 0x659   :  { %v5048_v28 = vsel %vm5036_vm10, %v4967_v42, %v4300_v17  ;;  %v13338_v17 = vld [vmem:[#allocation232_spill] sm:$0xff]  ;;  %13341 = vst [vmem:[#allocation323_spill] sm:$0xff] %v10296_v13 }
 0x65a   :  { %6371 = vmatmul.msk.f32.gmra.mxu1 %vm5126_vm9, %v5048_v28  ;;  %v13342_v42 = vld [vmem:[#allocation80_spill] sm:$0xff]  ;;  %v13343_v28 = vld [vmem:[#allocation111_spill] sm:$0xff] }
 0x65c   :  { %4353 = vrot.lane.b32.xlu2 %v13335_v32, %s6508_s14  ;;  %4145 = vrot.lane.b32.xlu0 %v13335_v32, %s6506_s19 }
 0x65d   :  { %4143 = vrot.lane.b32.xlu1 %v8916_v2, %s6506_s19 }
 0x65e   :  { %v10278_v61 = vpop.permute.xlu2 %2745  ;;  %v10280_v46 = vpop.permute.xlu0 %3882 }
 0x65f   :  { %13336 = vst [vmem:[#allocation49_spill] sm:$0xff] %v10278_v61  ;;  %v3881_v41 = vpop.permute.xlu1 %3880 }
 0x660   :  { %v10308_v58 = vpop.f32.mrf.mxu1 }
 0x661   :  { %13345 = vst [vmem:[#allocation336_spill] sm:$0xff] %v10308_v58 }
 0x664   :  { %3932 = vrot.lane.b32.xlu2 %v8916_v2, %s6505_s18  ;;  %3697 = vrot.lane.b32.xlu0 %v13338_v17, %s6507_s1 }
 0x665   :  { %3695 = vrot.lane.b32.xlu1 %v13339_v48, %s6507_s1 }
 0x666   :  { %v10290_v0 = vpop.permute.xlu2 %2962  ;;  %v10294_v22 = vpop.permute.xlu0 %3661 }
 0x667   :  { %13340 = vst [vmem:[#allocation125_spill] sm:$0xff] %v10290_v0  ;;  %v10292_v30 = vpop.permute.xlu1 %3659  ;;  %v13351_v0 = vld [vmem:[#allocation21_spill] sm:$0xff] }
 0x668   :  { %v10328_v58 = vpop.f32.mrf.mxu1 }
 0x669   :  { %13348 = vst [vmem:[#allocation338_spill] sm:$0xff] %v10328_v58  ;;  %v13355_v58 = vld [vmem:[#allocation114_spill] sm:$0xff] }
 0x66c   :  { %3457 = vrot.lane.b32.xlu2 %v13339_v48, %s6510_s25  ;;  %4357 = vrot.lane.b32.xlu0 %v13342_v42, %s6508_s14 }
 0x66d   :  { %4355 = vrot.lane.b32.xlu1 %v13343_v28, %s6508_s14 }
 0x66e   :  { %v10304_v14 = vpop.permute.xlu2 %3187  ;;  %v4304_v25 = vpop.permute.xlu0 %4303 }
 0x66f   :  { %v10306_v31 = vpop.permute.xlu1 %2743 }
 0x670   :  { %13344 = vst [vmem:[#allocation136_spill] sm:$0xff] %v10306_v31  ;;  %v4563_v31 = vsel %vm4557_vm3, %v4489_v12, %v13351_v0 }
 0x674   :  { %4147 = vrot.lane.b32.xlu2 %v13343_v28, %s6506_s19  ;;  %3936 = vrot.lane.b32.xlu0 %v13343_v28, %s6505_s18 }
 0x675   :  { %3934 = vrot.lane.b32.xlu1 %v13335_v32, %s6505_s18 }
 0x676   :  { %v10316_v13 = vpop.permute.xlu2 %3884  ;;  %v10320_v8 = vpop.permute.xlu0 %3425 }
 0x677   :  { %v10318_v48 = vpop.permute.xlu1 %2960 }
 0x678   :  { %13346 = vst [vmem:[#allocation337_spill] sm:$0xff] %v10318_v48 }
 0x67c   :  { %3699 = vrot.lane.b32.xlu2 %v13347_v27, %s6507_s1  ;;  %3461 = vrot.lane.b32.xlu0 %v13347_v27, %s6510_s25  ;;  %v4644_v27 = vsel %vm4631_vm4, %v4563_v31, %v13353_v24  ;;  %v13357_v31 = vld [vmem:[#allocation90_spill] sm:$0xff] }
 0x67d   :  { %3459 = vrot.lane.b32.xlu1 %v13338_v17, %s6510_s25  ;;  %v4725_v17 = vsel %vm4712_vm5, %v4644_v27, %v13354_v36  ;;  %v13358_v27 = vld [vmem:[#allocation3_spill] sm:$0xff] }
 0x67e   :  { %v10330_v21 = vpop.permute.xlu2 %3663  ;;  %v10339_v48 = vpop.permute.xlu0 %2747  ;;  %v4806_v49 = vsel %vm4793_vm7, %v4725_v17, %v9888_v20  ;;  %v4490_v36 = vsel %vm4484_vm2, %v13358_v27, %v13357_v31 }
 0x67f   :  { %v10335_v61 = vpop.permute.xlu1 %3185  ;;  %13352 = vst [vmem:[#allocation67_spill] sm:$0xff] %v10339_v48  ;;  %v4887_v12 = vsel %vm4874_vm6, %v4806_v49, %v10175_v29  ;;  %v4564_v37 = vsel %vm4557_vm3, %v4490_v36, %v13359_v44  ;;  %v13361_v44 = vld [vmem:[#allocation253_spill] sm:$0xff] }
 0x680   :  { %v4968_v0 = vsel %vm4955_vm8, %v4887_v12, %v4092_v63  ;;  %v4645_v29 = vsel %vm4631_vm4, %v4564_v37, %v13360_v47 }
 0x681   :  { %v4726_v49 = vsel %vm4712_vm5, %v4645_v29, %v9835_v23 }
 0x682   :  { %v4807_v31 = vsel %vm4793_vm7, %v4726_v49, %v9884_v50  ;;  %v13364_v50 = vld [vmem:[#allocation23_spill] sm:$0xff] }
 0x683   :  { %v4888_v63 = vsel %vm4874_vm6, %v4807_v31, %v3881_v41  ;;  %v13365_v41 = vld [vmem:[#allocation298_spill] sm:$0xff]  ;;  %v13367_v31 = vld [vmem:[#allocation29_spill] sm:$0xff] }
 0x684   :  { %4359 = vrot.lane.b32.xlu2 %v13355_v58, %s6508_s14  ;;  %4151 = vrot.lane.b32.xlu0 %v13355_v58, %s6506_s19  ;;  %v4969_v23 = vsel %vm4955_vm8, %v4888_v63, %v10263_v18  ;;  %v4491_v27 = vsel %vm4484_vm2, %v13365_v41, %v13364_v50  ;;  %v13368_v63 = vld [vmem:[#allocation299_spill] sm:$0xff]  ;;  %v13371_v41 = vld [vmem:[#allocation76_spill] sm:$0xff] }
 0x685   :  { %4149 = vrot.lane.b32.xlu1 %v13342_v42, %s6506_s19  ;;  %v5050_v36 = vsel %vm5036_vm10, %v4969_v23, %v4304_v25  ;;  %v13369_v25 = vld [vmem:[#allocation8_spill] sm:$0xff]  ;;  %v13370_v23 = vld [vmem:[#allocation61_spill] sm:$0xff] }
 0x686   :  { %v10355_v39 = vpop.f32.mrf.mxu1  ;;  %v4306_v24 = vpop.permute.xlu2 %4305 }
 0x687   :  { %13356 = vst [vmem:[#allocation284_spill] sm:$0xff] %v10355_v39  ;;  %v4302_v48 = vpop.permute.xlu1 %4301  ;;  %v10364_v17 = vpop.permute.xlu0 %2964  ;;  %v4492_v39 = vsel %vm4484_vm2, %v13368_v63, %v13367_v31 }
 0x688   :  { %v5049_v20 = vsel %vm5036_vm10, %v4968_v0, %v4302_v48  ;;  %v13362_v48 = vld [vmem:[#allocation240_spill] sm:$0xff] }
 0x689   :  { %6372 = vmatmul.msk.f32.gmra.mxu1 %vm5126_vm9, %v5049_v20  ;;  %v13366_v20 = vld [vmem:[#allocation312_spill] sm:$0xff] }
 0x68a   :  { %v4565_v29 = vsel %vm4557_vm3, %v4491_v27, %v13366_v20 }
 0x68b   :  { %v4646_v49 = vsel %vm4631_vm4, %v4565_v29, %v9837_v10 }
 0x68c   :  { %3938 = vrot.lane.b32.xlu2 %v13342_v42, %s6505_s18  ;;  %3703 = vrot.lane.b32.xlu0 %v13361_v44, %s6507_s1  ;;  %v4727_v18 = vsel %vm4712_vm5, %v4646_v49, %v9976_v55  ;;  %v4566_v55 = vsel %vm4557_vm3, %v4492_v39, %v13371_v41 }
 0x68d   :  { %3701 = vrot.lane.b32.xlu1 %v13362_v48, %s6507_s1  ;;  %v4808_v50 = vsel %vm4793_vm7, %v4727_v18, %v9925_v5  ;;  %v4647_v29 = vsel %vm4631_vm4, %v4566_v55, %v9929_v38 }
 0x68e   :  { %v10380_v37 = vpop.f32.mrf.mxu1  ;;  %v10382_v47 = vpop.permute.xlu2 %3427  ;;  %v4889_v27 = vsel %vm4874_vm6, %v4808_v50, %v10280_v46  ;;  %v4728_v5 = vsel %vm4712_vm5, %v4647_v29, %v9911_v40  ;;  %v13372_v46 = vld [vmem:[#allocation308_spill] sm:$0xff]  ;;  %v13376_v29 = vld [vmem:[#allocation158_spill] sm:$0xff] }
 0x68f   :  { %13363 = vst [vmem:[#allocation21_spill] sm:$0xff] %v10380_v37  ;;  %v10386_v12 = vpop.permute.xlu1 %3423  ;;  %v10392_v0 = vpop.permute.xlu0 %3189  ;;  %v4809_v39 = vsel %vm4793_vm7, %v4728_v5, %v10023_v54  ;;  %v13374_v54 = vld [vmem:[#allocation77_spill] sm:$0xff]  ;;  %v13378_v5 = vld [vmem:[#allocation14_spill] sm:$0xff] }
 0x690   :  { %v4890_v38 = vsel %vm4874_vm6, %v4809_v39, %v10316_v13 }
 0x691   :  { %6373 = vmatmul.msk.f32.gmra.mxu1 %vm5126_vm9, %v5050_v36 }
 0x694   :  { %3463 = vrot.lane.b32.xlu2 %v13362_v48, %s6510_s25  ;;  %4363 = vrot.lane.b32.xlu0 %v13369_v25, %s6508_s14  ;;  %v13469_v48 = vld [vmem:[#allocation276_spill] sm:$0xff] }
 0x695   :  { %4361 = vrot.lane.b32.xlu1 %v13370_v23, %s6508_s14 }
 0x696   :  { %v10412_v10 = vpop.permute.xlu2 %3926 }
 0x697   :  { %v5408_v36 = vpop.f32.mrf.mxu1  ;;  %v4096_v20 = vpop.permute.xlu1 %4095 }
 0x698   :  { %v4970_v49 = vsel %vm4955_vm8, %v4889_v27, %v4096_v20  ;;  %v4098_v31 = vpop.permute.xlu0 %4097  ;;  %v13375_v27 = vld [vmem:[#allocation91_spill] sm:$0xff] }
 0x699   :  { %v5051_v63 = vsel %vm5036_vm10, %v4970_v49, %v4306_v24  ;;  %v13373_v24 = vld [vmem:[#allocation13_spill] sm:$0xff]  ;;  %v4971_v40 = vsel %vm4955_vm8, %v4890_v38, %v4098_v31 }
 0x69a   :  { %6374 = vmatmul.msk.f32.gmra.mxu1 %vm5126_vm9, %v5051_v63  ;;  %v4493_v18 = vsel %vm4484_vm2, %v13373_v24, %v13372_v46  ;;  %v5052_v49 = vsel %vm5036_vm10, %v4971_v40, %v13376_v29  ;;  %v13377_v63 = vld [vmem:[#allocation311_spill] sm:$0xff]  ;;  %v13379_v38 = vld [vmem:[#allocation81_spill] sm:$0xff] }
 0x69b   :  { %v4567_v41 = vsel %vm4557_vm3, %v4493_v18, %v13374_v54  ;;  %v4494_v31 = vsel %vm4484_vm2, %v13378_v5, %v13377_v63  ;;  %v13385_v5 = vld [vmem:[#allocation142_spill] sm:$0xff] }
 0x69c   :  { %4153 = vrot.lane.b32.xlu2 %v13370_v23, %s6506_s19  ;;  %3942 = vrot.lane.b32.xlu0 %v13370_v23, %s6505_s18  ;;  %v4648_v36 = vsel %vm4631_vm4, %v4567_v41, %v13375_v27  ;;  %v4568_v46 = vsel %vm4557_vm3, %v4494_v31, %v13379_v38  ;;  %v13386_v38 = vld [vmem:[#allocation116_spill] sm:$0xff] }
 0x69d   :  { %3940 = vrot.lane.b32.xlu1 %v13355_v58, %s6505_s18  ;;  %v4729_v13 = vsel %vm4712_vm5, %v4648_v36, %v9970_v6  ;;  %v4649_v6 = vsel %vm4631_vm4, %v4568_v46, %v9972_v35  ;;  %v13381_v35 = vld [vmem:[#allocation103_spill] sm:$0xff]  ;;  %v13387_v46 = vld [vmem:[#allocation166_spill] sm:$0xff] }
 0x69e   :  { %v10439_v50 = vpop.permute.xlu2 %3451  ;;  %v4810_v39 = vsel %vm4793_vm7, %v4729_v13, %v10019_v56  ;;  %v4730_v18 = vsel %vm4712_vm5, %v4649_v6, %v10109_v9  ;;  %v13380_v56 = vld [vmem:[#allocation133_spill] sm:$0xff]  ;;  %v13383_v9 = vld [vmem:[#allocation150_spill] sm:$0xff] }
 0x69f   :  { %v3887_v55 = vpop.permute.xlu1 %3886  ;;  %v4811_v36 = vsel %vm4793_vm7, %v4730_v18, %v10060_v11 }
 0x6a0   :  { %v10445_v20 = vpop.permute.xlu0 %3449  ;;  %v4891_v24 = vsel %vm4874_vm6, %v4810_v39, %v3887_v55  ;;  %v13382_v55 = vld [vmem:[#allocation88_spill] sm:$0xff]  ;;  %v4892_v31 = vsel %vm4874_vm6, %v4811_v36, %v13385_v5  ;;  %v13390_v36 = vld [vmem:[#allocation317_spill] sm:$0xff] }
 0x6a1   :  { %v4972_v40 = vsel %vm4955_vm8, %v4891_v24, %v13380_v56  ;;  %v4495_v27 = vsel %vm4484_vm2, %v13382_v55, %v13381_v35  ;;  %v4973_v24 = vsel %vm4955_vm8, %v4892_v31, %v13387_v46  ;;  %v13389_v55 = vld [vmem:[#allocation146_spill] sm:$0xff]  ;;  %v13393_v5 = vld [vmem:[#allocation172_spill] sm:$0xff] }
 0x6a2   :  { %6375 = vmatmul.msk.f32.gmra.mxu1 %vm5126_vm9, %v5052_v49  ;;  %v5053_v29 = vsel %vm5036_vm10, %v4972_v40, %v13383_v9  ;;  %v13384_v49 = vld [vmem:[#allocation320_spill] sm:$0xff]  ;;  %v13388_v40 = vld [vmem:[#allocation157_spill] sm:$0xff]  ;;  %v13391_v9 = vld [vmem:[#allocation147_spill] sm:$0xff] }
 0x6a3   :  { %v4569_v63 = vsel %vm4557_vm3, %v4495_v27, %v13384_v49  ;;  %v5054_v35 = vsel %vm5036_vm10, %v4973_v24, %v13388_v40 }
 0x6a4   :  { %3705 = vrot.lane.b32.xlu2 %v8843_v34, %s6507_s1  ;;  %3467 = vrot.lane.b32.xlu0 %v8843_v34, %s6510_s25  ;;  %v4650_v39 = vsel %vm4631_vm4, %v4569_v63, %v10064_v57  ;;  %v13457_v34 = vld [vmem:[#allocation247_spill] sm:$0xff] }
 0x6a5   :  { %3465 = vrot.lane.b32.xlu1 %v13361_v44, %s6510_s25  ;;  %v4731_v6 = vsel %vm4712_vm5, %v4650_v39, %v10046_v16  ;;  %v13392_v16 = vld [vmem:[#allocation41_spill] sm:$0xff] }
 0x6a6   :  { %v10472_v54 = vpop.permute.xlu2 %4141  ;;  %v4812_v57 = vsel %vm4793_vm7, %v4731_v6, %v10155_v7 }
 0x6a7   :  { %v10474_v41 = vpop.permute.xlu1 %3665  ;;  %v4893_v27 = vsel %vm4874_vm6, %v4812_v57, %v13389_v55  ;;  %v13394_v57 = vld [vmem:[#allocation192_spill] sm:$0xff] }
 0x6a8   :  { %v10481_v13 = vpop.permute.xlu0 %4139  ;;  %v4974_v31 = vsel %vm4955_vm8, %v4893_v27, %v13393_v5  ;;  %v13397_v27 = vld [vmem:[#allocation87_spill] sm:$0xff]  ;;  %v13401_v5 = vld [vmem:[#allocation165_spill] sm:$0xff] }
 0x6a9   :  { %v5055_v40 = vsel %vm5036_vm10, %v4974_v31, %v13394_v57 }
 0x6aa   :  { %6376 = vmatmul.msk.f32.gmra.mxu1 %vm5126_vm9, %v5053_v29  ;;  %v4496_v29 = vsel %vm4484_vm2, %v13391_v9, %v13390_v36 }
 0x6ab   :  { %v4570_v7 = vsel %vm4557_vm3, %v4496_v29, %v13392_v16  ;;  %v13399_v29 = vld [vmem:[#allocation17_spill] sm:$0xff] }
 0x6ac   :  { %4365 = vrot.lane.b32.xlu2 %v13386_v38, %s6508_s14  ;;  %4157 = vrot.lane.b32.xlu0 %v13386_v38, %s6506_s19  ;;  %v4651_v49 = vsel %vm4631_vm4, %v4570_v7, %v10033_v59  ;;  %v13396_v59 = vld [vmem:[#allocation124_spill] sm:$0xff]  ;;  %v13400_v7 = vld [vmem:[#allocation70_spill] sm:$0xff] }
 0x6ad   :  { %4155 = vrot.lane.b32.xlu1 %v13369_v25, %s6506_s19  ;;  %v4732_v39 = vsel %vm4712_vm5, %v4651_v49, %v10105_v15  ;;  %v13398_v15 = vld [vmem:[#allocation171_spill] sm:$0xff] }
 0x6ae   :  { %v10498_v11 = vpop.permute.xlu2 %3693  ;;  %v4813_v24 = vsel %vm4793_vm7, %v4732_v39, %v10157_v51 }
 0x6af   :  { %v10504_v18 = vpop.permute.xlu1 %3689  ;;  %v4894_v9 = vsel %vm4874_vm6, %v4813_v24, %v13398_v15  ;;  %v13403_v24 = vld [vmem:[#allocation25_spill] sm:$0xff] }
 0x6b0   :  { %v10508_v56 = vpop.permute.xlu0 %3691  ;;  %v4975_v31 = vsel %vm4955_vm8, %v4894_v9, %v13401_v5  ;;  %v13407_v5 = vld [vmem:[#allocation200_spill] sm:$0xff] }
 0x6b2   :  { %6377 = vmatmul.msk.f32.gmra.mxu1 %vm5126_vm9, %v5054_v35  ;;  %v13395_v35 = vld [vmem:[#allocation79_spill] sm:$0xff] }
 0x6b3   :  { %v4497_v55 = vsel %vm4484_vm2, %v13396_v59, %v13395_v35 }
 0x6b4   :  { %3944 = vrot.lane.b32.xlu2 %v13369_v25, %s6505_s18  ;;  %3709 = vrot.lane.b32.xlu0 %v8920_v52, %s6507_s1  ;;  %v4571_v36 = vsel %vm4557_vm3, %v4497_v55, %v13397_v27  ;;  %v13405_v55 = vld [vmem:[#allocation85_spill] sm:$0xff] }
 0x6b5   :  { %3707 = vrot.lane.b32.xlu1 %v8859_v33, %s6507_s1  ;;  %v4652_v51 = vsel %vm4631_vm4, %v4571_v36, %v10111_v53  ;;  %v13402_v53 = vld [vmem:[#allocation330_spill] sm:$0xff]  ;;  %v13406_v36 = vld [vmem:[#allocation176_spill] sm:$0xff] }
 0x6b6   :  { %v10528_v63 = vpop.permute.xlu2 %4353  ;;  %v4733_v16 = vsel %vm4712_vm5, %v4652_v51, %v10240_v60  ;;  %v4498_v57 = vsel %vm4484_vm2, %v13403_v24, %v13402_v53  ;;  %v13404_v60 = vld [vmem:[#allocation185_spill] sm:$0xff] }
 0x6b7   :  { %v10534_v46 = vpop.permute.xlu1 %4349  ;;  %v5056_v59 = vsel %vm5036_vm10, %v4975_v31, %v13404_v60  ;;  %v4572_v27 = vsel %vm4557_vm3, %v4498_v57, %v13405_v55 }
 0x6b8   :  { %v10538_v6 = vpop.permute.xlu0 %4351  ;;  %v4653_v9 = vsel %vm4631_vm4, %v4572_v27, %v10191_v1  ;;  %v13410_v27 = vld [vmem:[#allocation328_spill] sm:$0xff] }
 0x6b9   :  { %v4734_v1 = vsel %vm4712_vm5, %v4653_v9, %v10179_v62  ;;  %v13412_v62 = vld [vmem:[#allocation22_spill] sm:$0xff] }
 0x6ba   :  { %6378 = vmatmul.msk.f32.gmra.mxu1 %vm5126_vm9, %v5055_v40  ;;  %v4814_v40 = vsel %vm4793_vm7, %v4733_v16, %v10189_v19  ;;  %v5827_v19 = vld [vmem:[%s12627_s4 + $0x1f0] sm:$0xff]  ;;  %v4815_v24 = vsel %vm4793_vm7, %v4734_v1, %v10292_v30  ;;  %v13413_v30 = vld [vmem:[#allocation139_spill] sm:$0xff] }
 0x6bb   :  { %v4895_v15 = vsel %vm4874_vm6, %v4814_v40, %v13406_v36  ;;  %5855 = vmatpush.msrb.mxu3 %v5827_v19  ;;  %v13408_v40 = vld [vmem:[#allocation190_spill] sm:$0xff] }
 0x6bc   :  { %3469 = vrot.lane.b32.xlu2 %v8859_v33, %s6510_s25  ;;  %4369 = vrot.lane.b32.xlu0 %v13399_v29, %s6508_s14  ;;  %v4976_v31 = vsel %vm4955_vm8, %v4895_v15, %v13407_v5  ;;  %v13411_v36 = vld [vmem:[#allocation26_spill] sm:$0xff]  ;;  %v13414_v5 = vld [vmem:[#allocation205_spill] sm:$0xff] }
 0x6bd   :  { %4367 = vrot.lane.b32.xlu1 %v13400_v7, %s6508_s14  ;;  %v5057_v60 = vsel %vm5036_vm10, %v4976_v31, %v13408_v40  ;;  %v4499_v15 = vsel %vm4484_vm2, %v13411_v36, %v13410_v27  ;;  %v13416_v36 = vld [vmem:[#allocation331_spill] sm:$0xff] }
 0x6be   :  { %v10560_v49 = vpop.permute.xlu2 %3932  ;;  %v4573_v9 = vsel %vm4557_vm3, %v4499_v15, %v13413_v30 }
 0x6bf   :  { %v10564_v39 = vpop.permute.xlu1 %3928  ;;  %v4654_v19 = vsel %vm4631_vm4, %v4573_v9, %v10165_v43  ;;  %v13417_v43 = vld [vmem:[#allocation100_spill] sm:$0xff] }
 0x6c0   :  { %v10571_v35 = vpop.permute.xlu0 %3930  ;;  %v4735_v1 = vsel %vm4712_vm5, %v4654_v19, %v10236_v26  ;;  %v4500_v15 = vsel %vm4484_vm2, %v13417_v43, %v13416_v36  ;;  %v13419_v26 = vld [vmem:[#allocation204_spill] sm:$0xff] }
 0x6c1   :  { %v4816_v40 = vsel %vm4793_vm7, %v4735_v1, %v10294_v22 }
 0x6c2   :  { %6379 = vmatmul.msk.f32.gmra.mxu1 %vm5126_vm9, %v5056_v59  ;;  %v13409_v59 = vld [vmem:[#allocation181_spill] sm:$0xff]  ;;  %v4897_v9 = vsel %vm4874_vm6, %v4816_v40, %v13419_v26  ;;  %v13425_v26 = vld [vmem:[#allocation208_spill] sm:$0xff] }
 0x6c3   :  { %v4896_v55 = vsel %vm4874_vm6, %v4815_v24, %v13409_v59  ;;  %v13415_v59 = vld [vmem:[#allocation222_spill] sm:$0xff] }
 0x6c4   :  { %4159 = vrot.lane.b32.xlu2 %v13400_v7, %s6506_s19  ;;  %3711 = vrot.lane.b32.xlu0 %v8916_v2, %s6507_s1  ;;  %v4977_v31 = vsel %vm4955_vm8, %v4896_v55, %v13414_v5  ;;  %v13418_v55 = vld [vmem:[#allocation56_spill] sm:$0xff] }
 0x6c5   :  { %3946 = vrot.lane.b32.xlu1 %v13386_v38, %s6505_s18  ;;  %v5058_v27 = vsel %vm5036_vm10, %v4977_v31, %v13415_v59  ;;  %v4574_v30 = vsel %vm4557_vm3, %v4500_v15, %v13418_v55  ;;  %v13420_v31 = vld [vmem:[#allocation199_spill] sm:$0xff]  ;;  %v13422_v59 = vld [vmem:[#allocation313_spill] sm:$0xff]  ;;  %v13424_v55 = vld [vmem:[#allocation108_spill] sm:$0xff] }
 0x6c6   :  { %v5410_v51 = vpop.f32.mrf.mxu1  ;;  %v10591_v16 = vpop.permute.xlu2 %3457  ;;  %v4655_v22 = vsel %vm4631_vm4, %v4574_v30, %v10246_v4  ;;  %v4978_v1 = vsel %vm4955_vm8, %v4897_v9, %v13420_v31  ;;  %v13421_v4 = vld [vmem:[#allocation110_spill] sm:$0xff]  ;;  %v13427_v31 = vld [vmem:[#allocation228_spill] sm:$0xff] }
 0x6c7   :  { %v10597_v53 = vpop.permute.xlu1 %3453  ;;  %v4736_v19 = vsel %vm4712_vm5, %v4655_v22, %v10386_v12  ;;  %v13423_v12 = vld [vmem:[#allocation216_spill] sm:$0xff] }
 0x6c8   :  { %v10601_v57 = vpop.permute.xlu0 %3455  ;;  %v4817_v36 = vsel %vm4793_vm7, %v4736_v19, %v10330_v21  ;;  %v5059_v15 = vsel %vm5036_vm10, %v4978_v1, %v13423_v12  ;;  %v13426_v21 = vld [vmem:[#allocation127_spill] sm:$0xff] }
 0x6c9   :  { %v4898_v9 = vsel %vm4874_vm6, %v4817_v36, %v13425_v26  ;;  %v13428_v36 = vld [vmem:[#allocation221_spill] sm:$0xff]  ;;  %v13431_v26 = vld [vmem:[#allocation59_spill] sm:$0xff] }
 0x6ca   :  { %6380 = vmatmul.msk.f32.gmra.mxu1 %vm5126_vm9, %v5057_v60  ;;  %v4979_v1 = vsel %vm4955_vm8, %v4898_v9, %v13427_v31 }
 0x6cb   :  { %v5060_v12 = vsel %vm5036_vm10, %v4979_v1, %v13428_v36  ;;  %v13433_v36 = vld [vmem:[#allocation233_spill] sm:$0xff] }
 0x6cc   :  { %3471 = vrot.lane.b32.xlu2 %v8920_v52, %s6510_s25  ;;  %4371 = vrot.lane.b32.xlu0 %v13412_v62, %s6508_s14 }
 0x6cd   :  { %3231 = vrot.lane.b32.xlu1 %v8859_v33, %s6509_s15  ;;  %v13449_v33 = vld [vmem:[#allocation237_spill] sm:$0xff] }
 0x6ce   :  { %v10621_v51 = vpop.permute.xlu2 %4147 }
 0x6cf   :  { %v10627_v24 = vpop.permute.xlu1 %4143 }
 0x6d0   :  { %v10631_v60 = vpop.permute.xlu0 %4145 }
 0x6d2   :  { %6381 = vmatmul.msk.f32.gmra.mxu1 %vm5126_vm9, %v5058_v27  ;;  %v4501_v27 = vsel %vm4484_vm2, %v13422_v59, %v13421_v4 }
 0x6d3   :  { %v4575_v30 = vsel %vm4557_vm3, %v4501_v27, %v13424_v55  ;;  %v13430_v55 = vld [vmem:[#allocation38_spill] sm:$0xff] }
 0x6d4   :  { %4161 = vrot.lane.b32.xlu2 %v13399_v29, %s6506_s19  ;;  %3713 = vrot.lane.b32.xlu0 %v13335_v32, %s6507_s1  ;;  %v4656_v22 = vsel %vm4631_vm4, %v4575_v30, %v10335_v61 }
 0x6d5   :  { %3948 = vrot.lane.b32.xlu1 %v13400_v7, %s6505_s18  ;;  %v4737_v4 = vsel %vm4712_vm5, %v4656_v22, %v10320_v8  ;;  %v5795_v8 = vld [vmem:[%s12627_s4 + $0xf0] sm:$0xff]  ;;  %v13432_v22 = vld [vmem:[#allocation213_spill] sm:$0xff] }
 0x6d6   :  { %v10653_v5 = vpop.permute.xlu2 %3699  ;;  %v4818_v61 = vsel %vm4793_vm7, %v4737_v4, %v10474_v41  ;;  %5835 = vmatpush.msrb.mxu2 %v5795_v8 }
 0x6d7   :  { %v10657_v40 = vpop.permute.xlu1 %3695  ;;  %v4899_v41 = vsel %vm4874_vm6, %v4818_v61, %v13432_v22  ;;  %v13438_v22 = vld [vmem:[#allocation249_spill] sm:$0xff] }
 0x6d8   :  { %v10664_v43 = vpop.permute.xlu0 %3697  ;;  %v4980_v61 = vsel %vm4955_vm8, %v4899_v41, %v13433_v36  ;;  %v13439_v36 = vld [vmem:[#allocation231_spill] sm:$0xff] }
 0x6da   :  { %6382 = vmatmul.msk.f32.gmra.mxu1 %vm5126_vm9, %v5059_v15  ;;  %v13429_v15 = vld [vmem:[#allocation89_spill] sm:$0xff] }
 0x6db   :  { %v4502_v30 = vsel %vm4484_vm2, %v13430_v55, %v13429_v15  ;;  %v13435_v15 = vld [vmem:[#allocation104_spill] sm:$0xff] }
 0x6dc   :  { %3473 = vrot.lane.b32.xlu2 %v8916_v2, %s6510_s25  ;;  %4373 = vrot.lane.b32.xlu0 %v13426_v21, %s6508_s14  ;;  %v4576_v9 = vsel %vm4557_vm3, %v4502_v30, %v13431_v26  ;;  %v13436_v30 = vld [vmem:[#allocation145_spill] sm:$0xff] }
 0x6dd   :  { %3233 = vrot.lane.b32.xlu1 %v8920_v52, %s6509_s15  ;;  %v4657_v31 = vsel %vm4631_vm4, %v4576_v9, %v10304_v14  ;;  %v13434_v14 = vld [vmem:[#allocation112_spill] sm:$0xff] }
 0x6de   :  { %v10681_v19 = vpop.permute.xlu2 %4359  ;;  %v4738_v1 = vsel %vm4712_vm5, %v4657_v31, %v10382_v47  ;;  %v4503_v55 = vsel %vm4484_vm2, %v13435_v15, %v13434_v14  ;;  %v13437_v47 = vld [vmem:[#allocation65_spill] sm:$0xff]  ;;  %v5061_v31 = vsel %vm5036_vm10, %v4980_v61, %v13438_v22  ;;  %v13440_v14 = vld [vmem:[#allocation115_spill] sm:$0xff]  ;;  %v13447_v52 = vld [vmem:[#allocation244_spill] sm:$0xff] }
 0x6df   :  { %v10687_v59 = vpop.permute.xlu1 %4355  ;;  %v4819_v8 = vsel %vm4793_vm7, %v4738_v1, %v13436_v30  ;;  %v4577_v9 = vsel %vm4557_vm3, %v4503_v55, %v13437_v47  ;;  %v13441_v15 = vld [vmem:[#allocation83_spill] sm:$0xff]  ;;  %v13442_v55 = vld [vmem:[#allocation128_spill] sm:$0xff]  ;;  %v13443_v30 = vld [vmem:[#allocation162_spill] sm:$0xff] }
 0x6e0   :  { %v10691_v27 = vpop.permute.xlu0 %4357  ;;  %v4658_v41 = vsel %vm4631_vm4, %v4577_v9, %v10392_v0  ;;  %v4900_v37 = vsel %vm4874_vm6, %v4819_v8, %v13439_v36  ;;  %v4504_v1 = vsel %vm4484_vm2, %v13441_v15, %v13440_v14  ;;  %v13444_v47 = vld [vmem:[#allocation227_spill] sm:$0xff]  ;;  %v13445_v9 = vld [vmem:[#allocation62_spill] sm:$0xff] }
 0x6e1   :  { %v4739_v61 = vsel %vm4712_vm5, %v4658_v41, %v13443_v30  ;;  %v4981_v8 = vsel %vm4955_vm8, %v4900_v37, %v13444_v47  ;;  %v4578_v22 = vsel %vm4557_vm3, %v4504_v1, %v13445_v9  ;;  %v13446_v36 = vld [vmem:[#allocation151_spill] sm:$0xff]  ;;  %v13448_v30 = vld [vmem:[#allocation152_spill] sm:$0xff]  ;;  %v10768_v47 = vpop.f32.mrf.mxu1 }
 0x6e2   :  { %6383 = vmatmul.msk.f32.gmra.mxu1 %vm5126_vm9, %v5060_v12  ;;  %v4820_v14 = vsel %vm4793_vm7, %v4739_v61, %v13446_v36  ;;  %v5062_v41 = vsel %vm5036_vm10, %v4981_v8, %v13447_v52  ;;  %13450 = vst [vmem:[#allocation332_spill] sm:$0xff] %v10768_v47  ;;  %v13451_v1 = vld [vmem:[#allocation156_spill] sm:$0xff]  ;;  %v5825_v52 = vld [vmem:[%s12627_s4 + $0x1e0] sm:$0xff]  ;;  %v13452_v8 = vld [vmem:[#allocation113_spill] sm:$0xff] }
 0x6e3   :  { %v4901_v37 = vsel %vm4874_vm6, %v4820_v14, %v13449_v33  ;;  %v13453_v33 = vld [vmem:[#allocation106_spill] sm:$0xff]  ;;  %v13455_v36 = vld [vmem:[#allocation256_spill] sm:$0xff]  ;;  %5856 = vmatpush.msrb.mxu3 %v5825_v52 }
 0x6e4   :  { %4163 = vrot.lane.b32.xlu2 %v13412_v62, %s6506_s19  ;;  %3715 = vrot.lane.b32.xlu0 %v13343_v28, %s6507_s1  ;;  %v4505_v9 = vsel %vm4484_vm2, %v13453_v33, %v13452_v8  ;;  %v4982_v14 = vsel %vm4955_vm8, %v4901_v37, %v13455_v36  ;;  %v13458_v8 = vld [vmem:[#allocation143_spill] sm:$0xff]  ;;  %v13459_v37 = vld [vmem:[#allocation242_spill] sm:$0xff] }
 0x6e5   :  { %3950 = vrot.lane.b32.xlu1 %v13399_v29, %s6505_s18  ;;  %v5063_v44 = vsel %vm5036_vm10, %v4982_v14, %v13457_v34  ;;  %v13462_v34 = vld [vmem:[#allocation117_spill] sm:$0xff]  ;;  %v13463_v36 = vld [vmem:[#allocation107_spill] sm:$0xff] }
 0x6e6   :  { %v10716_v4 = vpop.permute.xlu2 %3938  ;;  %v4506_v14 = vsel %vm4484_vm2, %v13463_v36, %v13462_v34  ;;  %v13470_v36 = vld [vmem:[#allocation168_spill] sm:$0xff] }
 0x6e7   :  { %v10720_v12 = vpop.permute.xlu1 %3934 }
 0x6e8   :  { %v10727_v26 = vpop.permute.xlu0 %3936 }
 0x6ea   :  { %6384 = vmatmul.msk.f32.gmra.mxu1 %vm5126_vm9, %v5061_v31 }
 0x6ec   :  { %3475 = vrot.lane.b32.xlu2 %v13335_v32, %s6510_s25  ;;  %4375 = vrot.lane.b32.xlu0 %v13442_v55, %s6508_s14 }
 0x6ed   :  { %3235 = vrot.lane.b32.xlu1 %v8916_v2, %s6509_s15  ;;  %v4659_v2 = vsel %vm4631_vm4, %v4578_v22, %v13448_v30 }
 0x6ee   :  { %v10749_v0 = vpop.permute.xlu2 %3463  ;;  %v4740_v61 = vsel %vm4712_vm5, %v4659_v2, %v13451_v1  ;;  %v4579_v2 = vsel %vm4557_vm3, %v4505_v9, %v10085_v45  ;;  %v13456_v1 = vld [vmem:[#allocation174_spill] sm:$0xff]  ;;  %v13460_v45 = vld [vmem:[#allocation32_spill] sm:$0xff] }
 0x6ef   :  { %v10755_v31 = vpop.permute.xlu1 %3459  ;;  %v4821_v47 = vsel %vm4793_vm7, %v4740_v61, %v13456_v1  ;;  %v4660_v33 = vsel %vm4631_vm4, %v4579_v2, %v13458_v8  ;;  %v13461_v9 = vld [vmem:[#allocation160_spill] sm:$0xff]  ;;  %v4580_v8 = vsel %vm4557_vm3, %v4506_v14, %v10177_v3  ;;  %v13473_v3 = vld [vmem:[#allocation50_spill] sm:$0xff] }
 0x6f0   :  { %v10759_v15 = vpop.permute.xlu0 %3461  ;;  %v4902_v52 = vsel %vm4874_vm6, %v4821_v47, %v13459_v37  ;;  %v4741_v61 = vsel %vm4712_vm5, %v4660_v33, %v13461_v9  ;;  %v13466_v47 = vld [vmem:[#allocation258_spill] sm:$0xff]  ;;  %v13467_v33 = vld [vmem:[#allocation180_spill] sm:$0xff] }
 0x6f1   :  { %v4983_v1 = vsel %vm4955_vm8, %v4902_v52, %v13466_v47  ;;  %v4822_v9 = vsel %vm4793_vm7, %v4741_v61, %v13467_v33  ;;  %v13472_v47 = vld [vmem:[#allocation333_spill] sm:$0xff]  ;;  %v13474_v61 = vld [vmem:[#allocation195_spill] sm:$0xff] }
 0x6f2   :  { %6385 = vmatmul.msk.f32.gmra.mxu1 %vm5126_vm9, %v5062_v41  ;;  %v5064_v34 = vsel %vm5036_vm10, %v4983_v1, %v13469_v48  ;;  %v4507_v14 = vsel %vm4484_vm2, %v13473_v3, %v13472_v47  ;;  %v13480_v47 = vld [vmem:[#allocation186_spill] sm:$0xff] }
 0x6f4   :  { %4165 = vrot.lane.b32.xlu2 %v13426_v21, %s6506_s19  ;;  %3717 = vrot.lane.b32.xlu0 %v13342_v42, %s6507_s1 }
 0x6f5   :  { %3952 = vrot.lane.b32.xlu1 %v13412_v62, %s6505_s18 }
 0x6f6   :  { %v10784_v22 = vpop.permute.xlu2 %4153 }
 0x6f7   :  { %13454 = vst [vmem:[#allocation48_spill] sm:$0xff] %v10784_v22  ;;  %v10790_v41 = vpop.permute.xlu1 %4149 }
 0x6f8   :  { %v10792_v30 = vpop.permute.xlu0 %4151 }
 0x6fa   :  { %6386 = vmatmul.msk.f32.gmra.mxu1 %vm5126_vm9, %v5063_v44  ;;  %v10814_v44 = vpop.f32.mrf.mxu1 }
 0x6fb   :  { %13464 = vst [vmem:[#allocation90_spill] sm:$0xff] %v10814_v44  ;;  %v4661_v44 = vsel %vm4631_vm4, %v4580_v8, %v13470_v36 }
 0x6fc   :  { %3477 = vrot.lane.b32.xlu2 %v13343_v28, %s6510_s25  ;;  %4377 = vrot.lane.b32.xlu0 %v13460_v45, %s6508_s14  ;;  %v4742_v48 = vsel %vm4712_vm5, %v4661_v44, %v13474_v61  ;;  %v13482_v44 = vld [vmem:[#allocation265_spill] sm:$0xff] }
 0x6fd   :  { %3237 = vrot.lane.b32.xlu1 %v13335_v32, %s6509_s15  ;;  %v4823_v3 = vsel %vm4793_vm7, %v4742_v48, %v13480_v47  ;;  %v13486_v48 = vld [vmem:[#allocation189_spill] sm:$0xff] }
 0x6fe   :  { %v10816_v2 = vpop.permute.xlu2 %3705 }
 0x6ff   :  { %13465 = vst [vmem:[#allocation3_spill] sm:$0xff] %v10816_v2  ;;  %v10822_v37 = vpop.permute.xlu1 %3701  ;;  %v13471_v2 = vld [vmem:[#allocation260_spill] sm:$0xff] }
 0x700   :  { %v10826_v32 = vpop.permute.xlu0 %3703  ;;  %v4903_v52 = vsel %vm4874_vm6, %v4822_v9, %v13471_v2  ;;  %v13477_v2 = vld [vmem:[#allocation251_spill] sm:$0xff] }
 0x701   :  { %13468 = vst [vmem:[#allocation20_spill] sm:$0xff] %v10826_v32  ;;  %v4984_v33 = vsel %vm4955_vm8, %v4903_v52, %v13477_v2  ;;  %v13478_v9 = vld [vmem:[#allocation119_spill] sm:$0xff] }
 0x702   :  { %6387 = vmatmul.msk.f32.gmra.mxu1 %vm5126_vm9, %v5064_v34  ;;  %v4581_v34 = vsel %vm4557_vm3, %v4507_v14, %v13478_v9  ;;  %v5065_v61 = vsel %vm5036_vm10, %v4984_v33, %v13482_v44  ;;  %v13483_v32 = vld [vmem:[#allocation187_spill] sm:$0xff]  ;;  %v13485_v14 = vld [vmem:[#allocation289_spill] sm:$0xff] }
 0x703   :  { %v13487_v33 = vld [vmem:[#allocation101_spill] sm:$0xff]  ;;  %v13492_v44 = vld [vmem:[#allocation335_spill] sm:$0xff] }
 0x704   :  { %4167 = vrot.lane.b32.xlu2 %v13442_v55, %s6506_s19  ;;  %3719 = vrot.lane.b32.xlu0 %v13355_v58, %s6507_s1  ;;  %v13488_v9 = vld [vmem:[#allocation53_spill] sm:$0xff] }
 0x705   :  { %3954 = vrot.lane.b32.xlu1 %v13426_v21, %s6505_s18 }
 0x706   :  { %v10846_v1 = vpop.f32.mrf.mxu1  ;;  %v10848_v8 = vpop.permute.xlu2 %4365 }
 0x707   :  { %13475 = vst [vmem:[#allocation329_spill] sm:$0xff] %v10846_v1  ;;  %v10854_v36 = vpop.permute.xlu1 %4361  ;;  %v4662_v1 = vsel %vm4631_vm4, %v4581_v34, %v13483_v32  ;;  %v4508_v32 = vsel %vm4484_vm2, %v13488_v9, %v13487_v33  ;;  %v13496_v9 = vld [vmem:[#allocation177_spill] sm:$0xff] }
 0x708   :  { %13476 = vst [vmem:[#allocation23_spill] sm:$0xff] %v10848_v8  ;;  %v10858_v22 = vpop.permute.xlu0 %4363  ;;  %v13484_v8 = vld [vmem:[#allocation262_spill] sm:$0xff]  ;;  %v4743_v2 = vsel %vm4712_vm5, %v4662_v1, %v13486_v48  ;;  %v13494_v48 = vld [vmem:[#allocation207_spill] sm:$0xff] }
 0x709   :  { %13479 = vst [vmem:[#allocation298_spill] sm:$0xff] %v10854_v36  ;;  %v4904_v52 = vsel %vm4874_vm6, %v4823_v3, %v13484_v8  ;;  %v13491_v8 = vld [vmem:[#allocation279_spill] sm:$0xff]  ;;  %v13495_v36 = vld [vmem:[#allocation268_spill] sm:$0xff] }
 0x70a   :  { %13481 = vst [vmem:[#allocation312_spill] sm:$0xff] %v10858_v22  ;;  %6388 = vmatmul.msk.f32.gmra.mxu1 %vm5126_vm9, %v5065_v61  ;;  %v4985_v3 = vsel %vm4955_vm8, %v4904_v52, %v13491_v8  ;;  %v4582_v61 = vsel %vm4557_vm3, %v4508_v32, %v13492_v44  ;;  %v13498_v32 = vld [vmem:[#allocation193_spill] sm:$0xff] }
 0x70b   :  { %v5066_v33 = vsel %vm5036_vm10, %v4985_v3, %v13495_v36  ;;  %v13499_v36 = vld [vmem:[#allocation334_spill] sm:$0xff]  ;;  %v13500_v8 = vld [vmem:[#allocation93_spill] sm:$0xff] }
 0x70c   :  { %3479 = vrot.lane.b32.xlu2 %v13342_v42, %s6510_s25  ;;  %4379 = vrot.lane.b32.xlu0 %v13485_v14, %s6508_s14  ;;  %v4509_v3 = vsel %vm4484_vm2, %v13500_v8, %v13499_v36 }
 0x70d   :  { %3239 = vrot.lane.b32.xlu1 %v13343_v28, %s6509_s15  ;;  %v4824_v28 = vsel %vm4793_vm7, %v4743_v2, %v13494_v48  ;;  %v13503_v48 = vld [vmem:[#allocation337_spill] sm:$0xff] }
 0x70e   :  { %v10878_v34 = vpop.f32.mrf.mxu1  ;;  %v10880_v47 = vpop.permute.xlu2 %3944 }
 0x70f   :  { %13489 = vst [vmem:[#allocation29_spill] sm:$0xff] %v10878_v34  ;;  %v10886_v22 = vpop.permute.xlu1 %3940  ;;  %v4663_v34 = vsel %vm4631_vm4, %v4582_v61, %v13496_v9  ;;  %v13502_v61 = vld [vmem:[#allocation281_spill] sm:$0xff] }
 0x710   :  { %13490 = vst [vmem:[#allocation299_spill] sm:$0xff] %v10880_v47  ;;  %v10888_v1 = vpop.permute.xlu0 %3942  ;;  %v13497_v47 = vld [vmem:[#allocation266_spill] sm:$0xff]  ;;  %v4744_v2 = vsel %vm4712_vm5, %v4663_v34, %v13498_v32  ;;  %v13506_v32 = vld [vmem:[#allocation212_spill] sm:$0xff] }
 0x711   :  { %13493 = vst [vmem:[#allocation8_spill] sm:$0xff] %v10888_v1  ;;  %v4905_v52 = vsel %vm4874_vm6, %v4824_v28, %v13497_v47  ;;  %v5793_v47 = vld [vmem:[%s12627_s4 + $0xe0] sm:$0xff]  ;;  %v4825_v36 = vsel %vm4793_vm7, %v4744_v2, %v13506_v32  ;;  %v13513_v2 = vld [vmem:[#allocation288_spill] sm:$0xff]  ;;  %v13514_v32 = vld [vmem:[#allocation225_spill] sm:$0xff] }
 0x712   :  { %6389 = vmatmul.msk.f32.gmra.mxu1 %vm5126_vm9, %v5066_v33  ;;  %v4986_v28 = vsel %vm4955_vm8, %v4905_v52, %v13502_v61  ;;  %v4583_v33 = vsel %vm4557_vm3, %v4509_v3, %v13503_v48  ;;  %5836 = vmatpush.msrb.mxu2 %v5793_v47  ;;  %v13509_v61 = vld [vmem:[#allocation202_spill] sm:$0xff]  ;;  %v13511_v48 = vld [vmem:[#allocation136_spill] sm:$0xff] }
 0x713   :  { %v4664_v1 = vsel %vm4631_vm4, %v4583_v33, %v13509_v61  ;;  %v13516_v33 = vld [vmem:[#allocation275_spill] sm:$0xff] }
 0x714   :  { %4169 = vrot.lane.b32.xlu2 %v13460_v45, %s6506_s19  ;;  %3721 = vrot.lane.b32.xlu0 %v13370_v23, %s6507_s1 }
 0x715   :  { %3956 = vrot.lane.b32.xlu1 %v13442_v55, %s6505_s18  ;;  %v13510_v55 = vld [vmem:[#allocation283_spill] sm:$0xff] }
 0x716   :  { %v10910_v44 = vpop.permute.xlu2 %3469  ;;  %v4906_v3 = vsel %vm4874_vm6, %v4825_v36, %v13510_v55  ;;  %v13517_v36 = vld [vmem:[#allocation125_spill] sm:$0xff] }
 0x717   :  { %13501 = vst [vmem:[#allocation76_spill] sm:$0xff] %v10910_v44  ;;  %v10919_v34 = vpop.permute.xlu1 %3465  ;;  %v10921_v9 = vpop.f32.mrf.mxu1  ;;  %v13508_v44 = vld [vmem:[#allocation52_spill] sm:$0xff]  ;;  %v4987_v55 = vsel %vm4955_vm8, %v4906_v3, %v13516_v33  ;;  %v13523_v3 = vld [vmem:[#allocation285_spill] sm:$0xff] }
 0x718   :  { %13504 = vst [vmem:[#allocation308_spill] sm:$0xff] %v10919_v34  ;;  %v10925_v8 = vpop.permute.xlu0 %3467  ;;  %v5067_v52 = vsel %vm5036_vm10, %v4986_v28, %v13508_v44  ;;  %v13512_v34 = vld [vmem:[#allocation95_spill] sm:$0xff]  ;;  %v4745_v44 = vsel %vm4712_vm5, %v4664_v1, %v13514_v32 }
 0x719   :  { %13505 = vst [vmem:[#allocation13_spill] sm:$0xff] %v10921_v9  ;;  %v4510_v47 = vsel %vm4484_vm2, %v13512_v34, %v13511_v48  ;;  %v13519_v48 = vld [vmem:[#allocation217_spill] sm:$0xff]  ;;  %v13521_v1 = vld [vmem:[#allocation39_spill] sm:$0xff] }
 0x71a   :  { %13507 = vst [vmem:[#allocation77_spill] sm:$0xff] %v10925_v8  ;;  %6390 = vmatmul.msk.f32.gmra.mxu1 %vm5126_vm9, %v5067_v52  ;;  %v4584_v34 = vsel %vm4557_vm3, %v4510_v47, %v13517_v36  ;;  %v4826_v9 = vsel %vm4793_vm7, %v4745_v44, %v13519_v48  ;;  %v5068_v32 = vsel %vm5036_vm10, %v4987_v55, %v13521_v1  ;;  %v13524_v44 = vld [vmem:[#allocation220_spill] sm:$0xff]  ;;  %v13525_v55 = vld [vmem:[#allocation49_spill] sm:$0xff] }
 0x71b   :  { %v4907_v47 = vsel %vm4874_vm6, %v4826_v9, %v13523_v3  ;;  %v13526_v36 = vld [vmem:[#allocation97_spill] sm:$0xff] }
 0x71c   :  { %3481 = vrot.lane.b32.xlu2 %v13355_v58, %s6510_s25  ;;  %4381 = vrot.lane.b32.xlu0 %v13513_v2, %s6508_s14  ;;  %v4511_v9 = vsel %vm4484_vm2, %v13526_v36, %v13525_v55  ;;  %v13528_v48 = vld [vmem:[#allocation5_spill] sm:$0xff] }
 0x71d   :  { %3241 = vrot.lane.b32.xlu1 %v13342_v42, %s6509_s15  ;;  %v13522_v42 = vld [vmem:[#allocation218_spill] sm:$0xff]  ;;  %v4988_v1 = vsel %vm4955_vm8, %v4907_v47, %v13528_v48  ;;  %v13533_v36 = vld [vmem:[#allocation209_spill] sm:$0xff]  ;;  %v13534_v47 = vld [vmem:[#allocation132_spill] sm:$0xff] }
 0x71e   :  { %v10945_v28 = vpop.permute.xlu2 %4159 }
 0x71f   :  { %13515 = vst [vmem:[#allocation91_spill] sm:$0xff] %v10945_v28  ;;  %v10951_v52 = vpop.permute.xlu1 %4155  ;;  %v10953_v61 = vpop.f32.mrf.mxu1  ;;  %v4665_v28 = vsel %vm4631_vm4, %v4584_v34, %v13522_v42  ;;  %v5823_v42 = vld [vmem:[%s12627_s4 + $0x1d0] sm:$0xff] }
 0x720   :  { %13518 = vst [vmem:[#allocation158_spill] sm:$0xff] %v10953_v61  ;;  %v10957_v8 = vpop.permute.xlu0 %4157  ;;  %v4746_v33 = vsel %vm4712_vm5, %v4665_v28, %v13524_v44  ;;  %5857 = vmatpush.msrb.mxu3 %v5823_v42  ;;  %v4585_v28 = vsel %vm4557_vm3, %v4511_v9, %v10364_v17  ;;  %v13531_v61 = vld [vmem:[#allocation235_spill] sm:$0xff] }
 0x721   :  { %13520 = vst [vmem:[#allocation311_spill] sm:$0xff] %v10957_v8  ;;  %v13532_v8 = vld [vmem:[#allocation292_spill] sm:$0xff]  ;;  %v13535_v42 = vld [vmem:[#allocation67_spill] sm:$0xff] }
 0x722   :  { %6391 = vmatmul.msk.f32.gmra.mxu1 %vm5126_vm9, %v5068_v32  ;;  %v5069_v55 = vsel %vm5036_vm10, %v4988_v1, %v13532_v8  ;;  %v13536_v9 = vld [vmem:[#allocation99_spill] sm:$0xff] }
 0x723   :  { %v4512_v48 = vsel %vm4484_vm2, %v13536_v9, %v13535_v42  ;;  %v13543_v9 = vld [vmem:[#allocation241_spill] sm:$0xff] }
 0x724   :  { %4171 = vrot.lane.b32.xlu2 %v13485_v14, %s6506_s19  ;;  %3723 = vrot.lane.b32.xlu0 %v13369_v25, %s6507_s1 }
 0x725   :  { %3958 = vrot.lane.b32.xlu1 %v13460_v45, %s6505_s18  ;;  %v4827_v45 = vsel %vm4793_vm7, %v4746_v33, %v13531_v61  ;;  %v13537_v61 = vld [vmem:[#allocation291_spill] sm:$0xff] }
 0x726   :  { %v10980_v34 = vpop.permute.xlu2 %3471  ;;  %v4908_v17 = vsel %vm4874_vm6, %v4827_v45, %v13534_v47  ;;  %v13538_v33 = vld [vmem:[#allocation223_spill] sm:$0xff] }
 0x727   :  { %13527 = vst [vmem:[#allocation14_spill] sm:$0xff] %v10980_v34  ;;  %v10986_v32 = vpop.permute.xlu1 %3707  ;;  %v10988_v3 = vpop.f32.mrf.mxu1  ;;  %v4666_v34 = vsel %vm4631_vm4, %v4585_v28, %v13533_v36  ;;  %v13540_v28 = vld [vmem:[#allocation295_spill] sm:$0xff] }
 0x728   :  { %13529 = vst [vmem:[#allocation81_spill] sm:$0xff] %v10988_v3  ;;  %v10990_v44 = vpop.permute.xlu0 %3709  ;;  %v4747_v8 = vsel %vm4712_vm5, %v4666_v34, %v13538_v33  ;;  %v4989_v45 = vsel %vm4955_vm8, %v4908_v17, %v13540_v28  ;;  %v13544_v34 = vld [vmem:[#allocation305_spill] sm:$0xff] }
 0x729   :  { %13530 = vst [vmem:[#allocation133_spill] sm:$0xff] %v10990_v44  ;;  %v4828_v3 = vsel %vm4793_vm7, %v4747_v8, %v13543_v9  ;;  %v5070_v33 = vsel %vm5036_vm10, %v4989_v45, %v13544_v34  ;;  %v13546_v17 = vld [vmem:[#allocation297_spill] sm:$0xff]  ;;  %v13547_v8 = vld [vmem:[#allocation252_spill] sm:$0xff] }
 0x72a   :  { %6392 = vmatmul.msk.f32.gmra.mxu1 %vm5126_vm9, %v5069_v55  ;;  %v13541_v55 = vld [vmem:[#allocation148_spill] sm:$0xff]  ;;  %v13551_v34 = vld [vmem:[#allocation245_spill] sm:$0xff] }
 0x72b   :  { %v4586_v36 = vsel %vm4557_vm3, %v4512_v48, %v13541_v55  ;;  %v4909_v48 = vsel %vm4874_vm6, %v4828_v3, %v13546_v17  ;;  %v13552_v17 = vld [vmem:[#allocation10_spill] sm:$0xff] }
 0x72c   :  { %3483 = vrot.lane.b32.xlu2 %v13370_v23, %s6510_s25  ;;  %4383 = vrot.lane.b32.xlu0 %v13537_v61, %s6508_s14 }
 0x72d   :  { %3243 = vrot.lane.b32.xlu1 %v13355_v58, %s6509_s15  ;;  %v13545_v58 = vld [vmem:[#allocation229_spill] sm:$0xff] }
 0x72e   :  { %v11012_v1 = vpop.permute.xlu2 %4161 }
 0x72f   :  { %13539 = vst [vmem:[#allocation103_spill] sm:$0xff] %v11012_v1  ;;  %v11018_v47 = vpop.permute.xlu1 %4367  ;;  %v11020_v42 = vpop.f32.mrf.mxu1  ;;  %v4667_v1 = vsel %vm4631_vm4, %v4586_v36, %v13545_v58  ;;  %v13549_v58 = vld [vmem:[#allocation153_spill] sm:$0xff] }
 0x730   :  { %13542 = vst [vmem:[#allocation88_spill] sm:$0xff] %v11020_v42  ;;  %v11024_v44 = vpop.permute.xlu0 %4369  ;;  %v4748_v28 = vsel %vm4712_vm5, %v4667_v1, %v13547_v8  ;;  %v4990_v55 = vsel %vm4955_vm8, %v4909_v48, %v13549_v58  ;;  %v13553_v1 = vld [vmem:[#allocation144_spill] sm:$0xff]  ;;  %v13556_v58 = vld [vmem:[#allocation45_spill] sm:$0xff] }
 0x731   :  { %v5071_v42 = vsel %vm5036_vm10, %v4990_v55, %v13552_v17  ;;  %v13554_v8 = vld [vmem:[#allocation68_spill] sm:$0xff] }
 0x732   :  { %6393 = vmatmul.msk.f32.gmra.mxu1 %vm5126_vm9, %v5070_v33  ;;  %v4829_v33 = vsel %vm4793_vm7, %v4748_v28, %v13551_v34  ;;  %v13558_v34 = vld [vmem:[#allocation9_spill] sm:$0xff] }
 0x734   :  { %4173 = vrot.lane.b32.xlu2 %v13513_v2, %s6506_s19  ;;  %3725 = vrot.lane.b32.xlu0 %v13386_v38, %s6507_s1 }
 0x735   :  { %3960 = vrot.lane.b32.xlu1 %v13485_v14, %s6505_s18  ;;  %v4513_v14 = vsel %vm4484_vm2, %v13554_v8, %v13553_v1 }
 0x736   :  { %v11041_v45 = vpop.permute.xlu2 %3473 }
 0x737   :  { %13548 = vst [vmem:[#allocation150_spill] sm:$0xff] %v11041_v45  ;;  %v11045_v36 = vpop.permute.xlu1 %3946  ;;  %v5436_v3 = vpop.f32.mrf.mxu1  ;;  %v13555_v45 = vld [vmem:[#allocation7_spill] sm:$0xff] }
 0x738   :  { %v11047_v9 = vpop.permute.xlu0 %3711  ;;  %v4910_v48 = vsel %vm4874_vm6, %v4829_v33, %v13555_v45  ;;  %v13557_v3 = vld [vmem:[#allocation140_spill] sm:$0xff]  ;;  %v13559_v33 = vld [vmem:[#allocation246_spill] sm:$0xff] }
 0x739   :  { %13550 = vst [vmem:[#allocation320_spill] sm:$0xff] %v11047_v9  ;;  %v4587_v28 = vsel %vm4557_vm3, %v4513_v14, %v13557_v3  ;;  %v13560_v14 = vld [vmem:[#allocation58_spill] sm:$0xff] }
 0x73a   :  { %6394 = vmatmul.msk.f32.gmra.mxu1 %vm5126_vm9, %v5071_v42  ;;  %v4991_v42 = vsel %vm4955_vm8, %v4910_v48, %v13558_v34  ;;  %v4668_v1 = vsel %vm4631_vm4, %v4587_v28, %v13559_v33  ;;  %v13561_v28 = vld [vmem:[#allocation137_spill] sm:$0xff] }
 0x73b   :  { %v4749_v9 = vsel %vm4712_vm5, %v4668_v1, %v10445_v20  ;;  %v5072_v3 = vsel %vm5036_vm10, %v4991_v42, %v13560_v14  ;;  %v13562_v34 = vld [vmem:[#allocation121_spill] sm:$0xff]  ;;  %v13565_v1 = vld [vmem:[#allocation238_spill] sm:$0xff] }
 0x73c   :  { %3485 = vrot.lane.b32.xlu2 %v13369_v25, %s6510_s25  ;;  %4385 = vrot.lane.b32.xlu0 %v13556_v58, %s6508_s14  ;;  %v4830_v48 = vsel %vm4793_vm7, %v4749_v9, %v10504_v18  ;;  %v4514_v42 = vsel %vm4484_vm2, %v13562_v34, %v13561_v28  ;;  %v13563_v9 = vld [vmem:[#allocation164_spill] sm:$0xff] }
 0x73d   :  { %3245 = vrot.lane.b32.xlu1 %v13370_v23, %s6509_s15  ;;  %v5791_v23 = vld [vmem:[%s12627_s4 + $0xd0] sm:$0xff]  ;;  %v4911_v20 = vsel %vm4874_vm6, %v4830_v48, %v10412_v10 }
 0x73e   :  { %v11067_v55 = vpop.permute.xlu2 %4163  ;;  %5837 = vmatpush.msrb.mxu2 %v5791_v23  ;;  %v4588_v23 = vsel %vm4557_vm3, %v4514_v42, %v13563_v9  ;;  %v4992_v10 = vsel %vm4955_vm8, %v4911_v20, %v10481_v13  ;;  %v13566_v9 = vld [vmem:[#allocation161_spill] sm:$0xff]  ;;  %v13569_v20 = vld [vmem:[#allocation182_spill] sm:$0xff] }
 0x73f   :  { %v11071_v17 = vpop.permute.xlu1 %3231  ;;  %v5438_v45 = vpop.f32.mrf.mxu1  ;;  %v4669_v14 = vsel %vm4631_vm4, %v4588_v23, %v13565_v1  ;;  %v5073_v28 = vsel %vm5036_vm10, %v4992_v10, %v10534_v46  ;;  %v13567_v23 = vld [vmem:[#allocation123_spill] sm:$0xff] }
 0x740   :  { %v11075_v8 = vpop.permute.xlu0 %4371  ;;  %v4750_v48 = vsel %vm4712_vm5, %v4669_v14, %v10439_v50  ;;  %v4515_v13 = vsel %vm4484_vm2, %v13567_v23, %v13566_v9  ;;  %v13568_v50 = vld [vmem:[#allocation12_spill] sm:$0xff] }
 0x741   :  { %v4831_v34 = vsel %vm4793_vm7, %v4750_v48, %v10508_v56  ;;  %v4589_v46 = vsel %vm4557_vm3, %v4515_v13, %v13569_v20  ;;  %v13570_v56 = vld [vmem:[#allocation254_spill] sm:$0xff]  ;;  %v13574_v20 = vld [vmem:[#allocation173_spill] sm:$0xff] }
 0x742   :  { %6395 = vmatmul.msk.f32.gmra.mxu1 %vm5126_vm9, %v5072_v3  ;;  %v4912_v42 = vsel %vm4874_vm6, %v4831_v34, %v10564_v39  ;;  %v4670_v1 = vsel %vm4631_vm4, %v4589_v46, %v13570_v56 }
 0x743   :  { %v4993_v39 = vsel %vm4955_vm8, %v4912_v42, %v10472_v54  ;;  %v4751_v10 = vsel %vm4712_vm5, %v4670_v1, %v10597_v53  ;;  %v13572_v54 = vld [vmem:[#allocation178_spill] sm:$0xff] }
 0x744   :  { %4175 = vrot.lane.b32.xlu2 %v13537_v61, %s6506_s19  ;;  %3727 = vrot.lane.b32.xlu0 %v13400_v7, %s6507_s1  ;;  %v5074_v9 = vsel %vm5036_vm10, %v4993_v39, %v10538_v6  ;;  %v4832_v23 = vsel %vm4793_vm7, %v4751_v10, %v10498_v11  ;;  %v13573_v42 = vld [vmem:[#allocation126_spill] sm:$0xff] }
 0x745   :  { %3962 = vrot.lane.b32.xlu1 %v13513_v2, %s6505_s18  ;;  %v4516_v13 = vsel %vm4484_vm2, %v13573_v42, %v13572_v54  ;;  %v4913_v53 = vsel %vm4874_vm6, %v4832_v23, %v10571_v35  ;;  %v13576_v39 = vld [vmem:[#allocation270_spill] sm:$0xff] }
 0x746   :  { %v11098_v18 = vpop.permute.xlu2 %3475  ;;  %v4994_v11 = vsel %vm4955_vm8, %v4913_v53, %v10627_v24  ;;  %v4590_v46 = vsel %vm4557_vm3, %v4516_v13, %v13574_v20  ;;  %v5821_v23 = vld [vmem:[%s12627_s4 + $0x1c0] sm:$0xff] }
 0x747   :  { %v11102_v45 = vpop.permute.xlu1 %3948  ;;  %v11104_v33 = vpop.f32.mrf.mxu1  ;;  %v4671_v10 = vsel %vm4631_vm4, %v4590_v46, %v13576_v39  ;;  %v5075_v24 = vsel %vm5036_vm10, %v4994_v11, %v10528_v63  ;;  %5858 = vmatpush.msrb.mxu3 %v5821_v23  ;;  %v13577_v42 = vld [vmem:[#allocation6_spill] sm:$0xff]  ;;  %v13578_v63 = vld [vmem:[#allocation169_spill] sm:$0xff] }
 0x748   :  { %13564 = vst [vmem:[#allocation142_spill] sm:$0xff] %v11104_v33  ;;  %v11110_v3 = vpop.permute.xlu0 %3713  ;;  %v4752_v35 = vsel %vm4712_vm5, %v4671_v10, %v10601_v57  ;;  %v13579_v13 = vld [vmem:[#allocation130_spill] sm:$0xff]  ;;  %v13582_v10 = vld [vmem:[#allocation263_spill] sm:$0xff] }
 0x749   :  { %v4833_v54 = vsel %vm4793_vm7, %v4752_v35, %v10657_v40  ;;  %v4517_v53 = vsel %vm4484_vm2, %v13579_v13, %v13578_v63  ;;  %v13580_v11 = vld [vmem:[#allocation198_spill] sm:$0xff] }
 0x74a   :  { %6396 = vmatmul.msk.f32.gmra.mxu1 %vm5126_vm9, %v5073_v28  ;;  %v4914_v57 = vsel %vm4874_vm6, %v4833_v54, %v10560_v49  ;;  %v4591_v20 = vsel %vm4557_vm3, %v4517_v53, %v13580_v11  ;;  %v13583_v53 = vld [vmem:[#allocation194_spill] sm:$0xff]  ;;  %v13584_v11 = vld [vmem:[#allocation131_spill] sm:$0xff] }
 0x74b   :  { %v4672_v35 = vsel %vm4631_vm4, %v4591_v20, %v13582_v10  ;;  %v4995_v49 = vsel %vm4955_vm8, %v4914_v57, %v10631_v60  ;;  %v4518_v60 = vsel %vm4484_vm2, %v13584_v11, %v13583_v53 }
 0x74c   :  { %3487 = vrot.lane.b32.xlu2 %v13386_v38, %s6510_s25  ;;  %4387 = vrot.lane.b32.xlu0 %v13568_v50, %s6508_s14  ;;  %v4753_v23 = vsel %vm4712_vm5, %v4672_v35, %v10591_v16  ;;  %v5076_v54 = vsel %vm5036_vm10, %v4995_v49, %v10687_v59  ;;  %v13585_v16 = vld [vmem:[#allocation214_spill] sm:$0xff] }
 0x74d   :  { %3247 = vrot.lane.b32.xlu1 %v13369_v25, %s6509_s15  ;;  %v4834_v63 = vsel %vm4793_vm7, %v4753_v23, %v10664_v43  ;;  %v4592_v59 = vsel %vm4557_vm3, %v4518_v60, %v13585_v16  ;;  %v13586_v43 = vld [vmem:[#allocation277_spill] sm:$0xff]  ;;  %v13591_v60 = vld [vmem:[#allocation206_spill] sm:$0xff] }
 0x74e   :  { %v11136_v14 = vpop.permute.xlu2 %4165  ;;  %v4915_v13 = vsel %vm4874_vm6, %v4834_v63, %v10720_v12  ;;  %v4673_v57 = vsel %vm4631_vm4, %v4592_v59, %v13586_v43 }
 0x74f   :  { %v11140_v48 = vpop.permute.xlu1 %3233  ;;  %v11142_v28 = vpop.f32.mrf.mxu1  ;;  %v4996_v12 = vsel %vm4955_vm8, %v4915_v13, %v10621_v51  ;;  %v4754_v10 = vsel %vm4712_vm5, %v4673_v57, %v10755_v31  ;;  %v13588_v51 = vld [vmem:[#allocation210_spill] sm:$0xff]  ;;  %v13589_v13 = vld [vmem:[#allocation135_spill] sm:$0xff] }
 0x750   :  { %13571 = vst [vmem:[#allocation116_spill] sm:$0xff] %v11142_v28  ;;  %v11144_v34 = vpop.permute.xlu0 %4373  ;;  %v4835_v63 = vsel %vm4793_vm7, %v4754_v10, %v10653_v5  ;;  %v4519_v53 = vsel %vm4484_vm2, %v13589_v13, %v13588_v51  ;;  %v13590_v31 = vld [vmem:[#allocation54_spill] sm:$0xff]  ;;  %v13595_v51 = vld [vmem:[#allocation149_spill] sm:$0xff]  ;;  %v13626_v28 = vld [vmem:[#allocation76_spill] sm:$0xff] }
 0x751   :  { %v4916_v11 = vsel %vm4874_vm6, %v4835_v63, %v10727_v26  ;;  %v4593_v16 = vsel %vm4557_vm3, %v4519_v53, %v13591_v60  ;;  %v13593_v57 = vld [vmem:[#allocation294_spill] sm:$0xff] }
 0x752   :  { %6397 = vmatmul.msk.f32.gmra.mxu1 %vm5126_vm9, %v5074_v9  ;;  %v4997_v5 = vsel %vm4955_vm8, %v4916_v11, %v10790_v41  ;;  %v13596_v53 = vld [vmem:[#allocation226_spill] sm:$0xff] }
 0x753   :  { %v5078_v41 = vsel %vm5036_vm10, %v4997_v5, %v10681_v19  ;;  %v13594_v19 = vld [vmem:[#allocation203_spill] sm:$0xff] }
 0x754   :  { %4177 = vrot.lane.b32.xlu2 %v13556_v58, %s6506_s19  ;;  %3729 = vrot.lane.b32.xlu0 %v13399_v29, %s6507_s1  ;;  %v4520_v13 = vsel %vm4484_vm2, %v13595_v51, %v13594_v19 }
 0x755   :  { %3964 = vrot.lane.b32.xlu1 %v13537_v61, %s6505_s18  ;;  %v4594_v11 = vsel %vm4557_vm3, %v4520_v13, %v13596_v53  ;;  %v13601_v13 = vld [vmem:[#allocation224_spill] sm:$0xff]  ;;  %v13602_v53 = vld [vmem:[#allocation155_spill] sm:$0xff] }
 0x756   :  { %v11164_v6 = vpop.permute.xlu2 %3477 }
 0x757   :  { %v11168_v56 = vpop.permute.xlu1 %3950  ;;  %v11170_v1 = vpop.f32.mrf.mxu1 }
 0x758   :  { %13575 = vst [vmem:[#allocation166_spill] sm:$0xff] %v11170_v1  ;;  %v11174_v9 = vpop.permute.xlu0 %3715 }
 0x75a   :  { %6398 = vmatmul.msk.f32.gmra.mxu1 %vm5126_vm9, %v5075_v24 }
 0x75c   :  { %3489 = vrot.lane.b32.xlu2 %v13400_v7, %s6510_s25  ;;  %4389 = vrot.lane.b32.xlu0 %v13577_v42, %s6508_s14 }
 0x75d   :  { %3249 = vrot.lane.b32.xlu1 %v13386_v38, %s6509_s15 }
 0x75e   :  { %v11197_v40 = vpop.permute.xlu2 %4167 }
 0x75f   :  { %v11201_v46 = vpop.permute.xlu1 %3235  ;;  %v11203_v39 = vpop.f32.mrf.mxu1 }
 0x760   :  { %13581 = vst [vmem:[#allocation157_spill] sm:$0xff] %v11203_v39  ;;  %v11209_v24 = vpop.permute.xlu0 %4375 }
 0x762   :  { %6399 = vmatmul.msk.f32.gmra.mxu1 %vm5126_vm9, %v5076_v54  ;;  %v5077_v54 = vsel %vm5036_vm10, %v4996_v12, %v10691_v27  ;;  %v4674_v12 = vsel %vm4631_vm4, %v4593_v16, %v13593_v57  ;;  %v13598_v16 = vld [vmem:[#allocation286_spill] sm:$0xff] }
 0x763   :  { %v4755_v26 = vsel %vm4712_vm5, %v4674_v12, %v10759_v15  ;;  %v4675_v57 = vsel %vm4631_vm4, %v4594_v11, %v13598_v16  ;;  %v13605_v16 = vld [vmem:[#allocation2_spill] sm:$0xff] }
 0x764   :  { %4179 = vrot.lane.b32.xlu2 %v13568_v50, %s6506_s19  ;;  %3731 = vrot.lane.b32.xlu0 %v13412_v62, %s6507_s1  ;;  %v4836_v63 = vsel %vm4793_vm7, %v4755_v26, %v10822_v37  ;;  %v4756_v26 = vsel %vm4712_vm5, %v4675_v57, %v10749_v0  ;;  %v13603_v0 = vld [vmem:[#allocation51_spill] sm:$0xff] }
 0x765   :  { %3966 = vrot.lane.b32.xlu1 %v13556_v58, %s6505_s18  ;;  %v4917_v15 = vsel %vm4874_vm6, %v4836_v63, %v10716_v4  ;;  %v13600_v63 = vld [vmem:[#allocation20_spill] sm:$0xff] }
 0x766   :  { %v11235_v20 = vpop.permute.xlu2 %3479  ;;  %v4998_v4 = vsel %vm4955_vm8, %v4917_v15, %v10792_v30  ;;  %v4837_v19 = vsel %vm4793_vm7, %v4756_v26, %v13600_v63  ;;  %v4521_v30 = vsel %vm4484_vm2, %v13602_v53, %v13601_v13  ;;  %v13604_v15 = vld [vmem:[#allocation243_spill] sm:$0xff]  ;;  %v13609_v53 = vld [vmem:[#allocation312_spill] sm:$0xff] }
 0x767   :  { %v11239_v35 = vpop.permute.xlu1 %3952  ;;  %v11241_v49 = vpop.f32.mrf.mxu1  ;;  %v4918_v51 = vsel %vm4874_vm6, %v4837_v19, %v10886_v22  ;;  %v4595_v11 = vsel %vm4557_vm3, %v4521_v30, %v13604_v15  ;;  %v13606_v22 = vld [vmem:[#allocation48_spill] sm:$0xff]  ;;  %v13610_v15 = vld [vmem:[#allocation3_spill] sm:$0xff] }
 0x768   :  { %13587 = vst [vmem:[#allocation146_spill] sm:$0xff] %v11241_v49  ;;  %v11243_v23 = vpop.permute.xlu0 %3717  ;;  %v4676_v57 = vsel %vm4631_vm4, %v4595_v11, %v13605_v16  ;;  %v13612_v16 = vld [vmem:[#allocation167_spill] sm:$0xff] }
 0x76a   :  { %6400 = vmatmul.msk.f32.gmra.mxu1 %vm5126_vm9, %v5077_v54  ;;  %v5789_v54 = vld [vmem:[%s12627_s4 + $0xc0] sm:$0xff] }
 0x76b   :  { %5838 = vmatpush.msrb.mxu2 %v5789_v54 }
 0x76c   :  { %3491 = vrot.lane.b32.xlu2 %v13399_v29, %s6510_s25  ;;  %4391 = vrot.lane.b32.xlu0 %v13590_v31, %s6508_s14 }
 0x76d   :  { %3251 = vrot.lane.b32.xlu1 %v13400_v7, %s6509_s15  ;;  %v13630_v7 = vld [vmem:[#allocation133_spill] sm:$0xff] }
 0x76e   :  { %v11263_v27 = vpop.permute.xlu2 %4169 }
 0x76f   :  { %v11267_v59 = vpop.permute.xlu1 %3237  ;;  %v11269_v43 = vpop.f32.mrf.mxu1 }
 0x770   :  { %13592 = vst [vmem:[#allocation317_spill] sm:$0xff] %v11269_v43  ;;  %v11273_v10 = vpop.permute.xlu0 %4377  ;;  %v13618_v43 = vld [vmem:[#allocation23_spill] sm:$0xff] }
 0x772   :  { %6401 = vmatmul.msk.f32.gmra.mxu1 %vm5126_vm9, %v5078_v41  ;;  %v13599_v41 = vld [vmem:[#allocation298_spill] sm:$0xff] }
 0x773   :  { %v5079_v54 = vsel %vm5036_vm10, %v4998_v4, %v13599_v41  ;;  %v4999_v4 = vsel %vm4955_vm8, %v4918_v51, %v13606_v22  ;;  %v13607_v41 = vld [vmem:[#allocation308_spill] sm:$0xff]  ;;  %v13611_v51 = vld [vmem:[#allocation239_spill] sm:$0xff] }
 0x774   :  { %4181 = vrot.lane.b32.xlu2 %v13577_v42, %s6506_s19  ;;  %3733 = vrot.lane.b32.xlu0 %v13426_v21, %s6507_s1  ;;  %v5080_v30 = vsel %vm5036_vm10, %v4999_v4, %v13609_v53  ;;  %v4522_v22 = vsel %vm4484_vm2, %v13612_v16, %v13611_v51  ;;  %v13615_v53 = vld [vmem:[#allocation234_spill] sm:$0xff] }
 0x775   :  { %3968 = vrot.lane.b32.xlu1 %v13568_v50, %s6505_s18  ;;  %v13616_v16 = vld [vmem:[#allocation302_spill] sm:$0xff] }
 0x776   :  { %v11296_v37 = vpop.permute.xlu2 %3481 }
 0x777   :  { %v11300_v5 = vpop.permute.xlu1 %3954  ;;  %v11302_v60 = vpop.f32.mrf.mxu1 }
 0x778   :  { %13597 = vst [vmem:[#allocation147_spill] sm:$0xff] %v11302_v60  ;;  %v11308_v12 = vpop.permute.xlu0 %3719 }
 0x77a   :  { %6402 = vmatmul.msk.f32.gmra.mxu1 %vm5126_vm9, %v5079_v54  ;;  %v4757_v54 = vsel %vm4712_vm5, %v4676_v57, %v13607_v41  ;;  %v13613_v57 = vld [vmem:[#allocation128_spill] sm:$0xff] }
 0x77b   :  { %v4838_v11 = vsel %vm4793_vm7, %v4757_v54, %v13610_v15  ;;  %v13614_v41 = vld [vmem:[#allocation8_spill] sm:$0xff] }
 0x77c   :  { %3493 = vrot.lane.b32.xlu2 %v13412_v62, %s6510_s25  ;;  %4393 = vrot.lane.b32.xlu0 %v13603_v0, %s6508_s14  ;;  %v4919_v60 = vsel %vm4874_vm6, %v4838_v11, %v13614_v41  ;;  %v13617_v11 = vld [vmem:[#allocation77_spill] sm:$0xff] }
 0x77d   :  { %3253 = vrot.lane.b32.xlu1 %v13399_v29, %s6509_s15  ;;  %v5000_v4 = vsel %vm4955_vm8, %v4919_v60, %v10951_v52  ;;  %v5819_v52 = vld [vmem:[%s12627_s4 + $0x1b0] sm:$0xff] }
 0x77e   :  { %v11334_v26 = vpop.permute.xlu2 %4171  ;;  %v5081_v1 = vsel %vm5036_vm10, %v5000_v4, %v13618_v43  ;;  %5859 = vmatpush.msrb.mxu3 %v5819_v52  ;;  %v2277_v43 = vpop.f32.mrf.mxu3  ;;  %v13621_v4 = vld [vmem:[#allocation230_spill] sm:$0xff]  ;;  %v13624_v52 = vld [vmem:[#allocation55_spill] sm:$0xff] }
 0x77f   :  { %v11338_v63 = vpop.permute.xlu1 %3239  ;;  %v11340_v19 = vpop.f32.mrf.mxu1 }
 0x780   :  { %13608 = vst [vmem:[#allocation41_spill] sm:$0xff] %v11340_v19  ;;  %v11342_v13 = vpop.permute.xlu0 %4379 }
 0x782   :  { %6403 = vmatmul.msk.f32.gmra.mxu1 %vm5126_vm9, %v5080_v30  ;;  %v4596_v30 = vsel %vm4557_vm3, %v4522_v22, %v13615_v53  ;;  %v13619_v22 = vld [vmem:[#allocation154_spill] sm:$0xff] }
 0x783   :  { %v4677_v19 = vsel %vm4631_vm4, %v4596_v30, %v13616_v16  ;;  %v13622_v30 = vld [vmem:[#allocation183_spill] sm:$0xff] }
 0x784   :  { %4183 = vrot.lane.b32.xlu2 %v13590_v31, %s6506_s19  ;;  %3735 = vrot.lane.b32.xlu0 %v13613_v57, %s6507_s1  ;;  %v4758_v41 = vsel %vm4712_vm5, %v4677_v19, %v13617_v11  ;;  %v13620_v19 = vld [vmem:[#allocation299_spill] sm:$0xff] }
 0x785   :  { %3970 = vrot.lane.b32.xlu1 %v13577_v42, %s6505_s18  ;;  %v4839_v60 = vsel %vm4793_vm7, %v4758_v41, %v10986_v32  ;;  %v4523_v32 = vsel %vm4484_vm2, %v13622_v30, %v13621_v4  ;;  %v13627_v30 = vld [vmem:[#allocation24_spill] sm:$0xff] }
 0x786   :  { %v11362_v54 = vpop.permute.xlu2 %3483  ;;  %v4920_v53 = vsel %vm4874_vm6, %v4839_v60, %v13620_v19  ;;  %v13625_v60 = vld [vmem:[#allocation311_spill] sm:$0xff]  ;;  %v2453_v29 = vmax.f32 %v13627_v30, %v2277_v43  ;;  %v13636_v30 = vld [vmem:[#allocation14_spill] sm:$0xff] }
 0x787   :  { %v11366_v15 = vpop.permute.xlu1 %3956  ;;  %v5464_v51 = vpop.f32.mrf.mxu1  ;;  %v5001_v19 = vsel %vm4955_vm8, %v4920_v53, %v13625_v60  ;;  %v13631_v53 = vld [vmem:[#allocation267_spill] sm:$0xff] }
 0x788   :  { %v11370_v49 = vpop.permute.xlu0 %3721  ;;  %v5082_v4 = vsel %vm5036_vm10, %v5001_v19, %v11018_v47  ;;  %v13633_v60 = vld [vmem:[#allocation163_spill] sm:$0xff]  ;;  %v13634_v19 = vld [vmem:[#allocation32_spill] sm:$0xff] }
 0x78a   :  { %6404 = vmatmul.msk.f32.gmra.mxu1 %vm5126_vm9, %v5081_v1  ;;  %v13623_v1 = vld [vmem:[#allocation250_spill] sm:$0xff] }
 0x78b   :  { %v4597_v16 = vsel %vm4557_vm3, %v4523_v32, %v13623_v1  ;;  %v13628_v32 = vld [vmem:[#allocation248_spill] sm:$0xff] }
 0x78c   :  { %3495 = vrot.lane.b32.xlu2 %v13426_v21, %s6510_s25  ;;  %4395 = vrot.lane.b32.xlu0 %v13619_v22, %s6508_s14  ;;  %v4678_v39 = vsel %vm4631_vm4, %v4597_v16, %v13624_v52  ;;  %v13629_v1 = vld [vmem:[#allocation188_spill] sm:$0xff] }
 0x78d   :  { %3255 = vrot.lane.b32.xlu1 %v13412_v62, %s6509_s15  ;;  %v4759_v62 = vsel %vm4712_vm5, %v4678_v39, %v13626_v28  ;;  %v13632_v39 = vld [vmem:[#allocation57_spill] sm:$0xff] }
 0x78e   :  { %v11393_v51 = vpop.permute.xlu2 %4173  ;;  %v4840_v16 = vsel %vm4793_vm7, %v4759_v62, %v13630_v7  ;;  %v2373_v47 = vmax.f32 %v13633_v60, %v13632_v39  ;;  %v13635_v62 = vld [vmem:[#allocation91_spill] sm:$0xff] }
 0x78f   :  { %v11397_v11 = vpop.permute.xlu1 %3241  ;;  %v5466_v41 = vpop.f32.mrf.mxu1  ;;  %v4921_v28 = vsel %vm4874_vm6, %v4840_v16, %v11045_v36  ;;  %v13639_v16 = vld [vmem:[#allocation197_spill] sm:$0xff] }
 0x790   :  { %v11403_v33 = vpop.permute.xlu0 %4381  ;;  %v4524_v41 = vsel %vm4484_vm2, %v13629_v1, %v13628_v32  ;;  %v2533_v7 = vmax.f32 %v2373_v47, %v2453_v29 }
 0x791   :  { %v4598_v52 = vsel %vm4557_vm3, %v4524_v41, %v13631_v53  ;;  %v13638_v41 = vld [vmem:[#allocation264_spill] sm:$0xff] }
 0x792   :  { %6405 = vmatmul.msk.f32.gmra.mxu1 %vm5126_vm9, %v5082_v4  ;;  %v4679_v43 = vsel %vm4631_vm4, %v4598_v52, %v11071_v17  ;;  %v5002_v4 = vsel %vm4955_vm8, %v4921_v28, %v13635_v62  ;;  %v4525_v53 = vsel %vm4484_vm2, %v13639_v16, %v13638_v41  ;;  %v11447_v39 = vmax.f32 %v2533_v7, 0.0  ;;  %v13640_v28 = vld [vmem:[#allocation320_spill] sm:$0xff]  ;;  %v13642_v7 = vld [vmem:[#allocation103_spill] sm:$0xff] }
 0x793   :  { %v4760_v32 = vsel %vm4712_vm5, %v4679_v43, %v13636_v30  ;;  %v5083_v29 = vsel %vm5036_vm10, %v5002_v4, %v11024_v44  ;;  %v13641_v43 = vld [vmem:[#allocation259_spill] sm:$0xff]  ;;  %v5787_v44 = vld [vmem:[%s12627_s4 + $0xb0] sm:$0xff] }
 0x794   :  { %4185 = vrot.lane.b32.xlu2 %v13603_v0, %s6506_s19  ;;  %3737 = vrot.lane.b32.xlu0 %v13634_v19, %s6507_s1  ;;  %v4841_v60 = vsel %vm4793_vm7, %v4760_v32, %v13640_v28  ;;  %v4599_v62 = vsel %vm4557_vm3, %v4525_v53, %v13641_v43 }
 0x795   :  { %3972 = vrot.lane.b32.xlu1 %v13590_v31, %s6505_s18  ;;  %v4922_v47 = vsel %vm4874_vm6, %v4841_v60, %v11102_v45  ;;  %v4680_v30 = vsel %vm4631_vm4, %v4599_v62, %v11140_v48  ;;  %v2280_v45 = vpop.f32.mrf.mxu3  ;;  %5839 = vmatpush.msrb.mxu2 %v5787_v44  ;;  %v13643_v48 = vld [vmem:[#allocation150_spill] sm:$0xff]  ;;  %v13645_v60 = vld [vmem:[#allocation27_spill] sm:$0xff] }
 0x796   :  { %v11432_v36 = vpop.permute.xlu2 %3485  ;;  %v5003_v4 = vsel %vm4955_vm8, %v4922_v47, %v13642_v7  ;;  %v4761_v41 = vsel %vm4712_vm5, %v4680_v30, %v13643_v48  ;;  %v2454_v43 = vmax.f32 %v13645_v60, %v2280_v45  ;;  %v13646_v62 = vld [vmem:[#allocation255_spill] sm:$0xff]  ;;  %v13648_v30 = vld [vmem:[#allocation274_spill] sm:$0xff] }
 0x797   :  { %v11436_v1 = vpop.permute.xlu1 %3958  ;;  %v11438_v17 = vpop.f32.mrf.mxu1  ;;  %v5084_v28 = vsel %vm5036_vm10, %v5003_v4, %v11075_v8  ;;  %v4842_v44 = vsel %vm4793_vm7, %v4761_v41, %v11110_v3 }
 0x798   :  { %13637 = vst [vmem:[#allocation172_spill] sm:$0xff] %v11438_v17  ;;  %v11443_v52 = vpop.permute.xlu0 %3723  ;;  %v13647_v17 = vld [vmem:[#allocation211_spill] sm:$0xff]  ;;  %v4923_v48 = vsel %vm4874_vm6, %v4842_v44, %v11168_v56 }
 0x799   :  { %v4526_v47 = vsel %vm4484_vm2, %v13647_v17, %v13646_v62  ;;  %v13651_v17 = vld [vmem:[#allocation289_spill] sm:$0xff]  ;;  %v5004_v4 = vsel %vm4955_vm8, %v4923_v48, %v11067_v55  ;;  %v13653_v62 = vld [vmem:[#allocation215_spill] sm:$0xff] }
 0x79a   :  { %6406 = vmatmul.msk.f32.gmra.mxu1 %vm5126_vm9, %v5083_v29  ;;  %v4600_v7 = vsel %vm4557_vm3, %v4526_v47, %v13648_v30 }
 0x79b   :  { %v4681_v45 = vsel %vm4631_vm4, %v4600_v7, %v11201_v46 }
 0x79c   :  { %3497 = vrot.lane.b32.xlu2 %v13613_v57, %s6510_s25  ;;  %4397 = vrot.lane.b32.xlu0 %v11447_v39, %s6508_s14 }
 0x79d   :  { %3257 = vrot.lane.b32.xlu1 %v13426_v21, %s6509_s15  ;;  %v13650_v21 = vld [vmem:[#allocation170_spill] sm:$0xff] }
 0x79e   :  { %v11469_v32 = vpop.permute.xlu2 %4175 }
 0x79f   :  { %v11473_v16 = vpop.permute.xlu1 %3243  ;;  %v11475_v53 = vpop.f32.mrf.mxu1 }
 0x7a0   :  { %13644 = vst [vmem:[#allocation192_spill] sm:$0xff] %v11475_v53  ;;  %v11477_v29 = vpop.permute.xlu0 %4383  ;;  %v13649_v53 = vld [vmem:[#allocation60_spill] sm:$0xff] }
 0x7a1   :  { %v2374_v8 = vmax.f32 %v13650_v21, %v13649_v53  ;;  %v4762_v21 = vsel %vm4712_vm5, %v4681_v45, %v11098_v18  ;;  %v13654_v18 = vld [vmem:[#allocation290_spill] sm:$0xff]  ;;  %v13655_v45 = vld [vmem:[#allocation287_spill] sm:$0xff] }
 0x7a2   :  { %6407 = vmatmul.msk.f32.gmra.mxu1 %vm5126_vm9, %v5084_v28  ;;  %v5085_v28 = vsel %vm5036_vm10, %v5004_v4, %v11144_v34  ;;  %v4843_v47 = vsel %vm4793_vm7, %v4762_v21, %v11174_v9  ;;  %v2283_v9 = vpop.f32.mrf.mxu3 }
 0x7a3   :  { %v2534_v3 = vmax.f32 %v2374_v8, %v2454_v43  ;;  %v13652_v43 = vld [vmem:[#allocation269_spill] sm:$0xff]  ;;  %v4924_v30 = vsel %vm4874_vm6, %v4843_v47, %v11239_v35 }
 0x7a4   :  { %4187 = vrot.lane.b32.xlu2 %v13619_v22, %s6506_s19  ;;  %3739 = vrot.lane.b32.xlu0 %v13651_v17, %s6507_s1  ;;  %v4527_v55 = vsel %vm4484_vm2, %v13653_v62, %v13652_v43  ;;  %v5005_v7 = vsel %vm4955_vm8, %v4924_v30, %v11136_v14  ;;  %v13657_v43 = vld [vmem:[#allocation30_spill] sm:$0xff] }
 0x7a5   :  { %3974 = vrot.lane.b32.xlu1 %v13603_v0, %s6505_s18  ;;  %v11516_v60 = vmax.f32 %v2534_v3, 0.0  ;;  %v4601_v44 = vsel %vm4557_vm3, %v4527_v55, %v13654_v18  ;;  %v13656_v3 = vld [vmem:[#allocation219_spill] sm:$0xff]  ;;  %v2455_v14 = vmax.f32 %v13657_v43, %v2283_v9  ;;  %v13658_v55 = vld [vmem:[#allocation282_spill] sm:$0xff] }
 0x7a6   :  { %v11504_v56 = vpop.permute.xlu2 %3487  ;;  %v4682_v34 = vsel %vm4631_vm4, %v4601_v44, %v11267_v59  ;;  %v4528_v4 = vsel %vm4484_vm2, %v13656_v3, %v13655_v45  ;;  %v13659_v18 = vld [vmem:[#allocation63_spill] sm:$0xff]  ;;  %v5817_v3 = vld [vmem:[%s12627_s4 + $0x1a0] sm:$0xff] }
 0x7a7   :  { %v11508_v41 = vpop.permute.xlu1 %3960  ;;  %v11510_v46 = vpop.f32.mrf.mxu1  ;;  %v4763_v35 = vsel %vm4712_vm5, %v4682_v34, %v11164_v6  ;;  %v4602_v47 = vsel %vm4557_vm3, %v4528_v4, %v13658_v55  ;;  %v13660_v44 = vld [vmem:[#allocation175_spill] sm:$0xff]  ;;  %5860 = vmatpush.msrb.mxu3 %v5817_v3 }
 0x7a8   :  { %v11512_v53 = vpop.permute.xlu0 %3725  ;;  %v4844_v62 = vsel %vm4793_vm7, %v4763_v35, %v11243_v23  ;;  %v2375_v30 = vmax.f32 %v13660_v44, %v13659_v18  ;;  %v4683_v34 = vsel %vm4631_vm4, %v4602_v47, %v11338_v63 }
 0x7a9   :  { %v4925_v6 = vsel %vm4874_vm6, %v4844_v62, %v11300_v5  ;;  %v4764_v9 = vsel %vm4712_vm5, %v4683_v34, %v11235_v20  ;;  %v13664_v34 = vld [vmem:[#allocation33_spill] sm:$0xff] }
 0x7aa   :  { %6408 = vmatmul.msk.f32.gmra.mxu1 %vm5126_vm9, %v5085_v28  ;;  %v5086_v28 = vsel %vm5036_vm10, %v5005_v7, %v11209_v24  ;;  %v2535_v24 = vmax.f32 %v2375_v30, %v2455_v14  ;;  %v5006_v23 = vsel %vm4955_vm8, %v4925_v6, %v11197_v40  ;;  %v13661_v40 = vld [vmem:[#allocation278_spill] sm:$0xff]  ;;  %v4845_v20 = vsel %vm4793_vm7, %v4764_v9, %v11308_v12  ;;  %v13663_v14 = vld [vmem:[#allocation4_spill] sm:$0xff]  ;;  %v2286_v12 = vpop.f32.mrf.mxu3 }
 0x7ab   :  { %v5087_v45 = vsel %vm5036_vm10, %v5006_v23, %v11273_v10  ;;  %v4926_v10 = vsel %vm4874_vm6, %v4845_v20, %v11366_v15  ;;  %v13665_v23 = vld [vmem:[#allocation293_spill] sm:$0xff]  ;;  %v13666_v9 = vld [vmem:[#allocation236_spill] sm:$0xff] }
 0x7ac   :  { %3499 = vrot.lane.b32.xlu2 %v13634_v19, %s6510_s25  ;;  %4399 = vrot.lane.b32.xlu0 %v11516_v60, %s6508_s14  ;;  %v11588_v4 = vmax.f32 %v2535_v24, 0.0  ;;  %v5007_v55 = vsel %vm4955_vm8, %v4926_v10, %v11263_v27  ;;  %v2456_v24 = vmax.f32 %v13664_v34, %v2286_v12  ;;  %v13671_v12 = vld [vmem:[#allocation240_spill] sm:$0xff] }
 0x7ad   :  { %3259 = vrot.lane.b32.xlu1 %v13613_v57, %s6509_s15  ;;  %v5088_v30 = vsel %vm5036_vm10, %v5007_v55, %v11342_v13 }
 0x7ae   :  { %v11538_v48 = vpop.permute.xlu2 %4177 }
 0x7af   :  { %v11542_v8 = vpop.permute.xlu1 %3245  ;;  %v11544_v59 = vpop.f32.mrf.mxu1 }
 0x7b0   :  { %v11549_v21 = vpop.permute.xlu0 %4385 }
 0x7b2   :  { %6409 = vmatmul.msk.f32.gmra.mxu1 %vm5126_vm9, %v5086_v28  ;;  %v13662_v28 = vld [vmem:[#allocation232_spill] sm:$0xff] }
 0x7b3   :  { %v4529_v43 = vsel %vm4484_vm2, %v13662_v28, %v13661_v40  ;;  %v13668_v28 = vld [vmem:[#allocation66_spill] sm:$0xff] }
 0x7b4   :  { %4189 = vrot.lane.b32.xlu2 %v11447_v39, %s6506_s19  ;;  %3741 = vrot.lane.b32.xlu0 %v13513_v2, %s6507_s1  ;;  %v4603_v62 = vsel %vm4557_vm3, %v4529_v43, %v13663_v14  ;;  %v13669_v43 = vld [vmem:[#allocation179_spill] sm:$0xff] }
 0x7b5   :  { %3976 = vrot.lane.b32.xlu1 %v13619_v22, %s6505_s18  ;;  %v4684_v6 = vsel %vm4631_vm4, %v4603_v62, %v11397_v11  ;;  %v2376_v13 = vmax.f32 %v13669_v43, %v13668_v28  ;;  %v13673_v28 = vld [vmem:[#allocation35_spill] sm:$0xff] }
 0x7b6   :  { %v11573_v5 = vpop.permute.xlu2 %3489  ;;  %v4765_v15 = vsel %vm4712_vm5, %v4684_v6, %v11296_v37  ;;  %v13667_v37 = vld [vmem:[#allocation84_spill] sm:$0xff]  ;;  %v13670_v6 = vld [vmem:[#allocation82_spill] sm:$0xff] }
 0x7b7   :  { %v11577_v7 = vpop.permute.xlu1 %3962  ;;  %v11579_v63 = vpop.f32.mrf.mxu1  ;;  %v4846_v27 = vsel %vm4793_vm7, %v4765_v15, %v11370_v49  ;;  %v2536_v49 = vmax.f32 %v2376_v13, %v2456_v24  ;;  %v4531_v55 = vsel %vm4484_vm2, %v13671_v12, %v13670_v6  ;;  %v13674_v13 = vld [vmem:[#allocation109_spill] sm:$0xff]  ;;  %v13678_v12 = vld [vmem:[#allocation184_spill] sm:$0xff] }
 0x7b8   :  { %v11581_v35 = vpop.permute.xlu0 %3727  ;;  %v4927_v40 = vsel %vm4874_vm6, %v4846_v27, %v11436_v1  ;;  %v13677_v6 = vld [vmem:[#allocation69_spill] sm:$0xff] }
 0x7b9   :  { %v5008_v14 = vsel %vm4955_vm8, %v4927_v40, %v11334_v26  ;;  %v11654_v34 = vmax.f32 %v2536_v49, 0.0 }
 0x7ba   :  { %6410 = vmatmul.msk.f32.gmra.mxu1 %vm5126_vm9, %v5087_v45  ;;  %v4530_v45 = vsel %vm4484_vm2, %v13666_v9, %v13665_v23  ;;  %v13672_v23 = vld [vmem:[#allocation296_spill] sm:$0xff] }
 0x7bb   :  { %v4604_v3 = vsel %vm4557_vm3, %v4530_v45, %v13667_v37  ;;  %v4605_v9 = vsel %vm4557_vm3, %v4531_v55, %v13672_v23 }
 0x7bc   :  { %3501 = vrot.lane.b32.xlu2 %v13651_v17, %s6510_s25  ;;  %4401 = vrot.lane.b32.xlu0 %v11588_v4, %s6508_s14  ;;  %v4685_v20 = vsel %vm4631_vm4, %v4604_v3, %v11473_v16 }
 0x7bd   :  { %3261 = vrot.lane.b32.xlu1 %v13634_v19, %s6509_s15  ;;  %v4766_v62 = vsel %vm4712_vm5, %v4685_v20, %v11362_v54  ;;  %v5785_v54 = vld [vmem:[%s12627_s4 + $0xa0] sm:$0xff]  ;;  %v13675_v20 = vld [vmem:[#allocation253_spill] sm:$0xff] }
 0x7be   :  { %v11610_v47 = vpop.permute.xlu2 %4179  ;;  %v4847_v26 = vsel %vm4793_vm7, %v4766_v62, %v11443_v52  ;;  %5840 = vmatpush.msrb.mxu2 %v5785_v54  ;;  %v2289_v52 = vpop.f32.mrf.mxu3  ;;  %v4532_v49 = vsel %vm4484_vm2, %v13675_v20, %v13674_v13 }
 0x7bf   :  { %v3248_v18 = vpop.permute.xlu1 %3247  ;;  %v11614_v11 = vpop.f32.mrf.mxu1  ;;  %v4928_v24 = vsel %vm4874_vm6, %v4847_v26, %v11508_v41  ;;  %v2457_v43 = vmax.f32 %v13673_v28, %v2289_v52  ;;  %v13680_v52 = vld [vmem:[#allocation257_spill] sm:$0xff] }
 0x7c0   :  { %v11616_v44 = vpop.permute.xlu0 %4387  ;;  %v5009_v41 = vsel %vm4955_vm8, %v4928_v24, %v11393_v51 }
 0x7c1   :  { %v5090_v40 = vsel %vm5036_vm10, %v5009_v41, %v11477_v29  ;;  %v2377_v29 = vmax.f32 %v13678_v12, %v13677_v6 }
 0x7c2   :  { %6411 = vmatmul.msk.f32.gmra.mxu1 %vm5126_vm9, %v5088_v30  ;;  %v5089_v30 = vsel %vm5036_vm10, %v5008_v14, %v11403_v33  ;;  %v4686_v33 = vsel %vm4631_vm4, %v4605_v9, %v11542_v8  ;;  %v13676_v14 = vld [vmem:[#allocation303_spill] sm:$0xff] }
 0x7c3   :  { %v4767_v27 = vsel %vm4712_vm5, %v4686_v33, %v11432_v36  ;;  %v4606_v36 = vsel %vm4557_vm3, %v4532_v49, %v13676_v14  ;;  %v13679_v33 = vld [vmem:[#allocation300_spill] sm:$0xff]  ;;  %v13683_v49 = vld [vmem:[#allocation261_spill] sm:$0xff] }
 0x7c4   :  { %4191 = vrot.lane.b32.xlu2 %v11516_v60, %s6506_s19  ;;  %3743 = vrot.lane.b32.xlu0 %v13537_v61, %s6507_s1  ;;  %v4848_v51 = vsel %vm4793_vm7, %v4767_v27, %v11512_v53  ;;  %v4687_v55 = vsel %vm4631_vm4, %v4606_v36, %v3248_v18  ;;  %v2537_v53 = vmax.f32 %v2377_v29, %v2457_v43  ;;  %v13681_v27 = vld [vmem:[#allocation134_spill] sm:$0xff]  ;;  %v13685_v29 = vld [vmem:[#allocation304_spill] sm:$0xff] }
 0x7c5   :  { %3978 = vrot.lane.b32.xlu1 %v11447_v39, %s6505_s18  ;;  %v4929_v62 = vsel %vm4874_vm6, %v4848_v51, %v11577_v7  ;;  %v4768_v7 = vsel %vm4712_vm5, %v4687_v55, %v11504_v56  ;;  %v4533_v41 = vsel %vm4484_vm2, %v13680_v52, %v13679_v33  ;;  %v13686_v55 = vld [vmem:[#allocation71_spill] sm:$0xff] }
 0x7c6   :  { %v11643_v1 = vpop.permute.xlu2 %3491  ;;  %v11712_v9 = vmax.f32 %v2537_v53, 0.0  ;;  %v4607_v56 = vsel %vm4557_vm3, %v4533_v41, %v13681_v27  ;;  %v13687_v53 = vld [vmem:[#allocation191_spill] sm:$0xff] }
 0x7c7   :  { %v3965_v10 = vpop.permute.xlu1 %3964  ;;  %v11647_v16 = vpop.f32.mrf.mxu1 }
 0x7c8   :  { %v3730_v15 = vpop.permute.xlu0 %3729 }
 0x7ca   :  { %6412 = vmatmul.msk.f32.gmra.mxu1 %vm5126_vm9, %v5089_v30  ;;  %v5010_v30 = vsel %vm4955_vm8, %v4929_v62, %v11469_v32  ;;  %v4849_v32 = vsel %vm4793_vm7, %v4768_v7, %v11581_v35  ;;  %v13684_v62 = vld [vmem:[#allocation37_spill] sm:$0xff] }
 0x7cb   :  { %v5091_v23 = vsel %vm5036_vm10, %v5010_v30, %v11549_v21  ;;  %v2292_v21 = vpop.f32.mrf.mxu3  ;;  %v2378_v30 = vmax.f32 %v13687_v53, %v13686_v55 }
 0x7cc   :  { %3503 = vrot.lane.b32.xlu2 %v13513_v2, %s6510_s25  ;;  %4403 = vrot.lane.b32.xlu0 %v11654_v34, %s6508_s14  ;;  %v2458_v6 = vmax.f32 %v13684_v62, %v2292_v21 }
 0x7cd   :  { %3263 = vrot.lane.b32.xlu1 %v13651_v17, %s6509_s15 }
 0x7ce   :  { %v11676_v45 = vpop.permute.xlu2 %4181 }
 0x7cf   :  { %v3250_v37 = vpop.permute.xlu1 %3249  ;;  %v11680_v8 = vpop.f32.mrf.mxu1 }
 0x7d0   :  { %v4390_v3 = vpop.permute.xlu0 %4389  ;;  %v4688_v28 = vsel %vm4631_vm4, %v4607_v56, %v3250_v37  ;;  %v13682_v37 = vld [vmem:[#allocation47_spill] sm:$0xff] }
 0x7d1   :  { %v4769_v13 = vsel %vm4712_vm5, %v4688_v28, %v11573_v5  ;;  %v4534_v51 = vsel %vm4484_vm2, %v13683_v49, %v13682_v37  ;;  %v13689_v28 = vld [vmem:[#allocation273_spill] sm:$0xff] }
 0x7d2   :  { %6413 = vmatmul.msk.f32.gmra.mxu1 %vm5126_vm9, %v5090_v40  ;;  %v4930_v40 = vsel %vm4874_vm6, %v4849_v32, %v3965_v10  ;;  %v4850_v12 = vsel %vm4793_vm7, %v4769_v13, %v3730_v15  ;;  %v4608_v5 = vsel %vm4557_vm3, %v4534_v51, %v13685_v29  ;;  %v5815_v32 = vld [vmem:[%s12627_s4 + $0x190] sm:$0xff] }
 0x7d3   :  { %v5011_v35 = vsel %vm4955_vm8, %v4930_v40, %v11538_v48  ;;  %5861 = vmatpush.msrb.mxu3 %v5815_v32 }
 0x7d4   :  { %4193 = vrot.lane.b32.xlu2 %v11588_v4, %s6506_s19  ;;  %3745 = vrot.lane.b32.xlu0 %v13556_v58, %s6507_s1  ;;  %v5092_v36 = vsel %vm5036_vm10, %v5011_v35, %v11616_v44  ;;  %v2538_v44 = vmax.f32 %v2378_v30, %v2458_v6  ;;  %v13693_v6 = vld [vmem:[#allocation196_spill] sm:$0xff] }
 0x7d5   :  { %3980 = vrot.lane.b32.xlu1 %v11516_v60, %s6505_s18 }
 0x7d6   :  { %v11706_v26 = vpop.permute.xlu2 %3493  ;;  %v11764_v27 = vmax.f32 %v2538_v44, 0.0 }
 0x7d7   :  { %v3967_v54 = vpop.permute.xlu1 %3966  ;;  %v5492_v18 = vpop.f32.mrf.mxu1 }
 0x7d8   :  { %v3732_v24 = vpop.permute.xlu0 %3731  ;;  %v4931_v48 = vsel %vm4874_vm6, %v4850_v12, %v3967_v54 }
 0x7d9   :  { %v5012_v15 = vsel %vm4955_vm8, %v4931_v48, %v11610_v47 }
 0x7da   :  { %6414 = vmatmul.msk.f32.gmra.mxu1 %vm5126_vm9, %v5091_v23  ;;  %v5093_v41 = vsel %vm5036_vm10, %v5012_v15, %v4390_v3 }
 0x7dc   :  { %3505 = vrot.lane.b32.xlu2 %v13537_v61, %s6510_s25  ;;  %4405 = vrot.lane.b32.xlu0 %v11712_v9, %s6508_s14 }
 0x7dd   :  { %3265 = vrot.lane.b32.xlu1 %v13513_v2, %s6509_s15 }
 0x7de   :  { %v4184_v43 = vpop.permute.xlu2 %4183 }
 0x7df   :  { %v3252_v10 = vpop.permute.xlu1 %3251  ;;  %v5494_v20 = vpop.f32.mrf.mxu1 }
 0x7e0   :  { %v4392_v14 = vpop.permute.xlu0 %4391  ;;  %v4689_v7 = vsel %vm4631_vm4, %v4608_v5, %v3252_v10  ;;  %v13690_v10 = vld [vmem:[#allocation141_spill] sm:$0xff] }
 0x7e1   :  { %v4770_v18 = vsel %vm4712_vm5, %v4689_v7, %v11643_v1  ;;  %v2295_v1 = vpop.f32.mrf.mxu3 }
 0x7e2   :  { %6415 = vmatmul.msk.f32.gmra.mxu1 %vm5126_vm9, %v5092_v36  ;;  %v4851_v56 = vsel %vm4793_vm7, %v4770_v18, %v3732_v24  ;;  %v13688_v24 = vld [vmem:[#allocation301_spill] sm:$0xff]  ;;  %v13691_v36 = vld [vmem:[#allocation40_spill] sm:$0xff] }
 0x7e3   :  { %v4535_v21 = vsel %vm4484_vm2, %v13689_v28, %v13688_v24  ;;  %v2459_v62 = vmax.f32 %v13691_v36, %v2295_v1  ;;  %v5783_v18 = vld [vmem:[%s12627_s4 + $0x90] sm:$0xff]  ;;  %v13696_v1 = vld [vmem:[#allocation15_spill] sm:$0xff] }
 0x7e4   :  { %4195 = vrot.lane.b32.xlu2 %v11654_v34, %s6506_s19  ;;  %3747 = vrot.lane.b32.xlu0 %v13568_v50, %s6507_s1  ;;  %v4609_v20 = vsel %vm4557_vm3, %v4535_v21, %v13690_v10  ;;  %v13697_v21 = vld [vmem:[#allocation43_spill] sm:$0xff] }
 0x7e5   :  { %3982 = vrot.lane.b32.xlu1 %v11588_v4, %s6505_s18  ;;  %5841 = vmatpush.msrb.mxu2 %v5783_v18  ;;  %v13698_v10 = vld [vmem:[#allocation75_spill] sm:$0xff]  ;;  %v13702_v18 = vld [vmem:[#allocation120_spill] sm:$0xff] }
 0x7e6   :  { %v3496_v54 = vpop.permute.xlu2 %3495 }
 0x7e7   :  { %v3969_v23 = vpop.permute.xlu1 %3968  ;;  %v11758_v33 = vpop.f32.mrf.mxu1 }
 0x7e8   :  { %v3734_v52 = vpop.permute.xlu0 %3733  ;;  %v4932_v47 = vsel %vm4874_vm6, %v4851_v56, %v3969_v23 }
 0x7e9   :  { %v5013_v3 = vsel %vm4955_vm8, %v4932_v47, %v11676_v45  ;;  %v13692_v45 = vld [vmem:[#allocation73_spill] sm:$0xff] }
 0x7ea   :  { %6416 = vmatmul.msk.f32.gmra.mxu1 %vm5126_vm9, %v5093_v41  ;;  %v5094_v51 = vsel %vm5036_vm10, %v5013_v3, %v4392_v14  ;;  %v2379_v12 = vmax.f32 %v13693_v6, %v13692_v45  ;;  %v13695_v41 = vld [vmem:[#allocation271_spill] sm:$0xff] }
 0x7ec   :  { %3507 = vrot.lane.b32.xlu2 %v13556_v58, %s6510_s25  ;;  %4407 = vrot.lane.b32.xlu0 %v11764_v27, %s6508_s14  ;;  %v2539_v14 = vmax.f32 %v2379_v12, %v2459_v62 }
 0x7ed   :  { %3267 = vrot.lane.b32.xlu1 %v13537_v61, %s6509_s15 }
 0x7ee   :  { %v4186_v40 = vpop.permute.xlu2 %4185  ;;  %v11803_v44 = vmax.f32 %v2539_v14, 0.0 }
 0x7ef   :  { %v3254_v35 = vpop.permute.xlu1 %3253  ;;  %v11780_v13 = vpop.f32.mrf.mxu1 }
 0x7f0   :  { %v4394_v37 = vpop.permute.xlu0 %4393  ;;  %v4690_v49 = vsel %vm4631_vm4, %v4609_v20, %v3254_v35  ;;  %v13699_v20 = vld [vmem:[#allocation201_spill] sm:$0xff] }
 0x7f1   :  { %v4771_v48 = vsel %vm4712_vm5, %v4690_v49, %v11706_v26 }
 0x7f2   :  { %6417 = vmatmul.msk.f32.gmra.mxu1 %vm5126_vm9, %v5094_v51  ;;  %v4852_v55 = vsel %vm4793_vm7, %v4771_v48, %v3734_v52  ;;  %v13694_v52 = vld [vmem:[#allocation138_spill] sm:$0xff] }
 0x7f3   :  { %v4536_v32 = vsel %vm4484_vm2, %v13695_v41, %v13694_v52 }
 0x7f4   :  { %4197 = vrot.lane.b32.xlu2 %v11712_v9, %s6506_s19  ;;  %3749 = vrot.lane.b32.xlu0 %v13577_v42, %s6507_s1  ;;  %v4610_v3 = vsel %vm4557_vm3, %v4536_v32, %v13696_v1 }
 0x7f5   :  { %3984 = vrot.lane.b32.xlu1 %v11654_v34, %s6505_s18 }
 0x7f6   :  { %v3498_v29 = vpop.permute.xlu2 %3497 }
 0x7f7   :  { %v3971_v5 = vpop.permute.xlu1 %3970  ;;  %v11799_v53 = vpop.f32.mrf.mxu1 }
 0x7f8   :  { %v4933_v30 = vsel %vm4874_vm6, %v4852_v55, %v3971_v5  ;;  %v3736_v7 = vpop.permute.xlu0 %3735  ;;  %v13700_v55 = vld [vmem:[#allocation306_spill] sm:$0xff] }
 0x7f9   :  { %v5014_v26 = vsel %vm4955_vm8, %v4933_v30, %v4184_v43  ;;  %v2298_v43 = vpop.f32.mrf.mxu3  ;;  %v13701_v30 = vld [vmem:[#allocation272_spill] sm:$0xff] }
 0x7fa   :  { %v5095_v15 = vsel %vm5036_vm10, %v5014_v26, %v4394_v37  ;;  %v2460_v35 = vmax.f32 %v13697_v21, %v2298_v43  ;;  %v2380_v37 = vmax.f32 %v13699_v20, %v13698_v10  ;;  %v13703_v20 = vmov 0.0  }
 0x7fb   :  { %6418 = vmatmul.msk.f32.gmra.mxu1 %vm5126_vm9, %v5095_v15 }
 0x7fc   :  { %3509 = vrot.lane.b32.xlu2 %v13568_v50, %s6510_s25  ;;  %4409 = vrot.lane.b32.xlu0 %v11803_v44, %s6508_s14  ;;  %v2540_v51 = vmax.f32 %v2380_v37, %v2460_v35  ;;  %v5813_v35 = vld [vmem:[%s12627_s4 + $0x180] sm:$0xff] }
 0x7fd   :  { %3269 = vrot.lane.b32.xlu1 %v13556_v58, %s6509_s15  ;;  %5862 = vmatpush.msrb.mxu3 %v5813_v35  ;;  %v13709_v35 = vld [vmem:[#allocation98_spill] sm:$0xff] }
 0x7fe   :  { %v4188_v23 = vpop.permute.xlu2 %4187  ;;  %v11839_v14 = vmax.f32 %v2540_v51, 0.0 }
 0x7ff   :  { %v3256_v56 = vpop.permute.xlu1 %3255  ;;  %v11819_v47 = vpop.f32.mrf.mxu1 }
 0x800   :  { %v4396_v24 = vpop.permute.xlu0 %4395  ;;  %v4691_v28 = vsel %vm4631_vm4, %v4610_v3, %v3256_v56 }
 0x801   :  { %v4772_v49 = vsel %vm4712_vm5, %v4691_v28, %v3496_v54 }
 0x802   :  { %v4853_v45 = vsel %vm4793_vm7, %v4772_v49, %v3736_v7  ;;  %v4537_v7 = vsel %vm4484_vm2, %v13701_v30, %v13700_v55  ;;  %v13705_v49 = vld [vmem:[#allocation111_spill] sm:$0xff] }
 0x803   :  { %v4611_v43 = vsel %vm4557_vm3, %v4537_v7, %v13702_v18 }
 0x804   :  { %4199 = vrot.lane.b32.xlu2 %v11764_v27, %s6506_s19  ;;  %3751 = vrot.lane.b32.xlu0 %v13590_v31, %s6507_s1 }
 0x805   :  { %3986 = vrot.lane.b32.xlu1 %v11712_v9, %s6505_s18 }
 0x806   :  { %v3500_v36 = vpop.permute.xlu2 %3499 }
 0x807   :  { %v3973_v62 = vpop.permute.xlu1 %3972  ;;  %v11835_v6 = vpop.f32.mrf.mxu1 }
 0x808   :  { %v4934_v12 = vsel %vm4874_vm6, %v4853_v45, %v3973_v62  ;;  %v3738_v48 = vpop.permute.xlu0 %3737 }
 0x809   :  { %v5015_v54 = vsel %vm4955_vm8, %v4934_v12, %v4186_v40  ;;  %v13706_v12 = vld [vmem:[#allocation159_spill] sm:$0xff] }
 0x80a   :  { %v5096_v5 = vsel %vm5036_vm10, %v5015_v54, %v4396_v24 }
 0x80b   :  { %6419 = vmatmul.msk.f32.gmra.mxu1 %vm5126_vm9, %v5096_v5 }
 0x80c   :  { %3511 = vrot.lane.b32.xlu2 %v13577_v42, %s6510_s25  ;;  %4411 = vrot.lane.b32.xlu0 %v11839_v14, %s6508_s14 }
 0x80d   :  { %3271 = vrot.lane.b32.xlu1 %v13568_v50, %s6509_s15 }
 0x80e   :  { %v4190_v40 = vpop.permute.xlu2 %4189 }
 0x80f   :  { %v3258_v26 = vpop.permute.xlu1 %3257  ;;  %v11852_v15 = vpop.f32.mrf.mxu1 }
 0x810   :  { %v4398_v52 = vpop.permute.xlu0 %4397  ;;  %v4692_v41 = vsel %vm4631_vm4, %v4611_v43, %v3258_v26 }
 0x811   :  { %v4773_v32 = vsel %vm4712_vm5, %v4692_v41, %v3498_v29 }
 0x812   :  { %v4854_v3 = vsel %vm4793_vm7, %v4773_v32, %v3738_v48 }
 0x814   :  { %4201 = vrot.lane.b32.xlu2 %v11803_v44, %s6506_s19  ;;  %3753 = vrot.lane.b32.xlu0 %v13603_v0, %s6507_s1 }
 0x815   :  { %3988 = vrot.lane.b32.xlu1 %v11764_v27, %s6505_s18 }
 0x816   :  { %v3502_v56 = vpop.permute.xlu2 %3501 }
 0x817   :  { %v3975_v1 = vpop.permute.xlu1 %3974  ;;  %v11865_v24 = vpop.f32.mrf.mxu1 }
 0x818   :  { %v4935_v28 = vsel %vm4874_vm6, %v4854_v3, %v3975_v1  ;;  %v3740_v21 = vpop.permute.xlu0 %3739  ;;  %v13708_v3 = vld [vmem:[#allocation80_spill] sm:$0xff] }
 0x819   :  { %v5016_v29 = vsel %vm4955_vm8, %v4935_v28, %v4188_v23  ;;  %v13704_v23 = vld [vmem:[#allocation11_spill] sm:$0xff] }
 0x81a   :  { %v5097_v10 = vsel %vm5036_vm10, %v5016_v29, %v4398_v52  ;;  %v4538_v51 = vsel %vm4484_vm2, %v13705_v49, %v13704_v23 }
 0x81b   :  { %6420 = vmatmul.msk.f32.gmra.mxu1 %vm5126_vm9, %v5097_v10  ;;  %v4612_v48 = vsel %vm4557_vm3, %v4538_v51, %v13706_v12 }
 0x81c   :  { %3513 = vrot.lane.b32.xlu2 %v13590_v31, %s6510_s25  ;;  %4413 = vrot.lane.b32.xlu0 %v13703_v20, %s6508_s14 }
 0x81d   :  { %3273 = vrot.lane.b32.xlu1 %v13577_v42, %s6509_s15 }
 0x81e   :  { %v4192_v37 = vpop.permute.xlu2 %4191 }
 0x81f   :  { %v3260_v62 = vpop.permute.xlu1 %3259  ;;  %v11883_v45 = vpop.f32.mrf.mxu1 }
 0x820   :  { %v4400_v54 = vpop.permute.xlu0 %4399  ;;  %v4693_v5 = vsel %vm4631_vm4, %v4612_v48, %v3260_v62 }
 0x821   :  { %v4774_v55 = vsel %vm4712_vm5, %v4693_v5, %v3500_v36  ;;  %v5781_v36 = vld [vmem:[%s12627_s4 + $0x80] sm:$0xff] }
 0x822   :  { %v4855_v26 = vsel %vm4793_vm7, %v4774_v55, %v3740_v21  ;;  %5842 = vmatpush.msrb.mxu2 %v5781_v36 }
 0x824   :  { %4203 = vrot.lane.b32.xlu2 %v11839_v14, %s6506_s19  ;;  %3755 = vrot.lane.b32.xlu0 %v13619_v22, %s6507_s1 }
 0x825   :  { %3990 = vrot.lane.b32.xlu1 %v11803_v44, %s6505_s18 }
 0x826   :  { %v3504_v30 = vpop.permute.xlu2 %3503 }
 0x827   :  { %v3977_v7 = vpop.permute.xlu1 %3976  ;;  %v5520_v18 = vpop.f32.mrf.mxu1 }
 0x828   :  { %v4936_v43 = vsel %vm4874_vm6, %v4855_v26, %v3977_v7  ;;  %v3742_v52 = vpop.permute.xlu0 %3741  ;;  %v13710_v7 = vld [vmem:[#allocation309_spill] sm:$0xff]  ;;  %v13711_v26 = vld [vmem:[#allocation114_spill] sm:$0xff] }
 0x829   :  { %v5017_v41 = vsel %vm4955_vm8, %v4936_v43, %v4190_v40  ;;  %v13707_v40 = vld [vmem:[#allocation18_spill] sm:$0xff]  ;;  %v4540_v18 = vsel %vm4484_vm2, %v13711_v26, %v13710_v7 }
 0x82a   :  { %v5098_v32 = vsel %vm5036_vm10, %v5017_v41, %v4400_v54  ;;  %v4539_v28 = vsel %vm4484_vm2, %v13708_v3, %v13707_v40  ;;  %v13712_v41 = vld [vmem:[#allocation74_spill] sm:$0xff] }
 0x82b   :  { %6421 = vmatmul.msk.f32.gmra.mxu1 %vm5126_vm9, %v5098_v32  ;;  %v4613_v10 = vsel %vm4557_vm3, %v4539_v28, %v13709_v35  ;;  %v4614_v36 = vsel %vm4557_vm3, %v4540_v18, %v13712_v41 }
 0x82c   :  { %3515 = vrot.lane.b32.xlu2 %v13603_v0, %s6510_s25  ;;  %3277 = vrot.lane.b32.xlu0 %v13603_v0, %s6509_s15 }
 0x82d   :  { %3275 = vrot.lane.b32.xlu1 %v13590_v31, %s6509_s15 }
 0x82e   :  { %v4194_v1 = vpop.permute.xlu2 %4193 }
 0x82f   :  { %v3262_v21 = vpop.permute.xlu1 %3261  ;;  %v5522_v29 = vpop.f32.mrf.mxu1 }
 0x830   :  { %v4402_v23 = vpop.permute.xlu0 %4401  ;;  %v4694_v49 = vsel %vm4631_vm4, %v4613_v10, %v3262_v21 }
 0x831   :  { %v4775_v51 = vsel %vm4712_vm5, %v4694_v49, %v3502_v56  ;;  %v5811_v49 = vld [vmem:[%s12627_s4 + $0x170] sm:$0xff] }
 0x832   :  { %v4856_v12 = vsel %vm4793_vm7, %v4775_v51, %v3742_v52  ;;  %5863 = vmatpush.msrb.mxu3 %v5811_v49 }
 0x834   :  { %4205 = vrot.lane.b32.xlu2 %v13703_v20, %s6506_s19  ;;  %3994 = vrot.lane.b32.xlu0 %v13703_v20, %s6505_s18 }
 0x835   :  { %3992 = vrot.lane.b32.xlu1 %v11839_v14, %s6505_s18 }
 0x836   :  { %v3506_v0 = vpop.permute.xlu2 %3505 }
 0x837   :  { %v3979_v62 = vpop.permute.xlu1 %3978  ;;  %v11923_v48 = vpop.f32.mrf.mxu1 }
 0x838   :  { %v4937_v54 = vsel %vm4874_vm6, %v4856_v12, %v3979_v62  ;;  %v3744_v5 = vpop.permute.xlu0 %3743  ;;  %v13714_v62 = vld [vmem:[#allocation61_spill] sm:$0xff] }
 0x839   :  { %v5018_v56 = vsel %vm4955_vm8, %v4937_v54, %v4192_v37 }
 0x83a   :  { %v5099_v55 = vsel %vm5036_vm10, %v5018_v56, %v4402_v23  ;;  %v13715_v56 = vld [vmem:[#allocation310_spill] sm:$0xff] }
 0x83b   :  { %6422 = vmatmul.msk.f32.gmra.mxu1 %vm5126_vm9, %v5099_v55 }
 0x83c   :  { %3757 = vrot.lane.b32.xlu2 %v11447_v39, %s6507_s1  ;;  %3759 = vrot.lane.b32.xlu0 %v11516_v60, %s6507_s1 }
 0x83d   :  { %3517 = vrot.lane.b32.xlu1 %v13619_v22, %s6510_s25 }
 0x83e   :  { %v4196_v43 = vpop.permute.xlu2 %4195 }
 0x83f   :  { %v3264_v52 = vpop.permute.xlu1 %3263  ;;  %v11938_v37 = vpop.f32.mrf.mxu1 }
 0x840   :  { %v4404_v32 = vpop.permute.xlu0 %4403  ;;  %v4695_v40 = vsel %vm4631_vm4, %v4614_v36, %v3264_v52 }
 0x841   :  { %v4776_v3 = vsel %vm4712_vm5, %v4695_v40, %v3504_v30 }
 0x842   :  { %v4857_v29 = vsel %vm4793_vm7, %v4776_v3, %v3744_v5  ;;  %v5779_v3 = vld [vmem:[%s12627_s4 + $0x70] sm:$0xff] }
 0x843   :  { %5843 = vmatpush.msrb.mxu2 %v5779_v3  ;;  %v13722_v3 = vld [vmem:[#allocation81_spill] sm:$0xff] }
 0x844   :  { %3519 = vrot.lane.b32.xlu2 %v11447_v39, %s6510_s25  ;;  %3761 = vrot.lane.b32.xlu0 %v11588_v4, %s6507_s1 }
 0x845   :  { %3279 = vrot.lane.b32.xlu1 %v13619_v22, %s6509_s15 }
 0x846   :  { %v3508_v28 = vpop.permute.xlu2 %3507 }
 0x847   :  { %v3981_v21 = vpop.permute.xlu1 %3980  ;;  %v11951_v35 = vpop.f32.mrf.mxu1 }
 0x848   :  { %v4938_v10 = vsel %vm4874_vm6, %v4857_v29, %v3981_v21  ;;  %v3746_v23 = vpop.permute.xlu0 %3745 }
 0x849   :  { %v5019_v30 = vsel %vm4955_vm8, %v4938_v10, %v4194_v1  ;;  %v13713_v1 = vld [vmem:[#allocation72_spill] sm:$0xff] }
 0x84a   :  { %v5100_v51 = vsel %vm5036_vm10, %v5019_v30, %v4404_v32  ;;  %v4541_v12 = vsel %vm4484_vm2, %v13714_v62, %v13713_v1  ;;  %v13717_v30 = vld [vmem:[#allocation321_spill] sm:$0xff] }
 0x84b   :  { %6423 = vmatmul.msk.f32.gmra.mxu1 %vm5126_vm9, %v5100_v51  ;;  %v4615_v55 = vsel %vm4557_vm3, %v4541_v12, %v13715_v56 }
 0x84c   :  { %3521 = vrot.lane.b32.xlu2 %v11516_v60, %s6510_s25  ;;  %3763 = vrot.lane.b32.xlu0 %v11654_v34, %s6507_s1 }
 0x84d   :  { %3281 = vrot.lane.b32.xlu1 %v11447_v39, %s6509_s15 }
 0x84e   :  { %v4198_v22 = vpop.permute.xlu2 %4197 }
 0x84f   :  { %v3266_v54 = vpop.permute.xlu1 %3265  ;;  %v5533_v5 = vpop.f32.mrf.mxu1 }
 0x850   :  { %v4406_v7 = vpop.permute.xlu0 %4405  ;;  %v4696_v26 = vsel %vm4631_vm4, %v4615_v55, %v3266_v54 }
 0x851   :  { %v4777_v18 = vsel %vm4712_vm5, %v4696_v26, %v3506_v0  ;;  %v13719_v26 = vld [vmem:[#allocation21_spill] sm:$0xff] }
 0x852   :  { %v4858_v41 = vsel %vm4793_vm7, %v4777_v18, %v3746_v23 }
 0x854   :  { %3523 = vrot.lane.b32.xlu2 %v11588_v4, %s6510_s25  ;;  %3765 = vrot.lane.b32.xlu0 %v11712_v9, %s6507_s1 }
 0x855   :  { %3283 = vrot.lane.b32.xlu1 %v11516_v60, %s6509_s15 }
 0x856   :  { %v11979_v39 = vpop.permute.xlu2 %3509 }
 0x857   :  { %v3983_v52 = vpop.permute.xlu1 %3982  ;;  %v5536_v36 = vpop.f32.mrf.mxu1 }
 0x858   :  { %v4939_v32 = vsel %vm4874_vm6, %v4858_v41, %v3983_v52  ;;  %v3748_v40 = vpop.permute.xlu0 %3747 }
 0x859   :  { %v5020_v0 = vsel %vm4955_vm8, %v4939_v32, %v4196_v43  ;;  %v13716_v43 = vld [vmem:[#allocation31_spill] sm:$0xff]  ;;  %v13720_v32 = vld [vmem:[#allocation158_spill] sm:$0xff] }
 0x85a   :  { %v5101_v21 = vsel %vm5036_vm10, %v5020_v0, %v4406_v7  ;;  %v4542_v29 = vsel %vm4484_vm2, %v13369_v25, %v13716_v43  ;;  %v13718_v7 = vld [vmem:[#allocation88_spill] sm:$0xff]  ;;  %v13721_v0 = vld [vmem:[#allocation338_spill] sm:$0xff] }
 0x85b   :  { %6424 = vmatmul.msk.f32.gmra.mxu1 %vm5126_vm9, %v5101_v21  ;;  %v4616_v49 = vsel %vm4557_vm3, %v4542_v29, %v13717_v30  ;;  %v5615_v18 = vmax.f32 %v13719_v26, %v13718_v7  ;;  %v13723_v21 = vld [vmem:[#allocation284_spill] sm:$0xff]  ;;  %v5628_v29 = vmax.f32 %v11835_v6, %v5536_v36  ;;  %v13727_v6 = vld [vmem:[#allocation13_spill] sm:$0xff] }
 0x85c   :  { %3525 = vrot.lane.b32.xlu2 %v11654_v34, %s6510_s25  ;;  %3767 = vrot.lane.b32.xlu0 %v11764_v27, %s6507_s1  ;;  %v5614_v43 = vmax.f32 %v13723_v21, %v13722_v3  ;;  %v13728_v36 = vld [vmem:[#allocation336_spill] sm:$0xff] }
 0x85d   :  { %3285 = vrot.lane.b32.xlu1 %v11588_v4, %s6509_s15  ;;  %v5612_v30 = vmax.f32 %v13728_v36, %v13727_v6 }
 0x85e   :  { %v11995_v60 = vpop.permute.xlu2 %4199 }
 0x85f   :  { %v3268_v10 = vpop.permute.xlu1 %3267  ;;  %v5539_v23 = vpop.f32.mrf.mxu1 }
 0x860   :  { %v4408_v51 = vpop.permute.xlu0 %4407  ;;  %v4697_v1 = vsel %vm4631_vm4, %v4616_v49, %v3268_v10  ;;  %v5629_v52 = vmax.f32 %v11852_v15, %v5539_v23  ;;  %v13724_v15 = vld [vmem:[#allocation318_spill] sm:$0xff]  ;;  %v5626_v23 = vmax.f32 %v11799_v53, %v11951_v35  ;;  %v5643_v49 = vmax.f32 %v5614_v43, %v5615_v18 }
 0x861   :  { %v4778_v62 = vsel %vm4712_vm5, %v4697_v1, %v3508_v28  ;;  %v13729_v1 = vld [vmem:[#allocation329_spill] sm:$0xff] }
 0x862   :  { %v4859_v12 = vsel %vm4793_vm7, %v4778_v62, %v3748_v40  ;;  %v5613_v40 = vmax.f32 %v13721_v0, %v13720_v32  ;;  %v13730_v62 = vld [vmem:[#allocation280_spill] sm:$0xff] }
 0x864   :  { %3527 = vrot.lane.b32.xlu2 %v11712_v9, %s6510_s25  ;;  %3769 = vrot.lane.b32.xlu0 %v11803_v44, %s6507_s1  ;;  %v5642_v53 = vmax.f32 %v5612_v30, %v5613_v40 }
 0x865   :  { %3287 = vrot.lane.b32.xlu1 %v11654_v34, %s6509_s15  ;;  %v5627_v34 = vmax.f32 %v11819_v47, %v5533_v5  ;;  %v4543_v47 = vsel %vm4484_vm2, %v13386_v38, %v13724_v15  ;;  %v13726_v5 = vld [vmem:[#allocation323_spill] sm:$0xff] }
 0x866   :  { %v12010_v25 = vpop.permute.xlu2 %3511 }
 0x867   :  { %v3985_v4 = vpop.permute.xlu1 %3984  ;;  %v5542_v54 = vpop.f32.mrf.mxu1 }
 0x868   :  { %v4940_v56 = vsel %vm4874_vm6, %v4859_v12, %v3985_v4  ;;  %v3750_v55 = vpop.permute.xlu0 %3749  ;;  %v5610_v4 = vmax.f32 %v13730_v62, %v13729_v1  ;;  %v5649_v12 = vmax.f32 %v5626_v23, %v5627_v34  ;;  %v5630_v35 = vmax.f32 %v11865_v24, %v5542_v54 }
 0x869   :  { %v5021_v28 = vsel %vm4955_vm8, %v4940_v56, %v4198_v22  ;;  %v13725_v22 = vld [vmem:[#allocation29_spill] sm:$0xff] }
 0x86a   :  { %v5102_v41 = vsel %vm5036_vm10, %v5021_v28, %v4408_v51  ;;  %v5611_v10 = vmax.f32 %v13726_v5, %v13725_v22  ;;  %v5650_v51 = vmax.f32 %v5628_v29, %v5629_v52  ;;  %v12046_v28 = vld [vmem:[%s12626_s3] ss:$0 sm:$0xff] }
 0x86b   :  { %6425 = vmatmul.msk.f32.gmra.mxu1 %vm5126_vm9, %v5102_v41  ;;  %v5663_v32 = vadd.f32 %v12046_v28, %v5643_v49  ;;  %v5669_v21 = vadd.f32 %v12046_v28, %v5649_v12  ;;  %v5662_v40 = vadd.f32 %v12046_v28, %v5642_v53 }
 0x86c   :  { %3529 = vrot.lane.b32.xlu2 %v11764_v27, %s6510_s25  ;;  %3771 = vrot.lane.b32.xlu0 %v11839_v14, %s6507_s1  ;;  %v5641_v41 = vmax.f32 %v5610_v4, %v5611_v10  ;;  %v5670_v0 = vadd.f32 %v12046_v28, %v5650_v51  ;;  %v13732_v4 = vld [vmem:[#allocation36_spill] sm:$0xff] }
 0x86d   :  { %3289 = vrot.lane.b32.xlu1 %v11712_v9, %s6509_s15  ;;  %v13731_v9 = vld [vmem:[#allocation314_spill] sm:$0xff]  ;;  %v5679_v43 = vmax.f32 %v5663_v32, 0.0  ;;  %v5678_v10 = vmax.f32 %v5662_v40, 0.0 }
 0x86e   :  { %v4617_v7 = vsel %vm4557_vm3, %v4543_v47, %v13731_v9  ;;  %v4202_v26 = vpop.permute.xlu2 %4201  ;;  %v5686_v29 = vmax.f32 %v5670_v0, 0.0  ;;  %v5685_v47 = vmax.f32 %v5669_v21, 0.0 }
 0x86f   :  { %v3270_v56 = vpop.permute.xlu1 %3269  ;;  %v5545_v38 = vpop.f32.mrf.mxu1 }
 0x870   :  { %v4410_v18 = vpop.permute.xlu0 %4409  ;;  %v5631_v52 = vmax.f32 %v11883_v45, %v5545_v38  ;;  %v4698_v34 = vsel %vm4631_vm4, %v4617_v7, %v3270_v56  ;;  %v5661_v45 = vadd.f32 %v12046_v28, %v5641_v41  ;;  %v6469_v1 = vpack.i.bf16 %v5686_v29, %v5678_v10  ;;  %v13734_v38 = vld [vmem:[#allocation319_spill] sm:$0xff]  ;;  %v5777_v7 = vld [vmem:[%s12627_s4 + $0x60] sm:$0xff] }
 0x871   :  { %v4779_v24 = vsel %vm4712_vm5, %v4698_v34, %v11979_v39  ;;  %5844 = vmatpush.msrb.mxu2 %v5777_v7  ;;  %v13737_v29 = vld [vmem:[#allocation326_spill] sm:$0xff] }
 0x872   :  { %v5651_v3 = vmax.f32 %v5630_v35, %v5631_v52  ;;  %v4860_v5 = vsel %vm4793_vm7, %v4779_v24, %v3750_v55  ;;  %v5677_v30 = vmax.f32 %v5661_v45, 0.0  ;;  %v5809_v55 = vld [vmem:[%s12627_s4 + $0x160] sm:$0xff]  ;;  %v13736_v45 = vld [vmem:[#allocation17_spill] sm:$0xff] }
 0x873   :  { %5864 = vmatpush.msrb.mxu3 %v5809_v55 }
 0x874   :  { %v5671_v54 = vadd.f32 %v12046_v28, %v5651_v3  ;;  %3531 = vrot.lane.b32.xlu2 %v11803_v44, %s6510_s25  ;;  %v6464_v62 = vpack.i.bf16 %v5685_v47, %v5677_v30 }
 0x875   :  { %3291 = vrot.lane.b32.xlu1 %v11764_v27, %s6509_s15 }
 0x876   :  { %v5687_v15 = vmax.f32 %v5671_v54, 0.0  ;;  %v3514_v51 = vpop.permute.xlu2 %3513  ;;  %v13735_v54 = vld [vmem:[#allocation316_spill] sm:$0xff] }
 0x877   :  { %v3987_v22 = vpop.permute.xlu1 %3986 }
 0x878   :  { %v6474_v23 = vpack.i.bf16 %v5687_v15, %v5679_v43  ;;  %v4941_v39 = vsel %vm4874_vm6, %v4860_v5, %v3987_v22  ;;  %v3752_v6 = vpop.permute.xlu0 %3751  ;;  %v5548_v36 = vpop.f32.mrf.mxu1  ;;  %v4545_v43 = vsel %vm4484_vm2, %v13736_v45, %v13735_v54 }
 0x879   :  { %v5022_v49 = vsel %vm4955_vm8, %v4941_v39, %v11995_v60  ;;  %v13733_v60 = vld [vmem:[#allocation70_spill] sm:$0xff]  ;;  %v4619_v15 = vsel %vm4557_vm3, %v4545_v43, %v13737_v29  ;;  %v5775_v29 = vld [vmem:[%s12627_s4 + $0x50] sm:$0xff] }
 0x87a   :  { %6475 = vrot.lane.b32.xlu0 %v6474_v23, %s6505_s18  ;;  %v5103_v27 = vsel %vm5036_vm10, %v5022_v49, %v4410_v18  ;;  %v4544_v12 = vsel %vm4484_vm2, %v13733_v60, %v13732_v4  ;;  %v13738_v49 = vld [vmem:[#allocation324_spill] sm:$0xff]  ;;  %5845 = vmatpush.msrb.mxu2 %v5775_v29 }
 0x87b   :  { %6426 = vmatmul.msk.f32.gmra.mxu1 %vm5126_vm9, %v5103_v27  ;;  %v4618_v53 = vsel %vm4557_vm3, %v4544_v12, %v13734_v38  ;;  %v13739_v27 = vld [vmem:[#allocation22_spill] sm:$0xff] }
 0x87c   :  { %6470 = vrot.lane.b32.xlu2 %v6469_v1, %s6510_s25  ;;  %v4546_v1 = vsel %vm4484_vm2, %v13739_v27, %v13738_v49 }
 0x87d   :  { %6465 = vrot.lane.b32.xlu1 %v6464_v62, %s6504_s22  ;;  %v13740_v62 = vld [vmem:[#allocation105_spill] sm:$0xff]  ;;  %s6512_s22 = smov 96  }
 0x87e   :  { %v4204_v52 = vpop.permute.xlu2 %4203  ;;  %v4620_v55 = vsel %vm4557_vm3, %v4546_v1, %v13740_v62 }
 0x87f   :  { %v3272_v56 = vpop.permute.xlu1 %3271 }
 0x880   :  { %v4412_v35 = vpop.permute.xlu0 %4411  ;;  %v4699_v9 = vsel %vm4631_vm4, %v4618_v53, %v3272_v56 }
 0x881   :  { %v4780_v18 = vsel %vm4712_vm5, %v4699_v9, %v12010_v25 }
 0x882   :  { %v4861_v34 = vsel %vm4793_vm7, %v4780_v18, %v3752_v6 }
 0x886   :  { %v3516_v24 = vpop.permute.xlu2 %3515 }
 0x887   :  { %v3989_v41 = vpop.permute.xlu1 %3988 }
 0x888   :  { %v4942_v32 = vsel %vm4874_vm6, %v4861_v34, %v3989_v41  ;;  %v3754_v0 = vpop.permute.xlu0 %3753  ;;  %v5550_v3 = vpop.f32.mrf.mxu1  ;;  %v13741_v34 = vld [vmem:[#allocation44_spill] sm:$0xff] }
 0x889   :  { %v5023_v21 = vsel %vm4955_vm8, %v4942_v32, %v4202_v26  ;;  %v13742_v32 = vld [vmem:[#allocation127_spill] sm:$0xff]  ;;  %v13743_v3 = vld [vmem:[#allocation46_spill] sm:$0xff] }
 0x88a   :  { %v5104_v40 = vsel %vm5036_vm10, %v5023_v21, %v4412_v35 }
 0x88b   :  { %6427 = vmatmul.msk.f32.gmra.mxu1 %vm5126_vm9, %v5104_v40 }
 0x88e   :  { %v12103_v23 = vpop.permute.xlu2 %4205 }
 0x88f   :  { %v3274_v25 = vpop.permute.xlu1 %3273 }
 0x890   :  { %v12098_v47 = vpop.permute.xlu0 %4413  ;;  %v4700_v22 = vsel %vm4631_vm4, %v4619_v15, %v3274_v25 }
 0x891   :  { %v4781_v5 = vsel %vm4712_vm5, %v4700_v22, %v3514_v51  ;;  %v13744_v22 = vld [vmem:[#allocation327_spill] sm:$0xff] }
 0x892   :  { %v4862_v10 = vsel %vm4793_vm7, %v4781_v5, %v3754_v0  ;;  %v4547_v0 = vsel %vm4484_vm2, %v13742_v32, %v13741_v34  ;;  %v4548_v5 = vsel %vm4484_vm2, %v13613_v57, %v13744_v22  ;;  %v13748_v34 = vld [vmem:[#allocation42_spill] sm:$0xff] }
 0x893   :  { %v4621_v21 = vsel %vm4557_vm3, %v4547_v0, %v13743_v3  ;;  %v4550_v32 = vsel %vm4484_vm2, %v13651_v17, %v13748_v34  ;;  %v13749_v0 = vld [vmem:[#allocation19_spill] sm:$0xff]  ;;  %v13755_v34 = vld [vmem:[#allocation96_spill] sm:$0xff] }
 0x894   :  { %v4624_v3 = vsel %vm4557_vm3, %v4550_v32, %v13749_v0 }
 0x896   :  { %v3758_v12 = vpop.permute.xlu2 %3757 }
 0x897   :  { %v3991_v26 = vpop.permute.xlu1 %3990 }
 0x898   :  { %v4943_v39 = vsel %vm4874_vm6, %v4862_v10, %v3991_v26  ;;  %v3756_v6 = vpop.permute.xlu0 %3755 }
 0x899   :  { %v5024_v36 = vsel %vm4955_vm8, %v4943_v39, %v4204_v52  ;;  %v5807_v52 = vld [vmem:[%s12627_s4 + $0x150] sm:$0xff] }
 0x89a   :  { %v5105_v30 = vsel %vm5036_vm10, %v5024_v36, %v12098_v47  ;;  %5865 = vmatpush.msrb.mxu3 %v5807_v52  ;;  %v13745_v39 = vld [vmem:[#allocation64_spill] sm:$0xff] }
 0x89b   :  { %6428 = vmatmul.msk.f32.gmra.mxu1 %vm5126_vm9, %v5105_v30 }
 0x89e   :  { %v3520_v41 = vpop.permute.xlu2 %3519 }
 0x89f   :  { %v3276_v51 = vpop.permute.xlu1 %3275 }
 0x8a0   :  { %v3278_v4 = vpop.permute.xlu0 %3277  ;;  %v4701_v60 = vsel %vm4631_vm4, %v4620_v55, %v3276_v51  ;;  %v13746_v51 = vld [vmem:[#allocation118_spill] sm:$0xff] }
 0x8a1   :  { %v4782_v56 = vsel %vm4712_vm5, %v4701_v60, %v3516_v24  ;;  %v4702_v40 = vsel %vm4631_vm4, %v4621_v21, %v3278_v4  ;;  %v4549_v62 = vsel %vm4484_vm2, %v13634_v19, %v13746_v51  ;;  %v13747_v60 = vld [vmem:[#allocation86_spill] sm:$0xff] }
 0x8a2   :  { %v4863_v53 = vsel %vm4793_vm7, %v4782_v56, %v3756_v6  ;;  %v4622_v6 = vsel %vm4557_vm3, %v4548_v5, %v13745_v39  ;;  %v13751_v5 = vld [vmem:[#allocation307_spill] sm:$0xff] }
 0x8a6   :  { %v3522_v10 = vpop.permute.xlu2 %3521 }
 0x8a7   :  { %v3993_v38 = vpop.permute.xlu1 %3992 }
 0x8a8   :  { %v4944_v35 = vsel %vm4874_vm6, %v4863_v53, %v3993_v38  ;;  %v12119_v9 = vpop.permute.xlu0 %3994 }
 0x8a9   :  { %v5025_v7 = vsel %vm4955_vm8, %v4944_v35, %v12103_v23 }
 0x8aa   :  { %v5106_v18 = vsel %vm5036_vm10, %v5025_v7, %v12098_v47 }
 0x8ab   :  { %6429 = vmatmul.msk.f32.gmra.mxu1 %vm5126_vm9, %v5106_v18 }
 0x8ae   :  { %v3524_v38 = vpop.permute.xlu2 %3523 }
 0x8af   :  { %v3518_v24 = vpop.permute.xlu1 %3517 }
 0x8b0   :  { %v4783_v54 = vsel %vm4712_vm5, %v4702_v40, %v3518_v24  ;;  %v3760_v45 = vpop.permute.xlu0 %3759 }
 0x8b1   :  { %v4864_v43 = vsel %vm4793_vm7, %v4783_v54, %v3758_v12  ;;  %v4623_v12 = vsel %vm4557_vm3, %v4549_v62, %v13747_v60  ;;  %v13753_v62 = vld [vmem:[#allocation122_spill] sm:$0xff]  ;;  %v5552_v60 = vpop.f32.mrf.mxu1 }
 0x8b2   :  { %v4945_v25 = vsel %vm4874_vm6, %v4864_v43, %v12119_v9 }
 0x8b3   :  { %v5026_v15 = vsel %vm4955_vm8, %v4945_v25, %v12103_v23 }
 0x8b4   :  { %v5107_v26 = vsel %vm5036_vm10, %v5026_v15, %v12098_v47  ;;  %v13750_v15 = vld [vmem:[#allocation16_spill] sm:$0xff] }
 0x8b5   :  { %6430 = vmatmul.msk.f32.gmra.mxu1 %vm5126_vm9, %v5107_v26  ;;  %v4551_v22 = vsel %vm4484_vm2, %v13513_v2, %v13750_v15 }
 0x8b6   :  { %v3526_v54 = vpop.permute.xlu2 %3525  ;;  %v4625_v26 = vsel %vm4557_vm3, %v4551_v22, %v13751_v5 }
 0x8b7   :  { %v3280_v36 = vpop.permute.xlu1 %3279 }
 0x8b8   :  { %v4703_v30 = vsel %vm4631_vm4, %v4622_v6, %v3280_v36  ;;  %v3762_v49 = vpop.permute.xlu0 %3761 }
 0x8b9   :  { %v4784_v27 = vsel %vm4712_vm5, %v4703_v30, %v3520_v41 }
 0x8ba   :  { %v4865_v1 = vsel %vm4793_vm7, %v4784_v27, %v3760_v45 }
 0x8bb   :  { %v4946_v57 = vsel %vm4874_vm6, %v4865_v1, %v12119_v9 }
 0x8bc   :  { %v5027_v55 = vsel %vm4955_vm8, %v4946_v57, %v12103_v23 }
 0x8bd   :  { %v5108_v4 = vsel %vm5036_vm10, %v5027_v55, %v12098_v47 }
 0x8be   :  { %6431 = vmatmul.msk.f32.gmra.mxu1 %vm5126_vm9, %v5108_v4  ;;  %v3528_v2 = vpop.permute.xlu2 %3527 }
 0x8bf   :  { %v3282_v56 = vpop.permute.xlu1 %3281 }
 0x8c0   :  { %v4704_v53 = vsel %vm4631_vm4, %v4623_v12, %v3282_v56  ;;  %v3764_v7 = vpop.permute.xlu0 %3763  ;;  %v5773_v56 = vld [vmem:[%s12627_s4 + $0x40] sm:$0xff] }
 0x8c1   :  { %v4785_v35 = vsel %vm4712_vm5, %v4704_v53, %v3522_v10  ;;  %5846 = vmatpush.msrb.mxu2 %v5773_v56  ;;  %v13758_v56 = vld [vmem:[#allocation192_spill] sm:$0xff] }
 0x8c2   :  { %v4866_v19 = vsel %vm4793_vm7, %v4785_v35, %v3762_v49  ;;  %v13752_v49 = vld [vmem:[#allocation28_spill] sm:$0xff] }
 0x8c3   :  { %v4947_v18 = vsel %vm4874_vm6, %v4866_v19, %v12119_v9  ;;  %v4552_v27 = vsel %vm4484_vm2, %v13537_v61, %v13752_v49  ;;  %v5805_v61 = vld [vmem:[%s12627_s4 + $0x140] sm:$0xff] }
 0x8c4   :  { %v5028_v52 = vsel %vm4955_vm8, %v4947_v18, %v12103_v23  ;;  %v4626_v55 = vsel %vm4557_vm3, %v4552_v27, %v13753_v62  ;;  %5866 = vmatpush.msrb.mxu3 %v5805_v61  ;;  %v13754_v18 = vld [vmem:[#allocation92_spill] sm:$0xff] }
 0x8c5   :  { %v5109_v41 = vsel %vm5036_vm10, %v5028_v52, %v12098_v47  ;;  %v4553_v52 = vsel %vm4484_vm2, %v13556_v58, %v13754_v18 }
 0x8c6   :  { %6432 = vmatmul.msk.f32.gmra.mxu1 %vm5126_vm9, %v5109_v41  ;;  %v3530_v41 = vpop.permute.xlu2 %3529  ;;  %v4627_v32 = vsel %vm4557_vm3, %v4553_v52, %v13755_v34 }
 0x8c7   :  { %v3284_v21 = vpop.permute.xlu1 %3283 }
 0x8c8   :  { %v4705_v40 = vsel %vm4631_vm4, %v4624_v3, %v3284_v21  ;;  %v3766_v43 = vpop.permute.xlu0 %3765  ;;  %v5555_v21 = vpop.f32.mrf.mxu1 }
 0x8c9   :  { %v4786_v24 = vsel %vm4712_vm5, %v4705_v40, %v3524_v38 }
 0x8ca   :  { %v4867_v45 = vsel %vm4793_vm7, %v4786_v24, %v3764_v7 }
 0x8cb   :  { %v4948_v25 = vsel %vm4874_vm6, %v4867_v45, %v12119_v9 }
 0x8cc   :  { %v5029_v17 = vsel %vm4955_vm8, %v4948_v25, %v12103_v23  ;;  %v13756_v25 = vld [vmem:[#allocation94_spill] sm:$0xff] }
 0x8cd   :  { %v5110_v29 = vsel %vm5036_vm10, %v5029_v17, %v12098_v47  ;;  %v4554_v17 = vsel %vm4484_vm2, %v13568_v50, %v13756_v25  ;;  %v13763_v25 = vld [vmem:[#allocation166_spill] sm:$0xff] }
 0x8ce   :  { %6433 = vmatmul.msk.f32.gmra.mxu1 %vm5126_vm9, %v5110_v29  ;;  %v13757_v29 = vld [vmem:[#allocation315_spill] sm:$0xff] }
 0x8cf   :  { %v3286_v10 = vpop.permute.xlu1 %3285  ;;  %v4628_v15 = vsel %vm4557_vm3, %v4554_v17, %v13757_v29  ;;  %v5618_v17 = vmax.f32 %v13763_v25, %v11510_v46  ;;  %v13765_v46 = vld [vmem:[#allocation146_spill] sm:$0xff]  ;;  %v5788_v25 = vld [vmem:[%s12627_s4 + $0xb8] sm:$0xff] }
 0x8d0   :  { %v4706_v39 = vsel %vm4631_vm4, %v4625_v26, %v3286_v10  ;;  %v3768_v57 = vpop.permute.xlu0 %3767  ;;  %v5558_v5 = vpop.f32.mrf.mxu1 }
 0x8d1   :  { %v4787_v6 = vsel %vm4712_vm5, %v4706_v39, %v3526_v54  ;;  %v3532_v26 = vpop.permute.xlu2 %3531 }
 0x8d2   :  { %v4868_v36 = vsel %vm4793_vm7, %v4787_v6, %v3766_v43 }
 0x8d3   :  { %v4949_v30 = vsel %vm4874_vm6, %v4868_v36, %v12119_v9 }
 0x8d4   :  { %v5030_v1 = vsel %vm4955_vm8, %v4949_v30, %v12103_v23 }
 0x8d5   :  { %v5111_v51 = vsel %vm5036_vm10, %v5030_v1, %v12098_v47 }
 0x8d6   :  { %6434 = vmatmul.msk.f32.gmra.mxu1 %vm5126_vm9, %v5111_v51  ;;  %v5803_v51 = vld [vmem:[%s12627_s4 + $0x130] sm:$0xff] }
 0x8d7   :  { %v3288_v4 = vpop.permute.xlu1 %3287  ;;  %5867 = vmatpush.msrb.mxu3 %v5803_v51 }
 0x8d8   :  { %v4707_v12 = vsel %vm4631_vm4, %v4626_v55, %v3288_v4  ;;  %v3770_v0 = vpop.permute.xlu0 %3769  ;;  %v5561_v27 = vpop.f32.mrf.mxu1  ;;  %v5771_v55 = vld [vmem:[%s12627_s4 + $0x30] sm:$0xff] }
 0x8d9   :  { %v4788_v38 = vsel %vm4712_vm5, %v4707_v12, %v3528_v2  ;;  %5847 = vmatpush.msrb.mxu2 %v5771_v55  ;;  %v5620_v55 = vmax.f32 %v13765_v46, %v11579_v63  ;;  %v5806_v46 = vld [vmem:[%s12627_s4 + $0x148] sm:$0xff] }
 0x8da   :  { %v4869_v53 = vsel %vm4793_vm7, %v4788_v38, %v3768_v57  ;;  %v13759_v38 = vld [vmem:[#allocation116_spill] sm:$0xff] }
 0x8db   :  { %v4950_v35 = vsel %vm4874_vm6, %v4869_v53, %v12119_v9  ;;  %v5617_v53 = vmax.f32 %v13759_v38, %v13758_v56  ;;  %v5799_v38 = vld [vmem:[%s12627_s4 + $0x110] sm:$0xff] }
 0x8dc   :  { %v5031_v7 = vsel %vm4955_vm8, %v4950_v35, %v12103_v23  ;;  %v13760_v35 = vld [vmem:[#allocation172_spill] sm:$0xff] }
 0x8dd   :  { %v5112_v19 = vsel %vm5036_vm10, %v5031_v7, %v12098_v47  ;;  %v13761_v7 = vld [vmem:[#allocation142_spill] sm:$0xff] }
 0x8de   :  { %6435 = vmatmul.msk.f32.gmra.mxu1 %vm5126_vm9, %v5112_v19  ;;  %v5616_v19 = vmax.f32 %v13761_v7, %v13760_v35  ;;  %v13766_v7 = vld [vmem:[#allocation41_spill] sm:$0xff] }
 0x8df   :  { %v3290_v3 = vpop.permute.xlu1 %3289 }
 0x8e0   :  { %v4708_v40 = vsel %vm4631_vm4, %v4627_v32, %v3290_v3  ;;  %v3772_v39 = vpop.permute.xlu0 %3771  ;;  %v5564_v2 = vpop.f32.mrf.mxu1  ;;  %v5644_v18 = vmax.f32 %v5616_v19, %v5617_v53  ;;  %v5623_v19 = vmax.f32 %v13766_v7, %v11680_v8  ;;  %v5624_v7 = vmax.f32 %v11758_v33, %v11923_v48 }
 0x8e1   :  { %v4789_v24 = vsel %vm4712_vm5, %v4708_v40, %v3530_v41 }
 0x8e2   :  { %v4870_v54 = vsel %vm4793_vm7, %v4789_v24, %v3770_v0  ;;  %v5664_v32 = vadd.f32 %v12046_v28, %v5644_v18 }
 0x8e3   :  { %v4951_v45 = vsel %vm4874_vm6, %v4870_v54, %v12119_v9 }
 0x8e4   :  { %v5032_v58 = vsel %vm4955_vm8, %v4951_v45, %v12103_v23  ;;  %v5680_v40 = vmax.f32 %v5664_v32, 0.0 }
 0x8e5   :  { %v5113_v43 = vsel %vm5036_vm10, %v5032_v58, %v12098_v47  ;;  %v5801_v58 = vld [vmem:[%s12627_s4 + $0x120] sm:$0xff] }
 0x8e6   :  { %6436 = vmatmul.msk.f32.gmra.mxu1 %vm5126_vm9, %v5113_v43  ;;  %v5769_v43 = vld [vmem:[%s12627_s4 + $0x20] sm:$0xff]  ;;  %5868 = vmatpush.msrb.mxu3 %v5801_v58  ;;  %v5792_v58 = vld [vmem:[%s12627_s4 + $0xd8] sm:$0xff] }
 0x8e7   :  { %v3292_v22 = vpop.permute.xlu1 %3291  ;;  %5848 = vmatpush.msrb.mxu2 %v5769_v43  ;;  %v5824_v43 = vld [vmem:[%s12627_s4 + $0x1d8] sm:$0xff] }
 0x8e8   :  { %v4709_v10 = vsel %vm4631_vm4, %v4628_v15, %v3292_v22  ;;  %v5567_v1 = vpop.f32.mrf.mxu1  ;;  %5869 = vmatpush.msrb.mxu3 %v5799_v38  ;;  %v5625_v38 = vmax.f32 %v11780_v13, %v11938_v37  ;;  %v13770_v13 = vld [vmem:[#allocation332_spill] sm:$0xff]  ;;  %v13771_v37 = vld [vmem:[#allocation322_spill] sm:$0xff] }
 0x8e9   :  { %v4790_v6 = vsel %vm4712_vm5, %v4709_v10, %v3532_v26 }
 0x8ea   :  { %v4871_v36 = vsel %vm4793_vm7, %v4790_v6, %v3772_v39 }
 0x8eb   :  { %v4952_v30 = vsel %vm4874_vm6, %v4871_v36, %v12119_v9 }
 0x8ec   :  { %v5033_v50 = vsel %vm4955_vm8, %v4952_v30, %v12103_v23 }
 0x8ed   :  { %v5114_v49 = vsel %vm5036_vm10, %v5033_v50, %v12098_v47 }
 0x8ee   :  { %6437 = vmatmul.msk.f32.gmra.mxu1 %vm5126_vm9, %v5114_v49 }
 0x8f8   :  { %v12258_v57 = vpop.f32.mrf.mxu1 }
 0x908   :  { %v12263_v62 = vpop.f32.mrf.mxu1 }
 0x918   :  { %v5576_v4 = vpop.f32.mrf.mxu1 }
 0x928   :  { %v5578_v12 = vpop.f32.mrf.mxu1 }
 0x932   :  { %v5580_v61 = vpop.f32.mrf.mxu1 }
 0x933   :  { %v5632_v41 = vmax.f32 %v5552_v60, %v5580_v61  ;;  %v13762_v60 = vld [vmem:[#allocation157_spill] sm:$0xff] }
 0x93b   :  { %v5583_v52 = vpop.f32.mrf.mxu1 }
 0x93c   :  { %v5633_v34 = vmax.f32 %v5555_v21, %v5583_v52  ;;  %v5619_v21 = vmax.f32 %v13762_v60, %v11544_v59  ;;  %v13764_v59 = vld [vmem:[#allocation317_spill] sm:$0xff]  ;;  %v5790_v60 = vld [vmem:[%s12627_s4 + $0xc8] sm:$0xff] }
 0x93d   :  { %v5621_v51 = vmax.f32 %v13764_v59, %v11614_v11  ;;  %v5767_v11 = vld [vmem:[%s12627_s4 + $0x10] sm:$0xff]  ;;  %v5808_v59 = vld [vmem:[%s12627_s4 + $0x158] sm:$0xff] }
 0x93e   :  { %v5652_v0 = vmax.f32 %v5632_v41, %v5633_v34  ;;  %v5645_v29 = vmax.f32 %v5618_v17, %v5619_v21  ;;  %5849 = vmatpush.msrb.mxu2 %v5767_v11  ;;  %v5822_v21 = vld [vmem:[%s12627_s4 + $0x1c8] sm:$0xff]  ;;  %v5820_v17 = vld [vmem:[%s12627_s4 + $0x1b8] sm:$0xff] }
 0x93f   :  { %v5646_v4 = vmax.f32 %v5620_v55, %v5621_v51  ;;  %v5774_v51 = vld [vmem:[%s12627_s4 + $0x48] sm:$0xff]  ;;  %v5772_v55 = vld [vmem:[%s12627_s4 + $0x38] sm:$0xff] }
 0x940   :  { %v5672_v3 = vadd.f32 %v12046_v28, %v5652_v0  ;;  %v5665_v10 = vadd.f32 %v12046_v28, %v5645_v29  ;;  %v5786_v29 = vld [vmem:[%s12627_s4 + $0xa8] sm:$0xff]  ;;  %v5768_v11 = vld [vmem:[%s12627_s4 + $0x18] sm:$0xff] }
 0x941   :  { %v5666_v61 = vadd.f32 %v12046_v28, %v5646_v4  ;;  %v5804_v4 = vld [vmem:[%s12627_s4 + $0x138] sm:$0xff] }
 0x942   :  { %v5688_v24 = vmax.f32 %v5672_v3, 0.0  ;;  %v5681_v36 = vmax.f32 %v5665_v10, 0.0  ;;  %v5782_v10 = vld [vmem:[%s12627_s4 + $0x88] sm:$0xff] }
 0x943   :  { %v5586_v54 = vpop.f32.mrf.mxu1 }
 0x944   :  { %v6479_v45 = vpack.i.bf16 %v5688_v24, %v5680_v40  ;;  %v5634_v22 = vmax.f32 %v5558_v5, %v5586_v54 }
 0x946   :  { %6480 = vrot.lane.b32.xlu1 %v6479_v45, %s6508_s14  ;;  %s6511_s14 = smov 80   ;;  %v5826_v45 = vld [vmem:[%s12627_s4 + $0x1e8] sm:$0xff] }
 0x94b   :  { %v5589_v15 = vpop.f32.mrf.mxu1 }
 0x94c   :  { %v5635_v26 = vmax.f32 %v5561_v27, %v5589_v15  ;;  %v5818_v15 = vld [vmem:[%s12627_s4 + $0x1a8] sm:$0xff] }
 0x94e   :  { %v5653_v39 = vmax.f32 %v5634_v22, %v5635_v26  ;;  %v5784_v22 = vld [vmem:[%s12627_s4 + $0x98] sm:$0xff] }
 0x94f   :  { %v5816_v26 = vld [vmem:[%s12627_s4 + $0x198] sm:$0xff] }
 0x950   :  { %v5673_v6 = vadd.f32 %v12046_v28, %v5653_v39  ;;  %v5814_v39 = vld [vmem:[%s12627_s4 + $0x188] sm:$0xff] }
 0x952   :  { %v5689_v30 = vmax.f32 %v5673_v6, 0.0  ;;  %v5780_v6 = vld [vmem:[%s12627_s4 + $0x78] sm:$0xff] }
 0x953   :  { %v5592_v50 = vpop.f32.mrf.mxu1 }
 0x954   :  { %v6484_v49 = vpack.i.bf16 %v5689_v30, %v5681_v36  ;;  %v5636_v27 = vmax.f32 %v5564_v2, %v5592_v50  ;;  %v5682_v2 = vmax.f32 %v5666_v61, 0.0  ;;  %v5812_v36 = vld [vmem:[%s12627_s4 + $0x178] sm:$0xff]  ;;  %v5778_v30 = vld [vmem:[%s12627_s4 + $0x68] sm:$0xff] }
 0x955   :  { %v5810_v50 = vld [vmem:[%s12627_s4 + $0x168] sm:$0xff]  ;;  %v13769_v61 = vld [vmem:[#allocation325_spill] sm:$0xff] }
 0x956   :  { %6485 = vrot.lane.b32.xlu2 %v6484_v49, %s6511_s14  ;;  %v5776_v49 = vld [vmem:[%s12627_s4 + $0x58] sm:$0xff] }
 0x95b   :  { %v5595_v5 = vpop.f32.mrf.mxu1 }
 0x95c   :  { %v5637_v12 = vmax.f32 %v5567_v1, %v5595_v5  ;;  %v5770_v5 = vld [vmem:[%s12627_s4 + $0x28] sm:$0xff] }
 0x95e   :  { %v5654_v56 = vmax.f32 %v5636_v27, %v5637_v12  ;;  %3293 = vrot.lane.b32.xlu2 %v11803_v44, %s6509_s15  ;;  %v13767_v44 = vld [vmem:[#allocation147_spill] sm:$0xff]  ;;  %v13768_v12 = vld [vmem:[#allocation90_spill] sm:$0xff] }
 0x95f   :  { %v5622_v18 = vmax.f32 %v13767_v44, %v11647_v16  ;;  %v5765_v16 = vld [vmem:[%s12627_s4] sm:$0xff]  ;;  %v5802_v27 = vld [vmem:[%s12627_s4 + $0x128] sm:$0xff] }
 0x960   :  { %v5674_v63 = vadd.f32 %v12046_v28, %v5654_v56  ;;  %5850 = vmatpush.msrb.mxu2 %v5765_v16  ;;  %v5609_v56 = vmax.f32 %v13769_v61, %v13768_v12  ;;  %v5931_v12 = vld [vmem:[%s12628_s6 + $0x70] sm:$0xff] }
 0x961   :  { %v5647_v52 = vmax.f32 %v5622_v18, %v5623_v19  ;;  %v6476_v19 = vpop.permute.xlu0 %6475  ;;  %v5648_v18 = vmax.f32 %v5624_v7, %v5625_v38  ;;  %v5947_v61 = vld [vmem:[%s12628_s6 + $0xf0] sm:$0xff] }
 0x962   :  { %v5690_v1 = vmax.f32 %v5674_v63, 0.0  ;;  %v5800_v63 = vld [vmem:[%s12627_s4 + $0x118] sm:$0xff] }
 0x963   :  { %v5598_v53 = vpop.f32.mrf.mxu1  ;;  %v5667_v0 = vadd.f32 %v12046_v28, %v5647_v52  ;;  %v6466_v52 = vpop.permute.xlu1 %6465 }
 0x964   :  { %v6489_v35 = vpack.i.bf16 %v5690_v1, %v5682_v2  ;;  %v5638_v34 = vmax.f32 %v12258_v57, %v5598_v53  ;;  %v5796_v57 = vld [vmem:[%s12627_s4 + $0xf8] sm:$0xff]  ;;  %v6471_v2 = vpop.permute.xlu2 %6470  ;;  %v5766_v1 = vld [vmem:[%s12627_s4 + $0x8] sm:$0xff] }
 0x965   :  { %v5683_v40 = vmax.f32 %v5667_v0, 0.0  ;;  %5875 = vmatpush.msra.mxu2 %v5796_v57  ;;  %v5798_v53 = vld [vmem:[%s12627_s4 + $0x108] sm:$0xff]  ;;  %v6468_v0 = vunpack.i.h.bf16 %v6466_v52  ;;  %v6473_v16 = vunpack.i.h.bf16 %v6471_v2 }
 0x966   :  { %3295 = vrot.lane.b32.xlu2 %v11839_v14, %s6509_s15  ;;  %6490 = vrot.lane.b32.xlu0 %v6489_v35, %s6512_s22  ;;  %s6513_s15 = smov 112   ;;  %v5608_v35 = vmax.f32 %v13771_v37, %v13770_v13  ;;  %v13775_v37 = vld [vmem:[#allocation78_spill] sm:$0xff] }
 0x968   :  { %v5640_v44 = vmax.f32 %v5608_v35, %v5609_v56  ;;  %v13773_v56 = vld [vmem:[#allocation34_spill] sm:$0xff] }
 0x96b   :  { %v5601_v41 = vpop.f32.mrf.mxu1 }
 0x96c   :  { %v5639_v32 = vmax.f32 %v12263_v62, %v5601_v41  ;;  %v5828_v62 = vld [vmem:[%s12627_s4 + $0x1f8] sm:$0xff]  ;;  %v5660_v41 = vadd.f32 %v12046_v28, %v5640_v44  ;;  %v5929_v44 = vld [vmem:[%s12628_s6 + $0x60] sm:$0xff] }
 0x96e   :  { %v5655_v3 = vmax.f32 %v5638_v34, %v5639_v32  ;;  %3533 = vrot.lane.b32.xlu0 %v11839_v14, %s6510_s25  ;;  %v5797_v14 = vld [vmem:[%s12627_s4 + $0x100] sm:$0xff]  ;;  %v5668_v34 = vadd.f32 %v12046_v28, %v5648_v18 }
 0x96f   :  { %5870 = vmatpush.msrb.mxu3 %v5797_v14  ;;  %v6472_v14 = vunpack.i.l.bf16 %v6471_v2  ;;  %v13774_v2 = vld [vmem:[#allocation129_spill] sm:$0xff]  ;;  %v5945_v18 = vld [vmem:[%s12628_s6 + $0xe0] sm:$0xff] }
 0x970   :  { %v5675_v8 = vadd.f32 %v12046_v28, %v5655_v3  ;;  %v6467_v3 = vunpack.i.l.bf16 %v6466_v52  ;;  %v6478_v28 = vunpack.i.h.bf16 %v6476_v19 }
 0x971   :  { %5895 = vmatpush.msra.mxu3 %v5828_v62 }
 0x972   :  { %v5691_v24 = vmax.f32 %v5675_v8, 0.0 }
 0x973   :  { %5896 = vmatpush.msra.mxu3 %v5826_v45 }
 0x974   :  { %v6494_v54 = vpack.i.bf16 %v5691_v24, %v5683_v40  ;;  %v5676_v40 = vmax.f32 %v5660_v41, 0.0  ;;  %v5684_v24 = vmax.f32 %v5668_v34, 0.0 }
 0x975   :  { %5897 = vmatpush.msra.mxu3 %v5824_v43 }
 0x976   :  { %3535 = vrot.lane.b32.xlu0 %v13703_v20, %s6510_s25  ;;  %6495 = vrot.lane.b32.xlu1 %v6494_v54, %s6513_s15  ;;  %v5758_v54 = vsel %vm4557_vm3, %v5684_v24, %v6468_v0  ;;  %v5748_v33 = vsel %vm4557_vm3, %v5676_v40, %v6467_v3  ;;  %v5927_v24 = vld [vmem:[%s12628_s6 + $0x50] sm:$0xff] }
 0x977   :  { %5898 = vmatpush.msra.mxu3 %v5822_v21  ;;  %v5749_v57 = vsel %vm4712_vm5, %v5748_v33, %v6472_v14  ;;  %v5759_v62 = vsel %vm4712_vm5, %v5758_v54, %v6473_v16  ;;  %v5943_v54 = vld [vmem:[%s12628_s6 + $0xd0] sm:$0xff]  ;;  %v5942_v16 = vld [vmem:[%s12628_s6 + $0xc8] sm:$0xff]  ;;  %v5925_v14 = vld [vmem:[%s12628_s6 + $0x40] sm:$0xff] }
 0x978   :  { %v5760_v21 = vsel %vm4874_vm6, %v5759_v62, %v6478_v28  ;;  %v5924_v62 = vld [vmem:[%s12628_s6 + $0x38] sm:$0xff]  ;;  %v5921_v28 = vld [vmem:[%s12628_s6 + $0x20] sm:$0xff] }
 0x979   :  { %5899 = vmatpush.msra.mxu3 %v5820_v17 }
 0x97b   :  { %5900 = vmatpush.msra.mxu3 %v5818_v15 }
 0x97d   :  { %5901 = vmatpush.msra.mxu3 %v5816_v26 }
 0x97e   :  { %3773 = vrot.lane.b32.xlu1 %v13703_v20, %s6507_s1  ;;  %v5794_v20 = vld [vmem:[%s12627_s4 + $0xe8] sm:$0xff] }
 0x97f   :  { %5876 = vmatpush.msra.mxu2 %v5794_v20  ;;  %5902 = vmatpush.msra.mxu3 %v5814_v39 }
 0x981   :  { %5877 = vmatpush.msra.mxu2 %v5792_v58  ;;  %5903 = vmatpush.msra.mxu3 %v5812_v36  ;;  %v6477_v58 = vunpack.i.l.bf16 %v6476_v19 }
 0x983   :  { %5878 = vmatpush.msra.mxu2 %v5790_v60  ;;  %5904 = vmatpush.msra.mxu3 %v5810_v50  ;;  %v5750_v60 = vsel %vm4874_vm6, %v5749_v57, %v6477_v58  ;;  %v5940_v58 = vld [vmem:[%s12628_s6 + $0xb8] sm:$0xff] }
 0x985   :  { %5879 = vmatpush.msra.mxu2 %v5788_v25  ;;  %5905 = vmatpush.msra.mxu3 %v5808_v59 }
 0x987   :  { %5880 = vmatpush.msra.mxu2 %v5786_v29  ;;  %5906 = vmatpush.msra.mxu3 %v5806_v46  ;;  %v5948_v46 = vld [vmem:[%s12628_s6 + $0xf8] sm:$0xff] }
 0x989   :  { %5881 = vmatpush.msra.mxu2 %v5784_v22  ;;  %5907 = vmatpush.msra.mxu3 %v5804_v4 }
 0x98b   :  { %5882 = vmatpush.msra.mxu2 %v5782_v10  ;;  %5908 = vmatpush.msra.mxu3 %v5802_v27 }
 0x98d   :  { %5883 = vmatpush.msra.mxu2 %v5780_v6  ;;  %5909 = vmatpush.msra.mxu3 %v5800_v63  ;;  %v5946_v63 = vld [vmem:[%s12628_s6 + $0xe8] sm:$0xff] }
 0x98f   :  { %5884 = vmatpush.msra.mxu2 %v5778_v30  ;;  %5910 = vmatpush.msra.mxu3 %v5798_v53 }
 0x991   :  { %5885 = vmatpush.msra.mxu2 %v5776_v49 }
 0x993   :  { %5886 = vmatpush.msra.mxu2 %v5774_v51  ;;  %v5932_v51 = vld [vmem:[%s12628_s6 + $0x78] sm:$0xff] }
 0x995   :  { %5887 = vmatpush.msra.mxu2 %v5772_v55  ;;  %v13772_v55 = vld [vmem:[#allocation102_spill] sm:$0xff] }
 0x996   :  { %v4555_v4 = vsel %vm4484_vm2, %v13577_v42, %v13772_v55  ;;  %v5930_v42 = vld [vmem:[%s12628_s6 + $0x68] sm:$0xff] }
 0x997   :  { %5888 = vmatpush.msra.mxu2 %v5770_v5  ;;  %v4629_v38 = vsel %vm4557_vm3, %v4555_v4, %v13773_v56  ;;  %v6001_v4 = vld [vmem:[%s12630_s8 + $0x38] sm:$0xff] }
 0x999   :  { %5889 = vmatpush.msra.mxu2 %v5768_v11 }
 0x99b   :  { %5890 = vmatpush.msra.mxu2 %v5766_v1  ;;  %v4556_v1 = vsel %vm4484_vm2, %v13590_v31, %v13774_v2 }
 0x99c   :  { %v4630_v35 = vsel %vm4557_vm3, %v4556_v1, %v13775_v37  ;;  %v6000_v37 = vld [vmem:[%s12630_s8 + $0x30] sm:$0xff] }
 0x9b0   :  { %v6486_v32 = vpop.permute.xlu2 %6485 }
 0x9b1   :  { %v6488_v26 = vunpack.i.h.bf16 %v6486_v32  ;;  %v6487_v10 = vunpack.i.l.bf16 %v6486_v32  ;;  %v5928_v32 = vld [vmem:[%s12628_s6 + $0x58] sm:$0xff] }
 0x9b8   :  { %v6481_v48 = vpop.permute.xlu1 %6480  ;;  %v3294_v43 = vpop.permute.xlu2 %3293 }
 0x9b9   :  { %v6483_v20 = vunpack.i.h.bf16 %v6481_v48  ;;  %v6482_v45 = vunpack.i.l.bf16 %v6481_v48  ;;  %v4710_v53 = vsel %vm4631_vm4, %v4629_v38, %v3294_v43  ;;  %v5926_v48 = vld [vmem:[%s12628_s6 + $0x48] sm:$0xff]  ;;  %v5919_v43 = vld [vmem:[%s12628_s6 + $0x10] sm:$0xff] }
 0x9bb   :  { %v5761_v17 = vsel %vm5036_vm10, %v5760_v21, %v6483_v20  ;;  %v5751_v29 = vsel %vm5036_vm10, %v5750_v60, %v6482_v45  ;;  %v5923_v45 = vld [vmem:[%s12628_s6 + $0x30] sm:$0xff]  ;;  %v5918_v21 = vld [vmem:[%s12628_s6 + $0x8] sm:$0xff] }
 0x9bc   :  { %v5753_v30 = vsel %vm5752_vm11, %v5751_v29, %v6487_v10  ;;  %v5762_v50 = vsel %vm5752_vm11, %v5761_v17, %v6488_v26  ;;  %v5939_v60 = vld [vmem:[%s12628_s6 + $0xb0] sm:$0xff]  ;;  %v5917_v17 = vld [vmem:[%s12628_s6] sm:$0xff]  ;;  %v5934_v26 = vld [vmem:[%s12628_s6 + $0x88] sm:$0xff] }
 0x9bd   :  { %v5937_v29 = vld [vmem:[%s12628_s6 + $0xa0] sm:$0xff] }
 0x9be   :  { %v5933_v10 = vld [vmem:[%s12628_s6 + $0x80] sm:$0xff] }
 0x9c0   :  { %v3296_v11 = vpop.permute.xlu2 %3295 }
 0x9c1   :  { %v4711_v31 = vsel %vm4631_vm4, %v4630_v35, %v3296_v11  ;;  %v5999_v35 = vld [vmem:[%s12630_s8 + $0x28] sm:$0xff] }
 0x9d8   :  { %v6491_v8 = vpop.permute.xlu0 %6490 }
 0x9d9   :  { %v6493_v15 = vunpack.i.h.bf16 %v6491_v8  ;;  %v6492_v22 = vunpack.i.l.bf16 %v6491_v8  ;;  %v5944_v8 = vld [vmem:[%s12628_s6 + $0xd8] sm:$0xff] }
 0x9db   :  { %v5755_v49 = vsel %vm5754_vm12, %v5753_v30, %v6492_v22  ;;  %v5763_v59 = vsel %vm5754_vm12, %v5762_v50, %v6493_v15  ;;  %v5936_v15 = vld [vmem:[%s12628_s6 + $0x98] sm:$0xff]  ;;  %v5935_v22 = vld [vmem:[%s12628_s6 + $0x90] sm:$0xff]  ;;  %v6006_v30 = vld [vmem:[%s12630_s8 + $0x60] sm:$0xff] }
 0x9dc   :  { %v6005_v50 = vld [vmem:[%s12630_s8 + $0x58] sm:$0xff] }
 0x9e0   :  { %v3534_v25 = vpop.permute.xlu0 %3533 }
 0x9e1   :  { %v4791_v7 = vsel %vm4712_vm5, %v4710_v53, %v3534_v25  ;;  %v5938_v25 = vld [vmem:[%s12628_s6 + $0xa8] sm:$0xff] }
 0x9e8   :  { %v6496_v39 = vpop.permute.xlu1 %6495  ;;  %v3536_v13 = vpop.permute.xlu0 %3535 }
 0x9e9   :  { %v6498_v6 = vunpack.i.h.bf16 %v6496_v39  ;;  %v6497_v36 = vunpack.i.l.bf16 %v6496_v39  ;;  %v4792_v41 = vsel %vm4712_vm5, %v4711_v31, %v3536_v13  ;;  %v6009_v39 = vld [vmem:[%s12630_s8 + $0x78] sm:$0xff]  ;;  %v5994_v31 = vld [vmem:[%s12630_s8] sm:$0xff] }
 0x9eb   :  { %v5757_v5 = vsel %vm5756_vm13, %v5755_v49, %v6497_v36  ;;  %v5764_v27 = vsel %vm5756_vm13, %v5763_v59, %v6498_v6  ;;  %v6008_v6 = vld [vmem:[%s12630_s8 + $0x70] sm:$0xff]  ;;  %v6007_v36 = vld [vmem:[%s12630_s8 + $0x68] sm:$0xff] }
 0x9ec   :  { %5851 = vmatmul.f32.vlgmr.msrb.gmra.mxu2 %v5757_v5  ;;  %5871 = vmatmul.f32.vlgmr.msrb.gmra.mxu3 %v5764_v27  ;;  %v6004_v49 = vld [vmem:[%s12630_s8 + $0x50] sm:$0xff]  ;;  %v6003_v59 = vld [vmem:[%s12630_s8 + $0x48] sm:$0xff] }
 0x9ed   :  { %5953 = vmatpush.msrb.mxu2 %v5932_v51  ;;  %5973 = vmatpush.msrb.mxu3 %v5948_v46  ;;  %v5829_v51 = vld [vmem:[%s12631_s5] sm:$0x3] }
 0x9ee   :  { %v6002_v46 = vld [vmem:[%s12630_s8 + $0x40] sm:$0xff]  ;;  %v5831_v55 = vperm.slane %v5829_v51, 0  ;;  %v5832_v11 = vperm.slane %v5829_v51, 1 }
 0x9ef   :  { %5954 = vmatpush.msrb.mxu2 %v5931_v12  ;;  %5974 = vmatpush.msrb.mxu3 %v5947_v61 }
 0x9f0   :  { %v3774_v19 = vpop.permute.xlu1 %3773 }
 0x9f1   :  { %v4872_v52 = vsel %vm4793_vm7, %v4791_v7, %v3774_v19  ;;  %5955 = vmatpush.msrb.mxu2 %v5930_v42  ;;  %5975 = vmatpush.msrb.mxu3 %v5946_v63  ;;  %v4873_v0 = vsel %vm4793_vm7, %v4792_v41, %v3774_v19  ;;  %v5998_v7 = vld [vmem:[%s12630_s8 + $0x20] sm:$0xff]  ;;  %v5997_v19 = vld [vmem:[%s12630_s8 + $0x18] sm:$0xff] }
 0x9f2   :  { %v4953_v34 = vsel %vm4874_vm6, %v4872_v52, %v12119_v9  ;;  %v4954_v33 = vsel %vm4874_vm6, %v4873_v0, %v12119_v9  ;;  %v5941_v9 = vld [vmem:[%s12628_s6 + $0xc0] sm:$0xff] }
 0x9f3   :  { %v5034_v3 = vsel %vm4955_vm8, %v4953_v34, %v12103_v23  ;;  %5956 = vmatpush.msrb.mxu2 %v5929_v44  ;;  %5976 = vmatpush.msrb.mxu3 %v5945_v18  ;;  %v5035_v57 = vsel %vm4955_vm8, %v4954_v33, %v12103_v23  ;;  %v5922_v23 = vld [vmem:[%s12628_s6 + $0x28] sm:$0xff]  ;;  %v5996_v44 = vld [vmem:[%s12630_s8 + $0x10] sm:$0xff]  ;;  %v6500_v52 = vld [vmem:[%s12629_s7] ss:$0 sm:$0xff] }
 0x9f4   :  { %5891 = vmatmul.f32.vlgmr.msra.gmra.mxu2 %v5757_v5  ;;  %5911 = vmatmul.f32.vlgmr.msra.gmra.mxu3 %v5764_v27  ;;  %v5115_v40 = vsel %vm5036_vm10, %v5034_v3, %v12098_v47  ;;  %v5116_v20 = vsel %vm5036_vm10, %v5035_v57, %v12098_v47  ;;  %v5920_v47 = vld [vmem:[%s12628_s6 + $0x18] sm:$0xff]  ;;  %v5995_v18 = vld [vmem:[%s12630_s8 + $0x8] sm:$0xff] }
 0x9f5   :  { %6438 = vmatmul.msk.f32.gmra.mxu1 %vm5126_vm9, %v5115_v40  ;;  %5957 = vmatpush.msrb.mxu2 %v5928_v32 }
 0x9f6   :  { %5977 = vmatpush.msrb.mxu3 %v5944_v8  ;;  %v6501_v8 = vld [vmem:[%s12632_s9] ss:$0 sm:$0xff] }
 0x9f7   :  { %5958 = vmatpush.msrb.mxu2 %v5927_v24 }
 0x9f8   :  { %5978 = vmatpush.msrb.mxu3 %v5943_v54 }
 0x9f9   :  { %5959 = vmatpush.msrb.mxu2 %v5926_v48 }
 0x9fa   :  { %5979 = vmatpush.msrb.mxu3 %v5942_v16 }
 0x9fb   :  { %5960 = vmatpush.msrb.mxu2 %v5925_v14 }
 0x9fc   :  { %5980 = vmatpush.msrb.mxu3 %v5941_v9 }
 0x9fd   :  { %6439 = vmatmul.msk.f32.gmra.mxu1 %vm5126_vm9, %v5116_v20  ;;  %5961 = vmatpush.msrb.mxu2 %v5924_v62 }
 0x9fe   :  { %5981 = vmatpush.msrb.mxu3 %v5940_v58 }
 0x9ff   :  { %5962 = vmatpush.msrb.mxu2 %v5923_v45 }
 0xa00   :  { %5982 = vmatpush.msrb.mxu3 %v5939_v60 }
 0xa01   :  { %5963 = vmatpush.msrb.mxu2 %v5922_v23 }
 0xa02   :  { %5983 = vmatpush.msrb.mxu3 %v5938_v25 }
 0xa03   :  { %5964 = vmatpush.msrb.mxu2 %v5921_v28 }
 0xa04   :  { %5984 = vmatpush.msrb.mxu3 %v5937_v29 }
 0xa05   :  { %5965 = vmatpush.msrb.mxu2 %v5920_v47 }
 0xa06   :  { %5985 = vmatpush.msrb.mxu3 %v5936_v15 }
 0xa07   :  { %5966 = vmatpush.msrb.mxu2 %v5919_v43 }
 0xa08   :  { %5986 = vmatpush.msrb.mxu3 %v5935_v22 }
 0xa09   :  { %5967 = vmatpush.msrb.mxu2 %v5918_v21 }
 0xa0a   :  { %5987 = vmatpush.msrb.mxu3 %v5934_v26 }
 0xa0b   :  { %5968 = vmatpush.msrb.mxu2 %v5917_v17 }
 0xa0c   :  { %5988 = vmatpush.msrb.mxu3 %v5933_v10 }
 0xa0d   :  { %6014 = vmatpush.msra.mxu2 %v6009_v39 }
 0xa0f   :  { %6015 = vmatpush.msra.mxu2 %v6008_v6 }
 0xa11   :  { %6016 = vmatpush.msra.mxu2 %v6007_v36 }
 0xa13   :  { %6017 = vmatpush.msra.mxu2 %v6006_v30 }
 0xa15   :  { %6018 = vmatpush.msra.mxu2 %v6005_v50 }
 0xa17   :  { %6019 = vmatpush.msra.mxu2 %v6004_v49 }
 0xa19   :  { %6020 = vmatpush.msra.mxu2 %v6003_v59 }
 0xa1b   :  { %6021 = vmatpush.msra.mxu2 %v6002_v46 }
 0xa1d   :  { %6022 = vmatpush.msra.mxu2 %v6001_v4 }
 0xa1f   :  { %6023 = vmatpush.msra.mxu2 %v6000_v37 }
 0xa21   :  { %6024 = vmatpush.msra.mxu2 %v5999_v35 }
 0xa23   :  { %6025 = vmatpush.msra.mxu2 %v5998_v7 }
 0xa25   :  { %6026 = vmatpush.msra.mxu2 %v5997_v19 }
 0xa27   :  { %6027 = vmatpush.msra.mxu2 %v5996_v44 }
 0xa29   :  { %6028 = vmatpush.msra.mxu2 %v5995_v18 }
 0xa2b   :  { %6029 = vmatpush.msra.mxu2 %v5994_v31 }
 0xa6f   :  { %v5852_v5 = vpop.f32.mrf.mxu2  ;;  %v5872_v27 = vpop.f32.mrf.mxu3 }
 0xa70   :  { %v5853_v12 = vadd.f32 %v5852_v5, %v5831_v55 }
 0xa72   :  { %v5873_v61 = vadd.f32 %v5872_v27, %v5853_v12  ;;  %v5604_v56 = vpop.f32.mrf.mxu1 }
 0xa74   :  { %v5915_v38 = vmax.f32 %v5873_v61, 0.0 }
 0xa76   :  { %5969 = vmatmul.f32.vlgmr.msrb.gmra.mxu2 %v5915_v38 }
 0xa77   :  { %v5892_v42 = vpop.f32.mrf.mxu2  ;;  %v5912_v2 = vpop.f32.mrf.mxu3 }
 0xa78   :  { %v5893_v63 = vadd.f32 %v5892_v42, %v5832_v11 }
 0xa7a   :  { %v5913_v1 = vadd.f32 %v5912_v2, %v5893_v63  ;;  %v5606_v53 = vpop.f32.mrf.mxu1 }
 0xa7c   :  { %v5916_v13 = vmax.f32 %v5913_v1, 0.0 }
 0xa7e   :  { %5989 = vmatmul.f32.vlgmr.msrb.gmra.mxu3 %v5916_v13 }
 0xaf9   :  { %v5970_v41 = vpop.f32.mrf.mxu2 }
 0xafa   :  { %v5971_v34 = vadd.f32 %v6500_v52, %v5970_v41 }
 0xb01   :  { %v5990_v32 = vpop.f32.mrf.mxu3 }
 0xb02   :  { %v5991_v0 = vadd.f32 %v5990_v32, %v5971_v34 }
 0xb04   :  { %v5993_v3 = vmax.f32 %v5991_v0, 0.0 }
 0xb06   :  { %6030 = vmatmul.f32.vlgmr.msra.gmra.mxu2 %v5993_v3 }
 0xb89   :  { %v6031_v40 = vpop.f32.mrf.mxu2 }
 0xb8a   :  { %v6032_v24 = vadd.f32 %v6501_v8, %v6031_v40 }
 0xb8c   :  { %6034 = vst [vmem:[%s12633_s10] sm:$0xff] %v6032_v24 }

</bundles_post_ra>
